<compile_context>
chip_gen: v5e
topology: v5e:2x2
jax: 0.10.0
libtpu: 0.0.40
codegen_flags: <defaults>
</compile_context>

<pallas_src>
import jax
import jax.numpy as jnp
from jax.experimental import pallas as pl
from jax.experimental.pallas import tpu as pltpu

HIDDEN = 100       # matches `n = 100` in the PyTorch module
BLOCK_B = 2048     # batch (lane-axis) tile per grid step; multiple of 128.
                   # Fits comfortably in VMEM on v5e/v6e/v7x (h tile ~1 MiB f32).


def _mlp_kernel(x_ref, w1_ref, b1_ref, w2_ref, b2_ref, o_ref):
    # Layout: hidden on the sublane axis, batch on the lane axis.
    #   x_ref : (1, TB)        lane-dense batch samples
    #   w1_ref: (Hp, 1)        fc1 weight column (fan_in = 1)
    #   b1_ref: (Hp, 1)        fc1 bias
    #   w2_ref: (Hp, 1)        fc3 weight (rows beyond HIDDEN are zero)
    #   b2_ref: (1, 1) SMEM    fc3 bias scalar
    #   o_ref : (1, TB)
    x = x_ref[...]                                    # (1, TB)
    z = w1_ref[...] * x + b1_ref[...]                 # outer product on VPU -> (Hp, TB)
    # sigmoid(z) = 0.5 * tanh(0.5 * z) + 0.5 : single EUP transcendental, no VPU divide.
    h = 0.5 * jnp.tanh(0.5 * z) + 0.5                 # (Hp, TB)
    # fc3 (N=1): weighted sum over the hidden (sublane) axis on the XLU.
    # Padded hidden rows have w2 == 0 so they contribute exactly 0.
    y = jnp.sum(h * w2_ref[...], axis=0, keepdims=True)   # (1, TB)
    o_ref[...] = y + b2_ref[0, 0]


def net_forward(x, fc1_w, fc1_b, fc3_w, fc3_b, *, block_b=BLOCK_B):
    """Forward pass of Net.

    x     : (B, 1)  f32
    fc1_w : (H, 1)  PyTorch fc1.weight
    fc1_b : (H,)    PyTorch fc1.bias
    fc3_w : (1, H)  PyTorch fc3.weight
    fc3_b : (1,)    PyTorch fc3.bias
    returns (B, 1) f32
    """
    B = x.shape[0]
    H = fc1_w.shape[0]
    Hp = pl.cdiv(H, 128) * 128   # pad hidden to a lane/sublane-friendly size (100 -> 128)

    # Zero-pad hidden. Padded units evaluate to sigmoid(0)=0.5, so w2's padded
    # rows MUST be zero (they are) for those units to contribute nothing.
    w1c = jnp.zeros((Hp, 1), jnp.float32).at[:H, 0].set(fc1_w[:, 0].astype(jnp.float32))
    b1c = jnp.zeros((Hp, 1), jnp.float32).at[:H, 0].set(fc1_b.astype(jnp.float32))
    w2c = jnp.zeros((Hp, 1), jnp.float32).at[:H, 0].set(fc3_w[0, :].astype(jnp.float32))
    b2c = fc3_b.reshape(1, 1).astype(jnp.float32)

    # Batch on the lane axis (lane-dense DMA + stores); pad to a multiple of block_b.
    nb = pl.cdiv(B, block_b)
    Bp = nb * block_b
    x_lane = jnp.zeros((1, Bp), jnp.float32).at[0, :B].set(x[:, 0].astype(jnp.float32))

    y_lane = pl.pallas_call(
        _mlp_kernel,
        out_shape=jax.ShapeDtypeStruct((1, Bp), jnp.float32),
        grid=(nb,),
        in_specs=[
            pl.BlockSpec((1, block_b), lambda i: (0, i)),   # x tile (pipelined)
            pl.BlockSpec((Hp, 1), lambda i: (0, 0)),        # w1, resident across steps
            pl.BlockSpec((Hp, 1), lambda i: (0, 0)),        # b1, resident
            pl.BlockSpec((Hp, 1), lambda i: (0, 0)),        # w2, resident
            pl.BlockSpec(memory_space=pltpu.SMEM),          # b2 scalar in SMEM
        ],
        out_specs=pl.BlockSpec((1, block_b), lambda i: (0, i)),  # lane-dense output
        compiler_params=pltpu.CompilerParams(
            dimension_semantics=("parallel",)),             # megacore sharding on v7x
    )(x_lane, w1c, b1c, w2c, b2c)

    return y_lane[0, :B].reshape(B, 1)


def init_params(key):
    """Deterministic init mimicking PyTorch Linear's U(-1/sqrt(fan_in), 1/sqrt(fan_in))."""
    k1, k2, k3, k4 = jax.random.split(key, 4)
    bound1 = 1.0                              # fc1 fan_in = 1
    bound2 = 1.0 / jnp.sqrt(float(HIDDEN))    # fc3 fan_in = 100
    fc1_w = jax.random.uniform(k1, (HIDDEN, 1), jnp.float32, -bound1, bound1)
    fc1_b = jax.random.uniform(k2, (HIDDEN,), jnp.float32, -bound1, bound1)
    fc3_w = jax.random.uniform(k3, (1, HIDDEN), jnp.float32, -bound2, bound2)
    fc3_b = jax.random.uniform(k4, (1,), jnp.float32, -bound2, bound2)
    return fc1_w, fc1_b, fc3_w, fc3_b


if __name__ == "__main__":
    key = jax.random.PRNGKey(0)
    k_params, k_x = jax.random.split(key)
    fc1_w, fc1_b, fc3_w, fc3_b = init_params(k_params)

    B = 8   # tiny demo batch; kernel tiles/pads internally
    x = jax.random.normal(k_x, (B, 1), jnp.float32)

    y = net_forward(x, fc1_w, fc1_b, fc3_w, fc3_b)
    y = jax.block_until_ready(y)

    # Pure-JAX reference (PyTorch Linear convention: y = x @ W^T + b).
    y_ref = jax.nn.sigmoid(x @ fc1_w.T + fc1_b) @ fc3_w.T + fc3_b
    assert y.shape == (B, 1)
    assert jnp.allclose(y, y_ref, atol=1e-5, rtol=1e-4), float(jnp.abs(y - y_ref).max())

    print("KERNEL_OK")
</pallas_src>

<mosaic_0001>
module attributes {stable_mosaic.version = 11 : i64} {
  func.func @_mlp_kernel(%arg0: i32, %arg1: memref<1x2048xf32, #tpu.memory_space<vmem>>, %arg2: memref<128x1xf32, #tpu.memory_space<vmem>>, %arg3: memref<128x1xf32, #tpu.memory_space<vmem>>, %arg4: memref<128x1xf32, #tpu.memory_space<vmem>>, %arg5: memref<1x1xf32, #tpu.memory_space<smem>>, %arg6: memref<1x2048xf32, #tpu.memory_space<vmem>>) attributes {dimension_semantics = [#tpu.dimension_semantics<parallel>], iteration_bounds = array<i64: 1>, scalar_prefetch = 0 : i64, scratch_operands = 0 : i64, tpu.core_type = #tpu.core_type<tc>, window_params = [{transform_indices = @transform_0, window_bounds = array<i64: 1, 2048>}, {pipeline_mode = #tpu.pipeline_mode<synchronous>, transform_indices = @transform_1, window_bounds = array<i64: 128, 1>}, {pipeline_mode = #tpu.pipeline_mode<synchronous>, transform_indices = @transform_2, window_bounds = array<i64: 128, 1>}, {pipeline_mode = #tpu.pipeline_mode<synchronous>, transform_indices = @transform_3, window_bounds = array<i64: 128, 1>}, {transform_indices = @transform_4, window_bounds = array<i64: 1, 1>}, {transform_indices = @transform_5, window_bounds = array<i64: 1, 2048>}]} {
    %c0 = arith.constant 0 : index
    %c0_0 = arith.constant 0 : index
    %0 = vector.load %arg1[%c0, %c0_0] : memref<1x2048xf32, #tpu.memory_space<vmem>>, vector<1x2048xf32>
    %c0_1 = arith.constant 0 : index
    %c0_2 = arith.constant 0 : index
    %1 = vector.load %arg2[%c0_1, %c0_2] : memref<128x1xf32, #tpu.memory_space<vmem>>, vector<128x1xf32>
    %2 = vector.broadcast %1 : vector<128x1xf32> to vector<128x2048xf32>
    %3 = vector.broadcast %0 : vector<1x2048xf32> to vector<128x2048xf32>
    %4 = arith.mulf %2, %3 : vector<128x2048xf32>
    %c0_3 = arith.constant 0 : index
    %c0_4 = arith.constant 0 : index
    %5 = vector.load %arg3[%c0_3, %c0_4] : memref<128x1xf32, #tpu.memory_space<vmem>>, vector<128x1xf32>
    %6 = vector.broadcast %5 : vector<128x1xf32> to vector<128x2048xf32>
    %7 = arith.addf %4, %6 : vector<128x2048xf32>
    %cst = arith.constant 5.000000e-01 : f32
    %8 = vector.broadcast %cst : f32 to vector<128x2048xf32>
    %9 = arith.mulf %8, %7 : vector<128x2048xf32>
    %10 = math.tanh %9 : vector<128x2048xf32>
    %cst_5 = arith.constant 5.000000e-01 : f32
    %11 = vector.broadcast %cst_5 : f32 to vector<128x2048xf32>
    %12 = arith.mulf %11, %10 : vector<128x2048xf32>
    %cst_6 = arith.constant 5.000000e-01 : f32
    %13 = vector.broadcast %cst_6 : f32 to vector<128x2048xf32>
    %14 = arith.addf %12, %13 : vector<128x2048xf32>
    %c0_7 = arith.constant 0 : index
    %c0_8 = arith.constant 0 : index
    %15 = vector.load %arg4[%c0_7, %c0_8] : memref<128x1xf32, #tpu.memory_space<vmem>>, vector<128x1xf32>
    %16 = vector.broadcast %15 : vector<128x1xf32> to vector<128x2048xf32>
    %17 = arith.mulf %14, %16 : vector<128x2048xf32>
    %cst_9 = arith.constant dense<0.000000e+00> : vector<2048xf32>
    %18 = vector.multi_reduction <add>, %17, %cst_9 [0] : vector<128x2048xf32> to vector<2048xf32>
    %19 = vector.shape_cast %18 : vector<2048xf32> to vector<1x2048xf32>
    %c0_10 = arith.constant 0 : index
    %c0_11 = arith.constant 0 : index
    %20 = memref.load %arg5[%c0_10, %c0_11] : memref<1x1xf32, #tpu.memory_space<smem>>
    %21 = vector.broadcast %20 : f32 to vector<1x2048xf32>
    %22 = arith.addf %19, %21 : vector<1x2048xf32>
    %c0_12 = arith.constant 0 : index
    %c0_13 = arith.constant 0 : index
    %23 = vector.load %arg6[%c0_12, %c0_13] : memref<1x2048xf32, #tpu.memory_space<vmem>>, vector<1x2048xf32>
    tpu.vector_store %arg6[%c0_12, %c0_13], %22 {strides = array<i32>} : memref<1x2048xf32, #tpu.memory_space<vmem>>, vector<1x2048xf32>,
    return
  }
  func.func @transform_0(%arg0: i32) -> (i32, i32) {
    %c0_i32 = arith.constant 0 : i32
    %c0_i32_0 = arith.constant 0 : i32
    return %c0_i32, %arg0 : i32, i32
  }
  func.func @transform_1(%arg0: i32) -> (i32, i32) {
    %c0_i32 = arith.constant 0 : i32
    %c0_i32_0 = arith.constant 0 : i32
    %c0_i32_1 = arith.constant 0 : i32
    return %c0_i32, %c0_i32_0 : i32, i32
  }
  func.func @transform_2(%arg0: i32) -> (i32, i32) {
    %c0_i32 = arith.constant 0 : i32
    %c0_i32_0 = arith.constant 0 : i32
    %c0_i32_1 = arith.constant 0 : i32
    return %c0_i32, %c0_i32_0 : i32, i32
  }
  func.func @transform_3(%arg0: i32) -> (i32, i32) {
    %c0_i32 = arith.constant 0 : i32
    %c0_i32_0 = arith.constant 0 : i32
    %c0_i32_1 = arith.constant 0 : i32
    return %c0_i32, %c0_i32_0 : i32, i32
  }
  func.func @transform_4(%arg0: i32) -> (i32, i32) {
    %c0_i32 = arith.constant 0 : i32
    %c0_i32_0 = arith.constant 0 : i32
    %c0_i32_1 = arith.constant 0 : i32
    return %c0_i32, %c0_i32_0 : i32, i32
  }
  func.func @transform_5(%arg0: i32) -> (i32, i32) {
    %c0_i32 = arith.constant 0 : i32
    %c0_i32_0 = arith.constant 0 : i32
    return %c0_i32, %arg0 : i32, i32
  }
}

</mosaic_0001>

<bundles_post_ra>
// kernel: tpu_custom_call.1
= control target key start
LH: loop header
LB: loop body
LE: loop exit
PB: predicated region body
PF: predicated region fallthrough
CT: control target
= control target key end

     0   :  { %v3106_v3 = vmov 0   ;;  %s8468_s0 = inlined_call_operand.vmem [shape: f32[1,2048], index: 0, kind: input, shape index: {}]   ;;  %s8469_s1 = inlined_call_operand.vmem [shape: f32[128,1], index: 1, kind: input, shape index: {}]   ;;  %s8470_s2 = inlined_call_operand.vmem [shape: f32[128,1], index: 2, kind: input, shape index: {}]   ;;  %s8471_s3 = inlined_call_operand.vmem [shape: f32[128,1], index: 3, kind: input, shape index: {}]   ;;  %s8472_s4 = inlined_call_operand.<no memory space> [shape: f32[1,1], index: 4, kind: input, shape index: {}]   ;;  %s8473_s5 = inlined_call_operand.hbm [shape: f32[1,2048], index: 5, kind: output, shape index: {}]  }
   0x1   :  { %v28_v0 = vld [vmem:[%s8469_s1 + $0x20] sm:$0xff]  ;;  %v26_v1 = vld [vmem:[%s8469_s1 + $0x10] sm:$0xff]  ;;  %2567 = vset.pattern.permute.xlu2 %v3106_v3  ;;  %2566 = vset.pattern.permute.xlu1 %v3106_v3 }
   0x2   :  { %v24_v2 = vld [vmem:[%s8469_s1] sm:$0xff]  ;;  %2565 = vset.pattern.permute.xlu0 %v3106_v3  ;;  %62 = vperm.xlu2 %2567, %v28_v0  }
   0x3   :  { %52 = vperm.xlu1 %2566, %v26_v1   ;;  %42 = vperm.xlu0 %2565, %v24_v2  }
   0x4   :  { %11 = vsyncpa [#allocation4], 0  ;;  %v29_v4 = vld [vmem:[%s8469_s1 + $0x28] sm:$0xff]  ;;  %v27_v5 = vld [vmem:[%s8469_s1 + $0x18] sm:$0xff]  ;;  %vm2522_vm0 = vcmask 1040384   ;;  %vm2524_vm1 = vcmask 1042434  }
   0x5   :  { %v25_v6 = vld [vmem:[%s8469_s1 + $0x8] sm:$0xff]  ;;  %v32_v7 = vld [vmem:[%s8469_s1 + $0x40] sm:$0xff]  ;;  %v31_v8 = vld [vmem:[%s8469_s1 + $0x38] sm:$0xff]  ;;  %vm2526_vm2 = vcmask 1041408   ;;  %vm2528_vm3 = vcmask 1044484   ;;  %vm2530_vm4 = vcmask 1046534  }
   0x6   :  { %v30_v9 = vld [vmem:[%s8469_s1 + $0x30] sm:$0xff]  ;;  %v35_v10 = vld [vmem:[%s8469_s1 + $0x58] sm:$0xff]  ;;  %v33_v12 = vld [vmem:[%s8469_s1 + $0x48] sm:$0xff]  ;;  %vm2532_vm5 = vcmask 1045508   ;;  %s2554_s16 = sshll.u32 %s8473_s5, 4  ;;  %vm2534_vm6 = vcmask 1043456   ;;  %s2555_s16 = int_to_ptr.hbm [resolvable:$true] %s2554_s16 }
   0x7   :  { %v34_v11 = vld [vmem:[%s8469_s1 + $0x50] sm:$0xff]  ;;  %v37_v14 = vld [vmem:[%s8469_s1 + $0x68] sm:$0xff]  ;;  %v36_v15 = vld [vmem:[%s8469_s1 + $0x60] sm:$0xff] }
   0x8   :  { %v38_v13 = vld [vmem:[%s8469_s1 + $0x70] sm:$0xff]  ;;  %v411_v16 = vld [vmem:[%s8470_s2 + $0x8] sm:$0xff]  ;;  %v410_v17 = vld [vmem:[%s8470_s2] sm:$0xff] }
   0x9   :  { %v39_v18 = vld [vmem:[%s8469_s1 + $0x78] sm:$0xff]  ;;  %v414_v19 = vld [vmem:[%s8470_s2 + $0x20] sm:$0xff]  ;;  %v412_v21 = vld [vmem:[%s8470_s2 + $0x10] sm:$0xff] }
   0xa   :  { %67 = vperm.xlu2 %2567, %v29_v4   ;;  %v413_v20 = vld [vmem:[%s8470_s2 + $0x18] sm:$0xff]  ;;  %v416_v23 = vld [vmem:[%s8470_s2 + $0x30] sm:$0xff]  ;;  %v415_v24 = vld [vmem:[%s8470_s2 + $0x28] sm:$0xff] }
   0xb   :  { %57 = vperm.xlu1 %2566, %v27_v5   ;;  %47 = vperm.xlu0 %2565, %v25_v6   ;;  %v417_v22 = vld [vmem:[%s8470_s2 + $0x38] sm:$0xff]  ;;  %v420_v25 = vld [vmem:[%s8470_s2 + $0x50] sm:$0xff]  ;;  %v419_v26 = vld [vmem:[%s8470_s2 + $0x48] sm:$0xff] }
   0xc   :  { %v418_v27 = vld [vmem:[%s8470_s2 + $0x40] sm:$0xff]  ;;  %v423_v28 = vld [vmem:[%s8470_s2 + $0x68] sm:$0xff]  ;;  %v421_v30 = vld [vmem:[%s8470_s2 + $0x58] sm:$0xff] }
   0xd   :  { %v422_v29 = vld [vmem:[%s8470_s2 + $0x60] sm:$0xff]  ;;  %v425_v32 = vld [vmem:[%s8470_s2 + $0x78] sm:$0xff]  ;;  %v424_v33 = vld [vmem:[%s8470_s2 + $0x70] sm:$0xff] }
   0xe   :  { %v1786_v31 = vld [vmem:[%s8471_s3] sm:$0xff]  ;;  %v1789_v34 = vld [vmem:[%s8471_s3 + $0x18] sm:$0xff]  ;;  %v1788_v35 = vld [vmem:[%s8471_s3 + $0x10] sm:$0xff] }
   0xf   :  { %v1787_v36 = vld [vmem:[%s8471_s3 + $0x8] sm:$0xff]  ;;  %v1792_v37 = vld [vmem:[%s8471_s3 + $0x30] sm:$0xff]  ;;  %v1790_v39 = vld [vmem:[%s8471_s3 + $0x20] sm:$0xff] }
  0x10   :  { %v1791_v38 = vld [vmem:[%s8471_s3 + $0x28] sm:$0xff]  ;;  %v1794_v41 = vld [vmem:[%s8471_s3 + $0x40] sm:$0xff]  ;;  %v1793_v42 = vld [vmem:[%s8471_s3 + $0x38] sm:$0xff] }
  0x11   :  { %v1795_v40 = vld [vmem:[%s8471_s3 + $0x48] sm:$0xff]  ;;  %v1798_v43 = vld [vmem:[%s8471_s3 + $0x60] sm:$0xff]  ;;  %v1797_v44 = vld [vmem:[%s8471_s3 + $0x58] sm:$0xff] }
  0x12   :  { %82 = vperm.xlu2 %2567, %v32_v7   ;;  %v1796_v45 = vld [vmem:[%s8471_s3 + $0x50] sm:$0xff]  ;;  %v1801_v46 = vld [vmem:[%s8471_s3 + $0x78] sm:$0xff]  ;;  %v1799_v48 = vld [vmem:[%s8471_s3 + $0x68] sm:$0xff] }
  0x13   :  { %77 = vperm.xlu1 %2566, %v31_v8   ;;  %72 = vperm.xlu0 %2565, %v30_v9   ;;  %v1800_v47 = vld [vmem:[%s8471_s3 + $0x70] sm:$0xff]  ;;  %v22_v51 = vld [vmem:[%s8468_s0] sm:$0xff]  ;;  %v23_v52 = vld [vmem:[%s8468_s0 + $0x8] sm:$0xff] }
  0x14   :  { %v3288_v53 = vperm.slane %v22_v51, 0  ;;  %v3290_v54 = vperm.slane %v22_v51, 1  ;;  %v3292_v55 = vperm.slane %v22_v51, 2  ;;  %v3294_v56 = vperm.slane %v22_v51, 3 }
  0x15   :  { %v3296_v57 = vperm.slane %v22_v51, 4  ;;  %v3298_v58 = vperm.slane %v22_v51, 5  ;;  %v3300_v59 = vperm.slane %v22_v51, 6  ;;  %v3302_v60 = vperm.slane %v22_v51, 7 }
  0x16   :  { %v3304_v61 = vperm.slane %v23_v52, 0  ;;  %v3306_v62 = vperm.slane %v23_v52, 1  ;;  %v3308_v63 = vperm.slane %v23_v52, 2  ;;  %v3310_v0 = vperm.slane %v23_v52, 3 }
  0x17   :  { %v3312_v1 = vperm.slane %v23_v52, 4  ;;  %v3314_v2 = vperm.slane %v23_v52, 5  ;;  %v3316_v3 = vperm.slane %v23_v52, 6  ;;  %v3318_v4 = vperm.slane %v23_v52, 7 }
  0x1a   :  { %97 = vperm.xlu2 %2567, %v35_v10  }
  0x1b   :  { %92 = vperm.xlu1 %2566, %v34_v11   ;;  %87 = vperm.xlu0 %2565, %v33_v12  }
  0x22   :  { %112 = vperm.xlu2 %2567, %v38_v13  }
  0x23   :  { %107 = vperm.xlu1 %2566, %v37_v14   ;;  %102 = vperm.xlu0 %2565, %v36_v15  }
  0x2a   :  { %433 = vperm.xlu2 %2567, %v411_v16  }
  0x2b   :  { %428 = vperm.xlu1 %2566, %v410_v17   ;;  %117 = vperm.xlu0 %2565, %v39_v18  }
  0x32   :  { %448 = vperm.xlu2 %2567, %v414_v19  }
  0x33   :  { %443 = vperm.xlu1 %2566, %v413_v20   ;;  %438 = vperm.xlu0 %2565, %v412_v21  }
  0x3a   :  { %463 = vperm.xlu2 %2567, %v417_v22  }
  0x3b   :  { %458 = vperm.xlu1 %2566, %v416_v23   ;;  %453 = vperm.xlu0 %2565, %v415_v24  }
  0x42   :  { %478 = vperm.xlu2 %2567, %v420_v25  }
  0x43   :  { %473 = vperm.xlu1 %2566, %v419_v26   ;;  %468 = vperm.xlu0 %2565, %v418_v27  }
  0x4a   :  { %493 = vperm.xlu2 %2567, %v423_v28  }
  0x4b   :  { %488 = vperm.xlu1 %2566, %v422_v29   ;;  %483 = vperm.xlu0 %2565, %v421_v30  }
  0x52   :  { %1804 = vperm.xlu2 %2567, %v1786_v31  }
  0x53   :  { %503 = vperm.xlu1 %2566, %v425_v32   ;;  %498 = vperm.xlu0 %2565, %v424_v33  }
  0x5a   :  { %1819 = vperm.xlu2 %2567, %v1789_v34  }
  0x5b   :  { %1814 = vperm.xlu1 %2566, %v1788_v35   ;;  %1809 = vperm.xlu0 %2565, %v1787_v36  }
  0x5c   :  { %v63_v49 = vpop.permute.xlu2 %62 }
  0x5d   :  { %v3321_v5 = vmul.f32 %v3288_v53, %v63_v49  ;;  %v3324_v6 = vmul.f32 %v3290_v54, %v63_v49  ;;  %v3329_v9 = vmul.f32 %v3292_v55, %v63_v49  ;;  %v3332_v10 = vmul.f32 %v3294_v56, %v63_v49 }
  0x5e   :  { %v3335_v11 = vmul.f32 %v3296_v57, %v63_v49  ;;  %v3338_v12 = vmul.f32 %v3298_v58, %v63_v49  ;;  %v3341_v13 = vmul.f32 %v3300_v59, %v63_v49  ;;  %v3344_v14 = vmul.f32 %v3302_v60, %v63_v49 }
  0x5f   :  { %8474 = vst [vmem:[#allocation6_spill] sm:$0xff] %v3321_v5  ;;  %v3347_v15 = vmul.f32 %v3304_v61, %v63_v49  ;;  %v3350_v16 = vmul.f32 %v3306_v62, %v63_v49  ;;  %v3353_v17 = vmul.f32 %v3308_v63, %v63_v49  ;;  %v3356_v18 = vmul.f32 %v3310_v0, %v63_v49 }
  0x60   :  { %8475 = vst [vmem:[#allocation7_spill] sm:$0xff] %v3324_v6  ;;  %v3359_v19 = vmul.f32 %v3312_v1, %v63_v49  ;;  %v3362_v20 = vmul.f32 %v3314_v2, %v63_v49  ;;  %v3365_v22 = vmul.f32 %v3316_v3, %v63_v49  ;;  %v3368_v23 = vmul.f32 %v3318_v4, %v63_v49 }
  0x61   :  { %8476 = vst [vmem:[#allocation8_spill] sm:$0xff] %v3329_v9 }
  0x62   :  { %1834 = vperm.xlu2 %2567, %v1792_v37   ;;  %8477 = vst [vmem:[#allocation9_spill] sm:$0xff] %v3332_v10 }
  0x63   :  { %1829 = vperm.xlu1 %2566, %v1791_v38   ;;  %1824 = vperm.xlu0 %2565, %v1790_v39   ;;  %8478 = vst [vmem:[#allocation10_spill] sm:$0xff] %v3335_v11 }
  0x64   :  { %v68_v50 = vpop.permute.xlu2 %67  ;;  %8479 = vst [vmem:[#allocation11_spill] sm:$0xff] %v3338_v12 }
  0x65   :  { %8480 = vst [vmem:[#allocation12_spill] sm:$0xff] %v3341_v13  ;;  %v3371_v24 = vmul.f32 %v3288_v53, %v68_v50  ;;  %v3374_v25 = vmul.f32 %v3290_v54, %v68_v50  ;;  %v3377_v26 = vmul.f32 %v3292_v55, %v68_v50  ;;  %v3380_v27 = vmul.f32 %v3294_v56, %v68_v50 }
  0x66   :  { %8481 = vst [vmem:[#allocation13_spill] sm:$0xff] %v3344_v14  ;;  %v3383_v28 = vmul.f32 %v3296_v57, %v68_v50  ;;  %v3386_v29 = vmul.f32 %v3298_v58, %v68_v50  ;;  %v3389_v30 = vmul.f32 %v3300_v59, %v68_v50  ;;  %v3392_v31 = vmul.f32 %v3302_v60, %v68_v50 }
  0x67   :  { %8482 = vst [vmem:[#allocation14_spill] sm:$0xff] %v3347_v15  ;;  %v3395_v32 = vmul.f32 %v3304_v61, %v68_v50  ;;  %v3398_v33 = vmul.f32 %v3306_v62, %v68_v50  ;;  %v3401_v34 = vmul.f32 %v3308_v63, %v68_v50  ;;  %v3404_v35 = vmul.f32 %v3310_v0, %v68_v50 }
  0x68   :  { %8483 = vst [vmem:[#allocation15_spill] sm:$0xff] %v3350_v16  ;;  %v3407_v36 = vmul.f32 %v3312_v1, %v68_v50  ;;  %v3410_v37 = vmul.f32 %v3314_v2, %v68_v50  ;;  %v3413_v38 = vmul.f32 %v3316_v3, %v68_v50  ;;  %v3416_v39 = vmul.f32 %v3318_v4, %v68_v50 }
  0x69   :  { %8484 = vst [vmem:[#allocation16_spill] sm:$0xff] %v3353_v17 }
  0x6a   :  { %1849 = vperm.xlu2 %2567, %v1795_v40   ;;  %8485 = vst [vmem:[#allocation17_spill] sm:$0xff] %v3356_v18 }
  0x6b   :  { %1844 = vperm.xlu1 %2566, %v1794_v41   ;;  %1839 = vperm.xlu0 %2565, %v1793_v42   ;;  %8486 = vst [vmem:[#allocation18_spill] sm:$0xff] %v3359_v19 }
  0x6c   :  { %v83_v7 = vpop.permute.xlu2 %82  ;;  %8487 = vst [vmem:[#allocation19_spill] sm:$0xff] %v3362_v20 }
  0x6d   :  { %8488 = vst [vmem:[#allocation20_spill] sm:$0xff] %v3365_v22  ;;  %v3419_v40 = vmul.f32 %v3288_v53, %v83_v7  ;;  %v3422_v41 = vmul.f32 %v3290_v54, %v83_v7  ;;  %v3425_v42 = vmul.f32 %v3292_v55, %v83_v7  ;;  %v3446_v49 = vmul.f32 %v3306_v62, %v83_v7 }
  0x6e   :  { %8489 = vst [vmem:[#allocation21_spill] sm:$0xff] %v3368_v23  ;;  %v3453_v52 = vmul.f32 %v3308_v63, %v83_v7 }
  0x6f   :  { %8490 = vst [vmem:[#allocation22_spill] sm:$0xff] %v3371_v24 }
  0x70   :  { %8491 = vst [vmem:[#allocation23_spill] sm:$0xff] %v3374_v25 }
  0x71   :  { %8492 = vst [vmem:[#allocation24_spill] sm:$0xff] %v3377_v26 }
  0x72   :  { %1864 = vperm.xlu2 %2567, %v1798_v43   ;;  %8493 = vst [vmem:[#allocation25_spill] sm:$0xff] %v3380_v27  ;;  %v3428_v43 = vmul.f32 %v3294_v56, %v83_v7 }
  0x73   :  { %1859 = vperm.xlu1 %2566, %v1797_v44   ;;  %1854 = vperm.xlu0 %2565, %v1796_v45   ;;  %8494 = vst [vmem:[#allocation26_spill] sm:$0xff] %v3383_v28  ;;  %v3431_v44 = vmul.f32 %v3296_v57, %v83_v7  ;;  %v3434_v45 = vmul.f32 %v3298_v58, %v83_v7 }
  0x74   :  { %8495 = vst [vmem:[#allocation27_spill] sm:$0xff] %v3386_v29  ;;  %v3448_v50 = vpop.permute.xlu2 %97 }
  0x75   :  { %v3326_v8 = vpop.permute.xlu1 %52  ;;  %v43_v21 = vpop.permute.xlu0 %42  ;;  %8496 = vst [vmem:[#allocation28_spill] sm:$0xff] %v3389_v30 }
  0x76   :  { %8497 = vst [vmem:[#allocation29_spill] sm:$0xff] %v3392_v31  ;;  %v3548_v31 = vmul.f32 %v3294_v56, %v3326_v8  ;;  %v3556_v30 = vmul.f32 %v3298_v58, %v3326_v8  ;;  %v3560_v29 = vmul.f32 %v3300_v59, %v3326_v8  ;;  %v3564_v28 = vmul.f32 %v3302_v60, %v3326_v8 }
  0x77   :  { %8498 = vst [vmem:[#allocation30_spill] sm:$0xff] %v3395_v32  ;;  %v3544_v32 = vmul.f32 %v3292_v55, %v3326_v8  ;;  %v3568_v27 = vmul.f32 %v3304_v61, %v3326_v8  ;;  %v3572_v26 = vmul.f32 %v3306_v62, %v3326_v8  ;;  %v3576_v25 = vmul.f32 %v3308_v63, %v3326_v8 }
  0x78   :  { %8499 = vst [vmem:[#allocation31_spill] sm:$0xff] %v3398_v33  ;;  %v3540_v33 = vmul.f32 %v3290_v54, %v3326_v8  ;;  %v3580_v24 = vmul.f32 %v3310_v0, %v3326_v8  ;;  %v3584_v23 = vmul.f32 %v3312_v1, %v3326_v8  ;;  %v3588_v22 = vmul.f32 %v3314_v2, %v3326_v8 }
  0x79   :  { %8500 = vst [vmem:[#allocation32_spill] sm:$0xff] %v3401_v34  ;;  %v3536_v34 = vmul.f32 %v3288_v53, %v3326_v8  ;;  %v3603_v16 = vmul.f32 %v3316_v3, %v3326_v8 }
  0x7a   :  { %1879 = vperm.xlu2 %2567, %v1801_v46   ;;  %8501 = vst [vmem:[#allocation33_spill] sm:$0xff] %v3404_v35  ;;  %v3437_v46 = vmul.f32 %v3300_v59, %v83_v7  ;;  %v3532_v35 = vmul.f32 %v3318_v4, %v43_v21 }
  0x7b   :  { %1874 = vperm.xlu1 %2566, %v1800_v47   ;;  %1869 = vperm.xlu0 %2565, %v1799_v48   ;;  %8502 = vst [vmem:[#allocation34_spill] sm:$0xff] %v3407_v36  ;;  %v3440_v47 = vmul.f32 %v3302_v60, %v83_v7  ;;  %v3443_v48 = vmul.f32 %v3304_v61, %v83_v7 }
  0x7c   :  { %8503 = vst [vmem:[#allocation35_spill] sm:$0xff] %v3410_v37  ;;  %v3526_v37 = vmul.f32 %v3314_v2, %v43_v21  ;;  %v3529_v36 = vmul.f32 %v3316_v3, %v43_v21 }
  0x7d   :  { %8504 = vst [vmem:[#allocation36_spill] sm:$0xff] %v3413_v38  ;;  %v3450_v51 = vpop.permute.xlu1 %57  ;;  %v3523_v38 = vmul.f32 %v3312_v1, %v43_v21 }
  0x7e   :  { %8505 = vst [vmem:[#allocation37_spill] sm:$0xff] %v3416_v39  ;;  %v3520_v39 = vmul.f32 %v3310_v0, %v43_v21 }
  0x7f   :  { %8506 = vst [vmem:[#allocation38_spill] sm:$0xff] %v3419_v40  ;;  %v3517_v40 = vmul.f32 %v3308_v63, %v43_v21 }
  0x80   :  { %8507 = vst [vmem:[#allocation39_spill] sm:$0xff] %v3422_v41  ;;  %v3514_v41 = vmul.f32 %v3306_v62, %v43_v21 }
  0x81   :  { %8508 = vst [vmem:[#allocation40_spill] sm:$0xff] %v3425_v42  ;;  %v3505_v42 = vmul.f32 %v3300_v59, %v43_v21 }
  0x82   :  { %8509 = vst [vmem:[#allocation41_spill] sm:$0xff] %v3428_v43  ;;  %v3502_v43 = vmul.f32 %v3298_v58, %v43_v21 }
  0x83   :  { %8510 = vst [vmem:[#allocation42_spill] sm:$0xff] %v3431_v44  ;;  %v3472_v44 = vmul.f32 %v3288_v53, %v3448_v50 }
  0x84   :  { %8511 = vst [vmem:[#allocation43_spill] sm:$0xff] %v3434_v45  ;;  %v3456_v45 = vmul.f32 %v3310_v0, %v83_v7 }
  0x85   :  { %8512 = vst [vmem:[#allocation44_spill] sm:$0xff] %v3437_v46  ;;  %v3459_v46 = vmul.f32 %v3312_v1, %v83_v7  ;;  %v3590_v20 = vpop.permute.xlu1 %77 }
  0x86   :  { %8513 = vst [vmem:[#allocation45_spill] sm:$0xff] %v3440_v47  ;;  %v3462_v47 = vmul.f32 %v3314_v2, %v83_v7 }
  0x87   :  { %8514 = vst [vmem:[#allocation46_spill] sm:$0xff] %v3443_v48  ;;  %v3465_v48 = vmul.f32 %v3316_v3, %v83_v7 }
  0x88   :  { %8515 = vst [vmem:[#allocation47_spill] sm:$0xff] %v3446_v49  ;;  %v3468_v49 = vmul.f32 %v3318_v4, %v83_v7  ;;  %v3490_v7 = vmul.f32 %v3294_v56, %v3448_v50 }
  0x89   :  { %8516 = vst [vmem:[#allocation48_spill] sm:$0xff] %v3453_v52  ;;  %v3476_v52 = vmul.f32 %v3290_v54, %v3448_v50 }
  0x8a   :  { %8517 = vst [vmem:[#allocation49_spill] sm:$0xff] %v3456_v45  ;;  %v3479_v45 = vmul.f32 %v3288_v53, %v43_v21 }
  0x8b   :  { %8518 = vst [vmem:[#allocation50_spill] sm:$0xff] %v3459_v46  ;;  %v3482_v46 = vmul.f32 %v3290_v54, %v43_v21 }
  0x8c   :  { %8519 = vst [vmem:[#allocation51_spill] sm:$0xff] %v3462_v47  ;;  %v3499_v47 = vmul.f32 %v3296_v57, %v43_v21 }
  0x8d   :  { %8520 = vst [vmem:[#allocation52_spill] sm:$0xff] %v3465_v48  ;;  %v3486_v48 = vmul.f32 %v3292_v55, %v3448_v50 }
  0x8e   :  { %8521 = vst [vmem:[#allocation53_spill] sm:$0xff] %v3468_v49  ;;  %v48_v49 = vpop.permute.xlu0 %47 }
  0x8f   :  { %8522 = vst [vmem:[#allocation54_spill] sm:$0xff] %v3472_v44  ;;  %v3493_v44 = vmul.f32 %v3292_v55, %v43_v21  ;;  %v3593_v19 = vmul.f32 %v3288_v53, %v48_v49  ;;  %v3596_v18 = vmul.f32 %v3290_v54, %v48_v49  ;;  %v3599_v17 = vmul.f32 %v3292_v55, %v48_v49 }
  0x90   :  { %8523 = vst [vmem:[#allocation55_spill] sm:$0xff] %v3476_v52  ;;  %v3496_v52 = vmul.f32 %v3294_v56, %v43_v21  ;;  %v3606_v15 = vmul.f32 %v3294_v56, %v48_v49  ;;  %v3609_v14 = vmul.f32 %v3296_v57, %v48_v49  ;;  %v3612_v13 = vmul.f32 %v3298_v58, %v48_v49 }
  0x91   :  { %8524 = vst [vmem:[#allocation56_spill] sm:$0xff] %v3486_v48  ;;  %v3508_v48 = vmul.f32 %v3302_v60, %v43_v21  ;;  %v3615_v12 = vmul.f32 %v3300_v59, %v48_v49  ;;  %v3618_v11 = vmul.f32 %v3302_v60, %v48_v49  ;;  %v3621_v10 = vmul.f32 %v3304_v61, %v48_v49 }
  0x92   :  { %8525 = vst [vmem:[#allocation57_spill] sm:$0xff] %v3490_v7  ;;  %v3511_v7 = vmul.f32 %v3304_v61, %v43_v21  ;;  %v3552_v21 = vmul.f32 %v3296_v57, %v3326_v8  ;;  %v3624_v9 = vmul.f32 %v3306_v62, %v48_v49  ;;  %v3627_v6 = vmul.f32 %v3308_v63, %v48_v49 }
  0x93   :  { %8526 = vst [vmem:[#allocation58_spill] sm:$0xff] %v3556_v30 }
  0x94   :  { %8527 = vst [vmem:[#allocation59_spill] sm:$0xff] %v3560_v29  ;;  %v3658_v29 = vmul.f32 %v3292_v55, %v3450_v51 }
  0x95   :  { %8528 = vst [vmem:[#allocation60_spill] sm:$0xff] %v3564_v28  ;;  %v3654_v28 = vmul.f32 %v3290_v54, %v3450_v51 }
  0x96   :  { %8529 = vst [vmem:[#allocation61_spill] sm:$0xff] %v3568_v27  ;;  %v73_v5 = vpop.permute.xlu0 %72  ;;  %v3650_v27 = vmul.f32 %v3288_v53, %v3450_v51 }
  0x97   :  { %8530 = vst [vmem:[#allocation62_spill] sm:$0xff] %v3572_v26  ;;  %v3646_v26 = vmul.f32 %v3318_v4, %v3326_v8  ;;  %v3666_v8 = vmul.f32 %v3296_v57, %v3450_v51  ;;  %v3722_v30 = vmul.f32 %v3294_v56, %v73_v5 }
  0x98   :  { %8531 = vst [vmem:[#allocation63_spill] sm:$0xff] %v3576_v25  ;;  %v3642_v25 = vmul.f32 %v3318_v4, %v48_v49 }
  0x99   :  { %8532 = vst [vmem:[#allocation64_spill] sm:$0xff] %v3580_v24  ;;  %v3639_v24 = vmul.f32 %v3316_v3, %v48_v49 }
  0x9a   :  { %8533 = vst [vmem:[#allocation65_spill] sm:$0xff] %v3584_v23  ;;  %v3636_v23 = vmul.f32 %v3314_v2, %v48_v49 }
  0x9b   :  { %8534 = vst [vmem:[#allocation66_spill] sm:$0xff] %v3588_v22  ;;  %v3633_v22 = vmul.f32 %v3312_v1, %v48_v49 }
  0x9c   :  { %8535 = vst [vmem:[#allocation67_spill] sm:$0xff] %v3603_v16  ;;  %v3630_v16 = vmul.f32 %v3310_v0, %v48_v49  ;;  %v3662_v49 = vmul.f32 %v3294_v56, %v3450_v51 }
  0x9d   :  { %8536 = vst [vmem:[#allocation68_spill] sm:$0xff] %v3646_v26  ;;  %v3670_v26 = vmul.f32 %v3298_v58, %v3450_v51 }
  0x9e   :  { %8537 = vst [vmem:[#allocation69_spill] sm:$0xff] %v3650_v27  ;;  %v3674_v27 = vmul.f32 %v3300_v59, %v3450_v51 }
  0x9f   :  { %8538 = vst [vmem:[#allocation70_spill] sm:$0xff] %v3654_v28  ;;  %v3678_v28 = vmul.f32 %v3302_v60, %v3450_v51 }
  0xa0   :  { %8539 = vst [vmem:[#allocation71_spill] sm:$0xff] %v3658_v29  ;;  %v3682_v29 = vmul.f32 %v3304_v61, %v3450_v51 }
  0xa1   :  { %8540 = vst [vmem:[#allocation72_spill] sm:$0xff] %v3662_v49  ;;  %v3686_v49 = vmul.f32 %v3306_v62, %v3450_v51 }
  0xa2   :  { %8541 = vst [vmem:[#allocation73_spill] sm:$0xff] %v3666_v8  ;;  %v3690_v8 = vmul.f32 %v3308_v63, %v3450_v51 }
  0xa3   :  { %8542 = vst [vmem:[#allocation74_spill] sm:$0xff] %v3670_v26  ;;  %v3694_v26 = vmul.f32 %v3310_v0, %v3450_v51 }
  0xa4   :  { %8543 = vst [vmem:[#allocation75_spill] sm:$0xff] %v3674_v27  ;;  %v3698_v27 = vmul.f32 %v3312_v1, %v3450_v51 }
  0xa5   :  { %8544 = vst [vmem:[#allocation76_spill] sm:$0xff] %v3678_v28  ;;  %v3702_v28 = vmul.f32 %v3314_v2, %v3450_v51 }
  0xa6   :  { %8545 = vst [vmem:[#allocation77_spill] sm:$0xff] %v3682_v29  ;;  %v3706_v29 = vmul.f32 %v3316_v3, %v3450_v51 }
  0xa7   :  { %8546 = vst [vmem:[#allocation78_spill] sm:$0xff] %v3686_v49  ;;  %v3710_v49 = vmul.f32 %v3318_v4, %v3450_v51  ;;  %v93_v51 = vpop.permute.xlu1 %92 }
  0xa8   :  { %8547 = vst [vmem:[#allocation79_spill] sm:$0xff] %v3690_v8  ;;  %v3713_v8 = vmul.f32 %v3288_v53, %v73_v5 }
  0xa9   :  { %8548 = vst [vmem:[#allocation80_spill] sm:$0xff] %v3694_v26  ;;  %v3716_v26 = vmul.f32 %v3290_v54, %v73_v5 }
  0xaa   :  { %8549 = vst [vmem:[#allocation81_spill] sm:$0xff] %v3698_v27  ;;  %v3719_v27 = vmul.f32 %v3292_v55, %v73_v5 }
  0xab   :  { %8550 = vst [vmem:[#allocation82_spill] sm:$0xff] %v3702_v28  ;;  %v3725_v28 = vmul.f32 %v3296_v57, %v73_v5 }
  0xac   :  { %8551 = vst [vmem:[#allocation83_spill] sm:$0xff] %v3706_v29  ;;  %v3728_v29 = vmul.f32 %v3298_v58, %v73_v5 }
  0xad   :  { %8552 = vst [vmem:[#allocation84_spill] sm:$0xff] %v3710_v49  ;;  %v3731_v49 = vmul.f32 %v3300_v59, %v73_v5 }
  0xae   :  { %8553 = vst [vmem:[#allocation85_spill] sm:$0xff] %v3713_v8  ;;  %v3734_v8 = vmul.f32 %v3302_v60, %v73_v5 }
  0xaf   :  { %8554 = vst [vmem:[#allocation86_spill] sm:$0xff] %v3716_v26  ;;  %v3737_v26 = vmul.f32 %v3304_v61, %v73_v5 }
  0xb0   :  { %8555 = vst [vmem:[#allocation87_spill] sm:$0xff] %v3719_v27  ;;  %v3740_v27 = vmul.f32 %v3306_v62, %v73_v5 }
  0xb1   :  { %8556 = vst [vmem:[#allocation88_spill] sm:$0xff] %v3722_v30  ;;  %v3743_v30 = vmul.f32 %v3308_v63, %v73_v5 }
  0xb2   :  { %8557 = vst [vmem:[#allocation89_spill] sm:$0xff] %v3725_v28  ;;  %v3746_v28 = vmul.f32 %v3310_v0, %v73_v5 }
  0xb3   :  { %8558 = vst [vmem:[#allocation90_spill] sm:$0xff] %v3728_v29  ;;  %v3749_v29 = vmul.f32 %v3312_v1, %v73_v5 }
  0xb4   :  { %8559 = vst [vmem:[#allocation91_spill] sm:$0xff] %v3731_v49  ;;  %v3752_v49 = vmul.f32 %v3314_v2, %v73_v5 }
  0xb5   :  { %8560 = vst [vmem:[#allocation92_spill] sm:$0xff] %v3734_v8  ;;  %v3755_v8 = vmul.f32 %v3316_v3, %v73_v5 }
  0xb6   :  { %8561 = vst [vmem:[#allocation93_spill] sm:$0xff] %v3737_v26  ;;  %v3758_v26 = vmul.f32 %v3318_v4, %v73_v5  ;;  %v3778_v5 = vmul.f32 %v3296_v57, %v3590_v20 }
  0xb7   :  { %8562 = vst [vmem:[#allocation94_spill] sm:$0xff] %v3740_v27  ;;  %v3762_v27 = vmul.f32 %v3288_v53, %v3590_v20 }
  0xb8   :  { %8563 = vst [vmem:[#allocation95_spill] sm:$0xff] %v3743_v30  ;;  %v3766_v30 = vmul.f32 %v3290_v54, %v3590_v20 }
  0xb9   :  { %8564 = vst [vmem:[#allocation96_spill] sm:$0xff] %v3746_v28  ;;  %v88_v28 = vpop.permute.xlu0 %87 }
  0xba   :  { %8565 = vst [vmem:[#allocation97_spill] sm:$0xff] %v3749_v29  ;;  %v3770_v29 = vmul.f32 %v3292_v55, %v3590_v20 }
  0xbb   :  { %8566 = vst [vmem:[#allocation98_spill] sm:$0xff] %v3752_v49  ;;  %v3774_v49 = vmul.f32 %v3294_v56, %v3590_v20 }
  0xbc   :  { %8567 = vst [vmem:[#allocation99_spill] sm:$0xff] %v3755_v8  ;;  %v3834_v8 = vmul.f32 %v3294_v56, %v88_v28 }
  0xbd   :  { %8568 = vst [vmem:[#allocation100_spill] sm:$0xff] %v3758_v26  ;;  %v3790_v26 = vmul.f32 %v3302_v60, %v3590_v20 }
  0xbe   :  { %8569 = vst [vmem:[#allocation101_spill] sm:$0xff] %v3762_v27  ;;  %v3782_v27 = vmul.f32 %v3298_v58, %v3590_v20 }
  0xbf   :  { %8570 = vst [vmem:[#allocation102_spill] sm:$0xff] %v3766_v30  ;;  %v3786_v30 = vmul.f32 %v3300_v59, %v3590_v20 }
  0xc0   :  { %8571 = vst [vmem:[#allocation103_spill] sm:$0xff] %v3770_v29  ;;  %v3794_v29 = vmul.f32 %v3304_v61, %v3590_v20 }
  0xc1   :  { %8572 = vst [vmem:[#allocation104_spill] sm:$0xff] %v3774_v49  ;;  %v3798_v49 = vmul.f32 %v3306_v62, %v3590_v20 }
  0xc2   :  { %8573 = vst [vmem:[#allocation105_spill] sm:$0xff] %v3778_v5  ;;  %v3802_v5 = vmul.f32 %v3308_v63, %v3590_v20 }
  0xc3   :  { %8574 = vst [vmem:[#allocation106_spill] sm:$0xff] %v3782_v27  ;;  %v3806_v27 = vmul.f32 %v3310_v0, %v3590_v20 }
  0xc4   :  { %8575 = vst [vmem:[#allocation107_spill] sm:$0xff] %v3786_v30  ;;  %v3810_v30 = vmul.f32 %v3312_v1, %v3590_v20 }
  0xc5   :  { %8576 = vst [vmem:[#allocation108_spill] sm:$0xff] %v3790_v26  ;;  %v3814_v26 = vmul.f32 %v3314_v2, %v3590_v20 }
  0xc6   :  { %8577 = vst [vmem:[#allocation109_spill] sm:$0xff] %v3794_v29  ;;  %v3818_v29 = vmul.f32 %v3316_v3, %v3590_v20 }
  0xc7   :  { %8578 = vst [vmem:[#allocation110_spill] sm:$0xff] %v3798_v49  ;;  %v3822_v49 = vmul.f32 %v3318_v4, %v3590_v20  ;;  %v3843_v20 = vmul.f32 %v3300_v59, %v88_v28 }
  0xc8   :  { %8579 = vst [vmem:[#allocation111_spill] sm:$0xff] %v3802_v5  ;;  %v3825_v5 = vmul.f32 %v3288_v53, %v88_v28 }
  0xc9   :  { %8580 = vst [vmem:[#allocation112_spill] sm:$0xff] %v3806_v27  ;;  %v3828_v27 = vmul.f32 %v3290_v54, %v88_v28 }
  0xca   :  { %8581 = vst [vmem:[#allocation113_spill] sm:$0xff] %v3810_v30  ;;  %v3831_v30 = vmul.f32 %v3292_v55, %v88_v28 }
  0xcb   :  { %8582 = vst [vmem:[#allocation114_spill] sm:$0xff] %v3814_v26  ;;  %v3837_v26 = vmul.f32 %v3296_v57, %v88_v28 }
  0xcc   :  { %8583 = vst [vmem:[#allocation115_spill] sm:$0xff] %v3818_v29  ;;  %v3840_v29 = vmul.f32 %v3298_v58, %v88_v28 }
  0xcd   :  { %8584 = vst [vmem:[#allocation116_spill] sm:$0xff] %v3822_v49  ;;  %v3866_v49 = vpop.permute.xlu1 %107 }
  0xce   :  { %8585 = vst [vmem:[#allocation117_spill] sm:$0xff] %v3825_v5  ;;  %v3846_v5 = vmul.f32 %v3302_v60, %v88_v28 }
  0xcf   :  { %8586 = vst [vmem:[#allocation118_spill] sm:$0xff] %v3828_v27  ;;  %v3849_v27 = vmul.f32 %v3304_v61, %v88_v28 }
  0xd0   :  { %8587 = vst [vmem:[#allocation119_spill] sm:$0xff] %v3831_v30  ;;  %v3852_v30 = vmul.f32 %v3306_v62, %v88_v28 }
  0xd1   :  { %8588 = vst [vmem:[#allocation120_spill] sm:$0xff] %v3834_v8  ;;  %v3855_v8 = vmul.f32 %v3308_v63, %v88_v28 }
  0xd2   :  { %8589 = vst [vmem:[#allocation121_spill] sm:$0xff] %v3837_v26  ;;  %v3858_v26 = vmul.f32 %v3310_v0, %v88_v28 }
  0xd3   :  { %8590 = vst [vmem:[#allocation122_spill] sm:$0xff] %v3840_v29  ;;  %v3861_v29 = vmul.f32 %v3312_v1, %v88_v28 }
  0xd4   :  { %8591 = vst [vmem:[#allocation123_spill] sm:$0xff] %v3843_v20  ;;  %v3864_v20 = vmul.f32 %v3314_v2, %v88_v28 }
  0xd5   :  { %8592 = vst [vmem:[#allocation124_spill] sm:$0xff] %v3846_v5  ;;  %v3869_v5 = vmul.f32 %v3316_v3, %v88_v28 }
  0xd6   :  { %8593 = vst [vmem:[#allocation125_spill] sm:$0xff] %v3849_v27  ;;  %v3872_v27 = vmul.f32 %v3318_v4, %v88_v28  ;;  %v3893_v28 = vmul.f32 %v3300_v59, %v93_v51 }
  0xd7   :  { %8594 = vst [vmem:[#allocation126_spill] sm:$0xff] %v3852_v30  ;;  %v3875_v30 = vmul.f32 %v3288_v53, %v93_v51 }
  0xd8   :  { %8595 = vst [vmem:[#allocation127_spill] sm:$0xff] %v3855_v8  ;;  %v3878_v8 = vmul.f32 %v3290_v54, %v93_v51 }
  0xd9   :  { %8596 = vst [vmem:[#allocation128_spill] sm:$0xff] %v3858_v26  ;;  %v3881_v26 = vmul.f32 %v3292_v55, %v93_v51 }
  0xda   :  { %8597 = vst [vmem:[#allocation129_spill] sm:$0xff] %v3861_v29  ;;  %v3884_v29 = vmul.f32 %v3294_v56, %v93_v51 }
  0xdb   :  { %8598 = vst [vmem:[#allocation130_spill] sm:$0xff] %v3864_v20  ;;  %v3887_v20 = vmul.f32 %v3296_v57, %v93_v51 }
  0xdc   :  { %8599 = vst [vmem:[#allocation131_spill] sm:$0xff] %v3869_v5  ;;  %v3890_v5 = vmul.f32 %v3298_v58, %v93_v51 }
  0xdd   :  { %8600 = vst [vmem:[#allocation132_spill] sm:$0xff] %v3872_v27  ;;  %v103_v27 = vpop.permute.xlu0 %102 }
  0xde   :  { %8601 = vst [vmem:[#allocation133_spill] sm:$0xff] %v3875_v30  ;;  %v3896_v30 = vmul.f32 %v3302_v60, %v93_v51 }
  0xdf   :  { %8602 = vst [vmem:[#allocation134_spill] sm:$0xff] %v3878_v8  ;;  %v3899_v8 = vmul.f32 %v3304_v61, %v93_v51 }
  0xe0   :  { %8603 = vst [vmem:[#allocation135_spill] sm:$0xff] %v3881_v26  ;;  %v3902_v26 = vmul.f32 %v3306_v62, %v93_v51 }
  0xe1   :  { %8604 = vst [vmem:[#allocation136_spill] sm:$0xff] %v3884_v29  ;;  %v3905_v29 = vmul.f32 %v3308_v63, %v93_v51 }
  0xe2   :  { %8605 = vst [vmem:[#allocation137_spill] sm:$0xff] %v3887_v20  ;;  %v3908_v20 = vmul.f32 %v3310_v0, %v93_v51 }
  0xe3   :  { %8606 = vst [vmem:[#allocation138_spill] sm:$0xff] %v3890_v5  ;;  %v3911_v5 = vmul.f32 %v3312_v1, %v93_v51 }
  0xe4   :  { %8607 = vst [vmem:[#allocation139_spill] sm:$0xff] %v3893_v28  ;;  %v3914_v28 = vmul.f32 %v3314_v2, %v93_v51 }
  0xe5   :  { %8608 = vst [vmem:[#allocation140_spill] sm:$0xff] %v3896_v30  ;;  %v3917_v30 = vmul.f32 %v3316_v3, %v93_v51 }
  0xe6   :  { %8609 = vst [vmem:[#allocation141_spill] sm:$0xff] %v3899_v8  ;;  %v3920_v8 = vmul.f32 %v3318_v4, %v93_v51  ;;  %v3940_v51 = vmul.f32 %v3304_v61, %v3448_v50 }
  0xe7   :  { %8610 = vst [vmem:[#allocation142_spill] sm:$0xff] %v3902_v26  ;;  %v3924_v26 = vmul.f32 %v3296_v57, %v3448_v50 }
  0xe8   :  { %8611 = vst [vmem:[#allocation143_spill] sm:$0xff] %v3905_v29 }
  0xe9   :  { %8612 = vst [vmem:[#allocation144_spill] sm:$0xff] %v3908_v20  ;;  %v3928_v20 = vmul.f32 %v3298_v58, %v3448_v50 }
  0xea   :  { %8613 = vst [vmem:[#allocation145_spill] sm:$0xff] %v3911_v5  ;;  %v3932_v5 = vmul.f32 %v3300_v59, %v3448_v50 }
  0xeb   :  { %8614 = vst [vmem:[#allocation146_spill] sm:$0xff] %v3914_v28  ;;  %v3936_v28 = vmul.f32 %v3302_v60, %v3448_v50 }
  0xec   :  { %8615 = vst [vmem:[#allocation147_spill] sm:$0xff] %v3917_v30  ;;  %v3980_v30 = vmul.f32 %v3294_v56, %v103_v27 }
  0xed   :  { %8616 = vst [vmem:[#allocation148_spill] sm:$0xff] %v3920_v8  ;;  %v3944_v8 = vmul.f32 %v3306_v62, %v3448_v50 }
  0xee   :  { %8617 = vst [vmem:[#allocation149_spill] sm:$0xff] %v3924_v26  ;;  %v3948_v26 = vmul.f32 %v3308_v63, %v3448_v50 }
  0xef   :  { %8618 = vst [vmem:[#allocation150_spill] sm:$0xff] %v3928_v20  ;;  %v3952_v20 = vmul.f32 %v3310_v0, %v3448_v50 }
  0xf0   :  { %8619 = vst [vmem:[#allocation151_spill] sm:$0xff] %v3932_v5  ;;  %v3956_v5 = vmul.f32 %v3312_v1, %v3448_v50 }
  0xf1   :  { %8620 = vst [vmem:[#allocation152_spill] sm:$0xff] %v3936_v28  ;;  %v3960_v28 = vmul.f32 %v3314_v2, %v3448_v50 }
  0xf2   :  { %8621 = vst [vmem:[#allocation153_spill] sm:$0xff] %v3940_v51  ;;  %v3964_v51 = vmul.f32 %v3316_v3, %v3448_v50 }
  0xf3   :  { %8622 = vst [vmem:[#allocation154_spill] sm:$0xff] %v3944_v8  ;;  %v3968_v8 = vmul.f32 %v3318_v4, %v3448_v50  ;;  %v3989_v50 = vmul.f32 %v3300_v59, %v103_v27 }
  0xf4   :  { %8623 = vst [vmem:[#allocation155_spill] sm:$0xff] %v3948_v26  ;;  %v3971_v26 = vmul.f32 %v3288_v53, %v103_v27 }
  0xf5   :  { %8624 = vst [vmem:[#allocation156_spill] sm:$0xff] %v3952_v20  ;;  %v3974_v20 = vmul.f32 %v3290_v54, %v103_v27 }
  0xf6   :  { %8625 = vst [vmem:[#allocation157_spill] sm:$0xff] %v3956_v5  ;;  %v3977_v5 = vmul.f32 %v3292_v55, %v103_v27 }
  0xf7   :  { %8626 = vst [vmem:[#allocation158_spill] sm:$0xff] %v3960_v28  ;;  %v3983_v28 = vmul.f32 %v3296_v57, %v103_v27 }
  0xf8   :  { %8627 = vst [vmem:[#allocation159_spill] sm:$0xff] %v3964_v51  ;;  %v3986_v51 = vmul.f32 %v3298_v58, %v103_v27 }
  0xf9   :  { %8628 = vst [vmem:[#allocation160_spill] sm:$0xff] %v3968_v8  ;;  %v4000_v8 = vpop.permute.xlu1 %428 }
  0xfa   :  { %8629 = vst [vmem:[#allocation161_spill] sm:$0xff] %v3971_v26  ;;  %v3992_v26 = vmul.f32 %v3302_v60, %v103_v27 }
  0xfb   :  { %8630 = vst [vmem:[#allocation162_spill] sm:$0xff] %v3974_v20  ;;  %v3995_v20 = vmul.f32 %v3304_v61, %v103_v27 }
  0xfc   :  { %8631 = vst [vmem:[#allocation163_spill] sm:$0xff] %v3977_v5  ;;  %v3998_v5 = vmul.f32 %v3306_v62, %v103_v27 }
  0xfd   :  { %8632 = vst [vmem:[#allocation164_spill] sm:$0xff] %v3980_v30  ;;  %v4003_v30 = vmul.f32 %v3308_v63, %v103_v27 }
  0xfe   :  { %8633 = vst [vmem:[#allocation165_spill] sm:$0xff] %v3983_v28  ;;  %v4006_v28 = vmul.f32 %v3310_v0, %v103_v27 }
  0xff   :  { %8634 = vst [vmem:[#allocation166_spill] sm:$0xff] %v3986_v51  ;;  %v4009_v51 = vmul.f32 %v3312_v1, %v103_v27 }
 0x100   :  { %8635 = vst [vmem:[#allocation167_spill] sm:$0xff] %v3989_v50  ;;  %v4012_v50 = vmul.f32 %v3314_v2, %v103_v27 }
 0x101   :  { %8636 = vst [vmem:[#allocation168_spill] sm:$0xff] %v3992_v26  ;;  %v4015_v26 = vmul.f32 %v3316_v3, %v103_v27 }
 0x102   :  { %8637 = vst [vmem:[#allocation169_spill] sm:$0xff] %v3995_v20  ;;  %v4018_v20 = vmul.f32 %v3318_v4, %v103_v27  ;;  %v4038_v27 = vmul.f32 %v3296_v57, %v3866_v49 }
 0x103   :  { %8638 = vst [vmem:[#allocation170_spill] sm:$0xff] %v3998_v5  ;;  %v4022_v5 = vmul.f32 %v3288_v53, %v3866_v49 }
 0x104   :  { %8639 = vst [vmem:[#allocation171_spill] sm:$0xff] %v4003_v30  ;;  %v4026_v30 = vmul.f32 %v3290_v54, %v3866_v49 }
 0x105   :  { %8640 = vst [vmem:[#allocation172_spill] sm:$0xff] %v4006_v28 }
 0x106   :  { %8641 = vst [vmem:[#allocation173_spill] sm:$0xff] %v4009_v51  ;;  %v4030_v51 = vmul.f32 %v3292_v55, %v3866_v49 }
 0x107   :  { %8642 = vst [vmem:[#allocation174_spill] sm:$0xff] %v4012_v50  ;;  %v4034_v50 = vmul.f32 %v3294_v56, %v3866_v49 }
 0x108   :  { %8643 = vst [vmem:[#allocation175_spill] sm:$0xff] %v4015_v26  ;;  %v4060_v26 = vmul.f32 %v3306_v62, %v3866_v49 }
 0x109   :  { %8644 = vst [vmem:[#allocation176_spill] sm:$0xff] %v4018_v20  ;;  %v4042_v20 = vmul.f32 %v3298_v58, %v3866_v49 }
 0x10a   :  { %8645 = vst [vmem:[#allocation177_spill] sm:$0xff] %v4022_v5  ;;  %v113_v5 = vpop.permute.xlu2 %112 }
 0x10b   :  { %8646 = vst [vmem:[#allocation178_spill] sm:$0xff] %v4026_v30  ;;  %v4046_v30 = vmul.f32 %v3300_v59, %v3866_v49  ;;  %v4099_v28 = vmul.f32 %v3292_v55, %v113_v5  ;;  %v4115_v29 = vmul.f32 %v3300_v59, %v113_v5 }
 0x10c   :  { %8647 = vst [vmem:[#allocation179_spill] sm:$0xff] %v4030_v51  ;;  %v4050_v51 = vmul.f32 %v3302_v60, %v3866_v49 }
 0x10d   :  { %8648 = vst [vmem:[#allocation180_spill] sm:$0xff] %v4034_v50  ;;  %v4054_v50 = vmul.f32 %v3304_v61, %v3866_v49 }
 0x10e   :  { %8649 = vst [vmem:[#allocation181_spill] sm:$0xff] %v4038_v27  ;;  %v506_v27 = vadd.f32 %v4000_v8, %v3479_v45  ;;  %v4078_v45 = vmul.f32 %v3314_v2, %v3866_v49 }
 0x10f   :  { %8650 = vst [vmem:[#allocation182_spill] sm:$0xff] %v4042_v20  ;;  %v4064_v20 = vmul.f32 %v3308_v63, %v3866_v49 }
 0x110   :  { %8651 = vst [vmem:[#allocation183_spill] sm:$0xff] %v4046_v30  ;;  %v4068_v30 = vmul.f32 %v3310_v0, %v3866_v49 }
 0x111   :  { %8652 = vst [vmem:[#allocation184_spill] sm:$0xff] %v4050_v51  ;;  %v507_v51 = vadd.f32 %v4000_v8, %v3482_v46  ;;  %v4091_v46 = vmul.f32 %v3288_v53, %v113_v5 }
 0x112   :  { %8653 = vst [vmem:[#allocation185_spill] sm:$0xff] %v4054_v50  ;;  %v4074_v50 = vmul.f32 %v3312_v1, %v3866_v49 }
 0x113   :  { %8654 = vst [vmem:[#allocation186_spill] sm:$0xff] %v4060_v26  ;;  %v4082_v26 = vmul.f32 %v3316_v3, %v3866_v49 }
 0x114   :  { %8655 = vst [vmem:[#allocation187_spill] sm:$0xff] %v4064_v20  ;;  %v508_v20 = vadd.f32 %v4000_v8, %v3493_v44  ;;  %v510_v44 = vadd.f32 %v4000_v8, %v3499_v47  ;;  %v512_v47 = vadd.f32 %v4000_v8, %v3505_v42  ;;  %v4136_v42 = vmul.f32 %v3310_v0, %v113_v5 }
 0x115   :  { %8656 = vst [vmem:[#allocation188_spill] sm:$0xff] %v4068_v30  ;;  %v4088_v30 = vmul.f32 %v3318_v4, %v3866_v49  ;;  %v762_v49 = vmul.f32 0.5, %v506_v27 }
 0x116   :  { %8657 = vst [vmem:[#allocation189_spill] sm:$0xff] %v4074_v50  ;;  %v4094_v50 = vmul.f32 %v3290_v54, %v113_v5  ;;  %v764_v27 = vmul.f32 0.5, %v508_v20  ;;  %v515_v20 = vadd.f32 %v4000_v8, %v3514_v41  ;;  %v4153_v41 = vmul.f32 %v3316_v3, %v113_v5 }
 0x117   :  { %8658 = vst [vmem:[#allocation190_spill] sm:$0xff] %v4078_v45  ;;  %v509_v45 = vadd.f32 %v4000_v8, %v3496_v52  ;;  %v763_v52 = vmul.f32 0.5, %v507_v51  ;;  %2568 = vtanh.f32 %v762_v49 }
 0x118   :  { %8659 = vst [vmem:[#allocation191_spill] sm:$0xff] %v4082_v26  ;;  %v4102_v26 = vmul.f32 %v3294_v56, %v113_v5 }
 0x119   :  { %8660 = vst [vmem:[#allocation192_spill] sm:$0xff] %v4088_v30  ;;  %v4107_v30 = vmul.f32 %v3296_v57, %v113_v5  ;;  %v765_v51 = vmul.f32 0.5, %v509_v45  ;;  %2570 = vtanh.f32 %v763_v52  ;;  %v768_v45 = vmul.f32 0.5, %v512_v47 }
 0x11a   :  { %8661 = vst [vmem:[#allocation193_spill] sm:$0xff] %v4091_v46  ;;  %v4110_v46 = vmul.f32 %v3298_v58, %v113_v5  ;;  %2572 = vtanh.f32 %v764_v27  ;;  %v4160_v47 = vmul.f32 %v3318_v4, %v113_v5  ;;  %v519_v27 = vadd.f32 %v4000_v8, %v3526_v37 }
 0x11b   :  { %8662 = vst [vmem:[#allocation194_spill] sm:$0xff] %v4094_v50  ;;  %v511_v50 = vadd.f32 %v4000_v8, %v3502_v43  ;;  %v513_v43 = vadd.f32 %v4000_v8, %v3508_v48  ;;  %v516_v48 = vadd.f32 %v4000_v8, %v3517_v40  ;;  %2574 = vtanh.f32 %v765_v51  ;;  %v4157_v40 = vpop.permute.xlu2 %433 }
 0x11c   :  { %8663 = vst [vmem:[#allocation195_spill] sm:$0xff] %v4099_v28  ;;  %v4118_v28 = vmul.f32 %v3302_v60, %v113_v5 }
 0x11d   :  { %8664 = vst [vmem:[#allocation196_spill] sm:$0xff] %v4102_v26  ;;  %v4123_v26 = vmul.f32 %v3304_v61, %v113_v5  ;;  %v769_v49 = vmul.f32 0.5, %v513_v43 }
 0x11e   :  { %8665 = vst [vmem:[#allocation197_spill] sm:$0xff] %v4107_v30  ;;  %v4126_v30 = vmul.f32 %v3306_v62, %v113_v5 }
 0x11f   :  { %8666 = vst [vmem:[#allocation198_spill] sm:$0xff] %v4110_v46  ;;  %v4131_v46 = vmul.f32 %v3308_v63, %v113_v5 }
 0x120   :  { %8667 = vst [vmem:[#allocation199_spill] sm:$0xff] %v4115_v29  ;;  %v766_v29 = vmul.f32 0.5, %v510_v44  ;;  %v517_v44 = vadd.f32 %v4000_v8, %v3520_v39  ;;  %v4164_v39 = vpop.eup %2568 }
 0x121   :  { %8668 = vst [vmem:[#allocation200_spill] sm:$0xff] %v4118_v28  ;;  %v514_v28 = vadd.f32 %v4000_v8, %v3511_v7  ;;  %v4148_v7 = vmul.f32 %v3314_v2, %v113_v5 }
 0x122   :  { %8669 = vst [vmem:[#allocation201_spill] sm:$0xff] %v4123_v26  ;;  %v767_v26 = vmul.f32 0.5, %v511_v50  ;;  %v518_v50 = vadd.f32 %v4000_v8, %v3523_v38  ;;  %2576 = vtanh.f32 %v766_v29  ;;  %v520_v38 = vadd.f32 %v4000_v8, %v3529_v36 }
 0x123   :  { %8670 = vst [vmem:[#allocation202_spill] sm:$0xff] %v4126_v30  ;;  %v4141_v30 = vmul.f32 %v3312_v1, %v113_v5  ;;  %v770_v52 = vmul.f32 0.5, %v514_v28  ;;  %v772_v29 = vmul.f32 0.5, %v516_v48  ;;  %v4172_v28 = vpop.eup %2570  ;;  %v773_v37 = vmul.f32 0.5, %v517_v44 }
 0x124   :  { %8671 = vst [vmem:[#allocation203_spill] sm:$0xff] %v4131_v46  ;;  %v4145_v46 = vpop.permute.xlu0 %117  ;;  %2578 = vtanh.f32 %v767_v26  ;;  %v521_v26 = vadd.f32 %v4000_v8, %v3532_v35  ;;  %v4180_v51 = vpop.eup %2572  ;;  %v522_v36 = vadd.f32 %v4157_v40, %v3593_v19  ;;  %v523_v35 = vadd.f32 %v4157_v40, %v3596_v18 }
 0x125   :  { %8672 = vst [vmem:[#allocation204_spill] sm:$0xff] %v4136_v42  ;;  %v4168_v43 = vmul.f32 %v3288_v53, %v4145_v46  ;;  %2580 = vtanh.f32 %v768_v45  ;;  %v4176_v5 = vmul.f32 %v3290_v54, %v4145_v46  ;;  %v4184_v53 = vmul.f32 %v3292_v55, %v4145_v46  ;;  %v4188_v48 = vpop.eup %2574 }
 0x126   :  { %8673 = vst [vmem:[#allocation205_spill] sm:$0xff] %v4141_v30  ;;  %2582 = vtanh.f32 %v769_v49  ;;  %v4192_v54 = vmul.f32 %v3294_v56, %v4145_v46  ;;  %v775_v8 = vmul.f32 0.5, %v519_v27  ;;  %v4200_v55 = vmul.f32 %v3296_v57, %v4145_v46 }
 0x127   :  { %8674 = vst [vmem:[#allocation206_spill] sm:$0xff] %v4148_v7  ;;  %v771_v7 = vmul.f32 0.5, %v515_v20  ;;  %v774_v20 = vmul.f32 0.5, %v518_v50  ;;  %2584 = vtanh.f32 %v770_v52  ;;  %v524_v19 = vadd.f32 %v4157_v40, %v3599_v17 }
 0x128   :  { %8675 = vst [vmem:[#allocation207_spill] sm:$0xff] %v4153_v41  ;;  %v4196_v45 = vpop.eup %2576  ;;  %v776_v44 = vmul.f32 0.5, %v520_v38  ;;  %v4208_v56 = vmul.f32 %v3298_v58, %v4145_v46  ;;  %v525_v18 = vadd.f32 %v4157_v40, %v3606_v15  ;;  %v4216_v57 = vmul.f32 %v3300_v59, %v4145_v46 }
 0x129   :  { %8676 = vst [vmem:[#allocation208_spill] sm:$0xff] %v4160_v47  ;;  %2586 = vtanh.f32 %v771_v7  ;;  %v777_v7 = vmul.f32 0.5, %v521_v26  ;;  %v526_v17 = vadd.f32 %v4157_v40, %v3609_v14  ;;  %v778_v52 = vmul.f32 0.5, %v522_v36 }
 0x12a   :  { %8677 = vst [vmem:[#allocation209_spill] sm:$0xff] %v4164_v39  ;;  %2588 = vtanh.f32 %v772_v29  ;;  %v4204_v49 = vpop.eup %2578  ;;  %v4224_v58 = vmul.f32 %v3302_v60, %v4145_v46  ;;  %v527_v15 = vadd.f32 %v4157_v40, %v3612_v13  ;;  %v779_v38 = vmul.f32 0.5, %v523_v35  ;;  %v8740_v39 = vld [vmem:[#allocation76_spill] sm:$0xff] }
 0x12b   :  { %8678 = vst [vmem:[#allocation210_spill] sm:$0xff] %v4168_v43  ;;  %2590 = vtanh.f32 %v773_v37  ;;  %v4212_v50 = vpop.eup %2580  ;;  %v4232_v59 = vmul.f32 %v3304_v61, %v4145_v46  ;;  %v528_v14 = vadd.f32 %v4157_v40, %v3615_v12  ;;  %v780_v26 = vmul.f32 0.5, %v524_v19  ;;  %v8821_v43 = vld [vmem:[#allocation98_spill] sm:$0xff] }
 0x12c   :  { %8679 = vst [vmem:[#allocation211_spill] sm:$0xff] %v4172_v28  ;;  %2592 = vtanh.f32 %v774_v20  ;;  %v4220_v27 = vpop.eup %2582  ;;  %v4240_v60 = vmul.f32 %v3306_v62, %v4145_v46  ;;  %v529_v13 = vadd.f32 %v4157_v40, %v3618_v11  ;;  %v781_v36 = vmul.f32 0.5, %v525_v18  ;;  %v8739_v28 = vld [vmem:[#allocation75_spill] sm:$0xff] }
 0x12d   :  { %8680 = vst [vmem:[#allocation212_spill] sm:$0xff] %v4176_v5  ;;  %2594 = vtanh.f32 %v775_v8  ;;  %v4228_v29 = vpop.eup %2584  ;;  %v4248_v61 = vmul.f32 %v3308_v63, %v4145_v46  ;;  %v530_v12 = vadd.f32 %v4157_v40, %v3621_v10  ;;  %v782_v35 = vmul.f32 0.5, %v526_v17  ;;  %v8818_v5 = vld [vmem:[#allocation96_spill] sm:$0xff] }
 0x12e   :  { %8681 = vst [vmem:[#allocation213_spill] sm:$0xff] %v4180_v51  ;;  %2596 = vtanh.f32 %v776_v44  ;;  %v4256_v62 = vmul.f32 %v3310_v0, %v4145_v46  ;;  %v531_v11 = vadd.f32 %v4157_v40, %v3624_v9  ;;  %v783_v19 = vmul.f32 0.5, %v527_v15  ;;  %v8737_v51 = vld [vmem:[#allocation74_spill] sm:$0xff] }
 0x12f   :  { %8682 = vst [vmem:[#allocation214_spill] sm:$0xff] %v4184_v53  ;;  %v4236_v37 = vpop.eup %2586  ;;  %2598 = vtanh.f32 %v777_v7  ;;  %v4264_v63 = vmul.f32 %v3312_v1, %v4145_v46  ;;  %v532_v10 = vadd.f32 %v4157_v40, %v3627_v6  ;;  %v784_v18 = vmul.f32 0.5, %v528_v14  ;;  %v439_v1 = vpop.permute.xlu0 %438 }
 0x130   :  { %8683 = vst [vmem:[#allocation215_spill] sm:$0xff] %v4188_v48  ;;  %v4244_v20 = vpop.eup %2588  ;;  %2600 = vtanh.f32 %v778_v52  ;;  %v4272_v0 = vmul.f32 %v3314_v2, %v4145_v46  ;;  %v533_v9 = vadd.f32 %v4157_v40, %v3630_v16  ;;  %v785_v17 = vmul.f32 0.5, %v529_v13  ;;  %v8734_v48 = vld [vmem:[#allocation72_spill] sm:$0xff] }
 0x131   :  { %8684 = vst [vmem:[#allocation216_spill] sm:$0xff] %v4192_v54  ;;  %v4252_v8 = vpop.eup %2590  ;;  %2602 = vtanh.f32 %v779_v38  ;;  %v4280_v15 = vmul.f32 %v3316_v3, %v4145_v46  ;;  %v534_v6 = vadd.f32 %v4157_v40, %v3633_v22  ;;  %v786_v38 = vmul.f32 0.5, %v530_v12 }
 0x132   :  { %8685 = vst [vmem:[#allocation217_spill] sm:$0xff] %v4196_v45  ;;  %v4260_v44 = vpop.eup %2592  ;;  %2604 = vtanh.f32 %v780_v26  ;;  %v4288_v2 = vmul.f32 %v3318_v4, %v4145_v46  ;;  %v535_v16 = vadd.f32 %v4157_v40, %v3636_v23  ;;  %v787_v26 = vmul.f32 0.5, %v531_v11 }
 0x133   :  { %8686 = vst [vmem:[#allocation218_spill] sm:$0xff] %v4200_v55  ;;  %v4268_v7 = vpop.eup %2594  ;;  %2606 = vtanh.f32 %v781_v36  ;;  %v536_v3 = vadd.f32 %v4157_v40, %v3639_v24  ;;  %v537_v22 = vadd.f32 %v4157_v40, %v3642_v25  ;;  %v788_v36 = vmul.f32 0.5, %v532_v10  ;;  %v8713_v40 = vld [vmem:[#allocation58_spill] sm:$0xff] }
 0x134   :  { %8687 = vst [vmem:[#allocation219_spill] sm:$0xff] %v4204_v49  ;;  %v4276_v52 = vpop.eup %2596  ;;  %2608 = vtanh.f32 %v782_v35  ;;  %v538_v4 = vadd.f32 %v439_v1, %v3536_v34  ;;  %v539_v46 = vadd.f32 %v439_v1, %v3540_v33  ;;  %v789_v35 = vmul.f32 0.5, %v533_v9  ;;  %v8715_v33 = vld [vmem:[#allocation59_spill] sm:$0xff] }
 0x135   :  { %8688 = vst [vmem:[#allocation220_spill] sm:$0xff] %v4208_v56  ;;  %v4284_v14 = vpop.eup %2598  ;;  %2610 = vtanh.f32 %v783_v19  ;;  %v540_v11 = vadd.f32 %v439_v1, %v3544_v32  ;;  %v541_v19 = vadd.f32 %v439_v1, %v3548_v31  ;;  %v790_v24 = vmul.f32 0.5, %v534_v6  ;;  %v8718_v31 = vld [vmem:[#allocation61_spill] sm:$0xff] }
 0x136   :  { %8689 = vst [vmem:[#allocation221_spill] sm:$0xff] %v4212_v50  ;;  %v4292_v13 = vpop.eup %2600  ;;  %2612 = vtanh.f32 %v784_v18  ;;  %v542_v25 = vadd.f32 %v439_v1, %v3552_v21  ;;  %v543_v10 = vadd.f32 %v439_v1, %v8713_v40  ;;  %v791_v18 = vmul.f32 0.5, %v535_v16  ;;  %v444_v16 = vpop.permute.xlu1 %443  ;;  %v8728_v50 = vld [vmem:[#allocation68_spill] sm:$0xff] }
 0x137   :  { %8690 = vst [vmem:[#allocation222_spill] sm:$0xff] %v4216_v57  ;;  %v4298_v12 = vpop.eup %2602  ;;  %2614 = vtanh.f32 %v785_v17  ;;  %v544_v9 = vadd.f32 %v439_v1, %v8715_v33  ;;  %v8716_v17 = vld [vmem:[#allocation60_spill] sm:$0xff]  ;;  %v546_v6 = vadd.f32 %v439_v1, %v8718_v31  ;;  %v794_v33 = vmul.f32 0.5, %v538_v4  ;;  %v8730_v4 = vld [vmem:[#allocation69_spill] sm:$0xff] }
 0x138   :  { %8691 = vst [vmem:[#allocation223_spill] sm:$0xff] %v4220_v27  ;;  %v4302_v23 = vpop.eup %2604  ;;  %2616 = vtanh.f32 %v786_v38  ;;  %v8719_v38 = vld [vmem:[#allocation62_spill] sm:$0xff]  ;;  %v795_v31 = vmul.f32 0.5, %v539_v46  ;;  %v4332_v49 = vadd.f32 %v439_v1, %v8728_v50  ;;  %v4348_v50 = vadd.f32 %v444_v16, %v8734_v48 }
 0x139   :  { %8692 = vst [vmem:[#allocation224_spill] sm:$0xff] %v4224_v58  ;;  %2618 = vtanh.f32 %v787_v26  ;;  %v8721_v26 = vld [vmem:[#allocation63_spill] sm:$0xff]  ;;  %v4364_v48 = vadd.f32 %v444_v16, %v8740_v39  ;;  %v8746_v39 = vld [vmem:[#allocation80_spill] sm:$0xff] }
 0x13a   :  { %8693 = vst [vmem:[#allocation225_spill] sm:$0xff] %v4228_v29  ;;  %2620 = vtanh.f32 %v788_v36  ;;  %v548_v40 = vadd.f32 %v439_v1, %v8721_v26  ;;  %v8725_v29 = vld [vmem:[#allocation66_spill] sm:$0xff]  ;;  %v796_v26 = vmul.f32 0.5, %v540_v11  ;;  %v8736_v11 = vld [vmem:[#allocation73_spill] sm:$0xff] }
 0x13b   :  { %8694 = vst [vmem:[#allocation226_spill] sm:$0xff] %v4232_v59  ;;  %2622 = vtanh.f32 %v789_v35  ;;  %v551_v27 = vadd.f32 %v439_v1, %v8725_v29  ;;  %v797_v29 = vmul.f32 0.5, %v541_v19  ;;  %v799_v19 = vmul.f32 0.5, %v543_v10  ;;  %v8797_v59 = vld [vmem:[#allocation35_spill] sm:$0xff] }
 0x13c   :  { %8695 = vst [vmem:[#allocation227_spill] sm:$0xff] %v4236_v37  ;;  %2624 = vtanh.f32 %v790_v24  ;;  %v4337_v24 = vadd.f32 %v444_v16, %v8730_v4  ;;  %v4353_v4 = vadd.f32 %v444_v16, %v8736_v11 }
 0x13d   :  { %8696 = vst [vmem:[#allocation228_spill] sm:$0xff] %v4240_v60  ;;  %2626 = vtanh.f32 %v791_v18  ;;  %v8733_v18 = vld [vmem:[#allocation71_spill] sm:$0xff]  ;;  %v8794_v60 = vld [vmem:[#allocation33_spill] sm:$0xff] }
 0x13e   :  { %8697 = vst [vmem:[#allocation229_spill] sm:$0xff] %v4244_v20  ;;  %v8722_v20 = vld [vmem:[#allocation64_spill] sm:$0xff] }
 0x13f   :  { %8698 = vst [vmem:[#allocation230_spill] sm:$0xff] %v4248_v61  ;;  %v549_v37 = vadd.f32 %v439_v1, %v8722_v20 }
 0x140   :  { %8699 = vst [vmem:[#allocation231_spill] sm:$0xff] %v4252_v8  ;;  %v793_v8 = vmul.f32 0.5, %v537_v22  ;;  %v8727_v22 = vld [vmem:[#allocation67_spill] sm:$0xff] }
 0x141   :  { %8700 = vst [vmem:[#allocation232_spill] sm:$0xff] %v4256_v62  ;;  %v4329_v35 = vadd.f32 %v439_v1, %v8727_v22  ;;  %v4345_v22 = vadd.f32 %v444_v16, %v8733_v18  ;;  %v4361_v18 = vadd.f32 %v444_v16, %v8739_v28  ;;  %v8745_v28 = vld [vmem:[#allocation79_spill] sm:$0xff] }
 0x142   :  { %8701 = vst [vmem:[#allocation233_spill] sm:$0xff] %v4260_v44  ;;  %v547_v44 = vadd.f32 %v439_v1, %v8719_v38 }
 0x143   :  { %8702 = vst [vmem:[#allocation234_spill] sm:$0xff] %v4264_v63 }
 0x144   :  { %8703 = vst [vmem:[#allocation235_spill] sm:$0xff] %v4268_v7  ;;  %v792_v7 = vmul.f32 0.5, %v536_v3  ;;  %v8724_v3 = vld [vmem:[#allocation65_spill] sm:$0xff] }
 0x145   :  { %8704 = vst [vmem:[#allocation236_spill] sm:$0xff] %v4272_v0  ;;  %v550_v36 = vadd.f32 %v439_v1, %v8724_v3  ;;  %v8731_v3 = vld [vmem:[#allocation70_spill] sm:$0xff] }
 0x146   :  { %8705 = vst [vmem:[#allocation237_spill] sm:$0xff] %v4276_v52  ;;  %v545_v52 = vadd.f32 %v439_v1, %v8716_v17  ;;  %2628 = vtanh.f32 %v792_v7  ;;  %v4340_v45 = vadd.f32 %v444_v16, %v8731_v3  ;;  %v798_v1 = vmul.f32 0.5, %v542_v25 }
 0x147   :  { %8706 = vst [vmem:[#allocation238_spill] sm:$0xff] %v4280_v15  ;;  %2630 = vtanh.f32 %v793_v8  ;;  %v4356_v3 = vadd.f32 %v444_v16, %v8737_v51  ;;  %v800_v25 = vmul.f32 0.5, %v544_v9  ;;  %v802_v9 = vmul.f32 0.5, %v546_v6 }
 0x148   :  { %8707 = vst [vmem:[#allocation239_spill] sm:$0xff] %v4284_v14  ;;  %v4306_v14 = vpop.eup %2606  ;;  %2632 = vtanh.f32 %v794_v33  ;;  %v801_v10 = vmul.f32 0.5, %v545_v52  ;;  %v803_v52 = vmul.f32 0.5, %v547_v44  ;;  %v804_v6 = vmul.f32 0.5, %v548_v40 }
 0x149   :  { %8708 = vst [vmem:[#allocation240_spill] sm:$0xff] %v4288_v2  ;;  %v4310_v34 = vpop.eup %2608  ;;  %2634 = vtanh.f32 %v795_v31  ;;  %v805_v44 = vmul.f32 0.5, %v549_v37  ;;  %v807_v37 = vmul.f32 0.5, %v551_v27  ;;  %v809_v27 = vmul.f32 0.5, %v4332_v49 }
 0x14a   :  { %8709 = vst [vmem:[#allocation241_spill] sm:$0xff] %v4292_v13  ;;  %v4314_v32 = vpop.eup %2610  ;;  %2636 = vtanh.f32 %v796_v26  ;;  %v8773_v13 = vld [vmem:[#allocation19_spill] sm:$0xff] }
 0x14b   :  { %8710 = vst [vmem:[#allocation242_spill] sm:$0xff] %v4298_v12  ;;  %v4318_v21 = vpop.eup %2612  ;;  %2638 = vtanh.f32 %v797_v29  ;;  %v8770_v12 = vld [vmem:[#allocation17_spill] sm:$0xff] }
 0x14c   :  { %8711 = vst [vmem:[#allocation243_spill] sm:$0xff] %v4302_v23  ;;  %v4322_v17 = vpop.eup %2614  ;;  %2640 = vtanh.f32 %v798_v1 }
 0x14d   :  { %8712 = vst [vmem:[#allocation244_spill] sm:$0xff] %v4306_v14  ;;  %v4326_v38 = vpop.eup %2616  ;;  %2642 = vtanh.f32 %v799_v19  ;;  %v8764_v14 = vld [vmem:[#allocation13_spill] sm:$0xff] }
 0x14e   :  { %8714 = vst [vmem:[#allocation58_spill] sm:$0xff] %v4310_v34  ;;  %v4334_v20 = vpop.eup %2618  ;;  %2644 = vtanh.f32 %v800_v25  ;;  %v8758_v34 = vld [vmem:[#allocation9_spill] sm:$0xff]  ;;  %v8760_v25 = vld [vmem:[#allocation10_spill] sm:$0xff] }
 0x14f   :  { %8717 = vst [vmem:[#allocation59_spill] sm:$0xff] %v4314_v32  ;;  %v4342_v46 = vpop.eup %2620  ;;  %v8755_v32 = vld [vmem:[#allocation7_spill] sm:$0xff]  ;;  %2646 = vtanh.f32 %v801_v10 }
 0x150   :  { %8720 = vst [vmem:[#allocation60_spill] sm:$0xff] %v4318_v21  ;;  %v4350_v7 = vpop.eup %2622  ;;  %v8752_v21 = vld [vmem:[#allocation84_spill] sm:$0xff]  ;;  %2648 = vtanh.f32 %v802_v9 }
 0x151   :  { %8723 = vst [vmem:[#allocation61_spill] sm:$0xff] %v4322_v17  ;;  %v4358_v8 = vpop.eup %2624  ;;  %2650 = vtanh.f32 %v803_v52 }
 0x152   :  { %8726 = vst [vmem:[#allocation62_spill] sm:$0xff] %v4326_v38  ;;  %v4366_v33 = vpop.eup %2626  ;;  %v4380_v38 = vadd.f32 %v444_v16, %v8746_v39  ;;  %v4396_v39 = vadd.f32 %v444_v16, %v8752_v21  ;;  %2652 = vtanh.f32 %v804_v6  ;;  %v810_v6 = vmul.f32 0.5, %v4337_v24 }
 0x153   :  { %8729 = vst [vmem:[#allocation63_spill] sm:$0xff] %v4334_v20  ;;  %v4374_v31 = vpop.eup %2628  ;;  %v4377_v20 = vadd.f32 %v444_v16, %v8745_v28  ;;  %2654 = vtanh.f32 %v805_v44  ;;  %v811_v44 = vmul.f32 0.5, %v4340_v45  ;;  %v812_v24 = vmul.f32 0.5, %v4345_v22 }
 0x154   :  { %8732 = vst [vmem:[#allocation64_spill] sm:$0xff] %v4342_v46  ;;  %v8743_v46 = vld [vmem:[#allocation78_spill] sm:$0xff]  ;;  %v4382_v26 = vpop.eup %2630  ;;  %v813_v45 = vmul.f32 0.5, %v4348_v50  ;;  %v814_v22 = vmul.f32 0.5, %v4353_v4  ;;  %v815_v50 = vmul.f32 0.5, %v4356_v3  ;;  %v816_v4 = vmul.f32 0.5, %v4361_v18 }
 0x155   :  { %8735 = vst [vmem:[#allocation65_spill] sm:$0xff] %v4350_v7  ;;  %v8742_v7 = vld [vmem:[#allocation77_spill] sm:$0xff]  ;;  %v4372_v51 = vadd.f32 %v444_v16, %v8743_v46  ;;  %v8749_v46 = vld [vmem:[#allocation82_spill] sm:$0xff]  ;;  %v4390_v29 = vpop.eup %2632  ;;  %v817_v3 = vmul.f32 0.5, %v4364_v48 }
 0x156   :  { %8738 = vst [vmem:[#allocation66_spill] sm:$0xff] %v4358_v8  ;;  %v4369_v11 = vadd.f32 %v444_v16, %v8742_v7  ;;  %v449_v8 = vpop.permute.xlu2 %448  ;;  %v8748_v7 = vld [vmem:[#allocation81_spill] sm:$0xff]  ;;  %v4388_v17 = vadd.f32 %v444_v16, %v8749_v46  ;;  %v4398_v1 = vpop.eup %2634 }
 0x157   :  { %8741 = vst [vmem:[#allocation67_spill] sm:$0xff] %v4366_v33  ;;  %v4385_v33 = vadd.f32 %v444_v16, %v8748_v7  ;;  %v4404_v46 = vadd.f32 %v449_v8, %v8755_v32  ;;  %v4406_v19 = vpop.eup %2636  ;;  %v4412_v21 = vadd.f32 %v449_v8, %v8758_v34  ;;  %v4428_v34 = vadd.f32 %v449_v8, %v8764_v14 }
 0x158   :  { %8744 = vst [vmem:[#allocation68_spill] sm:$0xff] %v4374_v31  ;;  %v8751_v31 = vld [vmem:[#allocation83_spill] sm:$0xff]  ;;  %v4414_v40 = vpop.eup %2638  ;;  %v4455_v49 = vadd.f32 %v449_v8, %v8773_v13 }
 0x159   :  { %8747 = vst [vmem:[#allocation69_spill] sm:$0xff] %v4382_v26  ;;  %v4393_v28 = vadd.f32 %v444_v16, %v8751_v31  ;;  %v8754_v26 = vld [vmem:[#allocation6_spill] sm:$0xff]  ;;  %v806_v16 = vmul.f32 0.5, %v550_v36  ;;  %v4422_v10 = vpop.eup %2640  ;;  %v808_v36 = vmul.f32 0.5, %v4329_v35  ;;  %v4446_v35 = vadd.f32 %v449_v8, %v8770_v12  ;;  %v8776_v12 = vld [vmem:[#allocation21_spill] sm:$0xff]  ;;  %v8779_v13 = vld [vmem:[#allocation23_spill] sm:$0xff] }
 0x15a   :  { %8750 = vst [vmem:[#allocation70_spill] sm:$0xff] %v4390_v29  ;;  %v4401_v7 = vadd.f32 %v449_v8, %v8754_v26  ;;  %v8757_v29 = vld [vmem:[#allocation8_spill] sm:$0xff]  ;;  %v4417_v26 = vadd.f32 %v449_v8, %v8760_v25  ;;  %v4431_v9 = vpop.eup %2642  ;;  %v8766_v25 = vld [vmem:[#allocation14_spill] sm:$0xff]  ;;  %v4464_v15 = vadd.f32 %v449_v8, %v8776_v12 }
 0x15b   :  { %8753 = vst [vmem:[#allocation71_spill] sm:$0xff] %v4398_v1  ;;  %v4409_v31 = vadd.f32 %v449_v8, %v8757_v29  ;;  %v8761_v1 = vld [vmem:[#allocation11_spill] sm:$0xff]  ;;  %v4440_v52 = vpop.eup %2644  ;;  %2656 = vtanh.f32 %v806_v16 }
 0x15c   :  { %8756 = vst [vmem:[#allocation72_spill] sm:$0xff] %v4406_v19  ;;  %v4420_v32 = vadd.f32 %v449_v8, %v8761_v1  ;;  %v8763_v19 = vld [vmem:[#allocation12_spill] sm:$0xff]  ;;  %v8767_v1 = vld [vmem:[#allocation15_spill] sm:$0xff]  ;;  %2658 = vtanh.f32 %v807_v37 }
 0x15d   :  { %8759 = vst [vmem:[#allocation73_spill] sm:$0xff] %v4414_v40  ;;  %v4425_v29 = vadd.f32 %v449_v8, %v8763_v19  ;;  %v4434_v40 = vadd.f32 %v449_v8, %v8766_v25  ;;  %v4437_v23 = vadd.f32 %v449_v8, %v8767_v1  ;;  %v454_v19 = vpop.permute.xlu0 %453  ;;  %v4449_v25 = vpop.eup %2646  ;;  %2660 = vtanh.f32 %v808_v36 }
 0x15e   :  { %8762 = vst [vmem:[#allocation74_spill] sm:$0xff] %v4422_v10  ;;  %v8769_v10 = vld [vmem:[#allocation16_spill] sm:$0xff]  ;;  %v4473_v0 = vadd.f32 %v454_v19, %v8779_v13  ;;  %2662 = vtanh.f32 %v809_v27  ;;  %v8785_v13 = vld [vmem:[#allocation27_spill] sm:$0xff]  ;;  %v4518_v18 = vadd.f32 %v454_v19, %v8794_v60  ;;  %v4527_v48 = vadd.f32 %v454_v19, %v8797_v59  ;;  %v8800_v60 = vld [vmem:[#allocation37_spill] sm:$0xff] }
 0x15f   :  { %8765 = vst [vmem:[#allocation75_spill] sm:$0xff] %v4431_v9  ;;  %v4443_v14 = vadd.f32 %v449_v8, %v8769_v10  ;;  %v8772_v9 = vld [vmem:[#allocation18_spill] sm:$0xff]  ;;  %v8775_v10 = vld [vmem:[#allocation20_spill] sm:$0xff]  ;;  %2664 = vtanh.f32 %v810_v6  ;;  %v4491_v63 = vadd.f32 %v454_v19, %v8785_v13  ;;  %v8791_v13 = vld [vmem:[#allocation31_spill] sm:$0xff]  ;;  %v4536_v57 = vadd.f32 %v454_v19, %v8800_v60 }
 0x160   :  { %8768 = vst [vmem:[#allocation76_spill] sm:$0xff] %v4440_v52  ;;  %v4452_v1 = vadd.f32 %v449_v8, %v8772_v9  ;;  %v4458_v52 = vpop.eup %2648  ;;  %v4461_v2 = vadd.f32 %v449_v8, %v8775_v10  ;;  %v8778_v9 = vld [vmem:[#allocation22_spill] sm:$0xff]  ;;  %v8781_v10 = vld [vmem:[#allocation24_spill] sm:$0xff]  ;;  %v8782_v8 = vld [vmem:[#allocation25_spill] sm:$0xff]  ;;  %2666 = vtanh.f32 %v811_v44  ;;  %v4509_v61 = vadd.f32 %v454_v19, %v8791_v13 }
 0x161   :  { %8771 = vst [vmem:[#allocation77_spill] sm:$0xff] %v4449_v25  ;;  %v4467_v16 = vpop.eup %2650  ;;  %v4470_v25 = vadd.f32 %v454_v19, %v8778_v9  ;;  %v4482_v12 = vadd.f32 %v454_v19, %v8782_v8  ;;  %v8784_v9 = vld [vmem:[#allocation26_spill] sm:$0xff]  ;;  %v8788_v8 = vld [vmem:[#allocation29_spill] sm:$0xff]  ;;  %2668 = vtanh.f32 %v812_v24  ;;  %v818_v24 = vmul.f32 0.5, %v4369_v11 }
 0x162   :  { %8774 = vst [vmem:[#allocation78_spill] sm:$0xff] %v4458_v52  ;;  %v4476_v37 = vpop.eup %2652  ;;  %v4479_v52 = vadd.f32 %v454_v19, %v8781_v10  ;;  %v8787_v10 = vld [vmem:[#allocation28_spill] sm:$0xff]  ;;  %v4500_v62 = vadd.f32 %v454_v19, %v8788_v8  ;;  %2670 = vtanh.f32 %v813_v45  ;;  %v819_v45 = vmul.f32 0.5, %v4372_v51  ;;  %v8803_v59 = vld [vmem:[#allocation86_spill] sm:$0xff] }
 0x163   :  { %8777 = vst [vmem:[#allocation79_spill] sm:$0xff] %v4467_v16  ;;  %v4485_v36 = vpop.eup %2654  ;;  %v4488_v16 = vadd.f32 %v454_v19, %v8784_v9  ;;  %v8790_v9 = vld [vmem:[#allocation30_spill] sm:$0xff]  ;;  %2672 = vtanh.f32 %v814_v22  ;;  %v820_v11 = vmul.f32 0.5, %v4377_v20  ;;  %v821_v51 = vmul.f32 0.5, %v4380_v38 }
 0x164   :  { %8780 = vst [vmem:[#allocation80_spill] sm:$0xff] %v4476_v37  ;;  %v4494_v27 = vpop.eup %2656  ;;  %v4497_v37 = vadd.f32 %v454_v19, %v8787_v10  ;;  %v459_v10 = vpop.permute.xlu1 %458  ;;  %2674 = vtanh.f32 %v815_v50  ;;  %v822_v20 = vmul.f32 0.5, %v4385_v33  ;;  %v823_v38 = vmul.f32 0.5, %v4388_v17 }
 0x165   :  { %8783 = vst [vmem:[#allocation81_spill] sm:$0xff] %v4485_v36  ;;  %v4503_v6 = vpop.eup %2658  ;;  %v4506_v36 = vadd.f32 %v454_v19, %v8790_v9  ;;  %2676 = vtanh.f32 %v816_v4  ;;  %v4545_v56 = vadd.f32 %v459_v10, %v8803_v59  ;;  %v8809_v59 = vld [vmem:[#allocation90_spill] sm:$0xff]  ;;  %v824_v33 = vmul.f32 0.5, %v4393_v28 }
 0x166   :  { %8786 = vst [vmem:[#allocation82_spill] sm:$0xff] %v4494_v27  ;;  %v4512_v44 = vpop.eup %2660  ;;  %v8793_v27 = vld [vmem:[#allocation32_spill] sm:$0xff]  ;;  %2678 = vtanh.f32 %v817_v3  ;;  %v4563_v55 = vadd.f32 %v459_v10, %v8809_v59  ;;  %v8815_v59 = vld [vmem:[#allocation94_spill] sm:$0xff]  ;;  %v825_v17 = vmul.f32 0.5, %v4396_v39  ;;  %v4590_v28 = vadd.f32 %v459_v10, %v8818_v5 }
 0x167   :  { %8789 = vst [vmem:[#allocation83_spill] sm:$0xff] %v4503_v6  ;;  %v4515_v8 = vadd.f32 %v454_v19, %v8793_v27  ;;  %v4521_v9 = vpop.eup %2662  ;;  %v8796_v6 = vld [vmem:[#allocation34_spill] sm:$0xff]  ;;  %v8799_v27 = vld [vmem:[#allocation36_spill] sm:$0xff]  ;;  %2680 = vtanh.f32 %v818_v24  ;;  %v4581_v53 = vadd.f32 %v459_v10, %v8815_v59  ;;  %v4599_v39 = vadd.f32 %v459_v10, %v8821_v43 }
 0x168   :  { %8792 = vst [vmem:[#allocation84_spill] sm:$0xff] %v4512_v44  ;;  %v4524_v13 = vadd.f32 %v454_v19, %v8796_v6  ;;  %v4530_v44 = vpop.eup %2664  ;;  %v4533_v58 = vadd.f32 %v454_v19, %v8799_v27  ;;  %v8802_v6 = vld [vmem:[#allocation85_spill] sm:$0xff]  ;;  %v8805_v27 = vld [vmem:[#allocation87_spill] sm:$0xff]  ;;  %v8806_v19 = vld [vmem:[#allocation88_spill] sm:$0xff]  ;;  %2682 = vtanh.f32 %v819_v45 }
 0x169   :  { %8795 = vst [vmem:[#allocation6_spill] sm:$0xff] %v4521_v9  ;;  %v4539_v22 = vpop.eup %2666  ;;  %v4542_v9 = vadd.f32 %v459_v10, %v8802_v6  ;;  %v4554_v60 = vadd.f32 %v459_v10, %v8806_v19  ;;  %v8808_v6 = vld [vmem:[#allocation89_spill] sm:$0xff]  ;;  %v8812_v19 = vld [vmem:[#allocation92_spill] sm:$0xff]  ;;  %2684 = vtanh.f32 %v820_v11  ;;  %v826_v11 = vmul.f32 0.5, %v4401_v7  ;;  %v8827_v43 = vld [vmem:[#allocation102_spill] sm:$0xff] }
 0x16a   :  { %8798 = vst [vmem:[#allocation7_spill] sm:$0xff] %v4530_v44  ;;  %v4548_v50 = vpop.eup %2668  ;;  %v4551_v44 = vadd.f32 %v459_v10, %v8805_v27  ;;  %v8811_v27 = vld [vmem:[#allocation91_spill] sm:$0xff]  ;;  %v4572_v54 = vadd.f32 %v459_v10, %v8812_v19  ;;  %2686 = vtanh.f32 %v821_v51  ;;  %v827_v51 = vmul.f32 0.5, %v4404_v46  ;;  %v8824_v5 = vld [vmem:[#allocation100_spill] sm:$0xff] }
 0x16b   :  { %8801 = vst [vmem:[#allocation8_spill] sm:$0xff] %v4539_v22  ;;  %v4557_v4 = vpop.eup %2670  ;;  %v4560_v22 = vadd.f32 %v459_v10, %v8808_v6  ;;  %v8814_v6 = vld [vmem:[#allocation93_spill] sm:$0xff]  ;;  %2688 = vtanh.f32 %v822_v20  ;;  %v4608_v41 = vadd.f32 %v459_v10, %v8824_v5  ;;  %v828_v7 = vmul.f32 0.5, %v4409_v31 }
 0x16c   :  { %8804 = vst [vmem:[#allocation9_spill] sm:$0xff] %v4548_v50  ;;  %v4566_v3 = vpop.eup %2672  ;;  %v4569_v50 = vadd.f32 %v459_v10, %v8811_v27  ;;  %v464_v27 = vpop.permute.xlu2 %463  ;;  %2690 = vtanh.f32 %v823_v38  ;;  %v829_v46 = vmul.f32 0.5, %v4412_v21  ;;  %v830_v31 = vmul.f32 0.5, %v4417_v26 }
 0x16d   :  { %8807 = vst [vmem:[#allocation10_spill] sm:$0xff] %v4557_v4  ;;  %v4575_v24 = vpop.eup %2674  ;;  %v4578_v4 = vadd.f32 %v459_v10, %v8814_v6  ;;  %2692 = vtanh.f32 %v824_v33  ;;  %v4617_v30 = vadd.f32 %v464_v27, %v8827_v43  ;;  %v8834_v43 = vld [vmem:[#allocation106_spill] sm:$0xff]  ;;  %v831_v21 = vmul.f32 0.5, %v4420_v32 }
 0x16e   :  { %8810 = vst [vmem:[#allocation11_spill] sm:$0xff] %v4566_v3  ;;  %v4584_v45 = vpop.eup %2676  ;;  %v8817_v3 = vld [vmem:[#allocation95_spill] sm:$0xff]  ;;  %2694 = vtanh.f32 %v825_v17  ;;  %v4635_v42 = vadd.f32 %v464_v27, %v8834_v43  ;;  %v832_v26 = vmul.f32 0.5, %v4425_v29  ;;  %v8842_v43 = vld [vmem:[#allocation110_spill] sm:$0xff]  ;;  %v833_v32 = vmul.f32 0.5, %v4428_v34 }
 0x16f   :  { %8813 = vst [vmem:[#allocation12_spill] sm:$0xff] %v4575_v24  ;;  %v4587_v19 = vadd.f32 %v459_v10, %v8817_v3  ;;  %v4593_v6 = vpop.eup %2678  ;;  %v8820_v24 = vld [vmem:[#allocation97_spill] sm:$0xff]  ;;  %v8823_v3 = vld [vmem:[#allocation99_spill] sm:$0xff]  ;;  %2696 = vtanh.f32 %v826_v11 }
 0x170   :  { %8816 = vst [vmem:[#allocation13_spill] sm:$0xff] %v4584_v45  ;;  %v4596_v59 = vadd.f32 %v459_v10, %v8820_v24  ;;  %v4602_v45 = vpop.eup %2680  ;;  %v4605_v47 = vadd.f32 %v459_v10, %v8823_v3  ;;  %v8826_v24 = vld [vmem:[#allocation101_spill] sm:$0xff]  ;;  %v8829_v3 = vld [vmem:[#allocation103_spill] sm:$0xff]  ;;  %v8830_v10 = vld [vmem:[#allocation104_spill] sm:$0xff]  ;;  %2698 = vtanh.f32 %v827_v51 }
 0x171   :  { %8819 = vst [vmem:[#allocation14_spill] sm:$0xff] %v4593_v6  ;;  %v4611_v20 = vpop.eup %2682  ;;  %v4614_v6 = vadd.f32 %v464_v27, %v8826_v24  ;;  %v4626_v5 = vadd.f32 %v464_v27, %v8830_v10  ;;  %v8833_v24 = vld [vmem:[#allocation105_spill] sm:$0xff]  ;;  %v8838_v10 = vld [vmem:[#allocation108_spill] sm:$0xff]  ;;  %2700 = vtanh.f32 %v828_v7  ;;  %v834_v7 = vmul.f32 0.5, %v4434_v40 }
 0x172   :  { %8822 = vst [vmem:[#allocation15_spill] sm:$0xff] %v4602_v45  ;;  %v4620_v38 = vpop.eup %2684  ;;  %v4623_v45 = vadd.f32 %v464_v27, %v8829_v3  ;;  %v8837_v3 = vld [vmem:[#allocation107_spill] sm:$0xff]  ;;  %2702 = vtanh.f32 %v829_v46  ;;  %v835_v46 = vmul.f32 0.5, %v4437_v23  ;;  %v836_v40 = vmul.f32 0.5, %v4443_v14 }
 0x173   :  { %8825 = vst [vmem:[#allocation16_spill] sm:$0xff] %v4611_v20  ;;  %v4629_v33 = vpop.eup %2686  ;;  %v4632_v20 = vadd.f32 %v464_v27, %v8833_v24  ;;  %v8841_v24 = vld [vmem:[#allocation109_spill] sm:$0xff]  ;;  %2704 = vtanh.f32 %v830_v31  ;;  %v837_v23 = vmul.f32 0.5, %v4446_v35  ;;  %v838_v14 = vmul.f32 0.5, %v4452_v1 }
 0x174   :  { %8828 = vst [vmem:[#allocation17_spill] sm:$0xff] %v4620_v38  ;;  %v4638_v17 = vpop.eup %2688  ;;  %v4641_v38 = vadd.f32 %v464_v27, %v8837_v3  ;;  %v469_v3 = vpop.permute.xlu0 %468  ;;  %2706 = vtanh.f32 %v831_v21  ;;  %v839_v35 = vmul.f32 0.5, %v4455_v49  ;;  %v840_v1 = vmul.f32 0.5, %v4461_v2 }
 0x175   :  { %8831 = vst [vmem:[#allocation18_spill] sm:$0xff] %v4626_v5  ;;  %v4644_v5 = vadd.f32 %v464_v27, %v8838_v10  ;;  %v4647_v11 = vpop.eup %2690  ;;  %2708 = vtanh.f32 %v832_v26  ;;  %v841_v49 = vmul.f32 0.5, %v4464_v15 }
 0x176   :  { %8832 = vst [vmem:[#allocation19_spill] sm:$0xff] %v4629_v33  ;;  %v4650_v33 = vadd.f32 %v464_v27, %v8841_v24  ;;  %v4656_v51 = vpop.eup %2692  ;;  %2710 = vtanh.f32 %v833_v32 }
 0x177   :  { %8835 = vst [vmem:[#allocation20_spill] sm:$0xff] %v4635_v42  ;;  %v4653_v42 = vadd.f32 %v464_v27, %v8842_v43  ;;  %v4665_v24 = vpop.eup %2694  ;;  %2712 = vtanh.f32 %v834_v7 }
 0x178   :  { %8836 = vst [vmem:[#allocation21_spill] sm:$0xff] %v4638_v17  ;;  %v8845_v17 = vld [vmem:[#allocation111_spill] sm:$0xff]  ;;  %2714 = vtanh.f32 %v835_v46 }
 0x179   :  { %8839 = vst [vmem:[#allocation22_spill] sm:$0xff] %v4644_v5  ;;  %v4659_v10 = vadd.f32 %v464_v27, %v8845_v17  ;;  %v8847_v5 = vld [vmem:[#allocation112_spill] sm:$0xff]  ;;  %v8854_v17 = vld [vmem:[#allocation115_spill] sm:$0xff]  ;;  %2716 = vtanh.f32 %v836_v40  ;;  %v842_v40 = vmul.f32 0.5, %v4470_v25  ;;  %v844_v25 = vmul.f32 0.5, %v4479_v52 }
 0x17a   :  { %8840 = vst [vmem:[#allocation23_spill] sm:$0xff] %v4647_v11  ;;  %v4662_v29 = vadd.f32 %v464_v27, %v8847_v5  ;;  %v8850_v11 = vld [vmem:[#allocation113_spill] sm:$0xff]  ;;  %v8855_v5 = vld [vmem:[#allocation116_spill] sm:$0xff]  ;;  %2718 = vtanh.f32 %v837_v23  ;;  %v843_v23 = vmul.f32 0.5, %v4473_v0  ;;  %v845_v0 = vmul.f32 0.5, %v4482_v12 }
 0x17b   :  { %8843 = vst [vmem:[#allocation24_spill] sm:$0xff] %v4653_v42  ;;  %v4668_v43 = vadd.f32 %v464_v27, %v8850_v11  ;;  %v8851_v42 = vld [vmem:[#allocation114_spill] sm:$0xff]  ;;  %2720 = vtanh.f32 %v838_v14  ;;  %v846_v52 = vmul.f32 0.5, %v4488_v16  ;;  %v847_v12 = vmul.f32 0.5, %v4491_v63 }
 0x17c   :  { %8844 = vst [vmem:[#allocation25_spill] sm:$0xff] %v4656_v51  ;;  %v4671_v34 = vadd.f32 %v464_v27, %v8851_v42  ;;  %v4674_v51 = vpop.eup %2696  ;;  %v8857_v11 = vld [vmem:[#allocation38_spill] sm:$0xff]  ;;  %v8858_v42 = vld [vmem:[#allocation39_spill] sm:$0xff]  ;;  %2722 = vtanh.f32 %v839_v35  ;;  %v848_v16 = vmul.f32 0.5, %v4497_v37  ;;  %v849_v63 = vmul.f32 0.5, %v4500_v62 }
 0x17d   :  { %8846 = vst [vmem:[#allocation26_spill] sm:$0xff] %v4659_v10  ;;  %v4677_v10 = vadd.f32 %v464_v27, %v8854_v17  ;;  %v4683_v31 = vpop.eup %2698  ;;  %v8861_v17 = vld [vmem:[#allocation40_spill] sm:$0xff]  ;;  %2724 = vtanh.f32 %v840_v1 }
 0x17e   :  { %8848 = vst [vmem:[#allocation27_spill] sm:$0xff] %v4662_v29  ;;  %v4680_v29 = vadd.f32 %v464_v27, %v8855_v5  ;;  %v4692_v21 = vpop.eup %2700  ;;  %v8862_v27 = vld [vmem:[#allocation41_spill] sm:$0xff]  ;;  %2726 = vtanh.f32 %v841_v49 }
 0x17f   :  { %8849 = vst [vmem:[#allocation28_spill] sm:$0xff] %v4665_v24  ;;  %v4686_v24 = vadd.f32 %v469_v3, %v8857_v11  ;;  %v4698_v5 = vadd.f32 %v469_v3, %v8862_v27  ;;  %v4701_v26 = vpop.eup %2702  ;;  %v8865_v11 = vld [vmem:[#allocation42_spill] sm:$0xff]  ;;  %v8870_v27 = vld [vmem:[#allocation45_spill] sm:$0xff]  ;;  %2728 = vtanh.f32 %v842_v40 }
 0x180   :  { %8852 = vst [vmem:[#allocation29_spill] sm:$0xff] %v4671_v34  ;;  %v4689_v34 = vadd.f32 %v469_v3, %v8858_v42  ;;  %v8866_v42 = vld [vmem:[#allocation43_spill] sm:$0xff]  ;;  %v4710_v32 = vpop.eup %2704  ;;  %2730 = vtanh.f32 %v843_v23 }
 0x181   :  { %8853 = vst [vmem:[#allocation30_spill] sm:$0xff] %v4674_v51  ;;  %v4695_v51 = vadd.f32 %v469_v3, %v8861_v17  ;;  %v8869_v17 = vld [vmem:[#allocation44_spill] sm:$0xff]  ;;  %v4719_v7 = vpop.eup %2706  ;;  %2732 = vtanh.f32 %v844_v25  ;;  %v850_v25 = vmul.f32 0.5, %v4506_v36  ;;  %v852_v36 = vmul.f32 0.5, %v4515_v8 }
 0x182   :  { %8856 = vst [vmem:[#allocation31_spill] sm:$0xff] %v4683_v31  ;;  %v4704_v31 = vadd.f32 %v469_v3, %v8865_v11  ;;  %v8873_v11 = vld [vmem:[#allocation46_spill] sm:$0xff]  ;;  %v4728_v46 = vpop.eup %2708  ;;  %2734 = vtanh.f32 %v845_v0  ;;  %v851_v0 = vmul.f32 0.5, %v4509_v61  ;;  %v853_v61 = vmul.f32 0.5, %v4518_v18 }
 0x183   :  { %8859 = vst [vmem:[#allocation32_spill] sm:$0xff] %v4689_v34  ;;  %v4707_v34 = vadd.f32 %v469_v3, %v8866_v42  ;;  %v8874_v42 = vld [vmem:[#allocation47_spill] sm:$0xff]  ;;  %2736 = vtanh.f32 %v846_v52  ;;  %v854_v8 = vmul.f32 0.5, %v4524_v13  ;;  %v855_v18 = vmul.f32 0.5, %v4527_v48 }
 0x184   :  { %8860 = vst [vmem:[#allocation33_spill] sm:$0xff] %v4692_v21  ;;  %v4713_v21 = vadd.f32 %v469_v3, %v8869_v17  ;;  %v474_v17 = vpop.permute.xlu1 %473  ;;  %2738 = vtanh.f32 %v847_v12  ;;  %v856_v13 = vmul.f32 0.5, %v4533_v58  ;;  %v857_v48 = vmul.f32 0.5, %v4536_v57 }
 0x185   :  { %8863 = vst [vmem:[#allocation34_spill] sm:$0xff] %v4698_v5  ;;  %v4716_v5 = vadd.f32 %v469_v3, %v8870_v27  ;;  %2740 = vtanh.f32 %v848_v16 }
 0x186   :  { %8864 = vst [vmem:[#allocation35_spill] sm:$0xff] %v4701_v26  ;;  %v4722_v26 = vadd.f32 %v469_v3, %v8873_v11  ;;  %v4737_v11 = vpop.eup %2710  ;;  %2742 = vtanh.f32 %v849_v63 }
 0x187   :  { %8867 = vst [vmem:[#allocation36_spill] sm:$0xff] %v4707_v34  ;;  %v4725_v34 = vadd.f32 %v469_v3, %v8874_v42 }
 0x188   :  { %8868 = vst [vmem:[#allocation37_spill] sm:$0xff] %v4710_v32  ;;  %v8877_v32 = vld [vmem:[#allocation48_spill] sm:$0xff] }
 0x189   :  { %8871 = vst [vmem:[#allocation85_spill] sm:$0xff] %v4716_v5  ;;  %v4731_v27 = vadd.f32 %v469_v3, %v8877_v32  ;;  %v8879_v5 = vld [vmem:[#allocation49_spill] sm:$0xff]  ;;  %v8886_v32 = vld [vmem:[#allocation52_spill] sm:$0xff] }
 0x18a   :  { %8872 = vst [vmem:[#allocation86_spill] sm:$0xff] %v4719_v7  ;;  %v4734_v2 = vadd.f32 %v469_v3, %v8879_v5  ;;  %v8882_v7 = vld [vmem:[#allocation50_spill] sm:$0xff]  ;;  %v8887_v5 = vld [vmem:[#allocation53_spill] sm:$0xff] }
 0x18b   :  { %8875 = vst [vmem:[#allocation87_spill] sm:$0xff] %v4725_v34  ;;  %v4740_v42 = vadd.f32 %v469_v3, %v8882_v7  ;;  %v8883_v34 = vld [vmem:[#allocation51_spill] sm:$0xff]  ;;  %v8889_v7 = vld [vmem:[#allocation117_spill] sm:$0xff] }
 0x18c   :  { %8876 = vst [vmem:[#allocation88_spill] sm:$0xff] %v4728_v46  ;;  %v4743_v15 = vadd.f32 %v469_v3, %v8883_v34  ;;  %v4746_v46 = vpop.eup %2712  ;;  %v8890_v34 = vld [vmem:[#allocation118_spill] sm:$0xff]  ;;  %2744 = vtanh.f32 %v850_v25 }
 0x18d   :  { %8878 = vst [vmem:[#allocation89_spill] sm:$0xff] %v4731_v27  ;;  %v4749_v27 = vadd.f32 %v469_v3, %v8886_v32  ;;  %v4755_v14 = vpop.eup %2714  ;;  %v8893_v32 = vld [vmem:[#allocation119_spill] sm:$0xff]  ;;  %2746 = vtanh.f32 %v851_v0 }
 0x18e   :  { %8880 = vst [vmem:[#allocation90_spill] sm:$0xff] %v4734_v2  ;;  %v4752_v2 = vadd.f32 %v469_v3, %v8887_v5  ;;  %v4764_v35 = vpop.eup %2716  ;;  %v8894_v3 = vld [vmem:[#allocation120_spill] sm:$0xff]  ;;  %2748 = vtanh.f32 %v852_v36  ;;  %v858_v36 = vmul.f32 0.5, %v4542_v9  ;;  %v860_v9 = vmul.f32 0.5, %v4551_v44 }
 0x18f   :  { %8881 = vst [vmem:[#allocation91_spill] sm:$0xff] %v4737_v11  ;;  %v4758_v11 = vadd.f32 %v474_v17, %v8889_v7  ;;  %v4770_v5 = vadd.f32 %v474_v17, %v8894_v3  ;;  %v4773_v1 = vpop.eup %2718  ;;  %v8897_v7 = vld [vmem:[#allocation121_spill] sm:$0xff]  ;;  %v8902_v3 = vld [vmem:[#allocation124_spill] sm:$0xff]  ;;  %2750 = vtanh.f32 %v853_v61  ;;  %v859_v61 = vmul.f32 0.5, %v4545_v56 }
 0x190   :  { %8884 = vst [vmem:[#allocation92_spill] sm:$0xff] %v4743_v15  ;;  %v4761_v15 = vadd.f32 %v474_v17, %v8890_v34  ;;  %v8898_v34 = vld [vmem:[#allocation122_spill] sm:$0xff]  ;;  %v4782_v49 = vpop.eup %2720  ;;  %2752 = vtanh.f32 %v854_v8  ;;  %v861_v56 = vmul.f32 0.5, %v4554_v60  ;;  %v862_v44 = vmul.f32 0.5, %v4560_v22 }
 0x191   :  { %8885 = vst [vmem:[#allocation93_spill] sm:$0xff] %v4746_v46  ;;  %v4767_v46 = vadd.f32 %v474_v17, %v8893_v32  ;;  %v8901_v32 = vld [vmem:[#allocation123_spill] sm:$0xff]  ;;  %v4791_v40 = vpop.eup %2722  ;;  %2754 = vtanh.f32 %v855_v18  ;;  %v863_v60 = vmul.f32 0.5, %v4563_v55  ;;  %v864_v22 = vmul.f32 0.5, %v4569_v50 }
 0x192   :  { %8888 = vst [vmem:[#allocation94_spill] sm:$0xff] %v4755_v14  ;;  %v4776_v14 = vadd.f32 %v474_v17, %v8897_v7  ;;  %v8905_v7 = vld [vmem:[#allocation125_spill] sm:$0xff]  ;;  %v4800_v23 = vpop.eup %2724  ;;  %2756 = vtanh.f32 %v856_v13  ;;  %v865_v55 = vmul.f32 0.5, %v4572_v54 }
 0x193   :  { %8891 = vst [vmem:[#allocation95_spill] sm:$0xff] %v4761_v15  ;;  %v4779_v15 = vadd.f32 %v474_v17, %v8898_v34  ;;  %v8906_v34 = vld [vmem:[#allocation126_spill] sm:$0xff] }
 0x194   :  { %8892 = vst [vmem:[#allocation96_spill] sm:$0xff] %v4764_v35  ;;  %v4785_v35 = vadd.f32 %v474_v17, %v8901_v32  ;;  %v479_v32 = vpop.permute.xlu2 %478 }
 0x195   :  { %8895 = vst [vmem:[#allocation97_spill] sm:$0xff] %v4770_v5  ;;  %v4788_v5 = vadd.f32 %v474_v17, %v8902_v3 }
 0x196   :  { %8896 = vst [vmem:[#allocation98_spill] sm:$0xff] %v4773_v1  ;;  %v4794_v1 = vadd.f32 %v474_v17, %v8905_v7  ;;  %v4809_v7 = vpop.eup %2726  ;;  %2758 = vtanh.f32 %v857_v48 }
 0x197   :  { %8899 = vst [vmem:[#allocation99_spill] sm:$0xff] %v4779_v15  ;;  %v4797_v15 = vadd.f32 %v474_v17, %v8906_v34 }
 0x198   :  { %8900 = vst [vmem:[#allocation100_spill] sm:$0xff] %v4782_v49  ;;  %v8909_v49 = vld [vmem:[#allocation127_spill] sm:$0xff] }
 0x199   :  { %8903 = vst [vmem:[#allocation101_spill] sm:$0xff] %v4788_v5  ;;  %v4803_v3 = vadd.f32 %v474_v17, %v8909_v49  ;;  %v8911_v5 = vld [vmem:[#allocation128_spill] sm:$0xff]  ;;  %v8918_v49 = vld [vmem:[#allocation131_spill] sm:$0xff] }
 0x19a   :  { %8904 = vst [vmem:[#allocation102_spill] sm:$0xff] %v4791_v40  ;;  %v4806_v37 = vadd.f32 %v474_v17, %v8911_v5  ;;  %v8914_v40 = vld [vmem:[#allocation129_spill] sm:$0xff]  ;;  %v8919_v5 = vld [vmem:[#allocation132_spill] sm:$0xff] }
 0x19b   :  { %8907 = vst [vmem:[#allocation103_spill] sm:$0xff] %v4797_v15  ;;  %v4812_v34 = vadd.f32 %v474_v17, %v8914_v40  ;;  %v8915_v15 = vld [vmem:[#allocation130_spill] sm:$0xff]  ;;  %v8921_v40 = vld [vmem:[#allocation133_spill] sm:$0xff] }
 0x19c   :  { %8908 = vst [vmem:[#allocation104_spill] sm:$0xff] %v4800_v23  ;;  %v4815_v62 = vadd.f32 %v474_v17, %v8915_v15  ;;  %v4818_v23 = vpop.eup %2728  ;;  %v8922_v15 = vld [vmem:[#allocation134_spill] sm:$0xff]  ;;  %2760 = vtanh.f32 %v858_v36 }
 0x19d   :  { %8910 = vst [vmem:[#allocation105_spill] sm:$0xff] %v4803_v3  ;;  %v4821_v3 = vadd.f32 %v474_v17, %v8918_v49  ;;  %v4827_v52 = vpop.eup %2730  ;;  %v8925_v49 = vld [vmem:[#allocation135_spill] sm:$0xff]  ;;  %2762 = vtanh.f32 %v859_v61 }
 0x19e   :  { %8912 = vst [vmem:[#allocation106_spill] sm:$0xff] %v4806_v37  ;;  %v4824_v37 = vadd.f32 %v474_v17, %v8919_v5  ;;  %v4836_v12 = vpop.eup %2732  ;;  %v8926_v17 = vld [vmem:[#allocation136_spill] sm:$0xff]  ;;  %2764 = vtanh.f32 %v860_v9  ;;  %v866_v9 = vmul.f32 0.5, %v4578_v4  ;;  %v868_v4 = vmul.f32 0.5, %v4587_v19 }
 0x19f   :  { %8913 = vst [vmem:[#allocation107_spill] sm:$0xff] %v4809_v7  ;;  %v4830_v7 = vadd.f32 %v479_v32, %v8921_v40  ;;  %v4842_v5 = vadd.f32 %v479_v32, %v8926_v17  ;;  %v4845_v16 = vpop.eup %2734  ;;  %v8929_v40 = vld [vmem:[#allocation137_spill] sm:$0xff]  ;;  %v8934_v17 = vld [vmem:[#allocation140_spill] sm:$0xff]  ;;  %2766 = vtanh.f32 %v861_v56  ;;  %v867_v56 = vmul.f32 0.5, %v4581_v53 }
 0x1a0   :  { %8916 = vst [vmem:[#allocation108_spill] sm:$0xff] %v4815_v62  ;;  %v4833_v62 = vadd.f32 %v479_v32, %v8922_v15  ;;  %v8930_v15 = vld [vmem:[#allocation138_spill] sm:$0xff]  ;;  %v4854_v63 = vpop.eup %2736  ;;  %2768 = vtanh.f32 %v862_v44  ;;  %v869_v53 = vmul.f32 0.5, %v4590_v28  ;;  %v870_v19 = vmul.f32 0.5, %v4596_v59 }
 0x1a1   :  { %8917 = vst [vmem:[#allocation109_spill] sm:$0xff] %v4818_v23  ;;  %v4839_v23 = vadd.f32 %v479_v32, %v8925_v49  ;;  %v8933_v49 = vld [vmem:[#allocation139_spill] sm:$0xff]  ;;  %v4863_v25 = vpop.eup %2738  ;;  %2770 = vtanh.f32 %v863_v60  ;;  %v871_v28 = vmul.f32 0.5, %v4599_v39  ;;  %v872_v59 = vmul.f32 0.5, %v4605_v47 }
 0x1a2   :  { %8920 = vst [vmem:[#allocation110_spill] sm:$0xff] %v4827_v52  ;;  %v4848_v52 = vadd.f32 %v479_v32, %v8929_v40  ;;  %v8937_v40 = vld [vmem:[#allocation141_spill] sm:$0xff]  ;;  %v4872_v0 = vpop.eup %2740  ;;  %2772 = vtanh.f32 %v864_v22  ;;  %v873_v39 = vmul.f32 0.5, %v4608_v41 }
 0x1a3   :  { %8923 = vst [vmem:[#allocation111_spill] sm:$0xff] %v4833_v62  ;;  %v4851_v62 = vadd.f32 %v479_v32, %v8930_v15  ;;  %v8938_v15 = vld [vmem:[#allocation142_spill] sm:$0xff] }
 0x1a4   :  { %8924 = vst [vmem:[#allocation112_spill] sm:$0xff] %v4836_v12  ;;  %v4857_v12 = vadd.f32 %v479_v32, %v8933_v49  ;;  %v484_v49 = vpop.permute.xlu0 %483 }
 0x1a5   :  { %8927 = vst [vmem:[#allocation113_spill] sm:$0xff] %v4842_v5  ;;  %v4860_v5 = vadd.f32 %v479_v32, %v8934_v17 }
 0x1a6   :  { %8928 = vst [vmem:[#allocation114_spill] sm:$0xff] %v4845_v16  ;;  %v4866_v16 = vadd.f32 %v479_v32, %v8937_v40  ;;  %v4881_v40 = vpop.eup %2742  ;;  %2774 = vtanh.f32 %v865_v55 }
 0x1a7   :  { %8931 = vst [vmem:[#allocation115_spill] sm:$0xff] %v4851_v62  ;;  %v4869_v62 = vadd.f32 %v479_v32, %v8938_v15 }
 0x1a8   :  { %8932 = vst [vmem:[#allocation116_spill] sm:$0xff] %v4854_v63  ;;  %v8941_v63 = vld [vmem:[#allocation143_spill] sm:$0xff] }
 0x1a9   :  { %8935 = vst [vmem:[#allocation38_spill] sm:$0xff] %v4860_v5  ;;  %v4875_v17 = vadd.f32 %v479_v32, %v8941_v63  ;;  %v8943_v5 = vld [vmem:[#allocation144_spill] sm:$0xff]  ;;  %v8950_v63 = vld [vmem:[#allocation147_spill] sm:$0xff] }
 0x1aa   :  { %8936 = vst [vmem:[#allocation39_spill] sm:$0xff] %v4863_v25  ;;  %v4878_v58 = vadd.f32 %v479_v32, %v8943_v5  ;;  %v8946_v25 = vld [vmem:[#allocation145_spill] sm:$0xff]  ;;  %v8951_v5 = vld [vmem:[#allocation148_spill] sm:$0xff] }
 0x1ab   :  { %8939 = vst [vmem:[#allocation40_spill] sm:$0xff] %v4869_v62  ;;  %v4884_v15 = vadd.f32 %v479_v32, %v8946_v25  ;;  %v8947_v62 = vld [vmem:[#allocation146_spill] sm:$0xff] }
 0x1ac   :  { %8940 = vst [vmem:[#allocation41_spill] sm:$0xff] %v4872_v0  ;;  %v4887_v57 = vadd.f32 %v479_v32, %v8947_v62  ;;  %v4890_v0 = vpop.eup %2744  ;;  %v8953_v25 = vld [vmem:[#allocation54_spill] sm:$0xff]  ;;  %v8954_v62 = vld [vmem:[#allocation55_spill] sm:$0xff]  ;;  %2776 = vtanh.f32 %v866_v9 }
 0x1ad   :  { %8942 = vst [vmem:[#allocation42_spill] sm:$0xff] %v4875_v17  ;;  %v4893_v17 = vadd.f32 %v479_v32, %v8950_v63  ;;  %v4899_v8 = vpop.eup %2746  ;;  %v8957_v63 = vld [vmem:[#allocation56_spill] sm:$0xff]  ;;  %2778 = vtanh.f32 %v867_v56 }
 0x1ae   :  { %8944 = vst [vmem:[#allocation43_spill] sm:$0xff] %v4878_v58  ;;  %v4896_v58 = vadd.f32 %v479_v32, %v8951_v5  ;;  %v4908_v18 = vpop.eup %2748  ;;  %v8958_v32 = vld [vmem:[#allocation57_spill] sm:$0xff]  ;;  %2780 = vtanh.f32 %v868_v4  ;;  %v874_v4 = vmul.f32 0.5, %v4614_v6  ;;  %v876_v6 = vmul.f32 0.5, %v4623_v45 }
 0x1af   :  { %8945 = vst [vmem:[#allocation44_spill] sm:$0xff] %v4881_v40  ;;  %v4902_v40 = vadd.f32 %v484_v49, %v8953_v25  ;;  %v4914_v5 = vadd.f32 %v484_v49, %v8958_v32  ;;  %v4917_v13 = vpop.eup %2750  ;;  %v8961_v25 = vld [vmem:[#allocation149_spill] sm:$0xff]  ;;  %v8966_v32 = vld [vmem:[#allocation152_spill] sm:$0xff]  ;;  %2782 = vtanh.f32 %v869_v53  ;;  %v875_v53 = vmul.f32 0.5, %v4617_v30  ;;  %v9021_v30 = vld [vmem:[#allocation18_spill] sm:$0xff] }
 0x1b0   :  { %8948 = vst [vmem:[#allocation45_spill] sm:$0xff] %v4887_v57  ;;  %v4905_v57 = vadd.f32 %v484_v49, %v8954_v62  ;;  %v8962_v62 = vld [vmem:[#allocation150_spill] sm:$0xff]  ;;  %v4926_v48 = vpop.eup %2752  ;;  %2784 = vtanh.f32 %v870_v19  ;;  %v878_v45 = vmul.f32 0.5, %v4632_v20  ;;  %v880_v20 = vmul.f32 0.5, %v4641_v38 }
 0x1b1   :  { %8949 = vst [vmem:[#allocation46_spill] sm:$0xff] %v4890_v0  ;;  %v4911_v0 = vadd.f32 %v484_v49, %v8957_v63  ;;  %v8965_v63 = vld [vmem:[#allocation151_spill] sm:$0xff]  ;;  %v4935_v36 = vpop.eup %2754  ;;  %2786 = vtanh.f32 %v871_v28  ;;  %v877_v28 = vmul.f32 0.5, %v9021_v30 }
 0x1b2   :  { %8952 = vst [vmem:[#allocation47_spill] sm:$0xff] %v4899_v8  ;;  %v4920_v8 = vadd.f32 %v484_v49, %v8961_v25  ;;  %v8969_v25 = vld [vmem:[#allocation153_spill] sm:$0xff]  ;;  %v4944_v61 = vpop.eup %2756  ;;  %2788 = vtanh.f32 %v872_v59 }
 0x1b3   :  { %8955 = vst [vmem:[#allocation48_spill] sm:$0xff] %v4905_v57  ;;  %v4923_v57 = vadd.f32 %v484_v49, %v8962_v62  ;;  %v8970_v62 = vld [vmem:[#allocation154_spill] sm:$0xff] }
 0x1b4   :  { %8956 = vst [vmem:[#allocation49_spill] sm:$0xff] %v4908_v18  ;;  %v4929_v18 = vadd.f32 %v484_v49, %v8965_v63  ;;  %v489_v63 = vpop.permute.xlu1 %488 }
 0x1b5   :  { %8959 = vst [vmem:[#allocation50_spill] sm:$0xff] %v4914_v5  ;;  %v4932_v5 = vadd.f32 %v484_v49, %v8966_v32 }
 0x1b6   :  { %8960 = vst [vmem:[#allocation51_spill] sm:$0xff] %v4917_v13  ;;  %v4938_v13 = vadd.f32 %v484_v49, %v8969_v25  ;;  %v4953_v25 = vpop.eup %2758  ;;  %2790 = vtanh.f32 %v873_v39  ;;  %v9031_v39 = vld [vmem:[#allocation20_spill] sm:$0xff] }
 0x1b7   :  { %8963 = vst [vmem:[#allocation52_spill] sm:$0xff] %v4923_v57  ;;  %v4941_v57 = vadd.f32 %v484_v49, %v8970_v62  ;;  %v879_v30 = vmul.f32 0.5, %v9031_v39 }
 0x1b8   :  { %8964 = vst [vmem:[#allocation53_spill] sm:$0xff] %v4926_v48  ;;  %v8973_v48 = vld [vmem:[#allocation155_spill] sm:$0xff] }
 0x1b9   :  { %8967 = vst [vmem:[#allocation117_spill] sm:$0xff] %v4932_v5  ;;  %v4947_v32 = vadd.f32 %v484_v49, %v8973_v48  ;;  %v8975_v5 = vld [vmem:[#allocation156_spill] sm:$0xff]  ;;  %v8982_v48 = vld [vmem:[#allocation159_spill] sm:$0xff] }
 0x1ba   :  { %8968 = vst [vmem:[#allocation118_spill] sm:$0xff] %v4935_v36  ;;  %v4950_v50 = vadd.f32 %v484_v49, %v8975_v5  ;;  %v8978_v36 = vld [vmem:[#allocation157_spill] sm:$0xff]  ;;  %v8983_v5 = vld [vmem:[#allocation160_spill] sm:$0xff] }
 0x1bb   :  { %8971 = vst [vmem:[#allocation119_spill] sm:$0xff] %v4941_v57  ;;  %v4956_v62 = vadd.f32 %v484_v49, %v8978_v36  ;;  %v8979_v57 = vld [vmem:[#allocation158_spill] sm:$0xff]  ;;  %v8985_v36 = vld [vmem:[#allocation161_spill] sm:$0xff] }
 0x1bc   :  { %8972 = vst [vmem:[#allocation120_spill] sm:$0xff] %v4944_v61  ;;  %v4959_v54 = vadd.f32 %v484_v49, %v8979_v57  ;;  %v4962_v61 = vpop.eup %2760  ;;  %v8986_v57 = vld [vmem:[#allocation162_spill] sm:$0xff]  ;;  %2792 = vtanh.f32 %v874_v4 }
 0x1bd   :  { %8974 = vst [vmem:[#allocation121_spill] sm:$0xff] %v4947_v32  ;;  %v4965_v32 = vadd.f32 %v484_v49, %v8982_v48  ;;  %v4971_v44 = vpop.eup %2762  ;;  %v8989_v48 = vld [vmem:[#allocation163_spill] sm:$0xff]  ;;  %2794 = vtanh.f32 %v875_v53  ;;  %v9042_v53 = vld [vmem:[#allocation22_spill] sm:$0xff] }
 0x1be   :  { %8976 = vst [vmem:[#allocation122_spill] sm:$0xff] %v4950_v50  ;;  %v4968_v50 = vadd.f32 %v484_v49, %v8983_v5  ;;  %v4980_v60 = vpop.eup %2764  ;;  %v8990_v49 = vld [vmem:[#allocation164_spill] sm:$0xff]  ;;  %2796 = vtanh.f32 %v876_v6  ;;  %v881_v39 = vmul.f32 0.5, %v9042_v53  ;;  %v882_v6 = vmul.f32 0.5, %v4650_v33  ;;  %v9058_v33 = vld [vmem:[#allocation26_spill] sm:$0xff] }
 0x1bf   :  { %8977 = vst [vmem:[#allocation123_spill] sm:$0xff] %v4953_v25  ;;  %v4974_v25 = vadd.f32 %v489_v63, %v8985_v36  ;;  %v4986_v5 = vadd.f32 %v489_v63, %v8990_v49  ;;  %v4989_v22 = vpop.eup %2766  ;;  %v8993_v36 = vld [vmem:[#allocation165_spill] sm:$0xff]  ;;  %v8998_v49 = vld [vmem:[#allocation168_spill] sm:$0xff]  ;;  %2798 = vtanh.f32 %v877_v28 }
 0x1c0   :  { %8980 = vst [vmem:[#allocation124_spill] sm:$0xff] %v4959_v54  ;;  %v4977_v54 = vadd.f32 %v489_v63, %v8986_v57  ;;  %v8994_v57 = vld [vmem:[#allocation166_spill] sm:$0xff]  ;;  %v4998_v55 = vpop.eup %2768  ;;  %2800 = vtanh.f32 %v878_v45  ;;  %v9053_v28 = vld [vmem:[#allocation24_spill] sm:$0xff]  ;;  %v884_v45 = vmul.f32 0.5, %v9058_v33 }
 0x1c1   :  { %8981 = vst [vmem:[#allocation125_spill] sm:$0xff] %v4962_v61  ;;  %v4983_v61 = vadd.f32 %v489_v63, %v8989_v48  ;;  %v8997_v48 = vld [vmem:[#allocation167_spill] sm:$0xff]  ;;  %v5007_v9 = vpop.eup %2770  ;;  %2802 = vtanh.f32 %v879_v30 }
 0x1c2   :  { %8984 = vst [vmem:[#allocation126_spill] sm:$0xff] %v4971_v44  ;;  %v4992_v44 = vadd.f32 %v489_v63, %v8993_v36  ;;  %v9001_v36 = vld [vmem:[#allocation169_spill] sm:$0xff]  ;;  %v5016_v56 = vpop.eup %2772  ;;  %2804 = vtanh.f32 %v880_v20  ;;  %v9063_v30 = vld [vmem:[#allocation27_spill] sm:$0xff]  ;;  %v886_v20 = vmul.f32 0.5, %v4668_v43  ;;  %v888_v43 = vmul.f32 0.5, %v4677_v10 }
 0x1c3   :  { %8987 = vst [vmem:[#allocation127_spill] sm:$0xff] %v4977_v54  ;;  %v4995_v54 = vadd.f32 %v489_v63, %v8994_v57  ;;  %v9002_v57 = vld [vmem:[#allocation170_spill] sm:$0xff] }
 0x1c4   :  { %8988 = vst [vmem:[#allocation128_spill] sm:$0xff] %v4980_v60  ;;  %v5001_v60 = vadd.f32 %v489_v63, %v8997_v48  ;;  %v494_v48 = vpop.permute.xlu2 %493 }
 0x1c5   :  { %8991 = vst [vmem:[#allocation129_spill] sm:$0xff] %v4986_v5  ;;  %v5004_v5 = vadd.f32 %v489_v63, %v8998_v49 }
 0x1c6   :  { %8992 = vst [vmem:[#allocation130_spill] sm:$0xff] %v4989_v22  ;;  %v5010_v22 = vadd.f32 %v489_v63, %v9001_v36  ;;  %v5025_v36 = vpop.eup %2774  ;;  %2806 = vtanh.f32 %v881_v39  ;;  %v9073_v39 = vld [vmem:[#allocation29_spill] sm:$0xff] }
 0x1c7   :  { %8995 = vst [vmem:[#allocation131_spill] sm:$0xff] %v4995_v54  ;;  %v5013_v54 = vadd.f32 %v489_v63, %v9002_v57 }
 0x1c8   :  { %8996 = vst [vmem:[#allocation132_spill] sm:$0xff] %v4998_v55  ;;  %v9005_v55 = vld [vmem:[#allocation171_spill] sm:$0xff] }
 0x1c9   :  { %8999 = vst [vmem:[#allocation133_spill] sm:$0xff] %v5004_v5  ;;  %v5019_v49 = vadd.f32 %v489_v63, %v9005_v55  ;;  %v9007_v5 = vld [vmem:[#allocation172_spill] sm:$0xff]  ;;  %v9014_v55 = vld [vmem:[#allocation175_spill] sm:$0xff] }
 0x1ca   :  { %9000 = vst [vmem:[#allocation134_spill] sm:$0xff] %v5007_v9  ;;  %v5022_v47 = vadd.f32 %v489_v63, %v9007_v5  ;;  %v9010_v9 = vld [vmem:[#allocation173_spill] sm:$0xff]  ;;  %v9016_v5 = vld [vmem:[#allocation176_spill] sm:$0xff] }
 0x1cb   :  { %9003 = vst [vmem:[#allocation135_spill] sm:$0xff] %v5013_v54  ;;  %v5028_v57 = vadd.f32 %v489_v63, %v9010_v9  ;;  %v9011_v54 = vld [vmem:[#allocation174_spill] sm:$0xff]  ;;  %v9018_v9 = vld [vmem:[#allocation177_spill] sm:$0xff] }
 0x1cc   :  { %9004 = vst [vmem:[#allocation136_spill] sm:$0xff] %v5016_v56  ;;  %v5031_v41 = vadd.f32 %v489_v63, %v9011_v54  ;;  %v5034_v56 = vpop.eup %2776  ;;  %v9019_v54 = vld [vmem:[#allocation178_spill] sm:$0xff]  ;;  %2808 = vtanh.f32 %v882_v6 }
 0x1cd   :  { %9006 = vst [vmem:[#allocation137_spill] sm:$0xff] %v5019_v49  ;;  %v5037_v49 = vadd.f32 %v489_v63, %v9014_v55  ;;  %v5043_v19 = vpop.eup %2778  ;;  %v9023_v55 = vld [vmem:[#allocation179_spill] sm:$0xff] }
 0x1ce   :  { %9008 = vst [vmem:[#allocation138_spill] sm:$0xff] %v5022_v47  ;;  %v5040_v47 = vadd.f32 %v489_v63, %v9016_v5  ;;  %v9025_v63 = vld [vmem:[#allocation180_spill] sm:$0xff] }
 0x1cf   :  { %9009 = vst [vmem:[#allocation139_spill] sm:$0xff] %v5025_v36  ;;  %v5046_v36 = vadd.f32 %v494_v48, %v9018_v9  ;;  %v5058_v5 = vadd.f32 %v494_v48, %v9025_v63  ;;  %v9028_v9 = vld [vmem:[#allocation181_spill] sm:$0xff]  ;;  %v9035_v63 = vld [vmem:[#allocation184_spill] sm:$0xff] }
 0x1d0   :  { %9012 = vst [vmem:[#allocation140_spill] sm:$0xff] %v5031_v41  ;;  %v5049_v41 = vadd.f32 %v494_v48, %v9019_v54  ;;  %v9029_v54 = vld [vmem:[#allocation182_spill] sm:$0xff] }
 0x1d1   :  { %9013 = vst [vmem:[#allocation141_spill] sm:$0xff] %v5034_v56  ;;  %v5052_v56 = vpop.eup %2780 }
 0x1d2   :  { %9015 = vst [vmem:[#allocation142_spill] sm:$0xff] %v5037_v49  ;;  %v5055_v49 = vadd.f32 %v494_v48, %v9023_v55  ;;  %v5061_v59 = vpop.eup %2782  ;;  %v9033_v55 = vld [vmem:[#allocation183_spill] sm:$0xff] }
 0x1d3   :  { %9017 = vst [vmem:[#allocation143_spill] sm:$0xff] %v5043_v19  ;;  %v5064_v19 = vadd.f32 %v494_v48, %v9028_v9  ;;  %v9038_v9 = vld [vmem:[#allocation185_spill] sm:$0xff] }
 0x1d4   :  { %9020 = vst [vmem:[#allocation144_spill] sm:$0xff] %v5049_v41  ;;  %v5067_v41 = vadd.f32 %v494_v48, %v9029_v54  ;;  %v9040_v54 = vld [vmem:[#allocation186_spill] sm:$0xff] }
 0x1d5   :  { %9022 = vst [vmem:[#allocation145_spill] sm:$0xff] %v5052_v56  ;;  %v5070_v56 = vpop.eup %2784 }
 0x1d6   :  { %9024 = vst [vmem:[#allocation146_spill] sm:$0xff] %v5055_v49  ;;  %v5073_v49 = vadd.f32 %v494_v48, %v9033_v55  ;;  %v5079_v4 = vpop.eup %2786  ;;  %v499_v55 = vpop.permute.xlu0 %498 }
 0x1d7   :  { %9026 = vst [vmem:[#allocation147_spill] sm:$0xff] %v5058_v5  ;;  %v5076_v5 = vadd.f32 %v494_v48, %v9035_v63 }
 0x1d8   :  { %9027 = vst [vmem:[#allocation148_spill] sm:$0xff] %v5061_v59  ;;  %v5082_v59 = vadd.f32 %v494_v48, %v9038_v9 }
 0x1d9   :  { %9030 = vst [vmem:[#allocation54_spill] sm:$0xff] %v5067_v41  ;;  %v5085_v41 = vadd.f32 %v494_v48, %v9040_v54 }
 0x1da   :  { %9032 = vst [vmem:[#allocation55_spill] sm:$0xff] %v5070_v56  ;;  %v5088_v56 = vpop.eup %2788 }
 0x1db   :  { %9034 = vst [vmem:[#allocation56_spill] sm:$0xff] %v5073_v49  ;;  %v9044_v49 = vld [vmem:[#allocation187_spill] sm:$0xff]  ;;  %v5097_v9 = vpop.eup %2790 }
 0x1dc   :  { %9036 = vst [vmem:[#allocation57_spill] sm:$0xff] %v5076_v5  ;;  %v5091_v63 = vadd.f32 %v494_v48, %v9044_v49  ;;  %v9046_v5 = vld [vmem:[#allocation188_spill] sm:$0xff]  ;;  %v9055_v49 = vld [vmem:[#allocation191_spill] sm:$0xff] }
 0x1dd   :  { %9037 = vst [vmem:[#allocation149_spill] sm:$0xff] %v5079_v4  ;;  %v5094_v38 = vadd.f32 %v494_v48, %v9046_v5  ;;  %v9049_v4 = vld [vmem:[#allocation189_spill] sm:$0xff]  ;;  %v9057_v5 = vld [vmem:[#allocation192_spill] sm:$0xff] }
 0x1de   :  { %9039 = vst [vmem:[#allocation150_spill] sm:$0xff] %v5082_v59  ;;  %v5100_v54 = vadd.f32 %v494_v48, %v9049_v4  ;;  %v5106_v59 = vpop.eup %2792  ;;  %v9060_v4 = vld [vmem:[#allocation193_spill] sm:$0xff] }
 0x1df   :  { %9041 = vst [vmem:[#allocation151_spill] sm:$0xff] %v5085_v41  ;;  %v9051_v41 = vld [vmem:[#allocation190_spill] sm:$0xff] }
 0x1e0   :  { %9043 = vst [vmem:[#allocation152_spill] sm:$0xff] %v5088_v56  ;;  %v5103_v53 = vadd.f32 %v494_v48, %v9051_v41  ;;  %v883_v56 = vmul.f32 0.5, %v9053_v28  ;;  %v9061_v41 = vld [vmem:[#allocation194_spill] sm:$0xff]  ;;  %v885_v28 = vmul.f32 0.5, %v9063_v30  ;;  %v887_v30 = vmul.f32 0.5, %v9073_v39 }
 0x1e1   :  { %9045 = vst [vmem:[#allocation153_spill] sm:$0xff] %v5091_v63  ;;  %v5109_v63 = vadd.f32 %v494_v48, %v9055_v49  ;;  %v9065_v49 = vld [vmem:[#allocation195_spill] sm:$0xff] }
 0x1e2   :  { %9047 = vst [vmem:[#allocation154_spill] sm:$0xff] %v5094_v38  ;;  %v5112_v38 = vadd.f32 %v494_v48, %v9057_v5  ;;  %v9067_v48 = vld [vmem:[#allocation196_spill] sm:$0xff]  ;;  %2810 = vtanh.f32 %v883_v56  ;;  %v889_v56 = vmul.f32 0.5, %v4680_v29 }
 0x1e3   :  { %9048 = vst [vmem:[#allocation155_spill] sm:$0xff] %v5097_v9  ;;  %v5115_v9 = vpop.eup %2794  ;;  %v5130_v5 = vadd.f32 %v499_v55, %v9067_v48  ;;  %v9076_v48 = vld [vmem:[#allocation200_spill] sm:$0xff]  ;;  %2812 = vtanh.f32 %v884_v45  ;;  %v890_v45 = vmul.f32 0.5, %v4686_v24  ;;  %v892_v24 = vmul.f32 0.5, %v4695_v51 }
 0x1e4   :  { %9050 = vst [vmem:[#allocation156_spill] sm:$0xff] %v5100_v54  ;;  %v5118_v54 = vadd.f32 %v499_v55, %v9060_v4  ;;  %v9070_v4 = vld [vmem:[#allocation197_spill] sm:$0xff]  ;;  %2814 = vtanh.f32 %v885_v28  ;;  %v9092_v28 = vld [vmem:[#allocation32_spill] sm:$0xff]  ;;  %v894_v51 = vmul.f32 0.5, %v4704_v31  ;;  %v896_v31 = vmul.f32 0.5, %v4713_v21 }
 0x1e5   :  { %9052 = vst [vmem:[#allocation157_spill] sm:$0xff] %v5103_v53  ;;  %v5121_v53 = vadd.f32 %v499_v55, %v9061_v41  ;;  %v9071_v41 = vld [vmem:[#allocation198_spill] sm:$0xff]  ;;  %2816 = vtanh.f32 %v886_v20  ;;  %v898_v21 = vmul.f32 0.5, %v4722_v26  ;;  %v9139_v26 = vld [vmem:[#allocation89_spill] sm:$0xff] }
 0x1e6   :  { %9054 = vst [vmem:[#allocation158_spill] sm:$0xff] %v5106_v59  ;;  %v5124_v59 = vpop.eup %2796  ;;  %2818 = vtanh.f32 %v887_v30  ;;  %v9101_v30 = vld [vmem:[#allocation34_spill] sm:$0xff] }
 0x1e7   :  { %9056 = vst [vmem:[#allocation159_spill] sm:$0xff] %v5109_v63  ;;  %v5127_v63 = vadd.f32 %v499_v55, %v9065_v49  ;;  %v5133_v33 = vpop.eup %2798  ;;  %v9075_v49 = vld [vmem:[#allocation199_spill] sm:$0xff]  ;;  %2820 = vtanh.f32 %v888_v43 }
 0x1e8   :  { %9059 = vst [vmem:[#allocation160_spill] sm:$0xff] %v5115_v9  ;;  %v5136_v9 = vadd.f32 %v499_v55, %v9070_v4  ;;  %v9079_v4 = vld [vmem:[#allocation201_spill] sm:$0xff]  ;;  %2822 = vtanh.f32 %v889_v56  ;;  %v9111_v56 = vld [vmem:[#allocation36_spill] sm:$0xff] }
 0x1e9   :  { %9062 = vst [vmem:[#allocation161_spill] sm:$0xff] %v5121_v53  ;;  %v5139_v53 = vadd.f32 %v499_v55, %v9071_v41  ;;  %v9081_v41 = vld [vmem:[#allocation202_spill] sm:$0xff]  ;;  %2824 = vtanh.f32 %v890_v45 }
 0x1ea   :  { %9064 = vst [vmem:[#allocation162_spill] sm:$0xff] %v5124_v59  ;;  %v5142_v59 = vpop.eup %2800 }
 0x1eb   :  { %9066 = vst [vmem:[#allocation163_spill] sm:$0xff] %v5127_v63  ;;  %v5145_v63 = vadd.f32 %v499_v55, %v9075_v49  ;;  %v5151_v6 = vpop.eup %2802  ;;  %v504_v49 = vpop.permute.xlu1 %503 }
 0x1ec   :  { %9068 = vst [vmem:[#allocation164_spill] sm:$0xff] %v5130_v5  ;;  %v5148_v5 = vadd.f32 %v499_v55, %v9076_v48  ;;  %v5160_v39 = vpop.eup %2804 }
 0x1ed   :  { %9069 = vst [vmem:[#allocation165_spill] sm:$0xff] %v5133_v33  ;;  %v5154_v33 = vadd.f32 %v499_v55, %v9079_v4  ;;  %v5169_v4 = vpop.eup %2806 }
 0x1ee   :  { %9072 = vst [vmem:[#allocation166_spill] sm:$0xff] %v5139_v53  ;;  %v5157_v53 = vadd.f32 %v499_v55, %v9081_v41 }
 0x1ef   :  { %9074 = vst [vmem:[#allocation167_spill] sm:$0xff] %v5142_v59  ;;  %v9084_v59 = vld [vmem:[#allocation203_spill] sm:$0xff] }
 0x1f0   :  { %9077 = vst [vmem:[#allocation168_spill] sm:$0xff] %v5148_v5  ;;  %v5163_v48 = vadd.f32 %v499_v55, %v9084_v59  ;;  %v9086_v5 = vld [vmem:[#allocation204_spill] sm:$0xff]  ;;  %v9094_v59 = vld [vmem:[#allocation207_spill] sm:$0xff] }
 0x1f1   :  { %9078 = vst [vmem:[#allocation169_spill] sm:$0xff] %v5151_v6  ;;  %v5166_v10 = vadd.f32 %v499_v55, %v9086_v5  ;;  %v9089_v6 = vld [vmem:[#allocation205_spill] sm:$0xff]  ;;  %v9096_v5 = vld [vmem:[#allocation208_spill] sm:$0xff] }
 0x1f2   :  { %9080 = vst [vmem:[#allocation170_spill] sm:$0xff] %v5154_v33  ;;  %v5172_v41 = vadd.f32 %v499_v55, %v9089_v6  ;;  %v5178_v33 = vpop.eup %2808  ;;  %v9098_v6 = vld [vmem:[#allocation210_spill] sm:$0xff] }
 0x1f3   :  { %9082 = vst [vmem:[#allocation171_spill] sm:$0xff] %v5157_v53  ;;  %v9090_v53 = vld [vmem:[#allocation206_spill] sm:$0xff]  ;;  %v5187_v20 = vpop.eup %2810 }
 0x1f4   :  { %9083 = vst [vmem:[#allocation172_spill] sm:$0xff] %v5160_v39  ;;  %v5175_v29 = vadd.f32 %v499_v55, %v9090_v53  ;;  %v891_v39 = vmul.f32 0.5, %v9092_v28  ;;  %v9099_v53 = vld [vmem:[#allocation212_spill] sm:$0xff]  ;;  %v893_v28 = vmul.f32 0.5, %v9101_v30  ;;  %v895_v30 = vmul.f32 0.5, %v9111_v56 }
 0x1f5   :  { %9085 = vst [vmem:[#allocation173_spill] sm:$0xff] %v5163_v48  ;;  %v5181_v48 = vadd.f32 %v499_v55, %v9094_v59  ;;  %v9103_v59 = vld [vmem:[#allocation214_spill] sm:$0xff] }
 0x1f6   :  { %9087 = vst [vmem:[#allocation174_spill] sm:$0xff] %v5166_v10  ;;  %v5184_v10 = vadd.f32 %v499_v55, %v9096_v5  ;;  %v9105_v55 = vld [vmem:[#allocation216_spill] sm:$0xff]  ;;  %2826 = vtanh.f32 %v891_v39  ;;  %v9122_v39 = vld [vmem:[#allocation85_spill] sm:$0xff] }
 0x1f7   :  { %9088 = vst [vmem:[#allocation175_spill] sm:$0xff] %v5169_v4  ;;  %v5190_v4 = vadd.f32 %v504_v49, %v9098_v6  ;;  %v5202_v5 = vadd.f32 %v504_v49, %v9105_v55  ;;  %v9108_v6 = vld [vmem:[#allocation218_spill] sm:$0xff]  ;;  %v9115_v55 = vld [vmem:[#allocation224_spill] sm:$0xff]  ;;  %2828 = vtanh.f32 %v892_v24  ;;  %v897_v56 = vmul.f32 0.5, %v9122_v39 }
 0x1f8   :  { %9091 = vst [vmem:[#allocation176_spill] sm:$0xff] %v5175_v29  ;;  %v5193_v29 = vadd.f32 %v504_v49, %v9099_v53  ;;  %v9109_v53 = vld [vmem:[#allocation220_spill] sm:$0xff]  ;;  %2830 = vtanh.f32 %v893_v28  ;;  %v9133_v28 = vld [vmem:[#allocation87_spill] sm:$0xff] }
 0x1f9   :  { %9093 = vst [vmem:[#allocation177_spill] sm:$0xff] %v5178_v33  ;;  %v5196_v33 = vpop.eup %2812  ;;  %2832 = vtanh.f32 %v894_v51  ;;  %v899_v39 = vmul.f32 0.5, %v9133_v28  ;;  %v900_v51 = vmul.f32 0.5, %v9139_v26 }
 0x1fa   :  { %9095 = vst [vmem:[#allocation178_spill] sm:$0xff] %v5181_v48  ;;  %v5199_v48 = vadd.f32 %v504_v49, %v9103_v59  ;;  %v5205_v43 = vpop.eup %2814  ;;  %v9113_v59 = vld [vmem:[#allocation222_spill] sm:$0xff]  ;;  %2834 = vtanh.f32 %v895_v30 }
 0x1fb   :  { %9097 = vst [vmem:[#allocation18_spill] sm:$0xff] %v5187_v20  ;;  %v5208_v20 = vadd.f32 %v504_v49, %v9108_v6  ;;  %v9118_v6 = vld [vmem:[#allocation226_spill] sm:$0xff]  ;;  %2836 = vtanh.f32 %v896_v31  ;;  %v9145_v31 = vld [vmem:[#allocation95_spill] sm:$0xff] }
 0x1fc   :  { %9100 = vst [vmem:[#allocation179_spill] sm:$0xff] %v5193_v29  ;;  %v5211_v29 = vadd.f32 %v504_v49, %v9109_v53  ;;  %v9120_v53 = vld [vmem:[#allocation228_spill] sm:$0xff]  ;;  %2838 = vtanh.f32 %v897_v56  ;;  %v907_v26 = vmul.f32 0.5, %v9145_v31  ;;  %v910_v56 = vmul.f32 0.5, %v4776_v14 }
 0x1fd   :  { %9102 = vst [vmem:[#allocation180_spill] sm:$0xff] %v5196_v33  ;;  %v5214_v33 = vpop.eup %2816  ;;  %2840 = vtanh.f32 %v898_v21  ;;  %v9150_v21 = vld [vmem:[#allocation101_spill] sm:$0xff]  ;;  %v5283_v31 = vmul.f32 0.5, %v4794_v1  ;;  %v9156_v1 = vld [vmem:[#allocation108_spill] sm:$0xff] }
 0x1fe   :  { %9104 = vst [vmem:[#allocation181_spill] sm:$0xff] %v5199_v48  ;;  %v5217_v48 = vadd.f32 %v504_v49, %v9113_v59  ;;  %v5223_v45 = vpop.eup %2818  ;;  %v9124_v59 = vld [vmem:[#allocation230_spill] sm:$0xff]  ;;  %2842 = vtanh.f32 %v899_v39  ;;  %v9153_v39 = vld [vmem:[#allocation105_spill] sm:$0xff] }
 0x1ff   :  { %9106 = vst [vmem:[#allocation182_spill] sm:$0xff] %v5202_v5  ;;  %v5220_v5 = vadd.f32 %v504_v49, %v9115_v55  ;;  %v9126_v55 = vld [vmem:[#allocation232_spill] sm:$0xff]  ;;  %2844 = vtanh.f32 %v900_v51  ;;  %v5291_v14 = vmul.f32 0.5, %v9153_v39 }
 0x200   :  { %9107 = vst [vmem:[#allocation20_spill] sm:$0xff] %v5205_v43  ;;  %v5226_v43 = vadd.f32 %v504_v49, %v9118_v6  ;;  %v9129_v6 = vld [vmem:[#allocation234_spill] sm:$0xff] }
 0x201   :  { %9110 = vst [vmem:[#allocation183_spill] sm:$0xff] %v5211_v29  ;;  %v5229_v29 = vadd.f32 %v504_v49, %v9120_v53  ;;  %v9131_v53 = vld [vmem:[#allocation236_spill] sm:$0xff] }
 0x202   :  { %9112 = vst [vmem:[#allocation184_spill] sm:$0xff] %v5214_v33  ;;  %v5232_v33 = vpop.eup %2820 }
 0x203   :  { %9114 = vst [vmem:[#allocation185_spill] sm:$0xff] %v5217_v48  ;;  %v5235_v48 = vadd.f32 %v504_v49, %v9124_v59  ;;  %v5241_v24 = vpop.eup %2822  ;;  %v9135_v59 = vld [vmem:[#allocation238_spill] sm:$0xff] }
 0x204   :  { %9116 = vst [vmem:[#allocation186_spill] sm:$0xff] %v5220_v5  ;;  %v5238_v5 = vadd.f32 %v504_v49, %v9126_v55  ;;  %v9137_v55 = vld [vmem:[#allocation240_spill] sm:$0xff] }
 0x205   :  { %9117 = vst [vmem:[#allocation22_spill] sm:$0xff] %v5223_v45  ;;  %v5244_v45 = vadd.f32 %v504_v49, %v9129_v6  ;;  %v9141_v6 = vld [vmem:[#allocation90_spill] sm:$0xff] }
 0x206   :  { %9119 = vst [vmem:[#allocation187_spill] sm:$0xff] %v5226_v43 }
 0x207   :  { %9121 = vst [vmem:[#allocation188_spill] sm:$0xff] %v5229_v29  ;;  %v5247_v29 = vadd.f32 %v504_v49, %v9131_v53  ;;  %v902_v53 = vmul.f32 0.5, %v4740_v42 }
 0x208   :  { %9123 = vst [vmem:[#allocation189_spill] sm:$0xff] %v5232_v33  ;;  %v5250_v33 = vpop.eup %2824 }
 0x209   :  { %9125 = vst [vmem:[#allocation190_spill] sm:$0xff] %v5235_v48  ;;  %v5253_v48 = vadd.f32 %v504_v49, %v9135_v59  ;;  %v904_v59 = vmul.f32 0.5, %v4749_v27 }
 0x20a   :  { %9127 = vst [vmem:[#allocation24_spill] sm:$0xff] %v5238_v5  ;;  %v5256_v5 = vadd.f32 %v504_v49, %v9137_v55  ;;  %v906_v49 = vmul.f32 0.5, %v4758_v11 }
 0x20b   :  { %9128 = vst [vmem:[#allocation191_spill] sm:$0xff] %v5241_v24  ;;  %v5259_v24 = vpop.eup %2826 }
 0x20c   :  { %9130 = vst [vmem:[#allocation192_spill] sm:$0xff] %v5244_v45  ;;  %v901_v45 = vmul.f32 0.5, %v9141_v6  ;;  %v5264_v30 = vpop.eup %2828  ;;  %v908_v6 = vmul.f32 0.5, %v4767_v46  ;;  %v9151_v46 = vld [vmem:[#allocation103_spill] sm:$0xff] }
 0x20d   :  { %9132 = vst [vmem:[#allocation26_spill] sm:$0xff] %v5247_v29  ;;  %v9142_v29 = vld [vmem:[#allocation92_spill] sm:$0xff]  ;;  %v5269_v55 = vpop.eup %2830 }
 0x20e   :  { %9134 = vst [vmem:[#allocation193_spill] sm:$0xff] %v5250_v33  ;;  %v903_v28 = vmul.f32 0.5, %v9142_v29  ;;  %v905_v33 = vmul.f32 0.5, %v4752_v2  ;;  %v5274_v29 = vpop.eup %2832  ;;  %v912_v2 = vmul.f32 0.5, %v4785_v35  ;;  %2846 = vtanh.f32 %v901_v45 }
 0x20f   :  { %9136 = vst [vmem:[#allocation194_spill] sm:$0xff] %v5253_v48  ;;  %v5279_v11 = vpop.eup %2834  ;;  %v5297_v35 = vmul.f32 0.5, %v4812_v34  ;;  %2848 = vtanh.f32 %v902_v53  ;;  %v5308_v45 = vmul.f32 0.5, %v4824_v37  ;;  %v9158_v34 = vld [vmem:[#allocation111_spill] sm:$0xff]  ;;  %v5319_v53 = vmul.f32 0.5, %v4839_v23  ;;  %v9163_v23 = vld [vmem:[#allocation38_spill] sm:$0xff] }
 0x210   :  { %9138 = vst [vmem:[#allocation27_spill] sm:$0xff] %v5256_v5  ;;  %v5286_v5 = vmul.f32 0.5, %v9151_v46  ;;  %v5305_v46 = vmul.f32 0.5, %v4821_v3  ;;  %2850 = vtanh.f32 %v903_v28  ;;  %v9160_v3 = vld [vmem:[#allocation113_spill] sm:$0xff]  ;;  %v5327_v37 = vmul.f32 0.5, %v4848_v52  ;;  %v9161_v28 = vld [vmem:[#allocation115_spill] sm:$0xff] }
 0x211   :  { %9140 = vst [vmem:[#allocation195_spill] sm:$0xff] %v5259_v24  ;;  %v9146_v24 = vld [vmem:[#allocation97_spill] sm:$0xff]  ;;  %2852 = vtanh.f32 %v904_v59  ;;  %v5341_v59 = vmul.f32 0.5, %v4866_v16  ;;  %v9165_v52 = vld [vmem:[#allocation40_spill] sm:$0xff] }
 0x212   :  { %9143 = vst [vmem:[#allocation196_spill] sm:$0xff] %v5264_v30  ;;  %v909_v42 = vmul.f32 0.5, %v9146_v24  ;;  %v9148_v30 = vld [vmem:[#allocation99_spill] sm:$0xff]  ;;  %v5288_v24 = vpop.eup %2836  ;;  %2854 = vtanh.f32 %v905_v33  ;;  %v9169_v16 = vld [vmem:[#allocation45_spill] sm:$0xff] }
 0x213   :  { %9144 = vst [vmem:[#allocation197_spill] sm:$0xff] %v5269_v55  ;;  %v911_v27 = vmul.f32 0.5, %v9148_v30  ;;  %v913_v55 = vmul.f32 0.5, %v9150_v21  ;;  %v9154_v30 = vld [vmem:[#allocation106_spill] sm:$0xff]  ;;  %v5299_v51 = vpop.eup %2838  ;;  %v5302_v21 = vmul.f32 0.5, %v9156_v1  ;;  %2856 = vtanh.f32 %v906_v49  ;;  %v9167_v33 = vld [vmem:[#allocation43_spill] sm:$0xff] }
 0x214   :  { %9147 = vst [vmem:[#allocation198_spill] sm:$0xff] %v5274_v29  ;;  %v5294_v29 = vmul.f32 0.5, %v9154_v30  ;;  %v5310_v39 = vpop.eup %2840  ;;  %v5313_v30 = vmul.f32 0.5, %v4830_v7  ;;  %2858 = vtanh.f32 %v907_v26  ;;  %v5360_v43 = vmul.f32 0.5, %v9169_v16  ;;  %v9171_v26 = vld [vmem:[#allocation48_spill] sm:$0xff] }
 0x215   :  { %9149 = vst [vmem:[#allocation29_spill] sm:$0xff] %v5279_v11  ;;  %v5321_v1 = vpop.eup %2842  ;;  %v5338_v11 = vmul.f32 0.5, %v9163_v23  ;;  %v5357_v23 = vmul.f32 0.5, %v4884_v15  ;;  %v5363_v49 = vmul.f32 0.5, %v4893_v17  ;;  %2860 = vtanh.f32 %v908_v6  ;;  %v9173_v17 = vld [vmem:[#allocation50_spill] sm:$0xff] }
 0x216   :  { %9152 = vst [vmem:[#allocation199_spill] sm:$0xff] %v5288_v24  ;;  %v5316_v24 = vmul.f32 0.5, %v9158_v34  ;;  %v5332_v7 = vpop.eup %2844  ;;  %v5335_v34 = vmul.f32 0.5, %v4857_v12  ;;  %2862 = vtanh.f32 %v909_v42  ;;  %v5379_v16 = vmul.f32 0.5, %v4911_v0  ;;  %v9178_v42 = vld [vmem:[#allocation117_spill] sm:$0xff] }
 0x217   :  { %9155 = vst [vmem:[#allocation200_spill] sm:$0xff] %v5299_v51  ;;  %v5324_v51 = vmul.f32 0.5, %v9160_v3  ;;  %v5343_v3 = vpop.eup %2846  ;;  %v5385_v6 = vmul.f32 0.5, %v4920_v8  ;;  %2864 = vtanh.f32 %v910_v56  ;;  %v9180_v8 = vld [vmem:[#allocation119_spill] sm:$0xff]  ;;  %v9181_v56 = vld [vmem:[#allocation121_spill] sm:$0xff] }
 0x218   :  { %9157 = vst [vmem:[#allocation201_spill] sm:$0xff] %v5310_v39  ;;  %v5330_v39 = vmul.f32 0.5, %v9161_v28  ;;  %v9166_v28 = vld [vmem:[#allocation42_spill] sm:$0xff]  ;;  %v5354_v12 = vpop.eup %2848  ;;  %2866 = vtanh.f32 %v911_v27  ;;  %v9184_v27 = vld [vmem:[#allocation124_spill] sm:$0xff] }
 0x219   :  { %9159 = vst [vmem:[#allocation202_spill] sm:$0xff] %v5321_v1  ;;  %v5346_v1 = vmul.f32 0.5, %v9165_v52  ;;  %v5349_v48 = vmul.f32 0.5, %v9166_v28  ;;  %v5365_v52 = vpop.eup %2850  ;;  %v5368_v28 = vmul.f32 0.5, %v4896_v58  ;;  %2868 = vtanh.f32 %v912_v2 }
 0x21a   :  { %9162 = vst [vmem:[#allocation203_spill] sm:$0xff] %v5332_v7  ;;  %v5352_v7 = vmul.f32 0.5, %v9167_v33  ;;  %v5371_v33 = vmul.f32 0.5, %v4902_v40  ;;  %v5376_v15 = vpop.eup %2852  ;;  %v9176_v40 = vld [vmem:[#allocation52_spill] sm:$0xff]  ;;  %2870 = vtanh.f32 %v913_v55  ;;  %v5429_v2 = vmul.f32 0.5, %v4974_v25  ;;  %v9191_v25 = vld [vmem:[#allocation131_spill] sm:$0xff] }
 0x21b   :  { %9164 = vst [vmem:[#allocation204_spill] sm:$0xff] %v5343_v3  ;;  %v5382_v3 = vmul.f32 0.5, %v9173_v17  ;;  %v5387_v58 = vpop.eup %2854  ;;  %v5401_v17 = vmul.f32 0.5, %v4938_v13  ;;  %2872 = vtanh.f32 %v5283_v31  ;;  %v5438_v55 = vmul.f32 0.5, %v4983_v61 }
 0x21c   :  { %9168 = vst [vmem:[#allocation205_spill] sm:$0xff] %v5354_v12  ;;  %v5374_v12 = vmul.f32 0.5, %v9171_v26  ;;  %v5393_v26 = vmul.f32 0.5, %v4929_v18  ;;  %v5398_v0 = vpop.eup %2856  ;;  %v9183_v18 = vld [vmem:[#allocation122_spill] sm:$0xff]  ;;  %2874 = vtanh.f32 %v5286_v5  ;;  %v5450_v31 = vmul.f32 0.5, %v9191_v25  ;;  %v9198_v25 = vld [vmem:[#allocation137_spill] sm:$0xff] }
 0x21d   :  { %9170 = vst [vmem:[#allocation206_spill] sm:$0xff] %v5365_v52  ;;  %v5390_v52 = vmul.f32 0.5, %v9176_v40  ;;  %v5409_v40 = vpop.eup %2858  ;;  %2876 = vtanh.f32 %v5291_v14  ;;  %v5462_v5 = vmul.f32 0.5, %v5010_v22 }
 0x21e   :  { %9172 = vst [vmem:[#allocation32_spill] sm:$0xff] %v5376_v15  ;;  %v5396_v15 = vmul.f32 0.5, %v9178_v42  ;;  %v5415_v42 = vmul.f32 0.5, %v4956_v62  ;;  %v5420_v13 = vpop.eup %2860  ;;  %v9187_v62 = vld [vmem:[#allocation127_spill] sm:$0xff]  ;;  %2878 = vtanh.f32 %v5294_v29 }
 0x21f   :  { %9174 = vst [vmem:[#allocation207_spill] sm:$0xff] %v5385_v6  ;;  %v5404_v6 = vmul.f32 0.5, %v9180_v8  ;;  %v5423_v8 = vmul.f32 0.5, %v4965_v32  ;;  %2880 = vtanh.f32 %v5297_v35 }
 0x220   :  { %9175 = vst [vmem:[#allocation208_spill] sm:$0xff] %v5387_v58  ;;  %v5407_v58 = vmul.f32 0.5, %v9181_v56  ;;  %v5426_v56 = vmul.f32 0.5, %v4968_v50  ;;  %v5447_v50 = vmul.f32 0.5, %v4992_v44  ;;  %2882 = vtanh.f32 %v5302_v21 }
 0x221   :  { %9177 = vst [vmem:[#allocation210_spill] sm:$0xff] %v5393_v26  ;;  %v5412_v26 = vmul.f32 0.5, %v9183_v18  ;;  %v5432_v18 = vpop.eup %2862  ;;  %2884 = vtanh.f32 %v5305_v46  ;;  %v5510_v21 = vmul.f32 0.5, %v5064_v19 }
 0x222   :  { %9179 = vst [vmem:[#allocation212_spill] sm:$0xff] %v5398_v0  ;;  %v5418_v0 = vmul.f32 0.5, %v9184_v27  ;;  %v9188_v27 = vld [vmem:[#allocation129_spill] sm:$0xff]  ;;  %v5444_v32 = vpop.eup %2864  ;;  %2886 = vtanh.f32 %v5308_v45 }
 0x223   :  { %9182 = vst [vmem:[#allocation34_spill] sm:$0xff] %v5409_v40  ;;  %v5435_v40 = vmul.f32 0.5, %v9187_v62  ;;  %v5456_v61 = vpop.eup %2866  ;;  %v9194_v62 = vld [vmem:[#allocation133_spill] sm:$0xff]  ;;  %2888 = vtanh.f32 %v5313_v30 }
 0x224   :  { %9185 = vst [vmem:[#allocation214_spill] sm:$0xff] %v5420_v13  ;;  %v5441_v13 = vmul.f32 0.5, %v9188_v27  ;;  %v5459_v27 = vmul.f32 0.5, %v9194_v62  ;;  %v5468_v44 = vpop.eup %2868  ;;  %v9202_v62 = vld [vmem:[#allocation140_spill] sm:$0xff]  ;;  %2890 = vtanh.f32 %v5316_v24  ;;  %v5558_v24 = vmul.f32 0.5, %v5118_v54  ;;  %v9239_v54 = vld [vmem:[#allocation166_spill] sm:$0xff] }
 0x225   :  { %9186 = vst [vmem:[#allocation216_spill] sm:$0xff] %v5432_v18  ;;  %v5453_v18 = vmul.f32 0.5, %v5001_v60  ;;  %v5471_v60 = vmul.f32 0.5, %v9198_v25  ;;  %v5480_v22 = vpop.eup %2870  ;;  %v9206_v25 = vld [vmem:[#allocation144_spill] sm:$0xff]  ;;  %2892 = vtanh.f32 %v5319_v53 }
 0x226   :  { %9189 = vst [vmem:[#allocation218_spill] sm:$0xff] %v5441_v13  ;;  %v5498_v35 = vmul.f32 0.5, %v9206_v25  ;;  %v9216_v25 = vld [vmem:[#allocation56_spill] sm:$0xff]  ;;  %2894 = vtanh.f32 %v5324_v51  ;;  %v5582_v51 = vmul.f32 0.5, %v5145_v63 }
 0x227   :  { %9190 = vst [vmem:[#allocation220_spill] sm:$0xff] %v5444_v32  ;;  %v9195_v32 = vld [vmem:[#allocation135_spill] sm:$0xff]  ;;  %2896 = vtanh.f32 %v5327_v37 }
 0x228   :  { %9192 = vst [vmem:[#allocation36_spill] sm:$0xff] %v5453_v18  ;;  %v5465_v13 = vmul.f32 0.5, %v9195_v32  ;;  %v9199_v18 = vld [vmem:[#allocation138_spill] sm:$0xff]  ;;  %v5483_v32 = vmul.f32 0.5, %v9202_v62  ;;  %v9211_v62 = vld [vmem:[#allocation147_spill] sm:$0xff]  ;;  %2898 = vtanh.f32 %v5330_v39  ;;  %v5606_v39 = vmul.f32 0.5, %v5172_v41 }
 0x229   :  { %9193 = vst [vmem:[#allocation222_spill] sm:$0xff] %v5456_v61  ;;  %v5474_v14 = vmul.f32 0.5, %v9199_v18  ;;  %v5477_v61 = vmul.f32 0.5, %v5028_v57  ;;  %v5492_v18 = vpop.eup %2872  ;;  %v5495_v57 = vmul.f32 0.5, %v5046_v36  ;;  %2900 = vtanh.f32 %v5335_v34 }
 0x22a   :  { %9196 = vst [vmem:[#allocation224_spill] sm:$0xff] %v5465_v13  ;;  %v9203_v13 = vld [vmem:[#allocation142_spill] sm:$0xff]  ;;  %2902 = vtanh.f32 %v5338_v11  ;;  %v5618_v34 = vmul.f32 0.5, %v5184_v10 }
 0x22b   :  { %9197 = vst [vmem:[#allocation226_spill] sm:$0xff] %v5468_v44  ;;  %v5486_v29 = vmul.f32 0.5, %v9203_v13  ;;  %v5489_v44 = vmul.f32 0.5, %v5040_v47  ;;  %v5504_v13 = vpop.eup %2874  ;;  %v5507_v47 = vmul.f32 0.5, %v9211_v62  ;;  %v9222_v62 = vld [vmem:[#allocation151_spill] sm:$0xff]  ;;  %2904 = vtanh.f32 %v5341_v59 }
 0x22c   :  { %9200 = vst [vmem:[#allocation228_spill] sm:$0xff] %v5477_v61  ;;  %v5516_v36 = vpop.eup %2876  ;;  %2906 = vtanh.f32 %v5346_v1 }
 0x22d   :  { %9201 = vst [vmem:[#allocation85_spill] sm:$0xff] %v5480_v22  ;;  %v9208_v22 = vld [vmem:[#allocation146_spill] sm:$0xff]  ;;  %v5528_v19 = vpop.eup %2878  ;;  %2908 = vtanh.f32 %v5349_v48 }
 0x22e   :  { %9204 = vst [vmem:[#allocation230_spill] sm:$0xff] %v5489_v44  ;;  %v5501_v61 = vmul.f32 0.5, %v9208_v22  ;;  %v5519_v22 = vmul.f32 0.5, %v9216_v25  ;;  %v9226_v25 = vld [vmem:[#allocation156_spill] sm:$0xff]  ;;  %2910 = vtanh.f32 %v5352_v7 }
 0x22f   :  { %9205 = vst [vmem:[#allocation232_spill] sm:$0xff] %v5492_v18  ;;  %v9213_v18 = vld [vmem:[#allocation54_spill] sm:$0xff] }
 0x230   :  { %9207 = vst [vmem:[#allocation234_spill] sm:$0xff] %v5498_v35  ;;  %v5513_v44 = vmul.f32 0.5, %v9213_v18  ;;  %v5531_v18 = vmul.f32 0.5, %v9222_v62  ;;  %v9231_v62 = vld [vmem:[#allocation161_spill] sm:$0xff] }
 0x231   :  { %9209 = vst [vmem:[#allocation236_spill] sm:$0xff] %v5501_v61  ;;  %v9217_v61 = vld [vmem:[#allocation57_spill] sm:$0xff] }
 0x232   :  { %9210 = vst [vmem:[#allocation87_spill] sm:$0xff] %v5504_v13  ;;  %v5522_v46 = vmul.f32 0.5, %v9217_v61  ;;  %v9219_v13 = vld [vmem:[#allocation150_spill] sm:$0xff]  ;;  %v5540_v61 = vpop.eup %2880  ;;  %2912 = vtanh.f32 %v5357_v23 }
 0x233   :  { %9212 = vst [vmem:[#allocation238_spill] sm:$0xff] %v5510_v21  ;;  %v5525_v35 = vmul.f32 0.5, %v9219_v13  ;;  %v5543_v13 = vmul.f32 0.5, %v9226_v25  ;;  %v9234_v25 = vld [vmem:[#allocation163_spill] sm:$0xff]  ;;  %v9287_v23 = vld [vmem:[#allocation242_spill] sm:$0xff] }
 0x234   :  { %9214 = vst [vmem:[#allocation240_spill] sm:$0xff] %v5513_v44  ;;  %v9223_v44 = vld [vmem:[#allocation153_spill] sm:$0xff] }
 0x235   :  { %9215 = vst [vmem:[#allocation89_spill] sm:$0xff] %v5516_v36  ;;  %v5534_v45 = vmul.f32 0.5, %v9223_v44  ;;  %v9224_v36 = vld [vmem:[#allocation154_spill] sm:$0xff]  ;;  %v5552_v44 = vpop.eup %2882  ;;  %2914 = vtanh.f32 %v5360_v43 }
 0x236   :  { %9218 = vst [vmem:[#allocation90_spill] sm:$0xff] %v5522_v46  ;;  %v5537_v21 = vmul.f32 0.5, %v9224_v36  ;;  %v5555_v36 = vmul.f32 0.5, %v5112_v38  ;;  %v9293_v43 = vld [vmem:[#allocation58_spill] sm:$0xff] }
 0x237   :  { %9220 = vst [vmem:[#allocation92_spill] sm:$0xff] %v5525_v35  ;;  %v9227_v35 = vld [vmem:[#allocation157_spill] sm:$0xff] }
 0x238   :  { %9221 = vst [vmem:[#allocation95_spill] sm:$0xff] %v5528_v19  ;;  %v5546_v30 = vmul.f32 0.5, %v9227_v35  ;;  %v9228_v19 = vld [vmem:[#allocation159_spill] sm:$0xff]  ;;  %v5564_v35 = vpop.eup %2884  ;;  %2916 = vtanh.f32 %v5363_v49 }
 0x239   :  { %9225 = vst [vmem:[#allocation97_spill] sm:$0xff] %v5540_v61  ;;  %v5549_v46 = vmul.f32 0.5, %v9228_v19  ;;  %v5561_v61 = vmul.f32 0.5, %v9231_v62  ;;  %v5567_v19 = vmul.f32 0.5, %v9234_v25  ;;  %v5576_v38 = vpop.eup %2886  ;;  %v5579_v62 = vmul.f32 0.5, %v9239_v54  ;;  %v9243_v25 = vld [vmem:[#allocation170_spill] sm:$0xff] }
 0x23a   :  { %9230 = vst [vmem:[#allocation101_spill] sm:$0xff] %v5552_v44  ;;  %v5573_v44 = vmul.f32 0.5, %v5136_v9  ;;  %v5591_v9 = vmul.f32 0.5, %v9243_v25  ;;  %v9247_v54 = vld [vmem:[#allocation174_spill] sm:$0xff]  ;;  %2918 = vtanh.f32 %v5368_v28  ;;  %v9295_v49 = vld [vmem:[#allocation59_spill] sm:$0xff] }
 0x23b   :  { %9229 = vst [vmem:[#allocation99_spill] sm:$0xff] %v5549_v46  ;;  %v9235_v46 = vld [vmem:[#allocation164_spill] sm:$0xff]  ;;  %v9252_v25 = vld [vmem:[#allocation178_spill] sm:$0xff] }
 0x23c   :  { %9232 = vst [vmem:[#allocation103_spill] sm:$0xff] %v5561_v61  ;;  %v5570_v53 = vmul.f32 0.5, %v9235_v46  ;;  %v5588_v46 = vpop.eup %2888  ;;  %2920 = vtanh.f32 %v5371_v33  ;;  %v9301_v28 = vld [vmem:[#allocation62_spill] sm:$0xff]  ;;  %v9307_v33 = vld [vmem:[#allocation65_spill] sm:$0xff] }
 0x23d   :  { %9233 = vst [vmem:[#allocation105_spill] sm:$0xff] %v5564_v35  ;;  %v9241_v35 = vld [vmem:[#allocation168_spill] sm:$0xff]  ;;  %v5600_v63 = vpop.eup %2890  ;;  %2922 = vtanh.f32 %v5374_v12 }
 0x23e   :  { %9236 = vst [vmem:[#allocation106_spill] sm:$0xff] %v5570_v53  ;;  %v5585_v61 = vmul.f32 0.5, %v9241_v35  ;;  %v5603_v35 = vmul.f32 0.5, %v9247_v54  ;;  %v9256_v54 = vld [vmem:[#allocation179_spill] sm:$0xff]  ;;  %v9313_v12 = vld [vmem:[#allocation68_spill] sm:$0xff] }
 0x23f   :  { %9237 = vst [vmem:[#allocation108_spill] sm:$0xff] %v5573_v44  ;;  %v9244_v44 = vld [vmem:[#allocation171_spill] sm:$0xff] }
 0x240   :  { %9238 = vst [vmem:[#allocation111_spill] sm:$0xff] %v5576_v38  ;;  %v5594_v37 = vmul.f32 0.5, %v9244_v44  ;;  %v9245_v38 = vld [vmem:[#allocation173_spill] sm:$0xff]  ;;  %v5612_v44 = vpop.eup %2892  ;;  %2924 = vtanh.f32 %v5379_v16  ;;  %v9319_v16 = vld [vmem:[#allocation31_spill] sm:$0xff] }
 0x241   :  { %9240 = vst [vmem:[#allocation113_spill] sm:$0xff] %v5582_v51  ;;  %v5597_v53 = vmul.f32 0.5, %v9245_v38  ;;  %v5615_v38 = vmul.f32 0.5, %v9252_v25  ;;  %v5624_v41 = vpop.eup %2894  ;;  %v9263_v25 = vld [vmem:[#allocation183_spill] sm:$0xff]  ;;  %2926 = vtanh.f32 %v5382_v3  ;;  %v9326_v3 = vld [vmem:[#allocation37_spill] sm:$0xff] }
 0x242   :  { %9242 = vst [vmem:[#allocation115_spill] sm:$0xff] %v5585_v61  ;;  %v9250_v61 = vld [vmem:[#allocation176_spill] sm:$0xff]  ;;  %v5636_v10 = vpop.eup %2896  ;;  %v5642_v59 = vmul.f32 0.5, %v9263_v25  ;;  %v9273_v25 = vld [vmem:[#allocation190_spill] sm:$0xff] }
 0x243   :  { %9246 = vst [vmem:[#allocation38_spill] sm:$0xff] %v5597_v53  ;;  %v5609_v51 = vmul.f32 0.5, %v9250_v61  ;;  %v5621_v53 = vmul.f32 0.5, %v5190_v4  ;;  %v5627_v61 = vmul.f32 0.5, %v9256_v54  ;;  %v5639_v4 = vmul.f32 0.5, %v5208_v20  ;;  %v9267_v54 = vld [vmem:[#allocation186_spill] sm:$0xff] }
 0x244   :  { %9248 = vst [vmem:[#allocation40_spill] sm:$0xff] %v5603_v35 }
 0x245   :  { %9249 = vst [vmem:[#allocation42_spill] sm:$0xff] %v5606_v39  ;;  %v9260_v39 = vld [vmem:[#allocation182_spill] sm:$0xff] }
 0x246   :  { %9251 = vst [vmem:[#allocation43_spill] sm:$0xff] %v5609_v51  ;;  %v9258_v51 = vld [vmem:[#allocation181_spill] sm:$0xff]  ;;  %v5633_v35 = vmul.f32 0.5, %v9260_v39  ;;  %v5651_v39 = vmul.f32 0.5, %v9267_v54  ;;  %v9279_v54 = vld [vmem:[#allocation26_spill] sm:$0xff] }
 0x247   :  { %9253 = vst [vmem:[#allocation45_spill] sm:$0xff] %v5615_v38  ;;  %v5630_v11 = vmul.f32 0.5, %v9258_v51  ;;  %v5648_v51 = vpop.eup %2898 }
 0x248   :  { %9254 = vst [vmem:[#allocation48_spill] sm:$0xff] %v5618_v34  ;;  %v5660_v20 = vpop.eup %2900 }
 0x249   :  { %9255 = vst [vmem:[#allocation50_spill] sm:$0xff] %v5621_v53  ;;  %v9265_v53 = vld [vmem:[#allocation185_spill] sm:$0xff] }
 0x24a   :  { %9257 = vst [vmem:[#allocation52_spill] sm:$0xff] %v5627_v61  ;;  %v5645_v34 = vmul.f32 0.5, %v9265_v53  ;;  %v5663_v53 = vmul.f32 0.5, %v9273_v25 }
 0x24b   :  { %9259 = vst [vmem:[#allocation117_spill] sm:$0xff] %v5630_v11  ;;  %v9271_v11 = vld [vmem:[#allocation188_spill] sm:$0xff] }
 0x24c   :  { %9261 = vst [vmem:[#allocation119_spill] sm:$0xff] %v5633_v35  ;;  %v9269_v35 = vld [vmem:[#allocation187_spill] sm:$0xff]  ;;  %v5657_v61 = vmul.f32 0.5, %v9271_v11  ;;  %v5675_v11 = vmul.f32 0.5, %v9279_v54 }
 0x24d   :  { %9262 = vst [vmem:[#allocation121_spill] sm:$0xff] %v5639_v4  ;;  %v5654_v1 = vmul.f32 0.5, %v9269_v35  ;;  %v5672_v35 = vpop.eup %2902  ;;  %v9289_v54 = vld [vmem:[#allocation243_spill] sm:$0xff] }
 0x24e   :  { %9264 = vst [vmem:[#allocation122_spill] sm:$0xff] %v5642_v59  ;;  %v9277_v59 = vld [vmem:[#allocation192_spill] sm:$0xff] }
 0x24f   :  { %9266 = vst [vmem:[#allocation124_spill] sm:$0xff] %v5645_v34  ;;  %v9275_v34 = vld [vmem:[#allocation24_spill] sm:$0xff]  ;;  %v5669_v4 = vmul.f32 0.5, %v9277_v59  ;;  %v9285_v59 = vld [vmem:[#allocation241_spill] sm:$0xff] }
 0x250   :  { %9268 = vst [vmem:[#allocation127_spill] sm:$0xff] %v5651_v39  ;;  %v5666_v48 = vmul.f32 0.5, %v9275_v34  ;;  %v5684_v34 = vpop.eup %2904  ;;  %v5688_v25 = vmul.f32 0.5, %v9285_v59 }
 0x251   :  { %9270 = vst [vmem:[#allocation129_spill] sm:$0xff] %v5654_v1  ;;  %v9283_v1 = vld [vmem:[#allocation27_spill] sm:$0xff] }
 0x252   :  { %9272 = vst [vmem:[#allocation131_spill] sm:$0xff] %v5657_v61  ;;  %v9281_v61 = vld [vmem:[#allocation194_spill] sm:$0xff]  ;;  %v5681_v39 = vmul.f32 0.5, %v9283_v1  ;;  %v9291_v1 = vld [vmem:[#allocation244_spill] sm:$0xff] }
 0x253   :  { %9274 = vst [vmem:[#allocation133_spill] sm:$0xff] %v5663_v53  ;;  %v5678_v7 = vmul.f32 0.5, %v9281_v61  ;;  %v5696_v61 = vpop.eup %2906  ;;  %v5766_v53 = vmul.f32 0.5, %v9326_v3 }
 0x254   :  { %9276 = vst [vmem:[#allocation135_spill] sm:$0xff] %v5666_v48  ;;  %v5706_v48 = vmul.f32 0.5, %v9295_v49  ;;  %v5708_v59 = vpop.eup %2908 }
 0x255   :  { %9278 = vst [vmem:[#allocation137_spill] sm:$0xff] %v5669_v4  ;;  %v5691_v4 = vmul.f32 0.5, %v9287_v23  ;;  %v9297_v23 = vld [vmem:[#allocation60_spill] sm:$0xff] }
 0x256   :  { %9280 = vst [vmem:[#allocation138_spill] sm:$0xff] %v5675_v11  ;;  %v5694_v11 = vmul.f32 0.5, %v9289_v54  ;;  %v5712_v54 = vmul.f32 0.5, %v9297_v23 }
 0x257   :  { %9282 = vst [vmem:[#allocation140_spill] sm:$0xff] %v5678_v7  ;;  %v5703_v7 = vmul.f32 0.5, %v9293_v43  ;;  %v9303_v43 = vld [vmem:[#allocation63_spill] sm:$0xff] }
 0x258   :  { %9284 = vst [vmem:[#allocation142_spill] sm:$0xff] %v5681_v39  ;;  %v5700_v39 = vmul.f32 0.5, %v9291_v1  ;;  %v5720_v1 = vpop.eup %2910  ;;  %v5724_v49 = vmul.f32 0.5, %v9303_v43 }
 0x259   :  { %9286 = vst [vmem:[#allocation144_spill] sm:$0xff] %v5688_v25  ;;  %v5718_v25 = vmul.f32 0.5, %v9301_v28  ;;  %v5732_v23 = vpop.eup %2912 }
 0x25a   :  { %9288 = vst [vmem:[#allocation146_spill] sm:$0xff] %v5691_v4  ;;  %v5744_v43 = vpop.eup %2914 }
 0x25b   :  { %9290 = vst [vmem:[#allocation147_spill] sm:$0xff] %v5694_v11  ;;  %v9299_v11 = vld [vmem:[#allocation61_spill] sm:$0xff] }
 0x25c   :  { %9292 = vst [vmem:[#allocation54_spill] sm:$0xff] %v5700_v39  ;;  %v5715_v4 = vmul.f32 0.5, %v9299_v11  ;;  %v5730_v39 = vmul.f32 0.5, %v9307_v33  ;;  %v9309_v11 = vld [vmem:[#allocation66_spill] sm:$0xff] }
 0x25d   :  { %9294 = vst [vmem:[#allocation56_spill] sm:$0xff] %v5703_v7  ;;  %v5736_v28 = vmul.f32 0.5, %v9309_v11  ;;  %v5756_v11 = vpop.eup %2916 }
 0x25e   :  { %9296 = vst [vmem:[#allocation57_spill] sm:$0xff] %v5706_v48  ;;  %v9305_v48 = vld [vmem:[#allocation64_spill] sm:$0xff] }
 0x25f   :  { %9298 = vst [vmem:[#allocation150_spill] sm:$0xff] %v5712_v54  ;;  %v5727_v7 = vmul.f32 0.5, %v9305_v48  ;;  %v5742_v54 = vmul.f32 0.5, %v9313_v12  ;;  %v9315_v48 = vld [vmem:[#allocation69_spill] sm:$0xff] }
 0x260   :  { %9300 = vst [vmem:[#allocation151_spill] sm:$0xff] %v5715_v4  ;;  %v5748_v33 = vmul.f32 0.5, %v9315_v48  ;;  %v5768_v48 = vpop.eup %2918 }
 0x261   :  { %9302 = vst [vmem:[#allocation153_spill] sm:$0xff] %v5718_v25  ;;  %v9311_v25 = vld [vmem:[#allocation67_spill] sm:$0xff] }
 0x262   :  { %9304 = vst [vmem:[#allocation154_spill] sm:$0xff] %v5724_v49  ;;  %v5739_v4 = vmul.f32 0.5, %v9311_v25  ;;  %v5754_v49 = vmul.f32 0.5, %v9319_v16  ;;  %v9321_v25 = vld [vmem:[#allocation207_spill] sm:$0xff] }
 0x263   :  { %9306 = vst [vmem:[#allocation156_spill] sm:$0xff] %v5727_v7  ;;  %2928 = vtanh.f32 %v9321_v25  ;;  %v9332_v25 = vld [vmem:[#allocation91_spill] sm:$0xff] }
 0x264   :  { %9308 = vst [vmem:[#allocation157_spill] sm:$0xff] %v5730_v39  ;;  %v9317_v39 = vld [vmem:[#allocation30_spill] sm:$0xff]  ;;  %2930 = vtanh.f32 %v5390_v52  ;;  %v9339_v52 = vld [vmem:[#allocation96_spill] sm:$0xff] }
 0x265   :  { %9310 = vst [vmem:[#allocation159_spill] sm:$0xff] %v5736_v28  ;;  %v5751_v7 = vmul.f32 0.5, %v9317_v39  ;;  %v9328_v39 = vld [vmem:[#allocation86_spill] sm:$0xff]  ;;  %v5790_v38 = vmul.f32 0.5, %v9339_v52 }
 0x266   :  { %9312 = vst [vmem:[#allocation161_spill] sm:$0xff] %v5739_v4  ;;  %v9322_v4 = vld [vmem:[#allocation33_spill] sm:$0xff]  ;;  %v5772_v16 = vmul.f32 0.5, %v9328_v39 }
 0x267   :  { %9314 = vst [vmem:[#allocation163_spill] sm:$0xff] %v5742_v54  ;;  %v5760_v12 = vmul.f32 0.5, %v9322_v4  ;;  %v9324_v54 = vld [vmem:[#allocation35_spill] sm:$0xff]  ;;  %v5780_v4 = vpop.eup %2920 }
 0x268   :  { %9316 = vst [vmem:[#allocation164_spill] sm:$0xff] %v5748_v33  ;;  %v5763_v28 = vmul.f32 0.5, %v9324_v54  ;;  %v5778_v33 = vmul.f32 0.5, %v9332_v25  ;;  %v9334_v54 = vld [vmem:[#allocation210_spill] sm:$0xff]  ;;  %v5792_v39 = vpop.eup %2922 }
 0x269   :  { %9318 = vst [vmem:[#allocation166_spill] sm:$0xff] %v5751_v7  ;;  %2932 = vtanh.f32 %v9334_v54  ;;  %v9345_v54 = vld [vmem:[#allocation102_spill] sm:$0xff] }
 0x26a   :  { %9320 = vst [vmem:[#allocation168_spill] sm:$0xff] %v5754_v49  ;;  %v9330_v49 = vld [vmem:[#allocation88_spill] sm:$0xff]  ;;  %2934 = vtanh.f32 %v5396_v15  ;;  %v9351_v15 = vld [vmem:[#allocation158_spill] sm:$0xff] }
 0x26b   :  { %9323 = vst [vmem:[#allocation170_spill] sm:$0xff] %v5760_v12  ;;  %v5775_v7 = vmul.f32 0.5, %v9330_v49  ;;  %v9341_v49 = vld [vmem:[#allocation98_spill] sm:$0xff]  ;;  %2936 = vtanh.f32 %v5401_v17  ;;  %v9357_v17 = vld [vmem:[#allocation165_spill] sm:$0xff] }
 0x26c   :  { %9325 = vst [vmem:[#allocation171_spill] sm:$0xff] %v5763_v28  ;;  %v9335_v28 = vld [vmem:[#allocation93_spill] sm:$0xff]  ;;  %v5796_v25 = vmul.f32 0.5, %v9341_v49  ;;  %2938 = vtanh.f32 %v5404_v6  ;;  %v9363_v6 = vld [vmem:[#allocation172_spill] sm:$0xff] }
 0x26d   :  { %9327 = vst [vmem:[#allocation173_spill] sm:$0xff] %v5766_v53  ;;  %v5784_v3 = vmul.f32 0.5, %v9335_v28  ;;  %v9337_v53 = vld [vmem:[#allocation94_spill] sm:$0xff]  ;;  %v5804_v28 = vpop.eup %2924  ;;  %2940 = vtanh.f32 %v5407_v58 }
 0x26e   :  { %9329 = vst [vmem:[#allocation174_spill] sm:$0xff] %v5772_v16  ;;  %v5787_v12 = vmul.f32 0.5, %v9337_v53  ;;  %v5802_v16 = vmul.f32 0.5, %v9345_v54  ;;  %v9347_v53 = vld [vmem:[#allocation104_spill] sm:$0xff]  ;;  %v5816_v49 = vpop.eup %2926  ;;  %2942 = vtanh.f32 %v5412_v26  ;;  %v9369_v58 = vld [vmem:[#allocation18_spill] sm:$0xff] }
 0x26f   :  { %9331 = vst [vmem:[#allocation176_spill] sm:$0xff] %v5775_v7  ;;  %v5808_v52 = vmul.f32 0.5, %v9347_v53  ;;  %v5828_v53 = vpop.eup %2928  ;;  %2944 = vtanh.f32 %v5415_v42  ;;  %v9375_v26 = vld [vmem:[#allocation184_spill] sm:$0xff]  ;;  %v9381_v42 = vld [vmem:[#allocation191_spill] sm:$0xff] }
 0x270   :  { %9333 = vst [vmem:[#allocation178_spill] sm:$0xff] %v5778_v33  ;;  %v9343_v33 = vld [vmem:[#allocation100_spill] sm:$0xff]  ;;  %2946 = vtanh.f32 %v5418_v0  ;;  %v9387_v0 = vld [vmem:[#allocation213_spill] sm:$0xff] }
 0x271   :  { %9336 = vst [vmem:[#allocation179_spill] sm:$0xff] %v5784_v3  ;;  %v5799_v7 = vmul.f32 0.5, %v9343_v33  ;;  %v5814_v3 = vmul.f32 0.5, %v9351_v15  ;;  %v9353_v33 = vld [vmem:[#allocation160_spill] sm:$0xff]  ;;  %2948 = vtanh.f32 %v5423_v8  ;;  %v9393_v8 = vld [vmem:[#allocation219_spill] sm:$0xff] }
 0x272   :  { %9338 = vst [vmem:[#allocation181_spill] sm:$0xff] %v5787_v12  ;;  %v5820_v54 = vmul.f32 0.5, %v9353_v33  ;;  %v5840_v33 = vpop.eup %2930  ;;  %2950 = vtanh.f32 %v5426_v56  ;;  %v9399_v56 = vld [vmem:[#allocation225_spill] sm:$0xff] }
 0x273   :  { %9340 = vst [vmem:[#allocation182_spill] sm:$0xff] %v5790_v38  ;;  %v9349_v38 = vld [vmem:[#allocation107_spill] sm:$0xff]  ;;  %2952 = vtanh.f32 %v5429_v2 }
 0x274   :  { %9342 = vst [vmem:[#allocation183_spill] sm:$0xff] %v5796_v25  ;;  %v5811_v12 = vmul.f32 0.5, %v9349_v38  ;;  %v5826_v25 = vmul.f32 0.5, %v9357_v17  ;;  %v9359_v38 = vld [vmem:[#allocation167_spill] sm:$0xff]  ;;  %2954 = vtanh.f32 %v5435_v40  ;;  %v9411_v40 = vld [vmem:[#allocation237_spill] sm:$0xff] }
 0x275   :  { %9344 = vst [vmem:[#allocation185_spill] sm:$0xff] %v5799_v7  ;;  %v5832_v15 = vmul.f32 0.5, %v9359_v38  ;;  %v5852_v38 = vpop.eup %2932  ;;  %v9405_v2 = vld [vmem:[#allocation231_spill] sm:$0xff]  ;;  %2956 = vtanh.f32 %v5438_v55  ;;  %v5946_v55 = vmul.f32 0.5, %v5600_v63  ;;  %v5967_v63 = vmul.f32 0.5, %v5660_v20  ;;  %v9431_v20 = vld [vmem:[#allocation73_spill] sm:$0xff] }
 0x276   :  { %9346 = vst [vmem:[#allocation186_spill] sm:$0xff] %v5802_v16  ;;  %v9355_v16 = vld [vmem:[#allocation162_spill] sm:$0xff] }
 0x277   :  { %9348 = vst [vmem:[#allocation187_spill] sm:$0xff] %v5808_v52  ;;  %v5823_v7 = vmul.f32 0.5, %v9355_v16  ;;  %v5838_v52 = vmul.f32 0.5, %v9363_v6  ;;  %v9365_v16 = vld [vmem:[#allocation175_spill] sm:$0xff] }
 0x278   :  { %9350 = vst [vmem:[#allocation188_spill] sm:$0xff] %v5811_v12  ;;  %v5844_v17 = vmul.f32 0.5, %v9365_v16  ;;  %v5864_v16 = vpop.eup %2934 }
 0x279   :  { %9352 = vst [vmem:[#allocation190_spill] sm:$0xff] %v5814_v3  ;;  %v9361_v3 = vld [vmem:[#allocation169_spill] sm:$0xff] }
 0x27a   :  { %9354 = vst [vmem:[#allocation24_spill] sm:$0xff] %v5820_v54  ;;  %v5835_v12 = vmul.f32 0.5, %v9361_v3  ;;  %v5850_v54 = vmul.f32 0.5, %v9369_v58  ;;  %v9371_v3 = vld [vmem:[#allocation180_spill] sm:$0xff] }
 0x27b   :  { %9356 = vst [vmem:[#allocation192_spill] sm:$0xff] %v5823_v7  ;;  %v5856_v6 = vmul.f32 0.5, %v9371_v3  ;;  %v5876_v3 = vpop.eup %2936 }
 0x27c   :  { %9358 = vst [vmem:[#allocation26_spill] sm:$0xff] %v5826_v25  ;;  %v9367_v25 = vld [vmem:[#allocation177_spill] sm:$0xff] }
 0x27d   :  { %9360 = vst [vmem:[#allocation194_spill] sm:$0xff] %v5832_v15  ;;  %v5847_v7 = vmul.f32 0.5, %v9367_v25  ;;  %v5862_v15 = vmul.f32 0.5, %v9375_v26  ;;  %v9377_v25 = vld [vmem:[#allocation22_spill] sm:$0xff] }
 0x27e   :  { %9362 = vst [vmem:[#allocation27_spill] sm:$0xff] %v5835_v12  ;;  %v5868_v58 = vmul.f32 0.5, %v9377_v25  ;;  %v5888_v25 = vpop.eup %2938 }
 0x27f   :  { %9364 = vst [vmem:[#allocation241_spill] sm:$0xff] %v5838_v52  ;;  %v9373_v52 = vld [vmem:[#allocation20_spill] sm:$0xff] }
 0x280   :  { %9366 = vst [vmem:[#allocation242_spill] sm:$0xff] %v5844_v17  ;;  %v5859_v12 = vmul.f32 0.5, %v9373_v52  ;;  %v5874_v17 = vmul.f32 0.5, %v9381_v42  ;;  %v9383_v52 = vld [vmem:[#allocation209_spill] sm:$0xff] }
 0x281   :  { %9368 = vst [vmem:[#allocation243_spill] sm:$0xff] %v5847_v7  ;;  %v5880_v26 = vmul.f32 0.5, %v9383_v52  ;;  %v5900_v52 = vpop.eup %2940 }
 0x282   :  { %9370 = vst [vmem:[#allocation244_spill] sm:$0xff] %v5850_v54  ;;  %v9379_v54 = vld [vmem:[#allocation189_spill] sm:$0xff] }
 0x283   :  { %9372 = vst [vmem:[#allocation58_spill] sm:$0xff] %v5856_v6  ;;  %v5871_v7 = vmul.f32 0.5, %v9379_v54  ;;  %v5886_v6 = vmul.f32 0.5, %v9387_v0  ;;  %v9389_v54 = vld [vmem:[#allocation215_spill] sm:$0xff] }
 0x284   :  { %9374 = vst [vmem:[#allocation59_spill] sm:$0xff] %v5859_v12  ;;  %v5892_v42 = vmul.f32 0.5, %v9389_v54  ;;  %v5912_v54 = vpop.eup %2942 }
 0x285   :  { %9376 = vst [vmem:[#allocation60_spill] sm:$0xff] %v5862_v15  ;;  %v9385_v15 = vld [vmem:[#allocation211_spill] sm:$0xff] }
 0x286   :  { %9378 = vst [vmem:[#allocation61_spill] sm:$0xff] %v5868_v58  ;;  %v5883_v12 = vmul.f32 0.5, %v9385_v15  ;;  %v5898_v58 = vmul.f32 0.5, %v9393_v8  ;;  %v9395_v15 = vld [vmem:[#allocation221_spill] sm:$0xff] }
 0x287   :  { %9380 = vst [vmem:[#allocation62_spill] sm:$0xff] %v5871_v7  ;;  %v5904_v0 = vmul.f32 0.5, %v9395_v15  ;;  %v5924_v15 = vpop.eup %2944 }
 0x288   :  { %9382 = vst [vmem:[#allocation63_spill] sm:$0xff] %v5874_v17  ;;  %v9391_v17 = vld [vmem:[#allocation217_spill] sm:$0xff] }
 0x289   :  { %9384 = vst [vmem:[#allocation64_spill] sm:$0xff] %v5880_v26  ;;  %v5895_v7 = vmul.f32 0.5, %v9391_v17  ;;  %v5910_v26 = vmul.f32 0.5, %v9399_v56  ;;  %v9401_v17 = vld [vmem:[#allocation227_spill] sm:$0xff] }
 0x28a   :  { %9386 = vst [vmem:[#allocation65_spill] sm:$0xff] %v5883_v12  ;;  %v5916_v8 = vmul.f32 0.5, %v9401_v17  ;;  %v5936_v17 = vpop.eup %2946 }
 0x28b   :  { %9388 = vst [vmem:[#allocation66_spill] sm:$0xff] %v5886_v6  ;;  %v9397_v6 = vld [vmem:[#allocation223_spill] sm:$0xff] }
 0x28c   :  { %9390 = vst [vmem:[#allocation67_spill] sm:$0xff] %v5892_v42  ;;  %v5907_v12 = vmul.f32 0.5, %v9397_v6  ;;  %v5922_v42 = vmul.f32 0.5, %v9405_v2  ;;  %v9407_v6 = vld [vmem:[#allocation233_spill] sm:$0xff] }
 0x28d   :  { %9392 = vst [vmem:[#allocation68_spill] sm:$0xff] %v5895_v7  ;;  %v5928_v56 = vmul.f32 0.5, %v9407_v6  ;;  %v5948_v6 = vpop.eup %2948 }
 0x28e   :  { %9394 = vst [vmem:[#allocation69_spill] sm:$0xff] %v5898_v58  ;;  %v9403_v58 = vld [vmem:[#allocation229_spill] sm:$0xff] }
 0x28f   :  { %9396 = vst [vmem:[#allocation30_spill] sm:$0xff] %v5904_v0  ;;  %v5919_v7 = vmul.f32 0.5, %v9403_v58  ;;  %v5934_v0 = vmul.f32 0.5, %v9411_v40  ;;  %v9413_v58 = vld [vmem:[#allocation218_spill] sm:$0xff]  ;;  %v5955_v40 = vmul.f32 0.5, %v5624_v41  ;;  %v9424_v41 = vld [vmem:[#allocation36_spill] sm:$0xff] }
 0x290   :  { %9398 = vst [vmem:[#allocation31_spill] sm:$0xff] %v5907_v12  ;;  %2958 = vtanh.f32 %v9413_v58  ;;  %v5958_v58 = vmul.f32 0.5, %v5636_v10 }
 0x291   :  { %9400 = vst [vmem:[#allocation207_spill] sm:$0xff] %v5910_v26  ;;  %v9409_v26 = vld [vmem:[#allocation235_spill] sm:$0xff]  ;;  %2960 = vtanh.f32 %v5447_v50  ;;  %v5970_v50 = vmul.f32 0.5, %v5672_v35  ;;  %v5988_v35 = vmul.f32 0.5, %v9431_v20 }
 0x292   :  { %9402 = vst [vmem:[#allocation33_spill] sm:$0xff] %v5916_v8  ;;  %v5931_v12 = vmul.f32 0.5, %v9409_v26  ;;  %v5952_v26 = vmul.f32 0.5, %v5612_v44  ;;  %2962 = vtanh.f32 %v5450_v31  ;;  %v9429_v31 = vld [vmem:[#allocation72_spill] sm:$0xff] }
 0x293   :  { %9404 = vst [vmem:[#allocation35_spill] sm:$0xff] %v5919_v7  ;;  %v9414_v7 = vld [vmem:[#allocation239_spill] sm:$0xff]  ;;  %2964 = vtanh.f32 %v9424_v41 }
 0x294   :  { %9406 = vst [vmem:[#allocation37_spill] sm:$0xff] %v5922_v42  ;;  %v5940_v2 = vmul.f32 0.5, %v9414_v7  ;;  %v5943_v42 = vmul.f32 0.5, %v5588_v46  ;;  %v5960_v7 = vpop.eup %2950  ;;  %v5964_v46 = vmul.f32 0.5, %v5648_v51  ;;  %2966 = vtanh.f32 %v5459_v27  ;;  %v9435_v41 = vld [vmem:[#allocation75_spill] sm:$0xff]  ;;  %v9441_v27 = vld [vmem:[#allocation78_spill] sm:$0xff] }
 0x295   :  { %9408 = vst [vmem:[#allocation86_spill] sm:$0xff] %v5928_v56  ;;  %v5972_v44 = vpop.eup %2952  ;;  %2968 = vtanh.f32 %v5462_v5  ;;  %v9448_v5 = vld [vmem:[#allocation81_spill] sm:$0xff] }
 0x296   :  { %9410 = vst [vmem:[#allocation88_spill] sm:$0xff] %v5931_v12  ;;  %v5984_v51 = vpop.eup %2954 }
 0x297   :  { %9412 = vst [vmem:[#allocation91_spill] sm:$0xff] %v5934_v0 }
 0x298   :  { %9415 = vst [vmem:[#allocation210_spill] sm:$0xff] %v5940_v2 }
 0x299   :  { %9416 = vst [vmem:[#allocation93_spill] sm:$0xff] %v5943_v42  ;;  %v9439_v42 = vld [vmem:[#allocation77_spill] sm:$0xff] }
 0x29a   :  { %9417 = vst [vmem:[#allocation94_spill] sm:$0xff] %v5946_v55  ;;  %v5982_v55 = vmul.f32 0.5, %v9429_v31 }
 0x29b   :  { %9418 = vst [vmem:[#allocation96_spill] sm:$0xff] %v5952_v26 }
 0x29c   :  { %9419 = vst [vmem:[#allocation98_spill] sm:$0xff] %v5955_v40  ;;  %v9425_v40 = vld [vmem:[#allocation70_spill] sm:$0xff] }
 0x29d   :  { %9420 = vst [vmem:[#allocation100_spill] sm:$0xff] %v5958_v58  ;;  %v5976_v10 = vmul.f32 0.5, %v9425_v40  ;;  %v9427_v58 = vld [vmem:[#allocation71_spill] sm:$0xff]  ;;  %v5996_v40 = vpop.eup %2956 }
 0x29e   :  { %9421 = vst [vmem:[#allocation102_spill] sm:$0xff] %v5964_v46  ;;  %v5979_v26 = vmul.f32 0.5, %v9427_v58  ;;  %v5994_v46 = vmul.f32 0.5, %v9435_v41  ;;  %v9437_v58 = vld [vmem:[#allocation76_spill] sm:$0xff]  ;;  %v6008_v20 = vpop.eup %2958 }
 0x29f   :  { %9422 = vst [vmem:[#allocation104_spill] sm:$0xff] %v5967_v63  ;;  %v6000_v31 = vmul.f32 0.5, %v9437_v58  ;;  %v6020_v58 = vpop.eup %2960 }
 0x2a0   :  { %9423 = vst [vmem:[#allocation107_spill] sm:$0xff] %v5970_v50  ;;  %v9433_v50 = vld [vmem:[#allocation74_spill] sm:$0xff] }
 0x2a1   :  { %9426 = vst [vmem:[#allocation158_spill] sm:$0xff] %v5976_v10  ;;  %v5991_v63 = vmul.f32 0.5, %v9433_v50  ;;  %v9443_v50 = vld [vmem:[#allocation224_spill] sm:$0xff]  ;;  %v6018_v10 = vmul.f32 0.5, %v9448_v5 }
 0x2a2   :  { %9428 = vst [vmem:[#allocation160_spill] sm:$0xff] %v5979_v26  ;;  %v6006_v26 = vmul.f32 0.5, %v9441_v27  ;;  %2970 = vtanh.f32 %v9443_v50  ;;  %v9454_v50 = vld [vmem:[#allocation84_spill] sm:$0xff] }
 0x2a3   :  { %9430 = vst [vmem:[#allocation162_spill] sm:$0xff] %v5982_v55  ;;  %v6003_v55 = vmul.f32 0.5, %v9439_v42  ;;  %2972 = vtanh.f32 %v5471_v60  ;;  %v9450_v42 = vld [vmem:[#allocation82_spill] sm:$0xff]  ;;  %v9460_v60 = vld [vmem:[#allocation8_spill] sm:$0xff] }
 0x2a4   :  { %9432 = vst [vmem:[#allocation165_spill] sm:$0xff] %v5988_v35  ;;  %v6024_v27 = vmul.f32 0.5, %v9450_v42  ;;  %2974 = vtanh.f32 %v5474_v14  ;;  %v9467_v14 = vld [vmem:[#allocation11_spill] sm:$0xff] }
 0x2a5   :  { %9434 = vst [vmem:[#allocation167_spill] sm:$0xff] %v5991_v63  ;;  %v9444_v63 = vld [vmem:[#allocation79_spill] sm:$0xff]  ;;  %v6054_v2 = vmul.f32 0.5, %v9467_v14 }
 0x2a6   :  { %9436 = vst [vmem:[#allocation169_spill] sm:$0xff] %v5994_v46  ;;  %v6012_v41 = vmul.f32 0.5, %v9444_v63  ;;  %v9446_v46 = vld [vmem:[#allocation80_spill] sm:$0xff]  ;;  %v6032_v63 = vpop.eup %2962 }
 0x2a7   :  { %9438 = vst [vmem:[#allocation172_spill] sm:$0xff] %v6000_v31  ;;  %v6015_v35 = vmul.f32 0.5, %v9446_v46  ;;  %v6030_v31 = vmul.f32 0.5, %v9454_v50  ;;  %v9456_v46 = vld [vmem:[#allocation6_spill] sm:$0xff]  ;;  %v6044_v42 = vpop.eup %2964 }
 0x2a8   :  { %9440 = vst [vmem:[#allocation175_spill] sm:$0xff] %v6003_v55  ;;  %v6036_v5 = vmul.f32 0.5, %v9456_v46  ;;  %v6056_v46 = vpop.eup %2966 }
 0x2a9   :  { %9442 = vst [vmem:[#allocation177_spill] sm:$0xff] %v6006_v26  ;;  %v9452_v26 = vld [vmem:[#allocation83_spill] sm:$0xff] }
 0x2aa   :  { %9445 = vst [vmem:[#allocation18_spill] sm:$0xff] %v6012_v41  ;;  %v6027_v55 = vmul.f32 0.5, %v9452_v26  ;;  %v6042_v41 = vmul.f32 0.5, %v9460_v60  ;;  %v9462_v26 = vld [vmem:[#allocation228_spill] sm:$0xff] }
 0x2ab   :  { %9447 = vst [vmem:[#allocation180_spill] sm:$0xff] %v6015_v35  ;;  %2976 = vtanh.f32 %v9462_v26  ;;  %v9473_v26 = vld [vmem:[#allocation14_spill] sm:$0xff] }
 0x2ac   :  { %9449 = vst [vmem:[#allocation20_spill] sm:$0xff] %v6018_v10  ;;  %v9458_v10 = vld [vmem:[#allocation7_spill] sm:$0xff]  ;;  %2978 = vtanh.f32 %v5483_v32  ;;  %v9479_v32 = vld [vmem:[#allocation17_spill] sm:$0xff] }
 0x2ad   :  { %9451 = vst [vmem:[#allocation184_spill] sm:$0xff] %v6024_v27  ;;  %v6039_v35 = vmul.f32 0.5, %v9458_v10  ;;  %v9469_v10 = vld [vmem:[#allocation12_spill] sm:$0xff]  ;;  %2980 = vtanh.f32 %v5486_v29  ;;  %v9486_v29 = vld [vmem:[#allocation23_spill] sm:$0xff] }
 0x2ae   :  { %9453 = vst [vmem:[#allocation22_spill] sm:$0xff] %v6027_v55  ;;  %v9463_v55 = vld [vmem:[#allocation9_spill] sm:$0xff]  ;;  %v6060_v60 = vmul.f32 0.5, %v9469_v10  ;;  %v6090_v0 = vmul.f32 0.5, %v9486_v29 }
 0x2af   :  { %9455 = vst [vmem:[#allocation189_spill] sm:$0xff] %v6030_v31  ;;  %v6048_v50 = vmul.f32 0.5, %v9463_v55  ;;  %v9465_v31 = vld [vmem:[#allocation10_spill] sm:$0xff]  ;;  %v6068_v55 = vpop.eup %2968 }
 0x2b0   :  { %9457 = vst [vmem:[#allocation191_spill] sm:$0xff] %v6036_v5  ;;  %v6051_v27 = vmul.f32 0.5, %v9465_v31  ;;  %v6066_v5 = vmul.f32 0.5, %v9473_v26  ;;  %v9475_v31 = vld [vmem:[#allocation15_spill] sm:$0xff]  ;;  %v6080_v10 = vpop.eup %2970 }
 0x2b1   :  { %9459 = vst [vmem:[#allocation209_spill] sm:$0xff] %v6039_v35  ;;  %v6072_v14 = vmul.f32 0.5, %v9475_v31  ;;  %v6092_v31 = vpop.eup %2972 }
 0x2b2   :  { %9461 = vst [vmem:[#allocation211_spill] sm:$0xff] %v6042_v41  ;;  %v9471_v41 = vld [vmem:[#allocation13_spill] sm:$0xff] }
 0x2b3   :  { %9464 = vst [vmem:[#allocation213_spill] sm:$0xff] %v6048_v50  ;;  %v6063_v35 = vmul.f32 0.5, %v9471_v41  ;;  %v6078_v50 = vmul.f32 0.5, %v9479_v32  ;;  %v9481_v41 = vld [vmem:[#allocation230_spill] sm:$0xff] }
 0x2b4   :  { %9466 = vst [vmem:[#allocation215_spill] sm:$0xff] %v6051_v27  ;;  %2982 = vtanh.f32 %v9481_v41  ;;  %v9492_v41 = vld [vmem:[#allocation109_spill] sm:$0xff] }
 0x2b5   :  { %9468 = vst [vmem:[#allocation217_spill] sm:$0xff] %v6054_v2  ;;  %v9477_v2 = vld [vmem:[#allocation16_spill] sm:$0xff]  ;;  %2984 = vtanh.f32 %v5495_v57  ;;  %v9499_v57 = vld [vmem:[#allocation114_spill] sm:$0xff] }
 0x2b6   :  { %9470 = vst [vmem:[#allocation219_spill] sm:$0xff] %v6060_v60  ;;  %v6075_v27 = vmul.f32 0.5, %v9477_v2  ;;  %v9488_v2 = vld [vmem:[#allocation25_spill] sm:$0xff]  ;;  %v6114_v12 = vmul.f32 0.5, %v9499_v57 }
 0x2b7   :  { %9472 = vst [vmem:[#allocation221_spill] sm:$0xff] %v6063_v35  ;;  %v9482_v35 = vld [vmem:[#allocation19_spill] sm:$0xff]  ;;  %v6096_v32 = vmul.f32 0.5, %v9488_v2 }
 0x2b8   :  { %9474 = vst [vmem:[#allocation223_spill] sm:$0xff] %v6066_v5  ;;  %v6084_v26 = vmul.f32 0.5, %v9482_v35  ;;  %v9484_v5 = vld [vmem:[#allocation21_spill] sm:$0xff]  ;;  %v6104_v35 = vpop.eup %2974 }
 0x2b9   :  { %9476 = vst [vmem:[#allocation225_spill] sm:$0xff] %v6072_v14  ;;  %v6087_v60 = vmul.f32 0.5, %v9484_v5  ;;  %v6102_v14 = vmul.f32 0.5, %v9492_v41  ;;  %v9494_v5 = vld [vmem:[#allocation234_spill] sm:$0xff]  ;;  %v6116_v2 = vpop.eup %2976 }
 0x2ba   :  { %9478 = vst [vmem:[#allocation227_spill] sm:$0xff] %v6075_v27  ;;  %2986 = vtanh.f32 %v9494_v5  ;;  %v9506_v5 = vld [vmem:[#allocation41_spill] sm:$0xff] }
 0x2bb   :  { %9480 = vst [vmem:[#allocation229_spill] sm:$0xff] %v6078_v50  ;;  %v9490_v50 = vld [vmem:[#allocation28_spill] sm:$0xff]  ;;  %v6126_v56 = vmul.f32 0.5, %v9506_v5 }
 0x2bc   :  { %9483 = vst [vmem:[#allocation231_spill] sm:$0xff] %v6084_v26  ;;  %v6099_v27 = vmul.f32 0.5, %v9490_v50  ;;  %v9501_v50 = vld [vmem:[#allocation236_spill] sm:$0xff] }
 0x2bd   :  { %9485 = vst [vmem:[#allocation233_spill] sm:$0xff] %v6087_v60  ;;  %v9495_v60 = vld [vmem:[#allocation110_spill] sm:$0xff]  ;;  %2988 = vtanh.f32 %v9501_v50  ;;  %v9512_v50 = vld [vmem:[#allocation47_spill] sm:$0xff] }
 0x2be   :  { %9487 = vst [vmem:[#allocation235_spill] sm:$0xff] %v6090_v0  ;;  %v6108_v29 = vmul.f32 0.5, %v9495_v60  ;;  %v9497_v0 = vld [vmem:[#allocation112_spill] sm:$0xff]  ;;  %v6128_v60 = vpop.eup %2978  ;;  %2990 = vtanh.f32 %v5507_v47  ;;  %v9520_v47 = vld [vmem:[#allocation53_spill] sm:$0xff] }
 0x2bf   :  { %9489 = vst [vmem:[#allocation237_spill] sm:$0xff] %v6096_v32  ;;  %v6111_v26 = vmul.f32 0.5, %v9497_v0  ;;  %v9508_v0 = vld [vmem:[#allocation44_spill] sm:$0xff]  ;;  %v6150_v8 = vmul.f32 0.5, %v9520_v47 }
 0x2c0   :  { %9491 = vst [vmem:[#allocation218_spill] sm:$0xff] %v6099_v27  ;;  %v9502_v27 = vld [vmem:[#allocation116_spill] sm:$0xff]  ;;  %v6132_v57 = vmul.f32 0.5, %v9508_v0 }
 0x2c1   :  { %9493 = vst [vmem:[#allocation239_spill] sm:$0xff] %v6102_v14  ;;  %v6120_v41 = vmul.f32 0.5, %v9502_v27  ;;  %v9504_v14 = vld [vmem:[#allocation39_spill] sm:$0xff]  ;;  %v6140_v27 = vpop.eup %2980 }
 0x2c2   :  { %9496 = vst [vmem:[#allocation36_spill] sm:$0xff] %v6108_v29  ;;  %v6123_v32 = vmul.f32 0.5, %v9504_v14  ;;  %v6138_v29 = vmul.f32 0.5, %v9512_v50  ;;  %v9515_v14 = vld [vmem:[#allocation238_spill] sm:$0xff]  ;;  %v6152_v0 = vpop.eup %2982 }
 0x2c3   :  { %9498 = vst [vmem:[#allocation70_spill] sm:$0xff] %v6111_v26  ;;  %2992 = vtanh.f32 %v9515_v14  ;;  %v9527_v14 = vld [vmem:[#allocation123_spill] sm:$0xff] }
 0x2c4   :  { %9500 = vst [vmem:[#allocation71_spill] sm:$0xff] %v6114_v12  ;;  %v9510_v12 = vld [vmem:[#allocation46_spill] sm:$0xff] }
 0x2c5   :  { %9503 = vst [vmem:[#allocation72_spill] sm:$0xff] %v6120_v41  ;;  %v6135_v26 = vmul.f32 0.5, %v9510_v12  ;;  %v9522_v12 = vld [vmem:[#allocation240_spill] sm:$0xff] }
 0x2c6   :  { %9505 = vst [vmem:[#allocation73_spill] sm:$0xff] %v6123_v32  ;;  %v9516_v32 = vld [vmem:[#allocation49_spill] sm:$0xff]  ;;  %2994 = vtanh.f32 %v9522_v12  ;;  %v9534_v12 = vld [vmem:[#allocation128_spill] sm:$0xff] }
 0x2c7   :  { %9507 = vst [vmem:[#allocation74_spill] sm:$0xff] %v6126_v56  ;;  %v6144_v5 = vmul.f32 0.5, %v9516_v32  ;;  %v9518_v56 = vld [vmem:[#allocation51_spill] sm:$0xff]  ;;  %v6164_v32 = vpop.eup %2984  ;;  %2996 = vtanh.f32 %v5519_v22  ;;  %v9542_v22 = vld [vmem:[#allocation134_spill] sm:$0xff] }
 0x2c8   :  { %9509 = vst [vmem:[#allocation75_spill] sm:$0xff] %v6132_v57  ;;  %v6147_v41 = vmul.f32 0.5, %v9518_v56  ;;  %v9530_v56 = vld [vmem:[#allocation125_spill] sm:$0xff] }
 0x2c9   :  { %9511 = vst [vmem:[#allocation76_spill] sm:$0xff] %v6135_v26  ;;  %v9523_v26 = vld [vmem:[#allocation118_spill] sm:$0xff]  ;;  %v6168_v47 = vmul.f32 0.5, %v9530_v56 }
 0x2ca   :  { %9513 = vst [vmem:[#allocation77_spill] sm:$0xff] %v6138_v29  ;;  %v6156_v50 = vmul.f32 0.5, %v9523_v26  ;;  %v9525_v29 = vld [vmem:[#allocation120_spill] sm:$0xff]  ;;  %v6176_v26 = vpop.eup %2986 }
 0x2cb   :  { %9514 = vst [vmem:[#allocation78_spill] sm:$0xff] %v6140_v27  ;;  %v6159_v57 = vmul.f32 0.5, %v9525_v29  ;;  %v6162_v27 = vmul.f32 0.5, %v9527_v14  ;;  %v9537_v29 = vld [vmem:[#allocation90_spill] sm:$0xff]  ;;  %v6188_v56 = vpop.eup %2988 }
 0x2cc   :  { %9517 = vst [vmem:[#allocation224_spill] sm:$0xff] %v6144_v5  ;;  %v6174_v5 = vmul.f32 0.5, %v9534_v12  ;;  %2998 = vtanh.f32 %v9537_v29  ;;  %v9549_v29 = vld [vmem:[#allocation141_spill] sm:$0xff] }
 0x2cd   :  { %9519 = vst [vmem:[#allocation79_spill] sm:$0xff] %v6147_v41 }
 0x2ce   :  { %9521 = vst [vmem:[#allocation80_spill] sm:$0xff] %v6150_v8  ;;  %v9532_v8 = vld [vmem:[#allocation126_spill] sm:$0xff] }
 0x2cf   :  { %9524 = vst [vmem:[#allocation81_spill] sm:$0xff] %v6156_v50  ;;  %v6171_v41 = vmul.f32 0.5, %v9532_v8  ;;  %v9544_v8 = vld [vmem:[#allocation92_spill] sm:$0xff] }
 0x2d0   :  { %9526 = vst [vmem:[#allocation82_spill] sm:$0xff] %v6159_v57  ;;  %v9538_v57 = vld [vmem:[#allocation130_spill] sm:$0xff]  ;;  %3000 = vtanh.f32 %v9544_v8  ;;  %v9555_v8 = vld [vmem:[#allocation148_spill] sm:$0xff] }
 0x2d1   :  { %9528 = vst [vmem:[#allocation83_spill] sm:$0xff] %v6162_v27  ;;  %v6180_v14 = vmul.f32 0.5, %v9538_v57  ;;  %v9540_v27 = vld [vmem:[#allocation132_spill] sm:$0xff]  ;;  %v6200_v57 = vpop.eup %2990  ;;  %3002 = vtanh.f32 %v5531_v18 }
 0x2d2   :  { %9529 = vst [vmem:[#allocation84_spill] sm:$0xff] %v6164_v32  ;;  %v6183_v50 = vmul.f32 0.5, %v9540_v27  ;;  %v6186_v32 = vmul.f32 0.5, %v9542_v22  ;;  %v9551_v27 = vld [vmem:[#allocation143_spill] sm:$0xff]  ;;  %3004 = vtanh.f32 %v5534_v45  ;;  %v9561_v18 = vld [vmem:[#allocation152_spill] sm:$0xff] }
 0x2d3   :  { %9531 = vst [vmem:[#allocation6_spill] sm:$0xff] %v6168_v47  ;;  %v6204_v22 = vmul.f32 0.5, %v9551_v27  ;;  %3006 = vtanh.f32 %v5537_v21  ;;  %v9567_v45 = vld [vmem:[#allocation195_spill] sm:$0xff]  ;;  %v9573_v21 = vld [vmem:[#allocation198_spill] sm:$0xff] }
 0x2d4   :  { %9533 = vst [vmem:[#allocation7_spill] sm:$0xff] %v6171_v41  ;;  %v9545_v41 = vld [vmem:[#allocation136_spill] sm:$0xff]  ;;  %3008 = vtanh.f32 %v5543_v13 }
 0x2d5   :  { %9535 = vst [vmem:[#allocation8_spill] sm:$0xff] %v6174_v5  ;;  %v6192_v12 = vmul.f32 0.5, %v9545_v41  ;;  %v9547_v5 = vld [vmem:[#allocation139_spill] sm:$0xff]  ;;  %v6212_v41 = vpop.eup %2992  ;;  %3010 = vtanh.f32 %v5546_v30  ;;  %v9580_v13 = vld [vmem:[#allocation200_spill] sm:$0xff] }
 0x2d6   :  { %9536 = vst [vmem:[#allocation228_spill] sm:$0xff] %v6176_v26  ;;  %v6195_v47 = vmul.f32 0.5, %v9547_v5  ;;  %v6198_v26 = vmul.f32 0.5, %v9549_v29  ;;  %v9557_v5 = vld [vmem:[#allocation55_spill] sm:$0xff]  ;;  %v6224_v27 = vpop.eup %2994 }
 0x2d7   :  { %9539 = vst [vmem:[#allocation9_spill] sm:$0xff] %v6180_v14  ;;  %v6210_v14 = vmul.f32 0.5, %v9555_v8  ;;  %v6216_v29 = vmul.f32 0.5, %v9557_v5  ;;  %v6236_v5 = vpop.eup %2996  ;;  %v9587_v30 = vld [vmem:[#allocation203_spill] sm:$0xff] }
 0x2d8   :  { %9541 = vst [vmem:[#allocation10_spill] sm:$0xff] %v6183_v50 }
 0x2d9   :  { %9543 = vst [vmem:[#allocation11_spill] sm:$0xff] %v6186_v32  ;;  %v9553_v32 = vld [vmem:[#allocation145_spill] sm:$0xff] }
 0x2da   :  { %9546 = vst [vmem:[#allocation12_spill] sm:$0xff] %v6192_v12  ;;  %v6207_v50 = vmul.f32 0.5, %v9553_v32  ;;  %v6222_v12 = vmul.f32 0.5, %v9561_v18  ;;  %v9563_v32 = vld [vmem:[#allocation155_spill] sm:$0xff] }
 0x2db   :  { %9548 = vst [vmem:[#allocation13_spill] sm:$0xff] %v6195_v47  ;;  %v6228_v8 = vmul.f32 0.5, %v9563_v32  ;;  %v6248_v32 = vpop.eup %2998 }
 0x2dc   :  { %9550 = vst [vmem:[#allocation14_spill] sm:$0xff] %v6198_v26  ;;  %v9559_v26 = vld [vmem:[#allocation149_spill] sm:$0xff] }
 0x2dd   :  { %9552 = vst [vmem:[#allocation15_spill] sm:$0xff] %v6204_v22  ;;  %v6219_v47 = vmul.f32 0.5, %v9559_v26  ;;  %v6234_v22 = vmul.f32 0.5, %v9567_v45  ;;  %v9569_v26 = vld [vmem:[#allocation196_spill] sm:$0xff] }
 0x2de   :  { %9554 = vst [vmem:[#allocation16_spill] sm:$0xff] %v6207_v50  ;;  %v6240_v18 = vmul.f32 0.5, %v9569_v26  ;;  %v6260_v26 = vpop.eup %3000 }
 0x2df   :  { %9556 = vst [vmem:[#allocation17_spill] sm:$0xff] %v6210_v14  ;;  %v9565_v14 = vld [vmem:[#allocation193_spill] sm:$0xff] }
 0x2e0   :  { %9558 = vst [vmem:[#allocation230_spill] sm:$0xff] %v6216_v29  ;;  %v6231_v50 = vmul.f32 0.5, %v9565_v14  ;;  %v6246_v29 = vmul.f32 0.5, %v9573_v21  ;;  %v9576_v14 = vld [vmem:[#allocation29_spill] sm:$0xff] }
 0x2e1   :  { %9560 = vst [vmem:[#allocation19_spill] sm:$0xff] %v6219_v47  ;;  %v6252_v45 = vmul.f32 0.5, %v9576_v14  ;;  %v6272_v14 = vpop.eup %3002 }
 0x2e2   :  { %9562 = vst [vmem:[#allocation21_spill] sm:$0xff] %v6222_v12  ;;  %v9571_v12 = vld [vmem:[#allocation197_spill] sm:$0xff] }
 0x2e3   :  { %9564 = vst [vmem:[#allocation23_spill] sm:$0xff] %v6228_v8  ;;  %v6243_v47 = vmul.f32 0.5, %v9571_v12  ;;  %v6258_v8 = vmul.f32 0.5, %v9580_v13  ;;  %v9582_v12 = vld [vmem:[#allocation99_spill] sm:$0xff] }
 0x2e4   :  { %9566 = vst [vmem:[#allocation25_spill] sm:$0xff] %v6231_v50  ;;  %3012 = vtanh.f32 %v9582_v12  ;;  %v9593_v12 = vld [vmem:[#allocation206_spill] sm:$0xff] }
 0x2e5   :  { %9568 = vst [vmem:[#allocation28_spill] sm:$0xff] %v6234_v22  ;;  %v9578_v22 = vld [vmem:[#allocation199_spill] sm:$0xff]  ;;  %3014 = vtanh.f32 %v5555_v36  ;;  %v9600_v36 = vld [vmem:[#allocation212_spill] sm:$0xff] }
 0x2e6   :  { %9570 = vst [vmem:[#allocation109_spill] sm:$0xff] %v6240_v18  ;;  %v6255_v50 = vmul.f32 0.5, %v9578_v22  ;;  %v9589_v22 = vld [vmem:[#allocation204_spill] sm:$0xff]  ;;  %3016 = vtanh.f32 %v5558_v24 }
 0x2e7   :  { %9572 = vst [vmem:[#allocation234_spill] sm:$0xff] %v6243_v47  ;;  %v9583_v47 = vld [vmem:[#allocation201_spill] sm:$0xff]  ;;  %v6276_v13 = vmul.f32 0.5, %v9589_v22  ;;  %v9607_v24 = vld [vmem:[#allocation216_spill] sm:$0xff] }
 0x2e8   :  { %9574 = vst [vmem:[#allocation110_spill] sm:$0xff] %v6246_v29  ;;  %v6264_v21 = vmul.f32 0.5, %v9583_v47  ;;  %v9585_v29 = vld [vmem:[#allocation202_spill] sm:$0xff]  ;;  %v6284_v47 = vpop.eup %3004 }
 0x2e9   :  { %9575 = vst [vmem:[#allocation112_spill] sm:$0xff] %v6248_v32  ;;  %v6267_v18 = vmul.f32 0.5, %v9585_v29  ;;  %v6270_v32 = vmul.f32 0.5, %v9587_v30  ;;  %v9596_v29 = vld [vmem:[#allocation32_spill] sm:$0xff]  ;;  %v6296_v22 = vpop.eup %3006 }
 0x2ea   :  { %9577 = vst [vmem:[#allocation114_spill] sm:$0xff] %v6252_v45  ;;  %v6282_v45 = vmul.f32 0.5, %v9593_v12  ;;  %v6288_v30 = vmul.f32 0.5, %v9596_v29  ;;  %v6308_v29 = vpop.eup %3008 }
 0x2eb   :  { %9579 = vst [vmem:[#allocation236_spill] sm:$0xff] %v6255_v50 }
 0x2ec   :  { %9581 = vst [vmem:[#allocation116_spill] sm:$0xff] %v6258_v8  ;;  %v9591_v8 = vld [vmem:[#allocation205_spill] sm:$0xff] }
 0x2ed   :  { %9584 = vst [vmem:[#allocation39_spill] sm:$0xff] %v6264_v21  ;;  %v6279_v50 = vmul.f32 0.5, %v9591_v8  ;;  %v6294_v21 = vmul.f32 0.5, %v9600_v36  ;;  %v9602_v8 = vld [vmem:[#allocation103_spill] sm:$0xff] }
 0x2ee   :  { %9586 = vst [vmem:[#allocation41_spill] sm:$0xff] %v6267_v18  ;;  %3018 = vtanh.f32 %v9602_v8  ;;  %v9614_v8 = vld [vmem:[#allocation226_spill] sm:$0xff] }
 0x2ef   :  { %9588 = vst [vmem:[#allocation44_spill] sm:$0xff] %v6270_v32  ;;  %v9598_v32 = vld [vmem:[#allocation208_spill] sm:$0xff]  ;;  %3020 = vtanh.f32 %v5567_v19  ;;  %v9622_v19 = vld [vmem:[#allocation87_spill] sm:$0xff] }
 0x2f0   :  { %9590 = vst [vmem:[#allocation46_spill] sm:$0xff] %v6276_v13  ;;  %v6291_v18 = vmul.f32 0.5, %v9598_v32  ;;  %v9610_v32 = vld [vmem:[#allocation220_spill] sm:$0xff] }
 0x2f1   :  { %9592 = vst [vmem:[#allocation47_spill] sm:$0xff] %v6279_v50  ;;  %v9603_v50 = vld [vmem:[#allocation34_spill] sm:$0xff]  ;;  %v6312_v36 = vmul.f32 0.5, %v9610_v32 }
 0x2f2   :  { %9594 = vst [vmem:[#allocation238_spill] sm:$0xff] %v6282_v45  ;;  %v6300_v12 = vmul.f32 0.5, %v9603_v50  ;;  %v9605_v45 = vld [vmem:[#allocation214_spill] sm:$0xff]  ;;  %v6320_v50 = vpop.eup %3010 }
 0x2f3   :  { %9595 = vst [vmem:[#allocation49_spill] sm:$0xff] %v6284_v47  ;;  %v6303_v13 = vmul.f32 0.5, %v9605_v45  ;;  %v6306_v47 = vmul.f32 0.5, %v9607_v24  ;;  %v9617_v45 = vld [vmem:[#allocation106_spill] sm:$0xff]  ;;  %v6332_v32 = vpop.eup %3012 }
 0x2f4   :  { %9597 = vst [vmem:[#allocation51_spill] sm:$0xff] %v6288_v30  ;;  %v6318_v30 = vmul.f32 0.5, %v9614_v8  ;;  %3022 = vtanh.f32 %v9617_v45  ;;  %v9627_v45 = vld [vmem:[#allocation97_spill] sm:$0xff] }
 0x2f5   :  { %9599 = vst [vmem:[#allocation53_spill] sm:$0xff] %v6291_v18 }
 0x2f6   :  { %9601 = vst [vmem:[#allocation240_spill] sm:$0xff] %v6294_v21  ;;  %v9612_v21 = vld [vmem:[#allocation222_spill] sm:$0xff] }
 0x2f7   :  { %9604 = vst [vmem:[#allocation118_spill] sm:$0xff] %v6300_v12  ;;  %v6315_v18 = vmul.f32 0.5, %v9612_v21  ;;  %v9624_v21 = vld [vmem:[#allocation108_spill] sm:$0xff] }
 0x2f8   :  { %9606 = vst [vmem:[#allocation120_spill] sm:$0xff] %v6303_v13  ;;  %v9618_v13 = vld [vmem:[#allocation85_spill] sm:$0xff]  ;;  %3024 = vtanh.f32 %v9624_v21  ;;  %v9631_v21 = vld [vmem:[#allocation111_spill] sm:$0xff] }
 0x2f9   :  { %9608 = vst [vmem:[#allocation123_spill] sm:$0xff] %v6306_v47  ;;  %v6324_v24 = vmul.f32 0.5, %v9618_v13  ;;  %v9620_v47 = vld [vmem:[#allocation232_spill] sm:$0xff]  ;;  %v6344_v13 = vpop.eup %3014  ;;  %3026 = vtanh.f32 %v5579_v62  ;;  %v6366_v62 = vmul.f32 0.5, %v5708_v59  ;;  %v6387_v59 = vmul.f32 0.5, %v5768_v48  ;;  %v9637_v48 = vld [vmem:[#allocation38_spill] sm:$0xff] }
 0x2fa   :  { %9609 = vst [vmem:[#allocation125_spill] sm:$0xff] %v6308_v29  ;;  %v6327_v12 = vmul.f32 0.5, %v9620_v47  ;;  %v6330_v29 = vmul.f32 0.5, %v9622_v19  ;;  %v9629_v47 = vld [vmem:[#allocation101_spill] sm:$0xff] }
 0x2fb   :  { %9611 = vst [vmem:[#allocation126_spill] sm:$0xff] %v6312_v36  ;;  %v6348_v19 = vmul.f32 0.5, %v9629_v47 }
 0x2fc   :  { %9613 = vst [vmem:[#allocation128_spill] sm:$0xff] %v6315_v18  ;;  %v9625_v18 = vld [vmem:[#allocation89_spill] sm:$0xff] }
 0x2fd   :  { %9615 = vst [vmem:[#allocation90_spill] sm:$0xff] %v6318_v30  ;;  %v6336_v8 = vmul.f32 0.5, %v9625_v18  ;;  %v9626_v30 = vld [vmem:[#allocation95_spill] sm:$0xff]  ;;  %v6356_v18 = vpop.eup %3016 }
 0x2fe   :  { %9616 = vst [vmem:[#allocation130_spill] sm:$0xff] %v6320_v50  ;;  %v6339_v36 = vmul.f32 0.5, %v9626_v30  ;;  %v6342_v50 = vmul.f32 0.5, %v9627_v45  ;;  %v9633_v30 = vld [vmem:[#allocation113_spill] sm:$0xff]  ;;  %v6360_v45 = vmul.f32 0.5, %v5684_v34  ;;  %v6368_v47 = vpop.eup %3018 }
 0x2ff   :  { %9619 = vst [vmem:[#allocation132_spill] sm:$0xff] %v6324_v24  ;;  %v6354_v24 = vmul.f32 0.5, %v9631_v21  ;;  %3028 = vtanh.f32 %v9633_v30  ;;  %v6372_v21 = vmul.f32 0.5, %v5720_v1  ;;  %v6378_v30 = vmul.f32 0.5, %v5744_v43  ;;  %v6380_v34 = vpop.eup %3020 }
 0x300   :  { %9621 = vst [vmem:[#allocation134_spill] sm:$0xff] %v6327_v12  ;;  %v6392_v1 = vpop.eup %3022  ;;  %v6399_v43 = vmul.f32 0.5, %v5804_v28  ;;  %v9639_v28 = vld [vmem:[#allocation40_spill] sm:$0xff] }
 0x301   :  { %9623 = vst [vmem:[#allocation92_spill] sm:$0xff] %v6330_v29  ;;  %v9630_v29 = vld [vmem:[#allocation105_spill] sm:$0xff] }
 0x302   :  { %9628 = vst [vmem:[#allocation136_spill] sm:$0xff] %v6342_v50  ;;  %v6351_v12 = vmul.f32 0.5, %v9630_v29  ;;  %v6363_v50 = vmul.f32 0.5, %v5696_v61  ;;  %v9634_v29 = vld [vmem:[#allocation115_spill] sm:$0xff]  ;;  %v6384_v61 = vmul.f32 0.5, %v5756_v11  ;;  %v6404_v11 = vpop.eup %3024 }
 0x303   :  { %9632 = vst [vmem:[#allocation139_spill] sm:$0xff] %v6354_v24  ;;  %3030 = vtanh.f32 %v9634_v29  ;;  %v6375_v24 = vmul.f32 0.5, %v5732_v23  ;;  %v6390_v29 = vmul.f32 0.5, %v5780_v4  ;;  %v6396_v23 = vmul.f32 0.5, %v5792_v39  ;;  %v6416_v39 = vpop.eup %3026 }
 0x304   :  { %3032 = vtanh.f32 %v5591_v9  ;;  %v6402_v9 = vmul.f32 0.5, %v5816_v49  ;;  %v6408_v4 = vmul.f32 0.5, %v5828_v53  ;;  %v6420_v49 = vmul.f32 0.5, %v5864_v16 }
 0x305   :  { %9635 = vst [vmem:[#allocation141_spill] sm:$0xff] %v6390_v29  ;;  %3034 = vtanh.f32 %v5594_v37  ;;  %v6411_v29 = vmul.f32 0.5, %v5840_v33  ;;  %v6414_v37 = vmul.f32 0.5, %v5852_v38  ;;  %v6428_v53 = vpop.eup %3028  ;;  %v9641_v33 = vld [vmem:[#allocation42_spill] sm:$0xff]  ;;  %v6432_v38 = vmul.f32 0.5, %v5900_v52 }
 0x306   :  { %9636 = vst [vmem:[#allocation143_spill] sm:$0xff] %v6402_v9  ;;  %3036 = vtanh.f32 %v9637_v48  ;;  %v6423_v9 = vmul.f32 0.5, %v5876_v3  ;;  %v6426_v48 = vmul.f32 0.5, %v5888_v25  ;;  %v9643_v3 = vld [vmem:[#allocation43_spill] sm:$0xff]  ;;  %v6444_v25 = vmul.f32 0.5, %v5936_v17 }
 0x307   :  { %9638 = vst [vmem:[#allocation145_spill] sm:$0xff] %v6414_v37  ;;  %3038 = vtanh.f32 %v9639_v28  ;;  %v6435_v37 = vmul.f32 0.5, %v5912_v54  ;;  %v6438_v28 = vmul.f32 0.5, %v5924_v15  ;;  %v9645_v54 = vld [vmem:[#allocation45_spill] sm:$0xff]  ;;  %v6456_v15 = vmul.f32 0.5, %v5972_v44 }
 0x308   :  { %9640 = vst [vmem:[#allocation148_spill] sm:$0xff] %v6426_v48  ;;  %3040 = vtanh.f32 %v9641_v33  ;;  %v6447_v48 = vmul.f32 0.5, %v5948_v6  ;;  %v6450_v33 = vmul.f32 0.5, %v5960_v7  ;;  %v9647_v6 = vld [vmem:[#allocation48_spill] sm:$0xff]  ;;  %v6468_v7 = vmul.f32 0.5, %v6008_v20 }
 0x309   :  { %9642 = vst [vmem:[#allocation55_spill] sm:$0xff] %v6438_v28  ;;  %v6440_v16 = vpop.eup %3030  ;;  %3042 = vtanh.f32 %v9643_v3  ;;  %v6459_v28 = vmul.f32 0.5, %v5984_v51  ;;  %v6462_v3 = vmul.f32 0.5, %v5996_v40  ;;  %v6478_v51 = vmul.f32 0.5, %v6044_v42 }
 0x30a   :  { %9644 = vst [vmem:[#allocation149_spill] sm:$0xff] %v6450_v33  ;;  %v6452_v52 = vpop.eup %3032  ;;  %3044 = vtanh.f32 %v9645_v54  ;;  %v6471_v33 = vmul.f32 0.5, %v6020_v58  ;;  %v6474_v54 = vmul.f32 0.5, %v6032_v63  ;;  %v6481_v40 = vmul.f32 0.5, %v6056_v46 }
 0x30b   :  { %9646 = vst [vmem:[#allocation152_spill] sm:$0xff] %v6456_v15  ;;  %v6464_v17 = vpop.eup %3034  ;;  %3046 = vtanh.f32 %v9647_v6  ;;  %v9649_v15 = vld [vmem:[#allocation50_spill] sm:$0xff]  ;;  %v6484_v6 = vmul.f32 0.5, %v6068_v55  ;;  %v6488_v58 = vmul.f32 0.5, %v6080_v10  ;;  %v6491_v63 = vmul.f32 0.5, %v6092_v31 }
 0x30c   :  { %9648 = vst [vmem:[#allocation155_spill] sm:$0xff] %v6468_v7  ;;  %v3037_v44 = vpop.eup %3036  ;;  %3048 = vtanh.f32 %v9649_v15  ;;  %v9652_v7 = vld [vmem:[#allocation52_spill] sm:$0xff]  ;;  %v6494_v15 = vmul.f32 0.5, %v6104_v35  ;;  %v6498_v46 = vmul.f32 0.5, %v6116_v2  ;;  %v6501_v55 = vmul.f32 0.5, %v6128_v60 }
 0x30d   :  { %9650 = vst [vmem:[#allocation193_spill] sm:$0xff] %v6478_v51  ;;  %v3039_v20 = vpop.eup %3038  ;;  %3050 = vtanh.f32 %v9652_v7  ;;  %v9656_v51 = vld [vmem:[#allocation117_spill] sm:$0xff]  ;;  %v6508_v31 = vmul.f32 0.5, %v6152_v0  ;;  %v9661_v35 = vld [vmem:[#allocation84_spill] sm:$0xff]  ;;  %v6518_v60 = vmul.f32 0.5, %v6188_v56 }
 0x30e   :  { %9651 = vst [vmem:[#allocation195_spill] sm:$0xff] %v6484_v6  ;;  %v3041_v42 = vpop.eup %3040  ;;  %3052 = vtanh.f32 %v9656_v51  ;;  %v9658_v6 = vld [vmem:[#allocation78_spill] sm:$0xff] }
 0x30f   :  { %9653 = vst [vmem:[#allocation196_spill] sm:$0xff] %v6488_v58  ;;  %v6504_v7 = vmul.f32 0.5, %v9658_v6  ;;  %v3043_v10 = vpop.eup %3042  ;;  %v9659_v58 = vld [vmem:[#allocation119_spill] sm:$0xff]  ;;  %v6521_v6 = vmul.f32 0.5, %v6200_v57  ;;  %v6538_v57 = vmul.f32 0.5, %v6260_v26 }
 0x310   :  { %9654 = vst [vmem:[#allocation197_spill] sm:$0xff] %v6491_v63  ;;  %3054 = vtanh.f32 %v9659_v58  ;;  %v9662_v63 = vld [vmem:[#allocation228_spill] sm:$0xff]  ;;  %v3045_v2 = vpop.eup %3044  ;;  %v6524_v58 = vmul.f32 0.5, %v6212_v41  ;;  %v6541_v41 = vmul.f32 0.5, %v6272_v14  ;;  %v6558_v14 = vmul.f32 0.5, %v6332_v32 }
 0x311   :  { %9655 = vst [vmem:[#allocation198_spill] sm:$0xff] %v6494_v15  ;;  %v6511_v15 = vmul.f32 0.5, %v9661_v35  ;;  %v6514_v51 = vmul.f32 0.5, %v9662_v63  ;;  %v3047_v0 = vpop.eup %3046  ;;  %v6528_v35 = vmul.f32 0.5, %v6224_v27  ;;  %v6531_v63 = vmul.f32 0.5, %v6236_v5 }
 0x312   :  { %9657 = vst [vmem:[#allocation29_spill] sm:$0xff] %v6498_v46  ;;  %v9664_v46 = vld [vmem:[#allocation121_spill] sm:$0xff]  ;;  %v3049_v56 = vpop.eup %3048  ;;  %v6548_v5 = vmul.f32 0.5, %v6296_v22 }
 0x313   :  { %9660 = vst [vmem:[#allocation199_spill] sm:$0xff] %v6508_v31  ;;  %3056 = vtanh.f32 %v9664_v46  ;;  %v9667_v31 = vld [vmem:[#allocation122_spill] sm:$0xff]  ;;  %v3051_v27 = vpop.eup %3050 }
 0x314   :  { %9663 = vst [vmem:[#allocation200_spill] sm:$0xff] %v6514_v51  ;;  %3058 = vtanh.f32 %v9667_v31  ;;  %v9670_v51 = vld [vmem:[#allocation112_spill] sm:$0xff]  ;;  %v3053_v26 = vpop.eup %3052 }
 0x315   :  { %9665 = vst [vmem:[#allocation99_spill] sm:$0xff] %v6518_v60  ;;  %v6534_v46 = vmul.f32 0.5, %v9670_v51  ;;  %v9672_v60 = vld [vmem:[#allocation124_spill] sm:$0xff]  ;;  %v9677_v51 = vld [vmem:[#allocation125_spill] sm:$0xff] }
 0x316   :  { %9666 = vst [vmem:[#allocation201_spill] sm:$0xff] %v6524_v58  ;;  %3060 = vtanh.f32 %v9672_v60  ;;  %v9674_v58 = vld [vmem:[#allocation49_spill] sm:$0xff]  ;;  %v3055_v22 = vpop.eup %3054 }
 0x317   :  { %9668 = vst [vmem:[#allocation202_spill] sm:$0xff] %v6528_v35  ;;  %v6544_v31 = vmul.f32 0.5, %v9674_v58  ;;  %v9675_v35 = vld [vmem:[#allocation127_spill] sm:$0xff]  ;;  %v6561_v58 = vmul.f32 0.5, %v6344_v13  ;;  %v6578_v13 = vmul.f32 0.5, %v6404_v11 }
 0x318   :  { %9669 = vst [vmem:[#allocation203_spill] sm:$0xff] %v6531_v63  ;;  %3062 = vtanh.f32 %v9675_v35  ;;  %v9678_v63 = vld [vmem:[#allocation130_spill] sm:$0xff]  ;;  %v6564_v35 = vmul.f32 0.5, %v6356_v18  ;;  %v6581_v18 = vmul.f32 0.5, %v6416_v39  ;;  %v6597_v39 = vmul.f32 0.5, %v3037_v44 }
 0x319   :  { %9671 = vst [vmem:[#allocation204_spill] sm:$0xff] %v6534_v46  ;;  %v6551_v46 = vmul.f32 0.5, %v9677_v51  ;;  %v6554_v60 = vmul.f32 0.5, %v9678_v63  ;;  %v6568_v51 = vmul.f32 0.5, %v6368_v47  ;;  %v6571_v63 = vmul.f32 0.5, %v6380_v34  ;;  %v3057_v32 = vpop.eup %3056 }
 0x31a   :  { %9673 = vst [vmem:[#allocation205_spill] sm:$0xff] %v6538_v57  ;;  %v9679_v57 = vld [vmem:[#allocation129_spill] sm:$0xff]  ;;  %v3059_v47 = vpop.eup %3058  ;;  %v6588_v34 = vmul.f32 0.5, %v6440_v16  ;;  %v6604_v16 = vmul.f32 0.5, %v3043_v10  ;;  %v6613_v44 = vmul.f32 0.5, %v3051_v27  ;;  %v6620_v10 = vmul.f32 0.5, %v3057_v32 }
 0x31b   :  { %9676 = vst [vmem:[#allocation206_spill] sm:$0xff] %v6548_v5  ;;  %3064 = vtanh.f32 %v9679_v57  ;;  %v9681_v5 = vld [vmem:[#allocation131_spill] sm:$0xff]  ;;  %v6574_v57 = vmul.f32 0.5, %v6392_v1  ;;  %v6591_v1 = vmul.f32 0.5, %v6452_v52  ;;  %v6608_v52 = vmul.f32 0.5, %v3047_v0 }
 0x31c   :  { %9680 = vst [vmem:[#allocation32_spill] sm:$0xff] %v6558_v14  ;;  %3066 = vtanh.f32 %v9681_v5  ;;  %v9683_v14 = vld [vmem:[#allocation133_spill] sm:$0xff]  ;;  %v6584_v5 = vmul.f32 0.5, %v6428_v53  ;;  %v3061_v11 = vpop.eup %3060  ;;  %v6601_v53 = vmul.f32 0.5, %v3041_v42 }
 0x31d   :  { %9682 = vst [vmem:[#allocation208_spill] sm:$0xff] %v6568_v51  ;;  %3068 = vtanh.f32 %v9683_v14  ;;  %v9687_v51 = vld [vmem:[#allocation135_spill] sm:$0xff]  ;;  %v6594_v14 = vmul.f32 0.5, %v6464_v17 }
 0x31e   :  { %9684 = vst [vmem:[#allocation212_spill] sm:$0xff] %v6578_v13  ;;  %3070 = vtanh.f32 %v9687_v51  ;;  %v9691_v13 = vld [vmem:[#allocation137_spill] sm:$0xff]  ;;  %v9693_v51 = vld [vmem:[#allocation138_spill] sm:$0xff] }
 0x31f   :  { %9685 = vst [vmem:[#allocation103_spill] sm:$0xff] %v6581_v18  ;;  %3072 = vtanh.f32 %v9691_v13  ;;  %v6599_v18 = vmul.f32 0.5, %v3039_v20  ;;  %v6615_v20 = vmul.f32 0.5, %v3053_v26  ;;  %v9697_v13 = vld [vmem:[#allocation142_spill] sm:$0xff] }
 0x320   :  { %9686 = vst [vmem:[#allocation34_spill] sm:$0xff] %v6584_v5  ;;  %v3063_v5 = vpop.eup %3062  ;;  %3074 = vtanh.f32 %v9693_v51  ;;  %v6624_v51 = vmul.f32 0.5, %v3061_v11 }
 0x321   :  { %9688 = vst [vmem:[#allocation214_spill] sm:$0xff] %v6588_v34  ;;  %v6606_v34 = vmul.f32 0.5, %v3045_v2  ;;  %v3065_v17 = vpop.eup %3064  ;;  %v6622_v2 = vmul.f32 0.5, %v3059_v47  ;;  %v9706_v47 = vld [vmem:[#allocation66_spill] sm:$0xff] }
 0x322   :  { %9689 = vst [vmem:[#allocation216_spill] sm:$0xff] %v6591_v1  ;;  %v6611_v1 = vmul.f32 0.5, %v3049_v56  ;;  %v3067_v42 = vpop.eup %3066  ;;  %v6628_v56 = vmul.f32 0.5, %v3065_v17 }
 0x323   :  { %9690 = vst [vmem:[#allocation220_spill] sm:$0xff] %v6594_v14  ;;  %v9695_v14 = vld [vmem:[#allocation140_spill] sm:$0xff]  ;;  %v3069_v0 = vpop.eup %3068  ;;  %v6630_v27 = vmul.f32 0.5, %v3067_v42 }
 0x324   :  { %9692 = vst [vmem:[#allocation222_spill] sm:$0xff] %v6601_v53  ;;  %3076 = vtanh.f32 %v9695_v14  ;;  %v6618_v53 = vmul.f32 0.5, %v3055_v22  ;;  %v3071_v26 = vpop.eup %3070  ;;  %v6632_v14 = vmul.f32 0.5, %v3069_v0  ;;  %v9704_v22 = vld [vmem:[#allocation65_spill] sm:$0xff]  ;;  %v9711_v42 = vld [vmem:[#allocation68_spill] sm:$0xff] }
 0x325   :  { %9694 = vst [vmem:[#allocation226_spill] sm:$0xff] %v6608_v52  ;;  %3078 = vtanh.f32 %v9697_v13  ;;  %v6626_v52 = vmul.f32 0.5, %v3063_v5  ;;  %v6638_v32 = vadd.f32 0.5, %v9704_v22  ;;  %v3073_v11 = vpop.eup %3072  ;;  %v9709_v5 = vld [vmem:[#allocation67_spill] sm:$0xff]  ;;  %v9713_v0 = vld [vmem:[#allocation69_spill] sm:$0xff]  ;;  %v9716_v22 = vld [vmem:[#allocation30_spill] sm:$0xff] }
 0x326   :  { %9696 = vst [vmem:[#allocation106_spill] sm:$0xff] %v6615_v20  ;;  %v9702_v20 = vld [vmem:[#allocation64_spill] sm:$0xff]  ;;  %v6646_v17 = vadd.f32 0.5, %v9709_v5 }
 0x327   :  { %9698 = vst [vmem:[#allocation85_spill] sm:$0xff] %v6622_v2  ;;  %v6635_v13 = vadd.f32 0.5, %v9702_v20  ;;  %v6641_v2 = vadd.f32 0.5, %v9706_v47  ;;  %v3075_v20 = vpop.eup %3074  ;;  %v9718_v47 = vld [vmem:[#allocation31_spill] sm:$0xff] }
 0x328   :  { %9699 = vst [vmem:[#allocation232_spill] sm:$0xff] %v6624_v51  ;;  %v6643_v51 = vmul.f32 0.5, %v3071_v26  ;;  %v9720_v26 = vld [vmem:[#allocation207_spill] sm:$0xff] }
 0x329   :  { %9700 = vst [vmem:[#allocation87_spill] sm:$0xff] %v6630_v27  ;;  %v6649_v27 = vadd.f32 0.5, %v9711_v42  ;;  %v9723_v42 = vld [vmem:[#allocation33_spill] sm:$0xff] }
 0x32a   :  { %9701 = vst [vmem:[#allocation108_spill] sm:$0xff] %v6632_v14  ;;  %v6652_v14 = vadd.f32 0.5, %v9713_v0  ;;  %v3077_v5 = vpop.eup %3076  ;;  %v9725_v0 = vld [vmem:[#allocation35_spill] sm:$0xff] }
 0x32b   :  { %9703 = vst [vmem:[#allocation89_spill] sm:$0xff] %v6635_v13  ;;  %v6654_v13 = vmul.f32 0.5, %v3073_v11  ;;  %v9727_v11 = vld [vmem:[#allocation37_spill] sm:$0xff] }
 0x32c   :  { %9705 = vst [vmem:[#allocation95_spill] sm:$0xff] %v6638_v32  ;;  %v6657_v32 = vadd.f32 0.5, %v9716_v22  ;;  %v3079_v22 = vpop.eup %3078 }
 0x32d   :  { %9707 = vst [vmem:[#allocation97_spill] sm:$0xff] %v6641_v2  ;;  %v6660_v2 = vadd.f32 0.5, %v9718_v47  ;;  %v9730_v47 = vld [vmem:[#allocation86_spill] sm:$0xff] }
 0x32e   :  { %9708 = vst [vmem:[#allocation101_spill] sm:$0xff] %v6643_v51  ;;  %v6663_v51 = vadd.f32 0.5, %v9720_v26  ;;  %v9732_v26 = vld [vmem:[#allocation88_spill] sm:$0xff] }
 0x32f   :  { %9710 = vst [vmem:[#allocation105_spill] sm:$0xff] %v6646_v17  ;;  %v6665_v17 = vmul.f32 0.5, %v3075_v20  ;;  %v9734_v20 = vld [vmem:[#allocation91_spill] sm:$0xff] }
 0x330   :  { %9712 = vst [vmem:[#allocation111_spill] sm:$0xff] %v6649_v27  ;;  %v6668_v27 = vadd.f32 0.5, %v9723_v42  ;;  %v6687_v42 = vmul.f32 0.5, %v3079_v22  ;;  %v9748_v22 = vld [vmem:[#allocation57_spill] sm:$0xff] }
 0x331   :  { %9714 = vst [vmem:[#allocation113_spill] sm:$0xff] %v6652_v14  ;;  %v6671_v14 = vadd.f32 0.5, %v9725_v0 }
 0x332   :  { %9715 = vst [vmem:[#allocation115_spill] sm:$0xff] %v6654_v13  ;;  %v6674_v13 = vadd.f32 0.5, %v9727_v11 }
 0x333   :  { %9717 = vst [vmem:[#allocation38_spill] sm:$0xff] %v6657_v32  ;;  %v6676_v32 = vmul.f32 0.5, %v3077_v5 }
 0x334   :  { %9719 = vst [vmem:[#allocation40_spill] sm:$0xff] %v6660_v2  ;;  %v6679_v2 = vadd.f32 0.5, %v9730_v47 }
 0x335   :  { %9721 = vst [vmem:[#allocation42_spill] sm:$0xff] %v6663_v51  ;;  %v6682_v51 = vadd.f32 0.5, %v9732_v26 }
 0x336   :  { %9722 = vst [vmem:[#allocation43_spill] sm:$0xff] %v6665_v17  ;;  %v6685_v17 = vadd.f32 0.5, %v9734_v20 }
 0x337   :  { %9724 = vst [vmem:[#allocation45_spill] sm:$0xff] %v6668_v27  ;;  %v9736_v27 = vld [vmem:[#allocation210_spill] sm:$0xff] }
 0x338   :  { %9726 = vst [vmem:[#allocation48_spill] sm:$0xff] %v6671_v14  ;;  %v6690_v0 = vadd.f32 0.5, %v9736_v27  ;;  %v9738_v14 = vld [vmem:[#allocation144_spill] sm:$0xff]  ;;  %v9750_v27 = vld [vmem:[#allocation150_spill] sm:$0xff] }
 0x339   :  { %9728 = vst [vmem:[#allocation50_spill] sm:$0xff] %v6674_v13  ;;  %v6693_v11 = vadd.f32 0.5, %v9738_v14  ;;  %v9740_v13 = vld [vmem:[#allocation146_spill] sm:$0xff]  ;;  %v9752_v14 = vld [vmem:[#allocation151_spill] sm:$0xff] }
 0x33a   :  { %9729 = vst [vmem:[#allocation52_spill] sm:$0xff] %v6676_v32  ;;  %v6696_v5 = vadd.f32 0.5, %v9740_v13  ;;  %v9742_v32 = vld [vmem:[#allocation147_spill] sm:$0xff]  ;;  %v9754_v13 = vld [vmem:[#allocation153_spill] sm:$0xff] }
 0x33b   :  { %9731 = vst [vmem:[#allocation117_spill] sm:$0xff] %v6679_v2  ;;  %v6699_v47 = vadd.f32 0.5, %v9742_v32  ;;  %v9744_v2 = vld [vmem:[#allocation54_spill] sm:$0xff] }
 0x33c   :  { %9733 = vst [vmem:[#allocation78_spill] sm:$0xff] %v6682_v51  ;;  %v6702_v26 = vadd.f32 0.5, %v9744_v2  ;;  %v9746_v51 = vld [vmem:[#allocation56_spill] sm:$0xff]  ;;  %v9756_v32 = vld [vmem:[#allocation154_spill] sm:$0xff] }
 0x33d   :  { %9735 = vst [vmem:[#allocation119_spill] sm:$0xff] %v6685_v17  ;;  %v6705_v20 = vadd.f32 0.5, %v9746_v51  ;;  %v6708_v17 = vadd.f32 0.5, %v9748_v22  ;;  %v9758_v2 = vld [vmem:[#allocation156_spill] sm:$0xff]  ;;  %v9760_v51 = vld [vmem:[#allocation157_spill] sm:$0xff]  ;;  %v9762_v22 = vld [vmem:[#allocation159_spill] sm:$0xff] }
 0x33e   :  { %9737 = vst [vmem:[#allocation84_spill] sm:$0xff] %v6690_v0  ;;  %v6711_v0 = vadd.f32 0.5, %v9750_v27  ;;  %v9764_v27 = vld [vmem:[#allocation161_spill] sm:$0xff] }
 0x33f   :  { %9739 = vst [vmem:[#allocation228_spill] sm:$0xff] %v6693_v11  ;;  %v6714_v11 = vadd.f32 0.5, %v9752_v14  ;;  %v9766_v14 = vld [vmem:[#allocation163_spill] sm:$0xff] }
 0x340   :  { %9741 = vst [vmem:[#allocation121_spill] sm:$0xff] %v6696_v5  ;;  %v6717_v5 = vadd.f32 0.5, %v9754_v13  ;;  %v9768_v13 = vld [vmem:[#allocation164_spill] sm:$0xff] }
 0x341   :  { %9743 = vst [vmem:[#allocation122_spill] sm:$0xff] %v6699_v47  ;;  %v6720_v47 = vadd.f32 0.5, %v9756_v32  ;;  %v9770_v32 = vld [vmem:[#allocation158_spill] sm:$0xff] }
 0x342   :  { %9745 = vst [vmem:[#allocation112_spill] sm:$0xff] %v6702_v26  ;;  %v6723_v26 = vadd.f32 0.5, %v9758_v2  ;;  %v9772_v2 = vld [vmem:[#allocation160_spill] sm:$0xff] }
 0x343   :  { %9747 = vst [vmem:[#allocation124_spill] sm:$0xff] %v6705_v20  ;;  %v6726_v20 = vadd.f32 0.5, %v9760_v51  ;;  %v9774_v51 = vld [vmem:[#allocation162_spill] sm:$0xff] }
 0x344   :  { %9749 = vst [vmem:[#allocation49_spill] sm:$0xff] %v6708_v17  ;;  %v6729_v17 = vadd.f32 0.5, %v9762_v22  ;;  %v9776_v22 = vld [vmem:[#allocation165_spill] sm:$0xff] }
 0x345   :  { %9751 = vst [vmem:[#allocation127_spill] sm:$0xff] %v6711_v0  ;;  %v6732_v0 = vadd.f32 0.5, %v9764_v27  ;;  %v9778_v27 = vld [vmem:[#allocation167_spill] sm:$0xff] }
 0x346   :  { %9753 = vst [vmem:[#allocation125_spill] sm:$0xff] %v6714_v11  ;;  %v6735_v11 = vadd.f32 0.5, %v9766_v14  ;;  %v9780_v14 = vld [vmem:[#allocation169_spill] sm:$0xff] }
 0x347   :  { %9755 = vst [vmem:[#allocation130_spill] sm:$0xff] %v6717_v5  ;;  %v6738_v5 = vadd.f32 0.5, %v9768_v13  ;;  %v9782_v13 = vld [vmem:[#allocation172_spill] sm:$0xff] }
 0x348   :  { %9757 = vst [vmem:[#allocation129_spill] sm:$0xff] %v6720_v47  ;;  %v6741_v47 = vadd.f32 0.5, %v9770_v32  ;;  %v9784_v32 = vld [vmem:[#allocation175_spill] sm:$0xff] }
 0x349   :  { %9759 = vst [vmem:[#allocation131_spill] sm:$0xff] %v6723_v26  ;;  %v6744_v26 = vadd.f32 0.5, %v9772_v2  ;;  %v9786_v2 = vld [vmem:[#allocation177_spill] sm:$0xff] }
 0x34a   :  { %9761 = vst [vmem:[#allocation133_spill] sm:$0xff] %v6726_v20  ;;  %v6747_v20 = vadd.f32 0.5, %v9774_v51  ;;  %v9788_v51 = vld [vmem:[#allocation18_spill] sm:$0xff] }
 0x34b   :  { %9763 = vst [vmem:[#allocation135_spill] sm:$0xff] %v6729_v17  ;;  %v6750_v17 = vadd.f32 0.5, %v9776_v22  ;;  %v9790_v22 = vld [vmem:[#allocation180_spill] sm:$0xff] }
 0x34c   :  { %9765 = vst [vmem:[#allocation137_spill] sm:$0xff] %v6732_v0  ;;  %v6753_v0 = vadd.f32 0.5, %v9778_v27  ;;  %v9792_v27 = vld [vmem:[#allocation20_spill] sm:$0xff] }
 0x34d   :  { %9767 = vst [vmem:[#allocation138_spill] sm:$0xff] %v6735_v11  ;;  %v6756_v11 = vadd.f32 0.5, %v9780_v14  ;;  %v9794_v14 = vld [vmem:[#allocation184_spill] sm:$0xff] }
 0x34e   :  { %9769 = vst [vmem:[#allocation140_spill] sm:$0xff] %v6738_v5  ;;  %v6759_v5 = vadd.f32 0.5, %v9782_v13  ;;  %v9796_v13 = vld [vmem:[#allocation22_spill] sm:$0xff] }
 0x34f   :  { %9771 = vst [vmem:[#allocation142_spill] sm:$0xff] %v6741_v47  ;;  %v6762_v47 = vadd.f32 0.5, %v9784_v32  ;;  %v9798_v32 = vld [vmem:[#allocation189_spill] sm:$0xff] }
 0x350   :  { %9773 = vst [vmem:[#allocation64_spill] sm:$0xff] %v6744_v26  ;;  %v6765_v26 = vadd.f32 0.5, %v9786_v2  ;;  %v9800_v2 = vld [vmem:[#allocation191_spill] sm:$0xff] }
 0x351   :  { %9775 = vst [vmem:[#allocation65_spill] sm:$0xff] %v6747_v20  ;;  %v6768_v20 = vadd.f32 0.5, %v9788_v51  ;;  %v9802_v51 = vld [vmem:[#allocation209_spill] sm:$0xff] }
 0x352   :  { %9777 = vst [vmem:[#allocation66_spill] sm:$0xff] %v6750_v17  ;;  %v6771_v17 = vadd.f32 0.5, %v9790_v22  ;;  %v9804_v22 = vld [vmem:[#allocation211_spill] sm:$0xff] }
 0x353   :  { %9779 = vst [vmem:[#allocation67_spill] sm:$0xff] %v6753_v0  ;;  %v6774_v0 = vadd.f32 0.5, %v9792_v27  ;;  %v9806_v27 = vld [vmem:[#allocation213_spill] sm:$0xff] }
 0x354   :  { %9781 = vst [vmem:[#allocation68_spill] sm:$0xff] %v6756_v11  ;;  %v6777_v11 = vadd.f32 0.5, %v9794_v14  ;;  %v9808_v14 = vld [vmem:[#allocation215_spill] sm:$0xff] }
 0x355   :  { %9783 = vst [vmem:[#allocation69_spill] sm:$0xff] %v6759_v5  ;;  %v6780_v5 = vadd.f32 0.5, %v9796_v13  ;;  %v9810_v13 = vld [vmem:[#allocation217_spill] sm:$0xff] }
 0x356   :  { %9785 = vst [vmem:[#allocation30_spill] sm:$0xff] %v6762_v47  ;;  %v6783_v47 = vadd.f32 0.5, %v9798_v32  ;;  %v9812_v32 = vld [vmem:[#allocation219_spill] sm:$0xff] }
 0x357   :  { %9787 = vst [vmem:[#allocation31_spill] sm:$0xff] %v6765_v26  ;;  %v6786_v26 = vadd.f32 0.5, %v9800_v2  ;;  %v9814_v2 = vld [vmem:[#allocation221_spill] sm:$0xff] }
 0x358   :  { %9789 = vst [vmem:[#allocation207_spill] sm:$0xff] %v6768_v20  ;;  %v6789_v20 = vadd.f32 0.5, %v9802_v51  ;;  %v9816_v51 = vld [vmem:[#allocation223_spill] sm:$0xff] }
 0x359   :  { %9791 = vst [vmem:[#allocation33_spill] sm:$0xff] %v6771_v17  ;;  %v6792_v17 = vadd.f32 0.5, %v9804_v22  ;;  %v9818_v22 = vld [vmem:[#allocation225_spill] sm:$0xff] }
 0x35a   :  { %9793 = vst [vmem:[#allocation35_spill] sm:$0xff] %v6774_v0  ;;  %v6795_v0 = vadd.f32 0.5, %v9806_v27  ;;  %v9820_v27 = vld [vmem:[#allocation227_spill] sm:$0xff] }
 0x35b   :  { %9795 = vst [vmem:[#allocation37_spill] sm:$0xff] %v6777_v11  ;;  %v6798_v11 = vadd.f32 0.5, %v9808_v14  ;;  %v9822_v14 = vld [vmem:[#allocation229_spill] sm:$0xff] }
 0x35c   :  { %9797 = vst [vmem:[#allocation86_spill] sm:$0xff] %v6780_v5  ;;  %v6801_v5 = vadd.f32 0.5, %v9810_v13  ;;  %v9824_v13 = vld [vmem:[#allocation231_spill] sm:$0xff] }
 0x35d   :  { %9799 = vst [vmem:[#allocation88_spill] sm:$0xff] %v6783_v47  ;;  %v6804_v47 = vadd.f32 0.5, %v9812_v32  ;;  %v9826_v32 = vld [vmem:[#allocation233_spill] sm:$0xff] }
 0x35e   :  { %9801 = vst [vmem:[#allocation91_spill] sm:$0xff] %v6786_v26  ;;  %v6807_v26 = vadd.f32 0.5, %v9814_v2  ;;  %v9828_v2 = vld [vmem:[#allocation235_spill] sm:$0xff] }
 0x35f   :  { %9803 = vst [vmem:[#allocation210_spill] sm:$0xff] %v6789_v20  ;;  %v6810_v20 = vadd.f32 0.5, %v9816_v51  ;;  %v9830_v51 = vld [vmem:[#allocation237_spill] sm:$0xff] }
 0x360   :  { %9805 = vst [vmem:[#allocation144_spill] sm:$0xff] %v6792_v17  ;;  %v6813_v17 = vadd.f32 0.5, %v9818_v22  ;;  %v9832_v22 = vld [vmem:[#allocation218_spill] sm:$0xff] }
 0x361   :  { %9807 = vst [vmem:[#allocation146_spill] sm:$0xff] %v6795_v0  ;;  %v6816_v0 = vadd.f32 0.5, %v9820_v27  ;;  %v9834_v27 = vld [vmem:[#allocation166_spill] sm:$0xff] }
 0x362   :  { %9809 = vst [vmem:[#allocation147_spill] sm:$0xff] %v6798_v11  ;;  %v6819_v11 = vadd.f32 0.5, %v9822_v14  ;;  %v9836_v14 = vld [vmem:[#allocation168_spill] sm:$0xff] }
 0x363   :  { %9811 = vst [vmem:[#allocation54_spill] sm:$0xff] %v6801_v5  ;;  %v6822_v5 = vadd.f32 0.5, %v9824_v13  ;;  %v9838_v13 = vld [vmem:[#allocation170_spill] sm:$0xff] }
 0x364   :  { %9813 = vst [vmem:[#allocation56_spill] sm:$0xff] %v6804_v47  ;;  %v6825_v47 = vadd.f32 0.5, %v9826_v32  ;;  %v9840_v32 = vld [vmem:[#allocation171_spill] sm:$0xff] }
 0x365   :  { %9815 = vst [vmem:[#allocation57_spill] sm:$0xff] %v6807_v26  ;;  %v6828_v26 = vadd.f32 0.5, %v9828_v2  ;;  %v9842_v2 = vld [vmem:[#allocation173_spill] sm:$0xff] }
 0x366   :  { %9817 = vst [vmem:[#allocation150_spill] sm:$0xff] %v6810_v20  ;;  %v6831_v20 = vadd.f32 0.5, %v9830_v51  ;;  %v9844_v51 = vld [vmem:[#allocation174_spill] sm:$0xff] }
 0x367   :  { %9819 = vst [vmem:[#allocation151_spill] sm:$0xff] %v6813_v17  ;;  %v6834_v17 = vadd.f32 0.5, %v9832_v22  ;;  %v9846_v22 = vld [vmem:[#allocation176_spill] sm:$0xff] }
 0x368   :  { %9821 = vst [vmem:[#allocation153_spill] sm:$0xff] %v6816_v0  ;;  %v6837_v0 = vadd.f32 0.5, %v9834_v27  ;;  %v9848_v27 = vld [vmem:[#allocation178_spill] sm:$0xff] }
 0x369   :  { %9823 = vst [vmem:[#allocation154_spill] sm:$0xff] %v6819_v11  ;;  %v6840_v11 = vadd.f32 0.5, %v9836_v14  ;;  %v9850_v14 = vld [vmem:[#allocation179_spill] sm:$0xff] }
 0x36a   :  { %9825 = vst [vmem:[#allocation156_spill] sm:$0xff] %v6822_v5  ;;  %v6843_v5 = vadd.f32 0.5, %v9838_v13  ;;  %v9852_v13 = vld [vmem:[#allocation181_spill] sm:$0xff] }
 0x36b   :  { %9827 = vst [vmem:[#allocation157_spill] sm:$0xff] %v6825_v47  ;;  %v6846_v47 = vadd.f32 0.5, %v9840_v32  ;;  %v9854_v32 = vld [vmem:[#allocation182_spill] sm:$0xff] }
 0x36c   :  { %9829 = vst [vmem:[#allocation159_spill] sm:$0xff] %v6828_v26  ;;  %v6849_v26 = vadd.f32 0.5, %v9842_v2  ;;  %v9856_v2 = vld [vmem:[#allocation183_spill] sm:$0xff] }
 0x36d   :  { %9831 = vst [vmem:[#allocation161_spill] sm:$0xff] %v6831_v20  ;;  %v6852_v20 = vadd.f32 0.5, %v9844_v51  ;;  %v9858_v51 = vld [vmem:[#allocation185_spill] sm:$0xff] }
 0x36e   :  { %9833 = vst [vmem:[#allocation163_spill] sm:$0xff] %v6834_v17  ;;  %v6855_v17 = vadd.f32 0.5, %v9846_v22  ;;  %v9860_v22 = vld [vmem:[#allocation186_spill] sm:$0xff] }
 0x36f   :  { %9835 = vst [vmem:[#allocation164_spill] sm:$0xff] %v6837_v0  ;;  %v6858_v0 = vadd.f32 0.5, %v9848_v27  ;;  %v9862_v27 = vld [vmem:[#allocation187_spill] sm:$0xff] }
 0x370   :  { %9837 = vst [vmem:[#allocation158_spill] sm:$0xff] %v6840_v11  ;;  %v6861_v11 = vadd.f32 0.5, %v9850_v14  ;;  %v9864_v14 = vld [vmem:[#allocation188_spill] sm:$0xff] }
 0x371   :  { %9839 = vst [vmem:[#allocation160_spill] sm:$0xff] %v6843_v5  ;;  %v6864_v5 = vadd.f32 0.5, %v9852_v13  ;;  %v9866_v13 = vld [vmem:[#allocation239_spill] sm:$0xff] }
 0x372   :  { %9841 = vst [vmem:[#allocation162_spill] sm:$0xff] %v6846_v47  ;;  %v6867_v47 = vadd.f32 0.5, %v9854_v32  ;;  %v9868_v32 = vld [vmem:[#allocation36_spill] sm:$0xff] }
 0x373   :  { %9843 = vst [vmem:[#allocation165_spill] sm:$0xff] %v6849_v26  ;;  %v6870_v26 = vadd.f32 0.5, %v9856_v2  ;;  %v9870_v2 = vld [vmem:[#allocation70_spill] sm:$0xff] }
 0x374   :  { %9845 = vst [vmem:[#allocation167_spill] sm:$0xff] %v6852_v20  ;;  %v6873_v20 = vadd.f32 0.5, %v9858_v51  ;;  %v9872_v51 = vld [vmem:[#allocation71_spill] sm:$0xff] }
 0x375   :  { %9847 = vst [vmem:[#allocation169_spill] sm:$0xff] %v6855_v17  ;;  %v6876_v17 = vadd.f32 0.5, %v9860_v22  ;;  %v9874_v22 = vld [vmem:[#allocation72_spill] sm:$0xff] }
 0x376   :  { %9849 = vst [vmem:[#allocation172_spill] sm:$0xff] %v6858_v0  ;;  %v6879_v0 = vadd.f32 0.5, %v9862_v27  ;;  %v9876_v27 = vld [vmem:[#allocation73_spill] sm:$0xff] }
 0x377   :  { %9851 = vst [vmem:[#allocation175_spill] sm:$0xff] %v6861_v11  ;;  %v6882_v11 = vadd.f32 0.5, %v9864_v14  ;;  %v9878_v14 = vld [vmem:[#allocation74_spill] sm:$0xff] }
 0x378   :  { %9853 = vst [vmem:[#allocation177_spill] sm:$0xff] %v6864_v5  ;;  %v6885_v5 = vadd.f32 0.5, %v9866_v13  ;;  %v9880_v13 = vld [vmem:[#allocation75_spill] sm:$0xff] }
 0x379   :  { %9855 = vst [vmem:[#allocation18_spill] sm:$0xff] %v6867_v47  ;;  %v6888_v47 = vadd.f32 0.5, %v9868_v32  ;;  %v9882_v32 = vld [vmem:[#allocation76_spill] sm:$0xff] }
 0x37a   :  { %9857 = vst [vmem:[#allocation180_spill] sm:$0xff] %v6870_v26  ;;  %v6891_v26 = vadd.f32 0.5, %v9870_v2  ;;  %v9884_v2 = vld [vmem:[#allocation77_spill] sm:$0xff] }
 0x37b   :  { %9859 = vst [vmem:[#allocation20_spill] sm:$0xff] %v6873_v20  ;;  %v6894_v20 = vadd.f32 0.5, %v9872_v51  ;;  %v9886_v51 = vld [vmem:[#allocation224_spill] sm:$0xff] }
 0x37c   :  { %9861 = vst [vmem:[#allocation184_spill] sm:$0xff] %v6876_v17  ;;  %v6897_v17 = vadd.f32 0.5, %v9874_v22  ;;  %v9888_v22 = vld [vmem:[#allocation79_spill] sm:$0xff] }
 0x37d   :  { %9863 = vst [vmem:[#allocation22_spill] sm:$0xff] %v6879_v0  ;;  %v6900_v0 = vadd.f32 0.5, %v9876_v27  ;;  %v9890_v27 = vld [vmem:[#allocation80_spill] sm:$0xff] }
 0x37e   :  { %9865 = vst [vmem:[#allocation189_spill] sm:$0xff] %v6882_v11  ;;  %v6903_v11 = vadd.f32 0.5, %v9878_v14  ;;  %v9892_v14 = vld [vmem:[#allocation81_spill] sm:$0xff] }
 0x37f   :  { %9867 = vst [vmem:[#allocation191_spill] sm:$0xff] %v6885_v5  ;;  %v6906_v5 = vadd.f32 0.5, %v9880_v13  ;;  %v9894_v13 = vld [vmem:[#allocation82_spill] sm:$0xff] }
 0x380   :  { %9869 = vst [vmem:[#allocation209_spill] sm:$0xff] %v6888_v47  ;;  %v6909_v47 = vadd.f32 0.5, %v9882_v32  ;;  %v9896_v32 = vld [vmem:[#allocation83_spill] sm:$0xff] }
 0x381   :  { %9871 = vst [vmem:[#allocation211_spill] sm:$0xff] %v6891_v26  ;;  %v6912_v26 = vadd.f32 0.5, %v9884_v2  ;;  %v9898_v2 = vld [vmem:[#allocation6_spill] sm:$0xff] }
 0x382   :  { %9873 = vst [vmem:[#allocation213_spill] sm:$0xff] %v6894_v20  ;;  %v6915_v20 = vadd.f32 0.5, %v9886_v51  ;;  %v9900_v51 = vld [vmem:[#allocation7_spill] sm:$0xff] }
 0x383   :  { %9875 = vst [vmem:[#allocation215_spill] sm:$0xff] %v6897_v17  ;;  %v6918_v17 = vadd.f32 0.5, %v9888_v22  ;;  %v9902_v22 = vld [vmem:[#allocation8_spill] sm:$0xff] }
 0x384   :  { %9877 = vst [vmem:[#allocation217_spill] sm:$0xff] %v6900_v0  ;;  %v6921_v0 = vadd.f32 0.5, %v9890_v27  ;;  %v9904_v27 = vld [vmem:[#allocation9_spill] sm:$0xff] }
 0x385   :  { %9879 = vst [vmem:[#allocation219_spill] sm:$0xff] %v6903_v11  ;;  %v6924_v11 = vadd.f32 0.5, %v9892_v14  ;;  %v9906_v14 = vld [vmem:[#allocation10_spill] sm:$0xff] }
 0x386   :  { %9881 = vst [vmem:[#allocation221_spill] sm:$0xff] %v6906_v5  ;;  %v6927_v5 = vadd.f32 0.5, %v9894_v13  ;;  %v9908_v13 = vld [vmem:[#allocation11_spill] sm:$0xff] }
 0x387   :  { %9883 = vst [vmem:[#allocation223_spill] sm:$0xff] %v6909_v47  ;;  %v6930_v47 = vadd.f32 0.5, %v9896_v32  ;;  %v9910_v32 = vld [vmem:[#allocation12_spill] sm:$0xff] }
 0x388   :  { %9885 = vst [vmem:[#allocation225_spill] sm:$0xff] %v6912_v26  ;;  %v6933_v26 = vadd.f32 0.5, %v9898_v2  ;;  %v9912_v2 = vld [vmem:[#allocation13_spill] sm:$0xff] }
 0x389   :  { %9887 = vst [vmem:[#allocation227_spill] sm:$0xff] %v6915_v20  ;;  %v6936_v20 = vadd.f32 0.5, %v9900_v51  ;;  %v9914_v51 = vld [vmem:[#allocation14_spill] sm:$0xff] }
 0x38a   :  { %9889 = vst [vmem:[#allocation229_spill] sm:$0xff] %v6918_v17  ;;  %v6939_v17 = vadd.f32 0.5, %v9902_v22  ;;  %v9916_v22 = vld [vmem:[#allocation15_spill] sm:$0xff] }
 0x38b   :  { %9891 = vst [vmem:[#allocation231_spill] sm:$0xff] %v6921_v0  ;;  %v6942_v0 = vadd.f32 0.5, %v9904_v27  ;;  %v9918_v27 = vld [vmem:[#allocation16_spill] sm:$0xff] }
 0x38c   :  { %9893 = vst [vmem:[#allocation233_spill] sm:$0xff] %v6924_v11  ;;  %v6945_v11 = vadd.f32 0.5, %v9906_v14  ;;  %v9920_v14 = vld [vmem:[#allocation17_spill] sm:$0xff] }
 0x38d   :  { %9895 = vst [vmem:[#allocation235_spill] sm:$0xff] %v6927_v5  ;;  %v6948_v5 = vadd.f32 0.5, %v9908_v13  ;;  %v9922_v13 = vld [vmem:[#allocation230_spill] sm:$0xff] }
 0x38e   :  { %9897 = vst [vmem:[#allocation237_spill] sm:$0xff] %v6930_v47  ;;  %v6951_v47 = vadd.f32 0.5, %v9910_v32  ;;  %v9924_v32 = vld [vmem:[#allocation19_spill] sm:$0xff] }
 0x38f   :  { %9899 = vst [vmem:[#allocation218_spill] sm:$0xff] %v6933_v26  ;;  %v6954_v26 = vadd.f32 0.5, %v9912_v2  ;;  %v9926_v2 = vld [vmem:[#allocation21_spill] sm:$0xff] }
 0x390   :  { %9901 = vst [vmem:[#allocation166_spill] sm:$0xff] %v6936_v20  ;;  %v6957_v20 = vadd.f32 0.5, %v9914_v51  ;;  %v9928_v51 = vld [vmem:[#allocation23_spill] sm:$0xff] }
 0x391   :  { %9903 = vst [vmem:[#allocation168_spill] sm:$0xff] %v6939_v17  ;;  %v6960_v17 = vadd.f32 0.5, %v9916_v22  ;;  %v9930_v22 = vld [vmem:[#allocation190_spill] sm:$0xff] }
 0x392   :  { %9905 = vst [vmem:[#allocation170_spill] sm:$0xff] %v6942_v0  ;;  %v6963_v0 = vadd.f32 0.5, %v9918_v27  ;;  %v9932_v27 = vld [vmem:[#allocation24_spill] sm:$0xff] }
 0x393   :  { %9907 = vst [vmem:[#allocation171_spill] sm:$0xff] %v6945_v11  ;;  %v6966_v11 = vadd.f32 0.5, %v9920_v14  ;;  %v9934_v14 = vld [vmem:[#allocation192_spill] sm:$0xff] }
 0x394   :  { %9909 = vst [vmem:[#allocation173_spill] sm:$0xff] %v6948_v5  ;;  %v6969_v5 = vadd.f32 0.5, %v9922_v13  ;;  %v9936_v13 = vld [vmem:[#allocation26_spill] sm:$0xff] }
 0x395   :  { %9911 = vst [vmem:[#allocation174_spill] sm:$0xff] %v6951_v47  ;;  %v6972_v47 = vadd.f32 0.5, %v9924_v32  ;;  %v9938_v32 = vld [vmem:[#allocation194_spill] sm:$0xff] }
 0x396   :  { %9913 = vst [vmem:[#allocation176_spill] sm:$0xff] %v6954_v26  ;;  %v6975_v26 = vadd.f32 0.5, %v9926_v2  ;;  %v9940_v2 = vld [vmem:[#allocation27_spill] sm:$0xff] }
 0x397   :  { %9915 = vst [vmem:[#allocation178_spill] sm:$0xff] %v6957_v20  ;;  %v6978_v20 = vadd.f32 0.5, %v9928_v51  ;;  %v9942_v51 = vld [vmem:[#allocation241_spill] sm:$0xff] }
 0x398   :  { %9917 = vst [vmem:[#allocation179_spill] sm:$0xff] %v6960_v17  ;;  %v6981_v17 = vadd.f32 0.5, %v9930_v22  ;;  %v9944_v22 = vld [vmem:[#allocation242_spill] sm:$0xff] }
 0x399   :  { %9919 = vst [vmem:[#allocation181_spill] sm:$0xff] %v6963_v0  ;;  %v6984_v0 = vadd.f32 0.5, %v9932_v27  ;;  %v9946_v27 = vld [vmem:[#allocation243_spill] sm:$0xff] }
 0x39a   :  { %9921 = vst [vmem:[#allocation182_spill] sm:$0xff] %v6966_v11  ;;  %v6987_v11 = vadd.f32 0.5, %v9934_v14  ;;  %v9948_v14 = vld [vmem:[#allocation244_spill] sm:$0xff] }
 0x39b   :  { %9923 = vst [vmem:[#allocation183_spill] sm:$0xff] %v6969_v5  ;;  %v6990_v5 = vadd.f32 0.5, %v9936_v13  ;;  %v9950_v13 = vld [vmem:[#allocation58_spill] sm:$0xff] }
 0x39c   :  { %9925 = vst [vmem:[#allocation185_spill] sm:$0xff] %v6972_v47  ;;  %v6993_v47 = vadd.f32 0.5, %v9938_v32  ;;  %v9952_v32 = vld [vmem:[#allocation59_spill] sm:$0xff] }
 0x39d   :  { %9927 = vst [vmem:[#allocation186_spill] sm:$0xff] %v6975_v26  ;;  %v6996_v26 = vadd.f32 0.5, %v9940_v2  ;;  %v9954_v2 = vld [vmem:[#allocation60_spill] sm:$0xff] }
 0x39e   :  { %9929 = vst [vmem:[#allocation187_spill] sm:$0xff] %v6978_v20  ;;  %v6999_v20 = vadd.f32 0.5, %v9942_v51  ;;  %v9956_v51 = vld [vmem:[#allocation61_spill] sm:$0xff] }
 0x39f   :  { %9931 = vst [vmem:[#allocation188_spill] sm:$0xff] %v6981_v17  ;;  %v7002_v17 = vadd.f32 0.5, %v9944_v22  ;;  %v9958_v22 = vld [vmem:[#allocation62_spill] sm:$0xff] }
 0x3a0   :  { %9933 = vst [vmem:[#allocation239_spill] sm:$0xff] %v6984_v0  ;;  %v7005_v0 = vadd.f32 0.5, %v9946_v27  ;;  %v9960_v27 = vld [vmem:[#allocation63_spill] sm:$0xff] }
 0x3a1   :  { %9935 = vst [vmem:[#allocation36_spill] sm:$0xff] %v6987_v11  ;;  %v7008_v11 = vadd.f32 0.5, %v9948_v14  ;;  %v9962_v14 = vld [vmem:[#allocation25_spill] sm:$0xff] }
 0x3a2   :  { %9937 = vst [vmem:[#allocation70_spill] sm:$0xff] %v6990_v5  ;;  %v7011_v5 = vadd.f32 0.5, %v9950_v13  ;;  %v9964_v13 = vld [vmem:[#allocation28_spill] sm:$0xff] }
 0x3a3   :  { %9939 = vst [vmem:[#allocation71_spill] sm:$0xff] %v6993_v47  ;;  %v7014_v47 = vadd.f32 0.5, %v9952_v32  ;;  %v9966_v32 = vld [vmem:[#allocation109_spill] sm:$0xff] }
 0x3a4   :  { %9941 = vst [vmem:[#allocation72_spill] sm:$0xff] %v6996_v26  ;;  %v7017_v26 = vadd.f32 0.5, %v9954_v2  ;;  %v9968_v2 = vld [vmem:[#allocation234_spill] sm:$0xff] }
 0x3a5   :  { %9943 = vst [vmem:[#allocation73_spill] sm:$0xff] %v6999_v20  ;;  %v7020_v20 = vadd.f32 0.5, %v9956_v51  ;;  %v9970_v51 = vld [vmem:[#allocation110_spill] sm:$0xff] }
 0x3a6   :  { %9945 = vst [vmem:[#allocation74_spill] sm:$0xff] %v7002_v17  ;;  %v7023_v17 = vadd.f32 0.5, %v9958_v22  ;;  %v9972_v22 = vld [vmem:[#allocation114_spill] sm:$0xff] }
 0x3a7   :  { %9947 = vst [vmem:[#allocation75_spill] sm:$0xff] %v7005_v0  ;;  %v7026_v0 = vadd.f32 0.5, %v9960_v27  ;;  %v9974_v27 = vld [vmem:[#allocation236_spill] sm:$0xff] }
 0x3a8   :  { %9949 = vst [vmem:[#allocation76_spill] sm:$0xff] %v7008_v11  ;;  %v7029_v11 = vadd.f32 0.5, %v9962_v14  ;;  %v9976_v14 = vld [vmem:[#allocation116_spill] sm:$0xff] }
 0x3a9   :  { %9951 = vst [vmem:[#allocation77_spill] sm:$0xff] %v7011_v5  ;;  %v7032_v5 = vadd.f32 0.5, %v9964_v13  ;;  %v9978_v13 = vld [vmem:[#allocation39_spill] sm:$0xff] }
 0x3aa   :  { %9953 = vst [vmem:[#allocation224_spill] sm:$0xff] %v7014_v47  ;;  %v7035_v47 = vadd.f32 0.5, %v9966_v32  ;;  %v9980_v32 = vld [vmem:[#allocation41_spill] sm:$0xff] }
 0x3ab   :  { %9955 = vst [vmem:[#allocation79_spill] sm:$0xff] %v7017_v26  ;;  %v7038_v26 = vadd.f32 0.5, %v9968_v2  ;;  %v9982_v2 = vld [vmem:[#allocation44_spill] sm:$0xff] }
 0x3ac   :  { %9957 = vst [vmem:[#allocation80_spill] sm:$0xff] %v7020_v20  ;;  %v7041_v20 = vadd.f32 0.5, %v9970_v51  ;;  %v9984_v51 = vld [vmem:[#allocation46_spill] sm:$0xff] }
 0x3ad   :  { %9959 = vst [vmem:[#allocation81_spill] sm:$0xff] %v7023_v17  ;;  %v7044_v17 = vadd.f32 0.5, %v9972_v22  ;;  %v9986_v22 = vld [vmem:[#allocation47_spill] sm:$0xff] }
 0x3ae   :  { %9961 = vst [vmem:[#allocation82_spill] sm:$0xff] %v7026_v0  ;;  %v7047_v0 = vadd.f32 0.5, %v9974_v27  ;;  %v9988_v27 = vld [vmem:[#allocation238_spill] sm:$0xff] }
 0x3af   :  { %9963 = vst [vmem:[#allocation83_spill] sm:$0xff] %v7029_v11  ;;  %v7050_v11 = vadd.f32 0.5, %v9976_v14  ;;  %v9990_v14 = vld [vmem:[#allocation51_spill] sm:$0xff] }
 0x3b0   :  { %9965 = vst [vmem:[#allocation6_spill] sm:$0xff] %v7032_v5  ;;  %v7053_v5 = vadd.f32 0.5, %v9978_v13  ;;  %v9992_v13 = vld [vmem:[#allocation53_spill] sm:$0xff] }
 0x3b1   :  { %9967 = vst [vmem:[#allocation7_spill] sm:$0xff] %v7035_v47  ;;  %v7056_v47 = vadd.f32 0.5, %v9980_v32  ;;  %v9994_v32 = vld [vmem:[#allocation240_spill] sm:$0xff] }
 0x3b2   :  { %9969 = vst [vmem:[#allocation8_spill] sm:$0xff] %v7038_v26  ;;  %v7059_v26 = vadd.f32 0.5, %v9982_v2  ;;  %v9996_v2 = vld [vmem:[#allocation118_spill] sm:$0xff] }
 0x3b3   :  { %9971 = vst [vmem:[#allocation9_spill] sm:$0xff] %v7041_v20  ;;  %v7062_v20 = vadd.f32 0.5, %v9984_v51  ;;  %v9998_v51 = vld [vmem:[#allocation120_spill] sm:$0xff] }
 0x3b4   :  { %9973 = vst [vmem:[#allocation10_spill] sm:$0xff] %v7044_v17  ;;  %v7065_v17 = vadd.f32 0.5, %v9986_v22  ;;  %v10000_v22 = vld [vmem:[#allocation123_spill] sm:$0xff] }
 0x3b5   :  { %9975 = vst [vmem:[#allocation11_spill] sm:$0xff] %v7047_v0  ;;  %v7068_v0 = vadd.f32 0.5, %v9988_v27  ;;  %v10001_v27 = vld [vmem:[#allocation126_spill] sm:$0xff] }
 0x3b6   :  { %9977 = vst [vmem:[#allocation12_spill] sm:$0xff] %v7050_v11  ;;  %v7071_v11 = vadd.f32 0.5, %v9990_v14  ;;  %v10002_v14 = vld [vmem:[#allocation128_spill] sm:$0xff] }
 0x3b7   :  { %9979 = vst [vmem:[#allocation13_spill] sm:$0xff] %v7053_v5  ;;  %v7074_v5 = vadd.f32 0.5, %v9992_v13  ;;  %v10004_v13 = vld [vmem:[#allocation90_spill] sm:$0xff] }
 0x3b8   :  { %9981 = vst [vmem:[#allocation14_spill] sm:$0xff] %v7056_v47  ;;  %v7077_v47 = vadd.f32 0.5, %v9994_v32  ;;  %v10005_v32 = vld [vmem:[#allocation132_spill] sm:$0xff] }
 0x3b9   :  { %9983 = vst [vmem:[#allocation15_spill] sm:$0xff] %v7059_v26  ;;  %v7080_v26 = vadd.f32 0.5, %v9996_v2  ;;  %v10006_v2 = vld [vmem:[#allocation134_spill] sm:$0xff] }
 0x3ba   :  { %9985 = vst [vmem:[#allocation16_spill] sm:$0xff] %v7062_v20  ;;  %v7083_v20 = vadd.f32 0.5, %v9998_v51  ;;  %v10008_v51 = vld [vmem:[#allocation92_spill] sm:$0xff] }
 0x3bb   :  { %9987 = vst [vmem:[#allocation17_spill] sm:$0xff] %v7065_v17  ;;  %v7086_v17 = vadd.f32 0.5, %v10000_v22  ;;  %v7107_v22 = vadd.f32 0.5, %v6336_v8  ;;  %v10020_v8 = vld [vmem:[#allocation94_spill] sm:$0xff] }
 0x3bc   :  { %9989 = vst [vmem:[#allocation230_spill] sm:$0xff] %v7068_v0  ;;  %v7089_v0 = vadd.f32 0.5, %v10001_v27  ;;  %v7110_v27 = vadd.f32 0.5, %v6339_v36  ;;  %v10021_v36 = vld [vmem:[#allocation96_spill] sm:$0xff] }
 0x3bd   :  { %9991 = vst [vmem:[#allocation19_spill] sm:$0xff] %v7071_v11  ;;  %v7092_v11 = vadd.f32 0.5, %v10002_v14  ;;  %v10012_v14 = vld [vmem:[#allocation136_spill] sm:$0xff] }
 0x3be   :  { %9993 = vst [vmem:[#allocation21_spill] sm:$0xff] %v7074_v5  ;;  %v7095_v5 = vadd.f32 0.5, %v10004_v13  ;;  %v7116_v13 = vadd.f32 0.5, %v6348_v19  ;;  %v10023_v19 = vld [vmem:[#allocation100_spill] sm:$0xff] }
 0x3bf   :  { %9995 = vst [vmem:[#allocation23_spill] sm:$0xff] %v7077_v47  ;;  %v7098_v47 = vadd.f32 0.5, %v10005_v32  ;;  %v7119_v32 = vadd.f32 0.5, %v6351_v12  ;;  %v10024_v12 = vld [vmem:[#allocation102_spill] sm:$0xff] }
 0x3c0   :  { %9997 = vst [vmem:[#allocation190_spill] sm:$0xff] %v7080_v26  ;;  %v7101_v26 = vadd.f32 0.5, %v10006_v2  ;;  %v10016_v2 = vld [vmem:[#allocation139_spill] sm:$0xff] }
 0x3c1   :  { %9999 = vst [vmem:[#allocation24_spill] sm:$0xff] %v7083_v20  ;;  %v7104_v20 = vadd.f32 0.5, %v10008_v51  ;;  %v10018_v51 = vld [vmem:[#allocation93_spill] sm:$0xff] }
 0x3c2   :  { %10003 = vst [vmem:[#allocation192_spill] sm:$0xff] %v7092_v11  ;;  %v7113_v11 = vadd.f32 0.5, %v10012_v14  ;;  %v10022_v14 = vld [vmem:[#allocation98_spill] sm:$0xff] }
 0x3c3   :  { %10007 = vst [vmem:[#allocation26_spill] sm:$0xff] %v7101_v26  ;;  %v7122_v26 = vadd.f32 0.5, %v10016_v2  ;;  %v10025_v2 = vld [vmem:[#allocation104_spill] sm:$0xff] }
 0x3c4   :  { %10009 = vst [vmem:[#allocation194_spill] sm:$0xff] %v7104_v20  ;;  %v7125_v20 = vadd.f32 0.5, %v10018_v51  ;;  %v10026_v51 = vld [vmem:[#allocation107_spill] sm:$0xff] }
 0x3c5   :  { %10010 = vst [vmem:[#allocation27_spill] sm:$0xff] %v7107_v22  ;;  %v7128_v22 = vadd.f32 0.5, %v10020_v8  ;;  %v7149_v8 = vadd.f32 0.5, %v6360_v45  ;;  %v7170_v45 = vadd.f32 0.5, %v6387_v59  ;;  %v10034_v59 = vld [vmem:[#allocation145_spill] sm:$0xff] }
 0x3c6   :  { %10011 = vst [vmem:[#allocation241_spill] sm:$0xff] %v7110_v27  ;;  %v7131_v27 = vadd.f32 0.5, %v10021_v36  ;;  %v7152_v36 = vadd.f32 0.5, %v6363_v50  ;;  %v10030_v50 = vld [vmem:[#allocation141_spill] sm:$0xff] }
 0x3c7   :  { %10013 = vst [vmem:[#allocation242_spill] sm:$0xff] %v7113_v11  ;;  %v7134_v11 = vadd.f32 0.5, %v10022_v14  ;;  %v7155_v14 = vadd.f32 0.5, %v6366_v62  ;;  %v7176_v62 = vadd.f32 0.5, %v6396_v23  ;;  %v7197_v23 = vadd.f32 0.5, %v6423_v9  ;;  %v10040_v9 = vld [vmem:[#allocation149_spill] sm:$0xff] }
 0x3c8   :  { %10014 = vst [vmem:[#allocation243_spill] sm:$0xff] %v7116_v13  ;;  %v7137_v13 = vadd.f32 0.5, %v10023_v19  ;;  %v7158_v19 = vadd.f32 0.5, %v6372_v21  ;;  %v7179_v21 = vadd.f32 0.5, %v6399_v43  ;;  %v10036_v43 = vld [vmem:[#allocation148_spill] sm:$0xff] }
 0x3c9   :  { %10015 = vst [vmem:[#allocation244_spill] sm:$0xff] %v7119_v32  ;;  %v7140_v32 = vadd.f32 0.5, %v10024_v12  ;;  %v7161_v12 = vadd.f32 0.5, %v6375_v24  ;;  %v10032_v24 = vld [vmem:[#allocation143_spill] sm:$0xff] }
 0x3ca   :  { %10017 = vst [vmem:[#allocation58_spill] sm:$0xff] %v7122_v26  ;;  %v7143_v26 = vadd.f32 0.5, %v10025_v2  ;;  %v7164_v2 = vadd.f32 0.5, %v6378_v30  ;;  %v7185_v30 = vadd.f32 0.5, %v6408_v4  ;;  %v7206_v4 = vadd.f32 0.5, %v6435_v37 }
 0x3cb   :  { %10019 = vst [vmem:[#allocation59_spill] sm:$0xff] %v7125_v20  ;;  %v7146_v20 = vadd.f32 0.5, %v10026_v51  ;;  %v7167_v51 = vadd.f32 0.5, %v6384_v61  ;;  %v7188_v61 = vadd.f32 0.5, %v6411_v29  ;;  %v10038_v29 = vld [vmem:[#allocation55_spill] sm:$0xff]  ;;  %v7227_v37 = vadd.f32 0.5, %v6462_v3 }
 0x3cc   :  { %10027 = vst [vmem:[#allocation60_spill] sm:$0xff] %v7152_v36  ;;  %v7173_v36 = vadd.f32 0.5, %v10030_v50  ;;  %v7194_v50 = vadd.f32 0.5, %v6420_v49  ;;  %v7215_v49 = vadd.f32 0.5, %v6447_v48  ;;  %v7236_v48 = vadd.f32 0.5, %v6474_v54  ;;  %v10052_v3 = vld [vmem:[#allocation196_spill] sm:$0xff] }
 0x3cd   :  { %10028 = vst [vmem:[#allocation61_spill] sm:$0xff] %v7161_v12  ;;  %v7182_v12 = vadd.f32 0.5, %v10032_v24  ;;  %v7203_v24 = vadd.f32 0.5, %v6432_v38  ;;  %v7224_v38 = vadd.f32 0.5, %v6459_v28  ;;  %v10050_v28 = vld [vmem:[#allocation195_spill] sm:$0xff]  ;;  %v10057_v54 = vld [vmem:[#allocation29_spill] sm:$0xff] }
 0x3ce   :  { %10029 = vst [vmem:[#allocation62_spill] sm:$0xff] %v7170_v45  ;;  %v7191_v45 = vadd.f32 0.5, %v10034_v59  ;;  %v7212_v59 = vadd.f32 0.5, %v6444_v25  ;;  %v7233_v25 = vadd.f32 0.5, %v6471_v33  ;;  %v10055_v33 = vld [vmem:[#allocation198_spill] sm:$0xff] }
 0x3cf   :  { %10031 = vst [vmem:[#allocation63_spill] sm:$0xff] %v7179_v21  ;;  %v7200_v21 = vadd.f32 0.5, %v10036_v43  ;;  %v10042_v43 = vld [vmem:[#allocation152_spill] sm:$0xff] }
 0x3d0   :  { %10033 = vst [vmem:[#allocation25_spill] sm:$0xff] %v7188_v61  ;;  %v7209_v61 = vadd.f32 0.5, %v10038_v29  ;;  %v10045_v29 = vld [vmem:[#allocation155_spill] sm:$0xff] }
 0x3d1   :  { %10035 = vst [vmem:[#allocation28_spill] sm:$0xff] %v7197_v23  ;;  %v7218_v23 = vadd.f32 0.5, %v10040_v9  ;;  %v10049_v9 = vld [vmem:[#allocation193_spill] sm:$0xff] }
 0x3d2   :  { %10037 = vst [vmem:[#allocation109_spill] sm:$0xff] %v7200_v21  ;;  %v7221_v21 = vadd.f32 0.5, %v10042_v43  ;;  %v7242_v43 = vadd.f32 0.5, %v6481_v40  ;;  %v7263_v40 = vadd.f32 0.5, %v6504_v7  ;;  %v10068_v7 = vld [vmem:[#allocation202_spill] sm:$0xff] }
 0x3d3   :  { %10039 = vst [vmem:[#allocation234_spill] sm:$0xff] %v7209_v61  ;;  %v7230_v61 = vadd.f32 0.5, %v10045_v29  ;;  %v10053_v29 = vld [vmem:[#allocation197_spill] sm:$0xff] }
 0x3d4   :  { %10041 = vst [vmem:[#allocation110_spill] sm:$0xff] %v7218_v23  ;;  %v7239_v23 = vadd.f32 0.5, %v10049_v9  ;;  %v7260_v9 = vadd.f32 0.5, %v6501_v55  ;;  %v10066_v55 = vld [vmem:[#allocation201_spill] sm:$0xff] }
 0x3d5   :  { %10043 = vst [vmem:[#allocation114_spill] sm:$0xff] %v7224_v38  ;;  %v7245_v38 = vadd.f32 0.5, %v10050_v28  ;;  %v10060_v28 = vld [vmem:[#allocation199_spill] sm:$0xff] }
 0x3d6   :  { %10044 = vst [vmem:[#allocation236_spill] sm:$0xff] %v7227_v37  ;;  %v7248_v37 = vadd.f32 0.5, %v10052_v3  ;;  %v7269_v3 = vadd.f32 0.5, %v6511_v15  ;;  %v10070_v15 = vld [vmem:[#allocation204_spill] sm:$0xff] }
 0x3d7   :  { %10046 = vst [vmem:[#allocation116_spill] sm:$0xff] %v7230_v61  ;;  %v7251_v61 = vadd.f32 0.5, %v10053_v29  ;;  %v10063_v29 = vld [vmem:[#allocation200_spill] sm:$0xff] }
 0x3d8   :  { %10047 = vst [vmem:[#allocation39_spill] sm:$0xff] %v7233_v25  ;;  %v7254_v25 = vadd.f32 0.5, %v10055_v33  ;;  %v10065_v33 = vld [vmem:[#allocation99_spill] sm:$0xff] }
 0x3d9   :  { %10048 = vst [vmem:[#allocation41_spill] sm:$0xff] %v7236_v48  ;;  %v7257_v48 = vadd.f32 0.5, %v10057_v54  ;;  %v7278_v54 = vadd.f32 0.5, %v6521_v6  ;;  %v7299_v6 = vadd.f32 0.5, %v6544_v31  ;;  %v10080_v31 = vld [vmem:[#allocation208_spill] sm:$0xff] }
 0x3da   :  { %10051 = vst [vmem:[#allocation44_spill] sm:$0xff] %v7245_v38  ;;  %v7266_v38 = vadd.f32 0.5, %v10060_v28  ;;  %v10069_v28 = vld [vmem:[#allocation203_spill] sm:$0xff] }
 0x3db   :  { %10054 = vst [vmem:[#allocation46_spill] sm:$0xff] %v7251_v61  ;;  %v7272_v61 = vadd.f32 0.5, %v10063_v29  ;;  %v10072_v29 = vld [vmem:[#allocation205_spill] sm:$0xff] }
 0x3dc   :  { %10056 = vst [vmem:[#allocation47_spill] sm:$0xff] %v7254_v25  ;;  %v7275_v25 = vadd.f32 0.5, %v10065_v33  ;;  %v7296_v33 = vadd.f32 0.5, %v6541_v41  ;;  %v7317_v41 = vadd.f32 0.5, %v6564_v35  ;;  %v10087_v35 = vld [vmem:[#allocation214_spill] sm:$0xff] }
 0x3dd   :  { %10058 = vst [vmem:[#allocation238_spill] sm:$0xff] %v7260_v9  ;;  %v7281_v9 = vadd.f32 0.5, %v10066_v55  ;;  %v10074_v55 = vld [vmem:[#allocation206_spill] sm:$0xff] }
 0x3de   :  { %10059 = vst [vmem:[#allocation51_spill] sm:$0xff] %v7263_v40  ;;  %v7284_v40 = vadd.f32 0.5, %v10068_v7  ;;  %v7305_v7 = vadd.f32 0.5, %v6551_v46  ;;  %v7326_v46 = vadd.f32 0.5, %v6574_v57  ;;  %v7347_v57 = vadd.f32 0.5, %v6597_v39 }
 0x3df   :  { %10061 = vst [vmem:[#allocation53_spill] sm:$0xff] %v7266_v38  ;;  %v7287_v38 = vadd.f32 0.5, %v10069_v28  ;;  %v7308_v28 = vadd.f32 0.5, %v6554_v60  ;;  %v10083_v60 = vld [vmem:[#allocation212_spill] sm:$0xff]  ;;  %v7368_v39 = vadd.f32 0.5, %v6613_v44  ;;  %v7389_v44 = vadd.f32 0.5, %v6628_v56 }
 0x3e0   :  { %10062 = vst [vmem:[#allocation240_spill] sm:$0xff] %v7269_v3  ;;  %v7290_v3 = vadd.f32 0.5, %v10070_v15  ;;  %v10076_v15 = vld [vmem:[#allocation32_spill] sm:$0xff]  ;;  %v7410_v56 = vadd.f32 0.5, %v6687_v42  ;;  %v10133_v42 = vld [vmem:[#allocation38_spill] sm:$0xff] }
 0x3e1   :  { %10064 = vst [vmem:[#allocation118_spill] sm:$0xff] %v7272_v61  ;;  %v7293_v61 = vadd.f32 0.5, %v10072_v29  ;;  %v7314_v29 = vadd.f32 0.5, %v6561_v58  ;;  %v10086_v58 = vld [vmem:[#allocation34_spill] sm:$0xff] }
 0x3e2   :  { %10067 = vst [vmem:[#allocation120_spill] sm:$0xff] %v7281_v9  ;;  %v7302_v9 = vadd.f32 0.5, %v10074_v55  ;;  %v7323_v55 = vadd.f32 0.5, %v6571_v63  ;;  %v10090_v63 = vld [vmem:[#allocation220_spill] sm:$0xff] }
 0x3e3   :  { %10071 = vst [vmem:[#allocation123_spill] sm:$0xff] %v7290_v3  ;;  %v7311_v3 = vadd.f32 0.5, %v10076_v15  ;;  %v10084_v15 = vld [vmem:[#allocation103_spill] sm:$0xff] }
 0x3e4   :  { %10073 = vst [vmem:[#allocation126_spill] sm:$0xff] %v7299_v6  ;;  %v7320_v6 = vadd.f32 0.5, %v10080_v31  ;;  %v10088_v31 = vld [vmem:[#allocation216_spill] sm:$0xff] }
 0x3e5   :  { %10075 = vst [vmem:[#allocation128_spill] sm:$0xff] %v7308_v28  ;;  %v7329_v28 = vadd.f32 0.5, %v10083_v60  ;;  %v7350_v60 = vadd.f32 0.5, %v6599_v18  ;;  %v1805_v18 = vpop.permute.xlu2 %1804 }
 0x3e6   :  { %10077 = vst [vmem:[#allocation90_spill] sm:$0xff] %v7311_v3  ;;  %v7332_v3 = vadd.f32 0.5, %v10084_v15  ;;  %v10093_v15 = vld [vmem:[#allocation222_spill] sm:$0xff] }
 0x3e7   :  { %10078 = vst [vmem:[#allocation132_spill] sm:$0xff] %v7314_v29  ;;  %v7335_v29 = vadd.f32 0.5, %v10086_v58  ;;  %v7356_v58 = vadd.f32 0.5, %v6604_v16  ;;  %v7377_v16 = vadd.f32 0.5, %v6620_v10  ;;  %v10112_v10 = vld [vmem:[#allocation101_spill] sm:$0xff] }
 0x3e8   :  { %10079 = vst [vmem:[#allocation134_spill] sm:$0xff] %v7317_v41  ;;  %v7338_v41 = vadd.f32 0.5, %v10087_v35  ;;  %v7359_v35 = vadd.f32 0.5, %v6606_v34  ;;  %v10102_v34 = vld [vmem:[#allocation85_spill] sm:$0xff] }
 0x3e9   :  { %10081 = vst [vmem:[#allocation92_spill] sm:$0xff] %v7320_v6  ;;  %v7341_v6 = vadd.f32 0.5, %v10088_v31  ;;  %v10095_v31 = vld [vmem:[#allocation226_spill] sm:$0xff] }
 0x3ea   :  { %10082 = vst [vmem:[#allocation136_spill] sm:$0xff] %v7323_v55  ;;  %v7344_v55 = vadd.f32 0.5, %v10090_v63  ;;  %v7365_v63 = vadd.f32 0.5, %v6611_v1  ;;  %v7386_v1 = vadd.f32 0.5, %v6626_v52  ;;  %v10118_v52 = vld [vmem:[#allocation52_spill] sm:$0xff] }
 0x3eb   :  { %10085 = vst [vmem:[#allocation139_spill] sm:$0xff] %v7332_v3  ;;  %v7353_v3 = vadd.f32 0.5, %v10093_v15  ;;  %v7374_v15 = vadd.f32 0.5, %v6618_v53  ;;  %v10110_v53 = vld [vmem:[#allocation108_spill] sm:$0xff] }
 0x3ec   :  { %10089 = vst [vmem:[#allocation93_spill] sm:$0xff] %v7341_v6  ;;  %v7362_v6 = vadd.f32 0.5, %v10095_v31  ;;  %v10104_v31 = vld [vmem:[#allocation232_spill] sm:$0xff] }
 0x3ed   :  { %10091 = vst [vmem:[#allocation94_spill] sm:$0xff] %v7347_v57 }
 0x3ee   :  { %10092 = vst [vmem:[#allocation96_spill] sm:$0xff] %v7350_v60  ;;  %v10098_v60 = vld [vmem:[#allocation106_spill] sm:$0xff] }
 0x3ef   :  { %10094 = vst [vmem:[#allocation98_spill] sm:$0xff] %v7359_v35  ;;  %v7371_v57 = vadd.f32 0.5, %v10098_v60  ;;  %v7380_v35 = vadd.f32 0.5, %v10102_v34  ;;  %v10108_v60 = vld [vmem:[#allocation87_spill] sm:$0xff] }
 0x3f0   :  { %10096 = vst [vmem:[#allocation100_spill] sm:$0xff] %v7362_v6  ;;  %v7383_v6 = vadd.f32 0.5, %v10104_v31  ;;  %v10114_v34 = vld [vmem:[#allocation115_spill] sm:$0xff] }
 0x3f1   :  { %10097 = vst [vmem:[#allocation102_spill] sm:$0xff] %v7368_v39  ;;  %v10116_v31 = vld [vmem:[#allocation43_spill] sm:$0xff] }
 0x3f2   :  { %10099 = vst [vmem:[#allocation104_spill] sm:$0xff] %v7371_v57  ;;  %v7392_v57 = vadd.f32 0.5, %v10108_v60  ;;  %v10121_v60 = vld [vmem:[#allocation89_spill] sm:$0xff] }
 0x3f3   :  { %10100 = vst [vmem:[#allocation107_spill] sm:$0xff] %v7374_v15  ;;  %v7395_v15 = vadd.f32 0.5, %v10110_v53  ;;  %v10123_v53 = vld [vmem:[#allocation95_spill] sm:$0xff] }
 0x3f4   :  { %10101 = vst [vmem:[#allocation141_spill] sm:$0xff] %v7377_v16  ;;  %v7398_v16 = vadd.f32 0.5, %v10112_v10  ;;  %v1810_v10 = vpop.permute.xlu0 %1809 }
 0x3f5   :  { %10103 = vst [vmem:[#allocation143_spill] sm:$0xff] %v7380_v35  ;;  %v7401_v35 = vadd.f32 0.5, %v10114_v34  ;;  %v10127_v34 = vld [vmem:[#allocation105_spill] sm:$0xff] }
 0x3f6   :  { %10105 = vst [vmem:[#allocation145_spill] sm:$0xff] %v7383_v6  ;;  %v7404_v6 = vadd.f32 0.5, %v10116_v31  ;;  %v10129_v31 = vld [vmem:[#allocation111_spill] sm:$0xff] }
 0x3f7   :  { %10106 = vst [vmem:[#allocation148_spill] sm:$0xff] %v7386_v1  ;;  %v7407_v1 = vadd.f32 0.5, %v10118_v52  ;;  %v10131_v52 = vld [vmem:[#allocation113_spill] sm:$0xff] }
 0x3f8   :  { %10107 = vst [vmem:[#allocation55_spill] sm:$0xff] %v7389_v44 }
 0x3f9   :  { %10109 = vst [vmem:[#allocation149_spill] sm:$0xff] %v7392_v57  ;;  %v7413_v57 = vmul.f32 %v1805_v18, %v10121_v60  ;;  %v10135_v60 = vld [vmem:[#allocation40_spill] sm:$0xff] }
 0x3fa   :  { %10111 = vst [vmem:[#allocation152_spill] sm:$0xff] %v7395_v15  ;;  %v7416_v15 = vmul.f32 %v1805_v18, %v10123_v53  ;;  %v10137_v53 = vld [vmem:[#allocation42_spill] sm:$0xff] }
 0x3fb   :  { %10113 = vst [vmem:[#allocation155_spill] sm:$0xff] %v7398_v16  ;;  %v10125_v16 = vld [vmem:[#allocation97_spill] sm:$0xff] }
 0x3fc   :  { %10115 = vst [vmem:[#allocation193_spill] sm:$0xff] %v7401_v35  ;;  %v7419_v44 = vmul.f32 %v1805_v18, %v10125_v16  ;;  %v7422_v35 = vmul.f32 %v1805_v18, %v10127_v34  ;;  %v10139_v16 = vld [vmem:[#allocation45_spill] sm:$0xff]  ;;  %v10141_v34 = vld [vmem:[#allocation48_spill] sm:$0xff] }
 0x3fd   :  { %10117 = vst [vmem:[#allocation195_spill] sm:$0xff] %v7404_v6  ;;  %v7425_v6 = vmul.f32 %v1805_v18, %v10129_v31  ;;  %v10143_v31 = vld [vmem:[#allocation50_spill] sm:$0xff] }
 0x3fe   :  { %10119 = vst [vmem:[#allocation196_spill] sm:$0xff] %v7407_v1  ;;  %v7428_v1 = vmul.f32 %v1805_v18, %v10131_v52  ;;  %v10145_v52 = vld [vmem:[#allocation117_spill] sm:$0xff] }
 0x3ff   :  { %10120 = vst [vmem:[#allocation197_spill] sm:$0xff] %v7410_v56  ;;  %v7431_v56 = vmul.f32 %v1805_v18, %v10133_v42  ;;  %v10147_v42 = vld [vmem:[#allocation78_spill] sm:$0xff] }
 0x400   :  { %10122 = vst [vmem:[#allocation198_spill] sm:$0xff] %v7413_v57  ;;  %v7434_v57 = vmul.f32 %v1805_v18, %v10135_v60  ;;  %v10149_v60 = vld [vmem:[#allocation119_spill] sm:$0xff] }
 0x401   :  { %10124 = vst [vmem:[#allocation29_spill] sm:$0xff] %v7416_v15  ;;  %v7437_v15 = vmul.f32 %v1805_v18, %v10137_v53  ;;  %v10151_v53 = vld [vmem:[#allocation84_spill] sm:$0xff] }
 0x402   :  { %10126 = vst [vmem:[#allocation199_spill] sm:$0xff] %v7419_v44  ;;  %v7440_v44 = vmul.f32 %v1805_v18, %v10139_v16  ;;  %v10153_v16 = vld [vmem:[#allocation228_spill] sm:$0xff] }
 0x403   :  { %10128 = vst [vmem:[#allocation200_spill] sm:$0xff] %v7422_v35  ;;  %v7443_v35 = vmul.f32 %v1805_v18, %v10141_v34  ;;  %v10155_v34 = vld [vmem:[#allocation121_spill] sm:$0xff] }
 0x404   :  { %10130 = vst [vmem:[#allocation99_spill] sm:$0xff] %v7425_v6  ;;  %v7446_v6 = vmul.f32 %v1805_v18, %v10143_v31  ;;  %v1815_v31 = vpop.permute.xlu1 %1814 }
 0x405   :  { %10132 = vst [vmem:[#allocation201_spill] sm:$0xff] %v7428_v1  ;;  %v7449_v1 = vmul.f32 %v1805_v18, %v10145_v52  ;;  %v10159_v52 = vld [vmem:[#allocation112_spill] sm:$0xff] }
 0x406   :  { %10134 = vst [vmem:[#allocation202_spill] sm:$0xff] %v7431_v56  ;;  %v7452_v56 = vmul.f32 %v1805_v18, %v10147_v42  ;;  %v10161_v42 = vld [vmem:[#allocation124_spill] sm:$0xff] }
 0x407   :  { %10136 = vst [vmem:[#allocation203_spill] sm:$0xff] %v7434_v57  ;;  %v7455_v57 = vmul.f32 %v1805_v18, %v10149_v60  ;;  %v10163_v60 = vld [vmem:[#allocation49_spill] sm:$0xff] }
 0x408   :  { %10138 = vst [vmem:[#allocation204_spill] sm:$0xff] %v7437_v15  ;;  %v7458_v15 = vmul.f32 %v1805_v18, %v10151_v53  ;;  %v10165_v18 = vld [vmem:[#allocation127_spill] sm:$0xff] }
 0x409   :  { %10140 = vst [vmem:[#allocation205_spill] sm:$0xff] %v7440_v44  ;;  %v7461_v44 = vmul.f32 %v1810_v10, %v10153_v16  ;;  %v7479_v53 = vmul.f32 %v1810_v10, %v10165_v18  ;;  %v10167_v16 = vld [vmem:[#allocation125_spill] sm:$0xff] }
 0x40a   :  { %10142 = vst [vmem:[#allocation206_spill] sm:$0xff] %v7443_v35  ;;  %v7464_v35 = vmul.f32 %v1810_v10, %v10155_v34  ;;  %v10169_v34 = vld [vmem:[#allocation130_spill] sm:$0xff]  ;;  %v10179_v18 = vld [vmem:[#allocation137_spill] sm:$0xff] }
 0x40b   :  { %10144 = vst [vmem:[#allocation32_spill] sm:$0xff] %v7446_v6  ;;  %v10157_v6 = vld [vmem:[#allocation122_spill] sm:$0xff] }
 0x40c   :  { %10146 = vst [vmem:[#allocation208_spill] sm:$0xff] %v7449_v1  ;;  %v7467_v39 = vmul.f32 %v1810_v10, %v10157_v6  ;;  %v7470_v1 = vmul.f32 %v1810_v10, %v10159_v52  ;;  %v10171_v6 = vld [vmem:[#allocation129_spill] sm:$0xff]  ;;  %v10173_v52 = vld [vmem:[#allocation131_spill] sm:$0xff] }
 0x40d   :  { %10148 = vst [vmem:[#allocation212_spill] sm:$0xff] %v7452_v56  ;;  %v7473_v56 = vmul.f32 %v1810_v10, %v10161_v42  ;;  %v10175_v42 = vld [vmem:[#allocation133_spill] sm:$0xff] }
 0x40e   :  { %10150 = vst [vmem:[#allocation103_spill] sm:$0xff] %v7455_v57  ;;  %v7476_v57 = vmul.f32 %v1810_v10, %v10163_v60  ;;  %v10177_v60 = vld [vmem:[#allocation135_spill] sm:$0xff] }
 0x40f   :  { %10152 = vst [vmem:[#allocation34_spill] sm:$0xff] %v7458_v15  ;;  %v7482_v15 = vmul.f32 %v1810_v10, %v10167_v16  ;;  %v10181_v16 = vld [vmem:[#allocation138_spill] sm:$0xff] }
 0x410   :  { %10154 = vst [vmem:[#allocation214_spill] sm:$0xff] %v7461_v44 }
 0x411   :  { %10156 = vst [vmem:[#allocation216_spill] sm:$0xff] %v7464_v35  ;;  %v7485_v35 = vmul.f32 %v1810_v10, %v10169_v34  ;;  %v10183_v34 = vld [vmem:[#allocation140_spill] sm:$0xff] }
 0x412   :  { %10158 = vst [vmem:[#allocation220_spill] sm:$0xff] %v7467_v39  ;;  %v7488_v39 = vmul.f32 %v1810_v10, %v10171_v6  ;;  %v10185_v6 = vld [vmem:[#allocation142_spill] sm:$0xff] }
 0x413   :  { %10160 = vst [vmem:[#allocation222_spill] sm:$0xff] %v7470_v1  ;;  %v7491_v1 = vmul.f32 %v1810_v10, %v10173_v52  ;;  %v10187_v52 = vld [vmem:[#allocation64_spill] sm:$0xff] }
 0x414   :  { %10162 = vst [vmem:[#allocation226_spill] sm:$0xff] %v7473_v56  ;;  %v7494_v56 = vmul.f32 %v1810_v10, %v10175_v42  ;;  %v1820_v42 = vpop.permute.xlu2 %1819 }
 0x415   :  { %10164 = vst [vmem:[#allocation106_spill] sm:$0xff] %v7476_v57  ;;  %v7497_v57 = vmul.f32 %v1810_v10, %v10177_v60  ;;  %v10191_v60 = vld [vmem:[#allocation66_spill] sm:$0xff] }
 0x416   :  { %10166 = vst [vmem:[#allocation85_spill] sm:$0xff] %v7479_v53  ;;  %v7500_v53 = vmul.f32 %v1810_v10, %v10179_v18  ;;  %v10193_v18 = vld [vmem:[#allocation67_spill] sm:$0xff] }
 0x417   :  { %10168 = vst [vmem:[#allocation232_spill] sm:$0xff] %v7482_v15  ;;  %v7503_v15 = vmul.f32 %v1810_v10, %v10181_v16  ;;  %v10195_v16 = vld [vmem:[#allocation68_spill] sm:$0xff] }
 0x418   :  { %10170 = vst [vmem:[#allocation87_spill] sm:$0xff] %v7485_v35  ;;  %v7506_v35 = vmul.f32 %v1810_v10, %v10183_v34  ;;  %v10197_v10 = vld [vmem:[#allocation69_spill] sm:$0xff] }
 0x419   :  { %10172 = vst [vmem:[#allocation108_spill] sm:$0xff] %v7488_v39  ;;  %v7509_v39 = vmul.f32 %v1815_v31, %v10185_v6  ;;  %v7527_v34 = vmul.f32 %v1815_v31, %v10197_v10  ;;  %v10199_v6 = vld [vmem:[#allocation30_spill] sm:$0xff] }
 0x41a   :  { %10174 = vst [vmem:[#allocation101_spill] sm:$0xff] %v7491_v1  ;;  %v7512_v1 = vmul.f32 %v1815_v31, %v10187_v52  ;;  %v10201_v52 = vld [vmem:[#allocation31_spill] sm:$0xff]  ;;  %v10211_v10 = vld [vmem:[#allocation86_spill] sm:$0xff] }
 0x41b   :  { %10176 = vst [vmem:[#allocation115_spill] sm:$0xff] %v7494_v56  ;;  %v10189_v56 = vld [vmem:[#allocation65_spill] sm:$0xff] }
 0x41c   :  { %10178 = vst [vmem:[#allocation43_spill] sm:$0xff] %v7497_v57  ;;  %v7515_v44 = vmul.f32 %v1815_v31, %v10189_v56  ;;  %v7518_v57 = vmul.f32 %v1815_v31, %v10191_v60  ;;  %v10203_v56 = vld [vmem:[#allocation207_spill] sm:$0xff]  ;;  %v10205_v60 = vld [vmem:[#allocation33_spill] sm:$0xff] }
 0x41d   :  { %10180 = vst [vmem:[#allocation52_spill] sm:$0xff] %v7500_v53  ;;  %v7521_v53 = vmul.f32 %v1815_v31, %v10193_v18  ;;  %v10207_v18 = vld [vmem:[#allocation35_spill] sm:$0xff] }
 0x41e   :  { %10182 = vst [vmem:[#allocation89_spill] sm:$0xff] %v7503_v15  ;;  %v7524_v15 = vmul.f32 %v1815_v31, %v10195_v16  ;;  %v10209_v16 = vld [vmem:[#allocation37_spill] sm:$0xff] }
 0x41f   :  { %10184 = vst [vmem:[#allocation95_spill] sm:$0xff] %v7506_v35  ;;  %v7530_v35 = vmul.f32 %v1815_v31, %v10199_v6  ;;  %v10213_v6 = vld [vmem:[#allocation88_spill] sm:$0xff] }
 0x420   :  { %10186 = vst [vmem:[#allocation97_spill] sm:$0xff] %v7509_v39 }
 0x421   :  { %10188 = vst [vmem:[#allocation105_spill] sm:$0xff] %v7512_v1  ;;  %v7533_v1 = vmul.f32 %v1815_v31, %v10201_v52  ;;  %v10215_v52 = vld [vmem:[#allocation91_spill] sm:$0xff] }
 0x422   :  { %10190 = vst [vmem:[#allocation111_spill] sm:$0xff] %v7515_v44  ;;  %v7536_v44 = vmul.f32 %v1815_v31, %v10203_v56  ;;  %v10217_v56 = vld [vmem:[#allocation210_spill] sm:$0xff] }
 0x423   :  { %10192 = vst [vmem:[#allocation113_spill] sm:$0xff] %v7518_v57  ;;  %v7539_v57 = vmul.f32 %v1815_v31, %v10205_v60  ;;  %v10219_v60 = vld [vmem:[#allocation144_spill] sm:$0xff] }
 0x424   :  { %10194 = vst [vmem:[#allocation38_spill] sm:$0xff] %v7521_v53  ;;  %v7542_v53 = vmul.f32 %v1815_v31, %v10207_v18  ;;  %v1825_v18 = vpop.permute.xlu0 %1824 }
 0x425   :  { %10196 = vst [vmem:[#allocation40_spill] sm:$0xff] %v7524_v15  ;;  %v7545_v15 = vmul.f32 %v1815_v31, %v10209_v16  ;;  %v10223_v16 = vld [vmem:[#allocation147_spill] sm:$0xff] }
 0x426   :  { %10198 = vst [vmem:[#allocation42_spill] sm:$0xff] %v7527_v34  ;;  %v7548_v34 = vmul.f32 %v1815_v31, %v10211_v10  ;;  %v10225_v10 = vld [vmem:[#allocation54_spill] sm:$0xff] }
 0x427   :  { %10200 = vst [vmem:[#allocation45_spill] sm:$0xff] %v7530_v35  ;;  %v7551_v35 = vmul.f32 %v1815_v31, %v10213_v6  ;;  %v10227_v6 = vld [vmem:[#allocation56_spill] sm:$0xff] }
 0x428   :  { %10202 = vst [vmem:[#allocation48_spill] sm:$0xff] %v7533_v1  ;;  %v7554_v1 = vmul.f32 %v1815_v31, %v10215_v52  ;;  %v10229_v31 = vld [vmem:[#allocation57_spill] sm:$0xff] }
 0x429   :  { %10204 = vst [vmem:[#allocation50_spill] sm:$0xff] %v7536_v44  ;;  %v7557_v44 = vmul.f32 %v1820_v42, %v10217_v56  ;;  %v7575_v52 = vmul.f32 %v1820_v42, %v10229_v31  ;;  %v10231_v56 = vld [vmem:[#allocation150_spill] sm:$0xff]  ;;  %v10243_v31 = vld [vmem:[#allocation159_spill] sm:$0xff] }
 0x42a   :  { %10206 = vst [vmem:[#allocation117_spill] sm:$0xff] %v7539_v57  ;;  %v7560_v57 = vmul.f32 %v1820_v42, %v10219_v60  ;;  %v10233_v60 = vld [vmem:[#allocation151_spill] sm:$0xff] }
 0x42b   :  { %10208 = vst [vmem:[#allocation78_spill] sm:$0xff] %v7542_v53  ;;  %v10221_v53 = vld [vmem:[#allocation146_spill] sm:$0xff] }
 0x42c   :  { %10210 = vst [vmem:[#allocation119_spill] sm:$0xff] %v7545_v15  ;;  %v7563_v39 = vmul.f32 %v1820_v42, %v10221_v53  ;;  %v7566_v15 = vmul.f32 %v1820_v42, %v10223_v16  ;;  %v10235_v53 = vld [vmem:[#allocation153_spill] sm:$0xff]  ;;  %v10237_v16 = vld [vmem:[#allocation154_spill] sm:$0xff] }
 0x42d   :  { %10212 = vst [vmem:[#allocation84_spill] sm:$0xff] %v7548_v34  ;;  %v7569_v34 = vmul.f32 %v1820_v42, %v10225_v10  ;;  %v10239_v10 = vld [vmem:[#allocation156_spill] sm:$0xff] }
 0x42e   :  { %10214 = vst [vmem:[#allocation228_spill] sm:$0xff] %v7551_v35  ;;  %v7572_v35 = vmul.f32 %v1820_v42, %v10227_v6  ;;  %v10241_v6 = vld [vmem:[#allocation157_spill] sm:$0xff] }
 0x42f   :  { %10216 = vst [vmem:[#allocation121_spill] sm:$0xff] %v7554_v1  ;;  %v7578_v1 = vmul.f32 %v1820_v42, %v10231_v56  ;;  %v10245_v56 = vld [vmem:[#allocation161_spill] sm:$0xff] }
 0x430   :  { %10218 = vst [vmem:[#allocation122_spill] sm:$0xff] %v7557_v44 }
 0x431   :  { %10220 = vst [vmem:[#allocation112_spill] sm:$0xff] %v7560_v57  ;;  %v7581_v57 = vmul.f32 %v1820_v42, %v10233_v60  ;;  %v10247_v60 = vld [vmem:[#allocation163_spill] sm:$0xff] }
 0x432   :  { %10222 = vst [vmem:[#allocation124_spill] sm:$0xff] %v7563_v39  ;;  %v7584_v39 = vmul.f32 %v1820_v42, %v10235_v53  ;;  %v10249_v53 = vld [vmem:[#allocation164_spill] sm:$0xff] }
 0x433   :  { %10224 = vst [vmem:[#allocation49_spill] sm:$0xff] %v7566_v15  ;;  %v7587_v15 = vmul.f32 %v1820_v42, %v10237_v16  ;;  %v10251_v16 = vld [vmem:[#allocation158_spill] sm:$0xff] }
 0x434   :  { %10226 = vst [vmem:[#allocation127_spill] sm:$0xff] %v7569_v34  ;;  %v7590_v34 = vmul.f32 %v1820_v42, %v10239_v10  ;;  %v1830_v10 = vpop.permute.xlu1 %1829 }
 0x435   :  { %10228 = vst [vmem:[#allocation125_spill] sm:$0xff] %v7572_v35  ;;  %v7593_v35 = vmul.f32 %v1820_v42, %v10241_v6  ;;  %v10255_v6 = vld [vmem:[#allocation162_spill] sm:$0xff] }
 0x436   :  { %10230 = vst [vmem:[#allocation130_spill] sm:$0xff] %v7575_v52  ;;  %v7596_v52 = vmul.f32 %v1820_v42, %v10243_v31  ;;  %v10257_v31 = vld [vmem:[#allocation165_spill] sm:$0xff] }
 0x437   :  { %10232 = vst [vmem:[#allocation129_spill] sm:$0xff] %v7578_v1  ;;  %v7599_v1 = vmul.f32 %v1820_v42, %v10245_v56  ;;  %v10259_v56 = vld [vmem:[#allocation167_spill] sm:$0xff] }
 0x438   :  { %10234 = vst [vmem:[#allocation131_spill] sm:$0xff] %v7581_v57  ;;  %v7602_v57 = vmul.f32 %v1820_v42, %v10247_v60  ;;  %v10261_v42 = vld [vmem:[#allocation169_spill] sm:$0xff] }
 0x439   :  { %10236 = vst [vmem:[#allocation133_spill] sm:$0xff] %v7584_v39  ;;  %v7605_v39 = vmul.f32 %v1825_v18, %v10249_v53  ;;  %v7623_v60 = vmul.f32 %v1825_v18, %v10261_v42  ;;  %v10263_v53 = vld [vmem:[#allocation172_spill] sm:$0xff] }
 0x43a   :  { %10238 = vst [vmem:[#allocation135_spill] sm:$0xff] %v7587_v15  ;;  %v7608_v15 = vmul.f32 %v1825_v18, %v10251_v16  ;;  %v10265_v16 = vld [vmem:[#allocation175_spill] sm:$0xff]  ;;  %v10275_v42 = vld [vmem:[#allocation184_spill] sm:$0xff] }
 0x43b   :  { %10240 = vst [vmem:[#allocation137_spill] sm:$0xff] %v7590_v34  ;;  %v10253_v34 = vld [vmem:[#allocation160_spill] sm:$0xff] }
 0x43c   :  { %10242 = vst [vmem:[#allocation138_spill] sm:$0xff] %v7593_v35  ;;  %v7611_v44 = vmul.f32 %v1825_v18, %v10253_v34  ;;  %v7614_v35 = vmul.f32 %v1825_v18, %v10255_v6  ;;  %v10267_v34 = vld [vmem:[#allocation177_spill] sm:$0xff]  ;;  %v10269_v6 = vld [vmem:[#allocation18_spill] sm:$0xff] }
 0x43d   :  { %10244 = vst [vmem:[#allocation140_spill] sm:$0xff] %v7596_v52  ;;  %v7617_v52 = vmul.f32 %v1825_v18, %v10257_v31  ;;  %v10271_v31 = vld [vmem:[#allocation180_spill] sm:$0xff] }
 0x43e   :  { %10246 = vst [vmem:[#allocation142_spill] sm:$0xff] %v7599_v1  ;;  %v7620_v1 = vmul.f32 %v1825_v18, %v10259_v56  ;;  %v10273_v56 = vld [vmem:[#allocation20_spill] sm:$0xff] }
 0x43f   :  { %10248 = vst [vmem:[#allocation64_spill] sm:$0xff] %v7602_v57  ;;  %v7626_v57 = vmul.f32 %v1825_v18, %v10263_v53  ;;  %v10277_v53 = vld [vmem:[#allocation22_spill] sm:$0xff] }
 0x440   :  { %10250 = vst [vmem:[#allocation65_spill] sm:$0xff] %v7605_v39 }
 0x441   :  { %10252 = vst [vmem:[#allocation66_spill] sm:$0xff] %v7608_v15  ;;  %v7629_v15 = vmul.f32 %v1825_v18, %v10265_v16  ;;  %v10279_v16 = vld [vmem:[#allocation189_spill] sm:$0xff] }
 0x442   :  { %10254 = vst [vmem:[#allocation67_spill] sm:$0xff] %v7611_v44  ;;  %v7632_v44 = vmul.f32 %v1825_v18, %v10267_v34  ;;  %v10281_v34 = vld [vmem:[#allocation191_spill] sm:$0xff] }
 0x443   :  { %10256 = vst [vmem:[#allocation68_spill] sm:$0xff] %v7614_v35  ;;  %v7635_v35 = vmul.f32 %v1825_v18, %v10269_v6  ;;  %v10283_v6 = vld [vmem:[#allocation209_spill] sm:$0xff] }
 0x444   :  { %10258 = vst [vmem:[#allocation69_spill] sm:$0xff] %v7617_v52  ;;  %v7638_v52 = vmul.f32 %v1825_v18, %v10271_v31  ;;  %v1835_v31 = vpop.permute.xlu2 %1834 }
 0x445   :  { %10260 = vst [vmem:[#allocation30_spill] sm:$0xff] %v7620_v1  ;;  %v7641_v1 = vmul.f32 %v1825_v18, %v10273_v56  ;;  %v10287_v56 = vld [vmem:[#allocation213_spill] sm:$0xff] }
 0x446   :  { %10262 = vst [vmem:[#allocation31_spill] sm:$0xff] %v7623_v60  ;;  %v7644_v60 = vmul.f32 %v1825_v18, %v10275_v42  ;;  %v10289_v42 = vld [vmem:[#allocation215_spill] sm:$0xff] }
 0x447   :  { %10264 = vst [vmem:[#allocation207_spill] sm:$0xff] %v7626_v57  ;;  %v7647_v57 = vmul.f32 %v1825_v18, %v10277_v53  ;;  %v10291_v53 = vld [vmem:[#allocation217_spill] sm:$0xff] }
 0x448   :  { %10266 = vst [vmem:[#allocation33_spill] sm:$0xff] %v7629_v15  ;;  %v7650_v15 = vmul.f32 %v1825_v18, %v10279_v16  ;;  %v10293_v18 = vld [vmem:[#allocation219_spill] sm:$0xff] }
 0x449   :  { %10268 = vst [vmem:[#allocation35_spill] sm:$0xff] %v7632_v44  ;;  %v7653_v44 = vmul.f32 %v1830_v10, %v10281_v34  ;;  %v7671_v16 = vmul.f32 %v1830_v10, %v10293_v18  ;;  %v10295_v34 = vld [vmem:[#allocation221_spill] sm:$0xff] }
 0x44a   :  { %10270 = vst [vmem:[#allocation37_spill] sm:$0xff] %v7635_v35  ;;  %v7656_v35 = vmul.f32 %v1830_v10, %v10283_v6  ;;  %v10297_v6 = vld [vmem:[#allocation223_spill] sm:$0xff]  ;;  %v10307_v18 = vld [vmem:[#allocation233_spill] sm:$0xff] }
 0x44b   :  { %10272 = vst [vmem:[#allocation86_spill] sm:$0xff] %v7638_v52  ;;  %v10285_v52 = vld [vmem:[#allocation211_spill] sm:$0xff] }
 0x44c   :  { %10274 = vst [vmem:[#allocation88_spill] sm:$0xff] %v7641_v1  ;;  %v7659_v39 = vmul.f32 %v1830_v10, %v10285_v52  ;;  %v7662_v1 = vmul.f32 %v1830_v10, %v10287_v56  ;;  %v10299_v52 = vld [vmem:[#allocation225_spill] sm:$0xff]  ;;  %v10301_v56 = vld [vmem:[#allocation227_spill] sm:$0xff] }
 0x44d   :  { %10276 = vst [vmem:[#allocation91_spill] sm:$0xff] %v7644_v60  ;;  %v7665_v60 = vmul.f32 %v1830_v10, %v10289_v42  ;;  %v10303_v42 = vld [vmem:[#allocation229_spill] sm:$0xff] }
 0x44e   :  { %10278 = vst [vmem:[#allocation210_spill] sm:$0xff] %v7647_v57  ;;  %v7668_v57 = vmul.f32 %v1830_v10, %v10291_v53  ;;  %v10305_v53 = vld [vmem:[#allocation231_spill] sm:$0xff] }
 0x44f   :  { %10280 = vst [vmem:[#allocation144_spill] sm:$0xff] %v7650_v15  ;;  %v7674_v15 = vmul.f32 %v1830_v10, %v10295_v34  ;;  %v10309_v34 = vld [vmem:[#allocation235_spill] sm:$0xff] }
 0x450   :  { %10282 = vst [vmem:[#allocation146_spill] sm:$0xff] %v7653_v44 }
 0x451   :  { %10284 = vst [vmem:[#allocation147_spill] sm:$0xff] %v7656_v35  ;;  %v7677_v35 = vmul.f32 %v1830_v10, %v10297_v6  ;;  %v10311_v6 = vld [vmem:[#allocation237_spill] sm:$0xff] }
 0x452   :  { %10286 = vst [vmem:[#allocation54_spill] sm:$0xff] %v7659_v39  ;;  %v7680_v39 = vmul.f32 %v1830_v10, %v10299_v52  ;;  %v10313_v52 = vld [vmem:[#allocation218_spill] sm:$0xff] }
 0x453   :  { %10288 = vst [vmem:[#allocation56_spill] sm:$0xff] %v7662_v1  ;;  %v7683_v1 = vmul.f32 %v1830_v10, %v10301_v56  ;;  %v10315_v56 = vld [vmem:[#allocation166_spill] sm:$0xff] }
 0x454   :  { %10290 = vst [vmem:[#allocation57_spill] sm:$0xff] %v7665_v60  ;;  %v7686_v60 = vmul.f32 %v1830_v10, %v10303_v42  ;;  %v1840_v42 = vpop.permute.xlu0 %1839 }
 0x455   :  { %10292 = vst [vmem:[#allocation150_spill] sm:$0xff] %v7668_v57  ;;  %v7689_v57 = vmul.f32 %v1830_v10, %v10305_v53  ;;  %v10319_v53 = vld [vmem:[#allocation170_spill] sm:$0xff] }
 0x456   :  { %10294 = vst [vmem:[#allocation151_spill] sm:$0xff] %v7671_v16  ;;  %v7692_v16 = vmul.f32 %v1830_v10, %v10307_v18  ;;  %v10321_v18 = vld [vmem:[#allocation171_spill] sm:$0xff] }
 0x457   :  { %10296 = vst [vmem:[#allocation153_spill] sm:$0xff] %v7674_v15  ;;  %v7695_v15 = vmul.f32 %v1830_v10, %v10309_v34  ;;  %v10323_v34 = vld [vmem:[#allocation173_spill] sm:$0xff] }
 0x458   :  { %10298 = vst [vmem:[#allocation154_spill] sm:$0xff] %v7677_v35  ;;  %v7698_v35 = vmul.f32 %v1830_v10, %v10311_v6  ;;  %v10325_v10 = vld [vmem:[#allocation174_spill] sm:$0xff] }
 0x459   :  { %10300 = vst [vmem:[#allocation156_spill] sm:$0xff] %v7680_v39  ;;  %v7701_v39 = vmul.f32 %v1835_v31, %v10313_v52  ;;  %v7719_v6 = vmul.f32 %v1835_v31, %v10325_v10  ;;  %v10327_v52 = vld [vmem:[#allocation176_spill] sm:$0xff]  ;;  %v10339_v10 = vld [vmem:[#allocation185_spill] sm:$0xff] }
 0x45a   :  { %10302 = vst [vmem:[#allocation157_spill] sm:$0xff] %v7683_v1  ;;  %v7704_v1 = vmul.f32 %v1835_v31, %v10315_v56  ;;  %v10329_v56 = vld [vmem:[#allocation178_spill] sm:$0xff] }
 0x45b   :  { %10304 = vst [vmem:[#allocation159_spill] sm:$0xff] %v7686_v60  ;;  %v10317_v60 = vld [vmem:[#allocation168_spill] sm:$0xff] }
 0x45c   :  { %10306 = vst [vmem:[#allocation161_spill] sm:$0xff] %v7689_v57  ;;  %v7707_v44 = vmul.f32 %v1835_v31, %v10317_v60  ;;  %v7710_v57 = vmul.f32 %v1835_v31, %v10319_v53  ;;  %v10331_v60 = vld [vmem:[#allocation179_spill] sm:$0xff]  ;;  %v10333_v53 = vld [vmem:[#allocation181_spill] sm:$0xff] }
 0x45d   :  { %10308 = vst [vmem:[#allocation163_spill] sm:$0xff] %v7692_v16  ;;  %v7713_v16 = vmul.f32 %v1835_v31, %v10321_v18  ;;  %v10335_v18 = vld [vmem:[#allocation182_spill] sm:$0xff] }
 0x45e   :  { %10310 = vst [vmem:[#allocation164_spill] sm:$0xff] %v7695_v15  ;;  %v7716_v15 = vmul.f32 %v1835_v31, %v10323_v34  ;;  %v10337_v34 = vld [vmem:[#allocation183_spill] sm:$0xff] }
 0x45f   :  { %10312 = vst [vmem:[#allocation158_spill] sm:$0xff] %v7698_v35  ;;  %v7722_v35 = vmul.f32 %v1835_v31, %v10327_v52  ;;  %v10341_v52 = vld [vmem:[#allocation186_spill] sm:$0xff] }
 0x460   :  { %10314 = vst [vmem:[#allocation160_spill] sm:$0xff] %v7701_v39 }
 0x461   :  { %10316 = vst [vmem:[#allocation162_spill] sm:$0xff] %v7704_v1  ;;  %v7725_v1 = vmul.f32 %v1835_v31, %v10329_v56  ;;  %v10343_v56 = vld [vmem:[#allocation187_spill] sm:$0xff] }
 0x462   :  { %10318 = vst [vmem:[#allocation165_spill] sm:$0xff] %v7707_v44  ;;  %v7728_v44 = vmul.f32 %v1835_v31, %v10331_v60  ;;  %v10345_v60 = vld [vmem:[#allocation188_spill] sm:$0xff] }
 0x463   :  { %10320 = vst [vmem:[#allocation167_spill] sm:$0xff] %v7710_v57  ;;  %v7731_v57 = vmul.f32 %v1835_v31, %v10333_v53  ;;  %v10347_v53 = vld [vmem:[#allocation239_spill] sm:$0xff] }
 0x464   :  { %10322 = vst [vmem:[#allocation169_spill] sm:$0xff] %v7713_v16  ;;  %v7734_v16 = vmul.f32 %v1835_v31, %v10335_v18  ;;  %v1845_v18 = vpop.permute.xlu1 %1844 }
 0x465   :  { %10324 = vst [vmem:[#allocation172_spill] sm:$0xff] %v7716_v15  ;;  %v7737_v15 = vmul.f32 %v1835_v31, %v10337_v34  ;;  %v10351_v34 = vld [vmem:[#allocation70_spill] sm:$0xff] }
 0x466   :  { %10326 = vst [vmem:[#allocation175_spill] sm:$0xff] %v7719_v6  ;;  %v7740_v6 = vmul.f32 %v1835_v31, %v10339_v10  ;;  %v10353_v10 = vld [vmem:[#allocation71_spill] sm:$0xff] }
 0x467   :  { %10328 = vst [vmem:[#allocation177_spill] sm:$0xff] %v7722_v35  ;;  %v7743_v35 = vmul.f32 %v1835_v31, %v10341_v52  ;;  %v10355_v52 = vld [vmem:[#allocation72_spill] sm:$0xff] }
 0x468   :  { %10330 = vst [vmem:[#allocation18_spill] sm:$0xff] %v7725_v1  ;;  %v7746_v1 = vmul.f32 %v1835_v31, %v10343_v56  ;;  %v10357_v31 = vld [vmem:[#allocation73_spill] sm:$0xff] }
 0x469   :  { %10332 = vst [vmem:[#allocation180_spill] sm:$0xff] %v7728_v44  ;;  %v7749_v44 = vmul.f32 %v1840_v42, %v10345_v60  ;;  %v7767_v56 = vmul.f32 %v1840_v42, %v10357_v31  ;;  %v10359_v60 = vld [vmem:[#allocation74_spill] sm:$0xff]  ;;  %v10371_v31 = vld [vmem:[#allocation80_spill] sm:$0xff] }
 0x46a   :  { %10334 = vst [vmem:[#allocation20_spill] sm:$0xff] %v7731_v57  ;;  %v7752_v57 = vmul.f32 %v1840_v42, %v10347_v53  ;;  %v10361_v53 = vld [vmem:[#allocation75_spill] sm:$0xff] }
 0x46b   :  { %10336 = vst [vmem:[#allocation184_spill] sm:$0xff] %v7734_v16  ;;  %v10349_v16 = vld [vmem:[#allocation36_spill] sm:$0xff] }
 0x46c   :  { %10338 = vst [vmem:[#allocation22_spill] sm:$0xff] %v7737_v15  ;;  %v7755_v39 = vmul.f32 %v1840_v42, %v10349_v16  ;;  %v7758_v15 = vmul.f32 %v1840_v42, %v10351_v34  ;;  %v10363_v16 = vld [vmem:[#allocation76_spill] sm:$0xff]  ;;  %v10365_v34 = vld [vmem:[#allocation77_spill] sm:$0xff] }
 0x46d   :  { %10340 = vst [vmem:[#allocation189_spill] sm:$0xff] %v7740_v6  ;;  %v7761_v6 = vmul.f32 %v1840_v42, %v10353_v10  ;;  %v10367_v10 = vld [vmem:[#allocation224_spill] sm:$0xff] }
 0x46e   :  { %10342 = vst [vmem:[#allocation191_spill] sm:$0xff] %v7743_v35  ;;  %v7764_v35 = vmul.f32 %v1840_v42, %v10355_v52  ;;  %v10369_v52 = vld [vmem:[#allocation79_spill] sm:$0xff] }
 0x46f   :  { %10344 = vst [vmem:[#allocation209_spill] sm:$0xff] %v7746_v1  ;;  %v7770_v1 = vmul.f32 %v1840_v42, %v10359_v60  ;;  %v10373_v60 = vld [vmem:[#allocation81_spill] sm:$0xff] }
 0x470   :  { %10346 = vst [vmem:[#allocation211_spill] sm:$0xff] %v7749_v44 }
 0x471   :  { %10348 = vst [vmem:[#allocation213_spill] sm:$0xff] %v7752_v57  ;;  %v7773_v57 = vmul.f32 %v1840_v42, %v10361_v53  ;;  %v10375_v53 = vld [vmem:[#allocation82_spill] sm:$0xff] }
 0x472   :  { %10350 = vst [vmem:[#allocation215_spill] sm:$0xff] %v7755_v39  ;;  %v7776_v39 = vmul.f32 %v1840_v42, %v10363_v16  ;;  %v10377_v16 = vld [vmem:[#allocation83_spill] sm:$0xff] }
 0x473   :  { %10352 = vst [vmem:[#allocation217_spill] sm:$0xff] %v7758_v15  ;;  %v7779_v15 = vmul.f32 %v1840_v42, %v10365_v34  ;;  %v10379_v34 = vld [vmem:[#allocation6_spill] sm:$0xff] }
 0x474   :  { %10354 = vst [vmem:[#allocation219_spill] sm:$0xff] %v7761_v6  ;;  %v7782_v6 = vmul.f32 %v1840_v42, %v10367_v10  ;;  %v1850_v10 = vpop.permute.xlu2 %1849 }
 0x475   :  { %10356 = vst [vmem:[#allocation221_spill] sm:$0xff] %v7764_v35  ;;  %v7785_v35 = vmul.f32 %v1840_v42, %v10369_v52  ;;  %v10383_v52 = vld [vmem:[#allocation8_spill] sm:$0xff] }
 0x476   :  { %10358 = vst [vmem:[#allocation223_spill] sm:$0xff] %v7767_v56  ;;  %v7788_v56 = vmul.f32 %v1840_v42, %v10371_v31  ;;  %v10385_v31 = vld [vmem:[#allocation9_spill] sm:$0xff] }
 0x477   :  { %10360 = vst [vmem:[#allocation225_spill] sm:$0xff] %v7770_v1  ;;  %v7791_v1 = vmul.f32 %v1840_v42, %v10373_v60  ;;  %v10387_v60 = vld [vmem:[#allocation10_spill] sm:$0xff] }
 0x478   :  { %10362 = vst [vmem:[#allocation227_spill] sm:$0xff] %v7773_v57  ;;  %v7794_v57 = vmul.f32 %v1840_v42, %v10375_v53  ;;  %v10389_v42 = vld [vmem:[#allocation11_spill] sm:$0xff] }
 0x479   :  { %10364 = vst [vmem:[#allocation229_spill] sm:$0xff] %v7776_v39  ;;  %v7797_v39 = vmul.f32 %v1845_v18, %v10377_v16  ;;  %v7815_v53 = vmul.f32 %v1845_v18, %v10389_v42  ;;  %v10391_v16 = vld [vmem:[#allocation12_spill] sm:$0xff]  ;;  %v10403_v42 = vld [vmem:[#allocation230_spill] sm:$0xff] }
 0x47a   :  { %10366 = vst [vmem:[#allocation231_spill] sm:$0xff] %v7779_v15  ;;  %v7800_v15 = vmul.f32 %v1845_v18, %v10379_v34  ;;  %v10393_v34 = vld [vmem:[#allocation13_spill] sm:$0xff] }
 0x47b   :  { %10368 = vst [vmem:[#allocation233_spill] sm:$0xff] %v7782_v6  ;;  %v10381_v6 = vld [vmem:[#allocation7_spill] sm:$0xff] }
 0x47c   :  { %10370 = vst [vmem:[#allocation235_spill] sm:$0xff] %v7785_v35  ;;  %v7803_v44 = vmul.f32 %v1845_v18, %v10381_v6  ;;  %v7806_v35 = vmul.f32 %v1845_v18, %v10383_v52  ;;  %v10395_v6 = vld [vmem:[#allocation14_spill] sm:$0xff]  ;;  %v10397_v52 = vld [vmem:[#allocation15_spill] sm:$0xff] }
 0x47d   :  { %10372 = vst [vmem:[#allocation237_spill] sm:$0xff] %v7788_v56  ;;  %v7809_v56 = vmul.f32 %v1845_v18, %v10385_v31  ;;  %v10399_v31 = vld [vmem:[#allocation16_spill] sm:$0xff] }
 0x47e   :  { %10374 = vst [vmem:[#allocation218_spill] sm:$0xff] %v7791_v1  ;;  %v7812_v1 = vmul.f32 %v1845_v18, %v10387_v60  ;;  %v10401_v60 = vld [vmem:[#allocation17_spill] sm:$0xff] }
 0x47f   :  { %10376 = vst [vmem:[#allocation166_spill] sm:$0xff] %v7794_v57  ;;  %v7818_v57 = vmul.f32 %v1845_v18, %v10391_v16  ;;  %v10405_v16 = vld [vmem:[#allocation19_spill] sm:$0xff] }
 0x480   :  { %10378 = vst [vmem:[#allocation168_spill] sm:$0xff] %v7797_v39 }
 0x481   :  { %10380 = vst [vmem:[#allocation170_spill] sm:$0xff] %v7800_v15  ;;  %v7821_v15 = vmul.f32 %v1845_v18, %v10393_v34  ;;  %v10407_v34 = vld [vmem:[#allocation21_spill] sm:$0xff] }
 0x482   :  { %10382 = vst [vmem:[#allocation171_spill] sm:$0xff] %v7803_v44  ;;  %v7824_v44 = vmul.f32 %v1845_v18, %v10395_v6  ;;  %v10409_v6 = vld [vmem:[#allocation23_spill] sm:$0xff] }
 0x483   :  { %10384 = vst [vmem:[#allocation173_spill] sm:$0xff] %v7806_v35  ;;  %v7827_v35 = vmul.f32 %v1845_v18, %v10397_v52  ;;  %v10410_v52 = vld [vmem:[#allocation190_spill] sm:$0xff] }
 0x484   :  { %10386 = vst [vmem:[#allocation174_spill] sm:$0xff] %v7809_v56  ;;  %v7830_v56 = vmul.f32 %v1845_v18, %v10399_v31  ;;  %v1855_v31 = vpop.permute.xlu0 %1854 }
 0x485   :  { %10388 = vst [vmem:[#allocation176_spill] sm:$0xff] %v7812_v1  ;;  %v7833_v1 = vmul.f32 %v1845_v18, %v10401_v60  ;;  %v7854_v60 = vmul.f32 %v1850_v10, %v7086_v17  ;;  %v10420_v17 = vld [vmem:[#allocation27_spill] sm:$0xff] }
 0x486   :  { %10390 = vst [vmem:[#allocation178_spill] sm:$0xff] %v7815_v53  ;;  %v7836_v53 = vmul.f32 %v1845_v18, %v10403_v42  ;;  %v7857_v42 = vmul.f32 %v1850_v10, %v7089_v0  ;;  %v10422_v0 = vld [vmem:[#allocation241_spill] sm:$0xff] }
 0x487   :  { %10392 = vst [vmem:[#allocation179_spill] sm:$0xff] %v7818_v57  ;;  %v7839_v57 = vmul.f32 %v1845_v18, %v10405_v16  ;;  %v10412_v16 = vld [vmem:[#allocation192_spill] sm:$0xff] }
 0x488   :  { %10394 = vst [vmem:[#allocation181_spill] sm:$0xff] %v7821_v15  ;;  %v7842_v15 = vmul.f32 %v1845_v18, %v10407_v34  ;;  %v7863_v18 = vmul.f32 %v1850_v10, %v7095_v5  ;;  %v7866_v34 = vmul.f32 %v1850_v10, %v7098_v47  ;;  %v10426_v5 = vld [vmem:[#allocation243_spill] sm:$0xff]  ;;  %v10428_v47 = vld [vmem:[#allocation244_spill] sm:$0xff] }
 0x489   :  { %10396 = vst [vmem:[#allocation182_spill] sm:$0xff] %v7824_v44  ;;  %v7845_v44 = vmul.f32 %v1850_v10, %v10409_v6  ;;  %v10416_v6 = vld [vmem:[#allocation26_spill] sm:$0xff] }
 0x48a   :  { %10398 = vst [vmem:[#allocation183_spill] sm:$0xff] %v7827_v35  ;;  %v7848_v35 = vmul.f32 %v1850_v10, %v10410_v52  ;;  %v7869_v52 = vmul.f32 %v1850_v10, %v10416_v6  ;;  %v10430_v6 = vld [vmem:[#allocation58_spill] sm:$0xff] }
 0x48b   :  { %10400 = vst [vmem:[#allocation185_spill] sm:$0xff] %v7830_v56  ;;  %v10411_v56 = vld [vmem:[#allocation24_spill] sm:$0xff] }
 0x48c   :  { %10402 = vst [vmem:[#allocation186_spill] sm:$0xff] %v7833_v1  ;;  %v7851_v39 = vmul.f32 %v1850_v10, %v10411_v56  ;;  %v10418_v56 = vld [vmem:[#allocation194_spill] sm:$0xff]  ;;  %v7878_v1 = vmul.f32 %v1850_v10, %v10422_v0  ;;  %v1860_v0 = vpop.permute.xlu1 %1859 }
 0x48d   :  { %10404 = vst [vmem:[#allocation187_spill] sm:$0xff] %v7836_v53  ;;  %v7875_v53 = vmul.f32 %v1850_v10, %v10420_v17  ;;  %v7896_v17 = vmul.f32 %v1855_v31, %v7128_v22  ;;  %v7917_v22 = vmul.f32 %v1855_v31, %v7149_v8  ;;  %v10442_v8 = vld [vmem:[#allocation62_spill] sm:$0xff] }
 0x48e   :  { %10406 = vst [vmem:[#allocation188_spill] sm:$0xff] %v7839_v57  ;;  %v7860_v57 = vmul.f32 %v1850_v10, %v10412_v16  ;;  %v10424_v16 = vld [vmem:[#allocation242_spill] sm:$0xff] }
 0x48f   :  { %10408 = vst [vmem:[#allocation239_spill] sm:$0xff] %v7842_v15  ;;  %v7872_v15 = vmul.f32 %v1850_v10, %v10418_v56  ;;  %v10432_v56 = vld [vmem:[#allocation59_spill] sm:$0xff] }
 0x490   :  { %10413 = vst [vmem:[#allocation36_spill] sm:$0xff] %v7860_v57  ;;  %v7881_v57 = vmul.f32 %v1850_v10, %v10424_v16  ;;  %v7902_v16 = vmul.f32 %v1855_v31, %v7134_v11  ;;  %v7923_v11 = vmul.f32 %v1855_v31, %v7155_v14  ;;  %v7944_v14 = vmul.f32 %v1860_v0, %v7176_v62  ;;  %v10446_v62 = vld [vmem:[#allocation28_spill] sm:$0xff] }
 0x491   :  { %10414 = vst [vmem:[#allocation70_spill] sm:$0xff] %v7863_v18  ;;  %v7884_v18 = vmul.f32 %v1850_v10, %v10426_v5  ;;  %v7905_v5 = vmul.f32 %v1855_v31, %v7137_v13  ;;  %v7926_v13 = vmul.f32 %v1855_v31, %v7158_v19  ;;  %v1865_v19 = vpop.permute.xlu2 %1864 }
 0x492   :  { %10415 = vst [vmem:[#allocation71_spill] sm:$0xff] %v7866_v34  ;;  %v7887_v34 = vmul.f32 %v1850_v10, %v10428_v47  ;;  %v7908_v47 = vmul.f32 %v1855_v31, %v7140_v32  ;;  %v10438_v32 = vld [vmem:[#allocation61_spill] sm:$0xff] }
 0x493   :  { %10417 = vst [vmem:[#allocation72_spill] sm:$0xff] %v7869_v52  ;;  %v7890_v52 = vmul.f32 %v1850_v10, %v10430_v6  ;;  %v7911_v10 = vmul.f32 %v1855_v31, %v7143_v26  ;;  %v7914_v6 = vmul.f32 %v1855_v31, %v7146_v20  ;;  %v7932_v26 = vmul.f32 %v1855_v31, %v7164_v2 }
 0x494   :  { %10419 = vst [vmem:[#allocation73_spill] sm:$0xff] %v7872_v15  ;;  %v7893_v15 = vmul.f32 %v1855_v31, %v10432_v56  ;;  %v7935_v20 = vmul.f32 %v1855_v31, %v7167_v51  ;;  %v7953_v2 = vmul.f32 %v1860_v0, %v7185_v30  ;;  %v10445_v51 = vld [vmem:[#allocation25_spill] sm:$0xff]  ;;  %v7974_v30 = vmul.f32 %v1860_v0, %v7206_v4  ;;  %v1870_v4 = vpop.permute.xlu0 %1869 }
 0x495   :  { %10421 = vst [vmem:[#allocation74_spill] sm:$0xff] %v7875_v53 }
 0x496   :  { %10423 = vst [vmem:[#allocation75_spill] sm:$0xff] %v7878_v1  ;;  %v7899_v1 = vmul.f32 %v1855_v31, %v7131_v27  ;;  %v10434_v27 = vld [vmem:[#allocation60_spill] sm:$0xff] }
 0x497   :  { %10425 = vst [vmem:[#allocation76_spill] sm:$0xff] %v7881_v57  ;;  %v7920_v56 = vmul.f32 %v1855_v31, %v10434_v27  ;;  %v7941_v27 = vmul.f32 %v1860_v0, %v7173_v36  ;;  %v7962_v36 = vmul.f32 %v1860_v0, %v7194_v50  ;;  %v7983_v50 = vmul.f32 %v1860_v0, %v7215_v49  ;;  %v10462_v49 = vld [vmem:[#allocation41_spill] sm:$0xff] }
 0x498   :  { %10427 = vst [vmem:[#allocation77_spill] sm:$0xff] %v7884_v18 }
 0x499   :  { %10429 = vst [vmem:[#allocation224_spill] sm:$0xff] %v7887_v34  ;;  %v7938_v34 = vmul.f32 %v1855_v31, %v10442_v8  ;;  %v7965_v8 = vmul.f32 %v1860_v0, %v10446_v62  ;;  %v10456_v62 = vld [vmem:[#allocation110_spill] sm:$0xff] }
 0x49a   :  { %10431 = vst [vmem:[#allocation79_spill] sm:$0xff] %v7890_v52  ;;  %v7929_v52 = vmul.f32 %v1855_v31, %v10438_v32  ;;  %v7950_v32 = vmul.f32 %v1860_v0, %v7182_v12  ;;  %v7959_v31 = vmul.f32 %v1860_v0, %v7191_v45  ;;  %v7971_v12 = vmul.f32 %v1860_v0, %v7203_v24  ;;  %v10458_v24 = vld [vmem:[#allocation114_spill] sm:$0xff] }
 0x49b   :  { %10433 = vst [vmem:[#allocation80_spill] sm:$0xff] %v7917_v22  ;;  %v7980_v45 = vmul.f32 %v1860_v0, %v7212_v59  ;;  %v10461_v59 = vld [vmem:[#allocation39_spill] sm:$0xff] }
 0x49c   :  { %10435 = vst [vmem:[#allocation81_spill] sm:$0xff] %v7920_v56 }
 0x49d   :  { %10436 = vst [vmem:[#allocation82_spill] sm:$0xff] %v7923_v11 }
 0x49e   :  { %10437 = vst [vmem:[#allocation83_spill] sm:$0xff] %v7926_v13  ;;  %v10444_v13 = vld [vmem:[#allocation63_spill] sm:$0xff] }
 0x49f   :  { %10439 = vst [vmem:[#allocation6_spill] sm:$0xff] %v7929_v52  ;;  %v7947_v11 = vmul.f32 %v1860_v0, %v10444_v13  ;;  %v10448_v13 = vld [vmem:[#allocation109_spill] sm:$0xff] }
 0x4a0   :  { %10440 = vst [vmem:[#allocation7_spill] sm:$0xff] %v7932_v26 }
 0x4a1   :  { %10441 = vst [vmem:[#allocation8_spill] sm:$0xff] %v7935_v20  ;;  %v7956_v20 = vmul.f32 %v1860_v0, %v10445_v51  ;;  %v10452_v51 = vld [vmem:[#allocation234_spill] sm:$0xff] }
 0x4a2   :  { %10443 = vst [vmem:[#allocation9_spill] sm:$0xff] %v7938_v34  ;;  %v7968_v34 = vmul.f32 %v1860_v0, %v10448_v13  ;;  %v7977_v26 = vmul.f32 %v1860_v0, %v10452_v51  ;;  %v7989_v13 = vmul.f32 %v1865_v19, %v7221_v21  ;;  %v10460_v51 = vld [vmem:[#allocation116_spill] sm:$0xff]  ;;  %v8010_v21 = vmul.f32 %v1865_v19, %v7242_v43  ;;  %v10473_v43 = vld [vmem:[#allocation51_spill] sm:$0xff] }
 0x4a3   :  { %10447 = vst [vmem:[#allocation10_spill] sm:$0xff] %v7965_v8  ;;  %v7986_v8 = vmul.f32 %v1860_v0, %v10456_v62  ;;  %v8007_v0 = vmul.f32 %v1865_v19, %v7239_v23  ;;  %v10463_v62 = vld [vmem:[#allocation44_spill] sm:$0xff]  ;;  %v10471_v23 = vld [vmem:[#allocation238_spill] sm:$0xff]  ;;  %v8031_v22 = vmul.f32 %v1865_v19, %v10473_v43  ;;  %v8052_v43 = vmul.f32 %v1870_v4, %v7284_v40 }
 0x4a4   :  { %10449 = vst [vmem:[#allocation11_spill] sm:$0xff] %v7968_v34  ;;  %v8028_v56 = vmul.f32 %v1865_v19, %v10471_v23  ;;  %v10479_v23 = vld [vmem:[#allocation120_spill] sm:$0xff]  ;;  %v8073_v40 = vmul.f32 %v1870_v4, %v7305_v7 }
 0x4a5   :  { %10450 = vst [vmem:[#allocation12_spill] sm:$0xff] %v7971_v12  ;;  %v7992_v12 = vmul.f32 %v1865_v19, %v10458_v24  ;;  %v8013_v24 = vmul.f32 %v1865_v19, %v10463_v62  ;;  %v10475_v62 = vld [vmem:[#allocation53_spill] sm:$0xff] }
 0x4a6   :  { %10451 = vst [vmem:[#allocation13_spill] sm:$0xff] %v7974_v30  ;;  %v10459_v30 = vld [vmem:[#allocation236_spill] sm:$0xff] }
 0x4a7   :  { %10453 = vst [vmem:[#allocation14_spill] sm:$0xff] %v7977_v26  ;;  %v7995_v34 = vmul.f32 %v1865_v19, %v10459_v30  ;;  %v7998_v26 = vmul.f32 %v1865_v19, %v10460_v51  ;;  %v8016_v30 = vmul.f32 %v1865_v19, %v7248_v37  ;;  %v10466_v51 = vld [vmem:[#allocation46_spill] sm:$0xff]  ;;  %v10477_v37 = vld [vmem:[#allocation240_spill] sm:$0xff] }
 0x4a8   :  { %10454 = vst [vmem:[#allocation15_spill] sm:$0xff] %v7980_v45  ;;  %v8001_v45 = vmul.f32 %v1865_v19, %v10461_v59  ;;  %v10468_v59 = vld [vmem:[#allocation47_spill] sm:$0xff] }
 0x4a9   :  { %10455 = vst [vmem:[#allocation16_spill] sm:$0xff] %v7983_v50  ;;  %v8004_v50 = vmul.f32 %v1865_v19, %v10462_v49  ;;  %v8022_v52 = vmul.f32 %v1865_v19, %v10468_v59  ;;  %v8025_v49 = vmul.f32 %v1865_v19, %v7257_v48  ;;  %v1875_v59 = vpop.permute.xlu1 %1874  ;;  %v8046_v48 = vmul.f32 %v1870_v4, %v7278_v54  ;;  %v10485_v54 = vld [vmem:[#allocation126_spill] sm:$0xff] }
 0x4aa   :  { %10457 = vst [vmem:[#allocation17_spill] sm:$0xff] %v7986_v8  ;;  %v8019_v8 = vmul.f32 %v1865_v19, %v10466_v51  ;;  %v10478_v51 = vld [vmem:[#allocation118_spill] sm:$0xff]  ;;  %v8094_v7 = vmul.f32 %v1875_v59, %v7326_v46 }
 0x4ab   :  { %10464 = vst [vmem:[#allocation230_spill] sm:$0xff] %v8013_v24  ;;  %v8034_v24 = vmul.f32 %v1865_v19, %v10475_v62  ;;  %v8055_v19 = vmul.f32 %v1870_v4, %v7287_v38  ;;  %v10481_v62 = vld [vmem:[#allocation123_spill] sm:$0xff]  ;;  %v10489_v38 = vld [vmem:[#allocation128_spill] sm:$0xff]  ;;  %v10510_v46 = vld [vmem:[#allocation94_spill] sm:$0xff] }
 0x4ac   :  { %10465 = vst [vmem:[#allocation19_spill] sm:$0xff] %v8016_v30  ;;  %v8037_v30 = vmul.f32 %v1870_v4, %v10477_v37  ;;  %v8058_v37 = vmul.f32 %v1870_v4, %v10481_v62  ;;  %v10491_v62 = vld [vmem:[#allocation90_spill] sm:$0xff] }
 0x4ad   :  { %10467 = vst [vmem:[#allocation21_spill] sm:$0xff] %v8019_v8  ;;  %v8040_v8 = vmul.f32 %v1870_v4, %v10478_v51  ;;  %v8061_v51 = vmul.f32 %v1870_v4, %v7293_v61  ;;  %v10493_v61 = vld [vmem:[#allocation132_spill] sm:$0xff] }
 0x4ae   :  { %10469 = vst [vmem:[#allocation23_spill] sm:$0xff] %v8022_v52  ;;  %v8043_v52 = vmul.f32 %v1870_v4, %v7275_v25  ;;  %v8064_v25 = vmul.f32 %v1870_v4, %v7296_v33  ;;  %v10495_v33 = vld [vmem:[#allocation134_spill] sm:$0xff] }
 0x4af   :  { %10470 = vst [vmem:[#allocation190_spill] sm:$0xff] %v8025_v49  ;;  %v8079_v49 = vmul.f32 %v1870_v4, %v10491_v62  ;;  %v10503_v62 = vld [vmem:[#allocation139_spill] sm:$0xff] }
 0x4b0   :  { %10472 = vst [vmem:[#allocation24_spill] sm:$0xff] %v8028_v56  ;;  %v8049_v56 = vmul.f32 %v1870_v4, %v10479_v23  ;;  %v8070_v23 = vmul.f32 %v1870_v4, %v7302_v9  ;;  %v1880_v9 = vpop.permute.xlu2 %1879 }
 0x4b1   :  { %10474 = vst [vmem:[#allocation192_spill] sm:$0xff] %v8031_v22  ;;  %v8076_v22 = vmul.f32 %v1870_v4, %v10489_v38  ;;  %v8097_v38 = vmul.f32 %v1875_v59, %v7329_v28  ;;  %v10512_v28 = vld [vmem:[#allocation96_spill] sm:$0xff] }
 0x4b2   :  { %10476 = vst [vmem:[#allocation26_spill] sm:$0xff] %v8034_v24  ;;  %v8067_v24 = vmul.f32 %v1870_v4, %v10485_v54  ;;  %v10497_v54 = vld [vmem:[#allocation92_spill] sm:$0xff] }
 0x4b3   :  { %10480 = vst [vmem:[#allocation194_spill] sm:$0xff] %v8055_v19  ;;  %v10573_v19 = vld [vmem:[#allocation122_spill] sm:$0xff] }
 0x4b4   :  { %10482 = vst [vmem:[#allocation27_spill] sm:$0xff] %v8058_v37 }
 0x4b5   :  { %10483 = vst [vmem:[#allocation241_spill] sm:$0xff] %v8061_v51  ;;  %v8082_v51 = vmul.f32 %v1870_v4, %v10493_v61  ;;  %v8103_v4 = vmul.f32 %v1875_v59, %v7335_v29  ;;  %v8106_v61 = vmul.f32 %v1875_v59, %v7338_v41  ;;  %v8124_v29 = vmul.f32 %v1875_v59, %v7356_v58  ;;  %v10516_v41 = vld [vmem:[#allocation98_spill] sm:$0xff]  ;;  %v10527_v58 = vld [vmem:[#allocation141_spill] sm:$0xff] }
 0x4b6   :  { %10484 = vst [vmem:[#allocation242_spill] sm:$0xff] %v8064_v25  ;;  %v8085_v25 = vmul.f32 %v1875_v59, %v10495_v33  ;;  %v10507_v33 = vld [vmem:[#allocation93_spill] sm:$0xff] }
 0x4b7   :  { %10486 = vst [vmem:[#allocation243_spill] sm:$0xff] %v8067_v24  ;;  %v8088_v24 = vmul.f32 %v1875_v59, %v10497_v54  ;;  %v8109_v54 = vmul.f32 %v1875_v59, %v10507_v33  ;;  %v10518_v33 = vld [vmem:[#allocation100_spill] sm:$0xff] }
 0x4b8   :  { %10487 = vst [vmem:[#allocation244_spill] sm:$0xff] %v8070_v23  ;;  %v10499_v23 = vld [vmem:[#allocation136_spill] sm:$0xff] }
 0x4b9   :  { %10488 = vst [vmem:[#allocation58_spill] sm:$0xff] %v8073_v40  ;;  %v8091_v18 = vmul.f32 %v1875_v59, %v10499_v23  ;;  %v8112_v23 = vmul.f32 %v1875_v59, %v7344_v55  ;;  %v8127_v40 = vmul.f32 %v1875_v59, %v10516_v41  ;;  %v8133_v55 = vmul.f32 %v1880_v9, %v7365_v63  ;;  %v10529_v41 = vld [vmem:[#allocation143_spill] sm:$0xff]  ;;  %v10533_v63 = vld [vmem:[#allocation148_spill] sm:$0xff] }
 0x4ba   :  { %10490 = vst [vmem:[#allocation59_spill] sm:$0xff] %v8076_v22  ;;  %v8118_v22 = vmul.f32 %v1875_v59, %v10512_v28  ;;  %v10523_v28 = vld [vmem:[#allocation104_spill] sm:$0xff] }
 0x4bb   :  { %10492 = vst [vmem:[#allocation60_spill] sm:$0xff] %v8079_v49  ;;  %v8100_v49 = vmul.f32 %v1875_v59, %v10503_v62  ;;  %v8121_v62 = vmul.f32 %v1875_v59, %v7353_v3  ;;  %v10525_v3 = vld [vmem:[#allocation107_spill] sm:$0xff] }
 0x4bc   :  { %10494 = vst [vmem:[#allocation61_spill] sm:$0xff] %v8082_v51  ;;  %v8115_v51 = vmul.f32 %v1875_v59, %v10510_v46  ;;  %v10521_v46 = vld [vmem:[#allocation102_spill] sm:$0xff] }
 0x4bd   :  { %10496 = vst [vmem:[#allocation62_spill] sm:$0xff] %v8085_v25  ;;  %v10578_v25 = vld [vmem:[#allocation49_spill] sm:$0xff] }
 0x4be   :  { %10498 = vst [vmem:[#allocation63_spill] sm:$0xff] %v8088_v24 }
 0x4bf   :  { %10500 = vst [vmem:[#allocation25_spill] sm:$0xff] %v8091_v18  ;;  %v10570_v18 = vld [vmem:[#allocation113_spill] sm:$0xff] }
 0x4c0   :  { %10501 = vst [vmem:[#allocation28_spill] sm:$0xff] %v8094_v7 }
 0x4c1   :  { %10502 = vst [vmem:[#allocation109_spill] sm:$0xff] %v8097_v38 }
 0x4c2   :  { %10504 = vst [vmem:[#allocation234_spill] sm:$0xff] %v8100_v49 }
 0x4c3   :  { %10505 = vst [vmem:[#allocation110_spill] sm:$0xff] %v8103_v4 }
 0x4c4   :  { %10506 = vst [vmem:[#allocation114_spill] sm:$0xff] %v8106_v61 }
 0x4c5   :  { %10508 = vst [vmem:[#allocation236_spill] sm:$0xff] %v8109_v54  ;;  %v8130_v54 = vmul.f32 %v1875_v59, %v10518_v33  ;;  %v10531_v59 = vld [vmem:[#allocation145_spill] sm:$0xff] }
 0x4c6   :  { %10509 = vst [vmem:[#allocation116_spill] sm:$0xff] %v8112_v23  ;;  %v8151_v33 = vmul.f32 %v1880_v9, %v10531_v59  ;;  %v10545_v59 = vld [vmem:[#allocation195_spill] sm:$0xff] }
 0x4c7   :  { %10511 = vst [vmem:[#allocation39_spill] sm:$0xff] %v8115_v51  ;;  %v8136_v51 = vmul.f32 %v1880_v9, %v10521_v46  ;;  %v10535_v46 = vld [vmem:[#allocation55_spill] sm:$0xff] }
 0x4c8   :  { %10513 = vst [vmem:[#allocation41_spill] sm:$0xff] %v8118_v22  ;;  %v8139_v22 = vmul.f32 %v1880_v9, %v10523_v28  ;;  %v8157_v23 = vmul.f32 %v1880_v9, %v10535_v46  ;;  %v10537_v28 = vld [vmem:[#allocation149_spill] sm:$0xff] }
 0x4c9   :  { %10514 = vst [vmem:[#allocation44_spill] sm:$0xff] %v8121_v62  ;;  %v8142_v62 = vmul.f32 %v1880_v9, %v10525_v3  ;;  %v8160_v57 = vmul.f32 %v1880_v9, %v10537_v28  ;;  %v10539_v3 = vld [vmem:[#allocation152_spill] sm:$0xff]  ;;  %v10549_v46 = vld [vmem:[#allocation197_spill] sm:$0xff]  ;;  %v10551_v28 = vld [vmem:[#allocation198_spill] sm:$0xff] }
 0x4ca   :  { %10515 = vst [vmem:[#allocation46_spill] sm:$0xff] %v8124_v29  ;;  %v8145_v29 = vmul.f32 %v1880_v9, %v10527_v58  ;;  %v8163_v53 = vmul.f32 %v1880_v9, %v10539_v3  ;;  %v10541_v58 = vld [vmem:[#allocation155_spill] sm:$0xff]  ;;  %v10553_v3 = vld [vmem:[#allocation29_spill] sm:$0xff] }
 0x4cb   :  { %10517 = vst [vmem:[#allocation47_spill] sm:$0xff] %v8127_v40  ;;  %v8148_v40 = vmul.f32 %v1880_v9, %v10529_v41  ;;  %v10543_v41 = vld [vmem:[#allocation193_spill] sm:$0xff] }
 0x4cc   :  { %10519 = vst [vmem:[#allocation238_spill] sm:$0xff] %v8130_v54  ;;  %v8154_v54 = vmul.f32 %v1880_v9, %v10533_v63  ;;  %v10547_v63 = vld [vmem:[#allocation196_spill] sm:$0xff] }
 0x4cd   :  { %10520 = vst [vmem:[#allocation51_spill] sm:$0xff] %v8133_v55 }
 0x4ce   :  { %10522 = vst [vmem:[#allocation53_spill] sm:$0xff] %v8136_v51 }
 0x4cf   :  { %10524 = vst [vmem:[#allocation240_spill] sm:$0xff] %v8139_v22 }
 0x4d0   :  { %10526 = vst [vmem:[#allocation118_spill] sm:$0xff] %v8142_v62 }
 0x4d1   :  { %10528 = vst [vmem:[#allocation120_spill] sm:$0xff] %v8145_v29  ;;  %v8166_v29 = vmul.f32 %v1880_v9, %v10541_v58  ;;  %v10555_v58 = vld [vmem:[#allocation199_spill] sm:$0xff] }
 0x4d2   :  { %10530 = vst [vmem:[#allocation123_spill] sm:$0xff] %v8148_v40  ;;  %v8169_v40 = vmul.f32 %v1880_v9, %v10543_v41  ;;  %v10557_v41 = vld [vmem:[#allocation200_spill] sm:$0xff] }
 0x4d3   :  { %10532 = vst [vmem:[#allocation126_spill] sm:$0xff] %v8151_v33  ;;  %v8172_v33 = vmul.f32 %v1880_v9, %v10545_v59  ;;  %v10559_v59 = vld [vmem:[#allocation99_spill] sm:$0xff] }
 0x4d4   :  { %10534 = vst [vmem:[#allocation128_spill] sm:$0xff] %v8154_v54  ;;  %v8175_v54 = vmul.f32 %v1880_v9, %v10547_v63  ;;  %v10561_v63 = vld [vmem:[#allocation201_spill] sm:$0xff] }
 0x4d5   :  { %10536 = vst [vmem:[#allocation90_spill] sm:$0xff] %v8157_v23  ;;  %v8178_v23 = vmul.f32 %v1880_v9, %v10549_v46  ;;  %v10563_v9 = vld [vmem:[#allocation97_spill] sm:$0xff] }
 0x4d6   :  { %10538 = vst [vmem:[#allocation132_spill] sm:$0xff] %v8160_v57  ;;  %v10552_v57 = vld [vmem:[#allocation214_spill] sm:$0xff] }
 0x4d7   :  { %10540 = vst [vmem:[#allocation134_spill] sm:$0xff] %v8163_v53  ;;  %v2138_v62 = vadd.f32 %v10552_v57, %v10551_v28  ;;  %v10554_v53 = vld [vmem:[#allocation216_spill] sm:$0xff]  ;;  %v10565_v57 = vld [vmem:[#allocation202_spill] sm:$0xff]  ;;  %v10566_v28 = vld [vmem:[#allocation85_spill] sm:$0xff] }
 0x4d8   :  { %10542 = vst [vmem:[#allocation92_spill] sm:$0xff] %v8166_v29  ;;  %v2159_v22 = vadd.f32 %v10554_v53, %v10553_v3  ;;  %v10556_v29 = vld [vmem:[#allocation220_spill] sm:$0xff]  ;;  %v2264_v38 = vadd.f32 %v10566_v28, %v10565_v57  ;;  %v10567_v53 = vld [vmem:[#allocation203_spill] sm:$0xff] }
 0x4d9   :  { %10544 = vst [vmem:[#allocation136_spill] sm:$0xff] %v8169_v40  ;;  %v2180_v61 = vadd.f32 %v10556_v29, %v10555_v58  ;;  %v10558_v40 = vld [vmem:[#allocation222_spill] sm:$0xff]  ;;  %v2139_v46 = vadd.f32 %v2138_v62, %v10563_v9  ;;  %v10568_v3 = vld [vmem:[#allocation232_spill] sm:$0xff]  ;;  %v10569_v29 = vld [vmem:[#allocation111_spill] sm:$0xff] }
 0x4da   :  { %10546 = vst [vmem:[#allocation139_spill] sm:$0xff] %v8172_v33  ;;  %v2201_v4 = vadd.f32 %v10558_v40, %v10557_v41  ;;  %v10560_v33 = vld [vmem:[#allocation226_spill] sm:$0xff]  ;;  %v2285_v7 = vadd.f32 %v10568_v3, %v10567_v53  ;;  %v10577_v57 = vld [vmem:[#allocation124_spill] sm:$0xff]  ;;  %v10579_v3 = vld [vmem:[#allocation127_spill] sm:$0xff] }
 0x4db   :  { %10548 = vst [vmem:[#allocation93_spill] sm:$0xff] %v8175_v54  ;;  %v2222_v51 = vadd.f32 %v10560_v33, %v10559_v59  ;;  %v10562_v54 = vld [vmem:[#allocation106_spill] sm:$0xff]  ;;  %v2181_v58 = vadd.f32 %v2180_v61, %v10569_v29  ;;  %v10572_v33 = vld [vmem:[#allocation40_spill] sm:$0xff]  ;;  %v10580_v29 = vld [vmem:[#allocation125_spill] sm:$0xff] }
 0x4dc   :  { %10550 = vst [vmem:[#allocation94_spill] sm:$0xff] %v8178_v23  ;;  %v2243_v55 = vadd.f32 %v10562_v54, %v10561_v63  ;;  %v10564_v23 = vld [vmem:[#allocation105_spill] sm:$0xff]  ;;  %v2202_v40 = vadd.f32 %v2201_v4, %v10570_v18  ;;  %v10571_v41 = vld [vmem:[#allocation38_spill] sm:$0xff]  ;;  %v2140_v54 = vadd.f32 %v2139_v46, %v10573_v19  ;;  %v10574_v63 = vld [vmem:[#allocation112_spill] sm:$0xff] }
 0x4dd   :  { %v2160_v49 = vadd.f32 %v2159_v22, %v10564_v23  ;;  %v2223_v37 = vadd.f32 %v2222_v51, %v10571_v41  ;;  %v10575_v9 = vld [vmem:[#allocation42_spill] sm:$0xff]  ;;  %v10576_v23 = vld [vmem:[#allocation45_spill] sm:$0xff]  ;;  %v2182_v28 = vadd.f32 %v2181_v58, %v10577_v57 }
 0x4de   :  { %v2244_v59 = vadd.f32 %v2243_v55, %v10572_v33  ;;  %v2265_v22 = vadd.f32 %v2264_v38, %v10575_v9  ;;  %v2286_v24 = vadd.f32 %v2285_v7, %v10576_v23  ;;  %v2203_v53 = vadd.f32 %v2202_v40, %v10578_v25  ;;  %v10581_v4 = vld [vmem:[#allocation65_spill] sm:$0xff]  ;;  %v10582_v41 = vld [vmem:[#allocation66_spill] sm:$0xff]  ;;  %v10586_v9 = vld [vmem:[#allocation68_spill] sm:$0xff] }
 0x4df   :  { %v2161_v62 = vadd.f32 %v2160_v49, %v10574_v63  ;;  %v2224_v61 = vadd.f32 %v2223_v37, %v10579_v3  ;;  %v2141_v51 = vadd.f32 %v2140_v54, %v10581_v4  ;;  %v10583_v33 = vld [vmem:[#allocation130_spill] sm:$0xff]  ;;  %v10584_v46 = vld [vmem:[#allocation129_spill] sm:$0xff]  ;;  %v10585_v63 = vld [vmem:[#allocation67_spill] sm:$0xff] }
 0x4e0   :  { %v2245_v18 = vadd.f32 %v2244_v59, %v10580_v29  ;;  %v2266_v19 = vadd.f32 %v2265_v22, %v10583_v33  ;;  %v2287_v49 = vadd.f32 %v2286_v24, %v10584_v46  ;;  %v2183_v38 = vadd.f32 %v2182_v28, %v10585_v63  ;;  %v10587_v23 = vld [vmem:[#allocation69_spill] sm:$0xff]  ;;  %v10588_v57 = vld [vmem:[#allocation30_spill] sm:$0xff]  ;;  %v10590_v3 = vld [vmem:[#allocation147_spill] sm:$0xff] }
 0x4e1   :  { %v2162_v55 = vadd.f32 %v2161_v62, %v10582_v41  ;;  %v2204_v7 = vadd.f32 %v2203_v53, %v10586_v9  ;;  %v2225_v58 = vadd.f32 %v2224_v61, %v10587_v23  ;;  %v10589_v40 = vld [vmem:[#allocation146_spill] sm:$0xff]  ;;  %v10591_v29 = vld [vmem:[#allocation31_spill] sm:$0xff]  ;;  %v10594_v33 = vld [vmem:[#allocation56_spill] sm:$0xff] }
 0x4e2   :  { %v2246_v25 = vadd.f32 %v2245_v18, %v10588_v57  ;;  %v2142_v37 = vadd.f32 %v2141_v51, %v10589_v40  ;;  %v2267_v54 = vadd.f32 %v2266_v19, %v10591_v29  ;;  %v10592_v4 = vld [vmem:[#allocation207_spill] sm:$0xff]  ;;  %v10593_v41 = vld [vmem:[#allocation54_spill] sm:$0xff]  ;;  %v10595_v46 = vld [vmem:[#allocation57_spill] sm:$0xff] }
 0x4e3   :  { %v2163_v59 = vadd.f32 %v2162_v55, %v10590_v3  ;;  %v2288_v62 = vadd.f32 %v2287_v49, %v10592_v4  ;;  %v2184_v22 = vadd.f32 %v2183_v38, %v10593_v41  ;;  %v2205_v24 = vadd.f32 %v2204_v7, %v10594_v33  ;;  %v10596_v63 = vld [vmem:[#allocation150_spill] sm:$0xff]  ;;  %v10597_v9 = vld [vmem:[#allocation160_spill] sm:$0xff]  ;;  %v10599_v57 = vld [vmem:[#allocation151_spill] sm:$0xff] }
 0x4e4   :  { %v2226_v28 = vadd.f32 %v2225_v58, %v10595_v46  ;;  %v2247_v53 = vadd.f32 %v2246_v25, %v10596_v63  ;;  %v2143_v61 = vadd.f32 %v2142_v37, %v10597_v9  ;;  %v10598_v23 = vld [vmem:[#allocation162_spill] sm:$0xff]  ;;  %v2268_v51 = vadd.f32 %v2267_v54, %v10599_v57  ;;  %v10600_v40 = vld [vmem:[#allocation153_spill] sm:$0xff]  ;;  %v10602_v29 = vld [vmem:[#allocation167_spill] sm:$0xff] }
 0x4e5   :  { %v2164_v18 = vadd.f32 %v2163_v59, %v10598_v23  ;;  %v2289_v55 = vadd.f32 %v2288_v62, %v10600_v40  ;;  %v10601_v3 = vld [vmem:[#allocation165_spill] sm:$0xff]  ;;  %v2206_v49 = vadd.f32 %v2205_v24, %v10602_v29  ;;  %v10604_v41 = vld [vmem:[#allocation172_spill] sm:$0xff]  ;;  %v10605_v33 = vld [vmem:[#allocation211_spill] sm:$0xff] }
 0x4e6   :  { %v2185_v19 = vadd.f32 %v2184_v22, %v10601_v3  ;;  %v10603_v4 = vld [vmem:[#allocation169_spill] sm:$0xff]  ;;  %v2248_v7 = vadd.f32 %v2247_v53, %v10604_v41  ;;  %v2144_v58 = vadd.f32 %v2143_v61, %v10605_v33  ;;  %v10607_v63 = vld [vmem:[#allocation175_spill] sm:$0xff]  ;;  %v10613_v29 = vld [vmem:[#allocation168_spill] sm:$0xff] }
 0x4e7   :  { %v2227_v38 = vadd.f32 %v2226_v28, %v10603_v4  ;;  %v10606_v46 = vld [vmem:[#allocation213_spill] sm:$0xff]  ;;  %v2269_v37 = vadd.f32 %v2268_v51, %v10607_v63  ;;  %v10609_v23 = vld [vmem:[#allocation215_spill] sm:$0xff]  ;;  %v10614_v4 = vld [vmem:[#allocation170_spill] sm:$0xff] }
 0x4e8   :  { %v2165_v25 = vadd.f32 %v2164_v18, %v10606_v46  ;;  %v10608_v9 = vld [vmem:[#allocation177_spill] sm:$0xff]  ;;  %v2186_v54 = vadd.f32 %v2185_v19, %v10609_v23  ;;  %v10611_v40 = vld [vmem:[#allocation219_spill] sm:$0xff]  ;;  %v2145_v28 = vadd.f32 %v2144_v58, %v10613_v29  ;;  %v10620_v23 = vld [vmem:[#allocation176_spill] sm:$0xff] }
 0x4e9   :  { %v2290_v59 = vadd.f32 %v2289_v55, %v10608_v9  ;;  %v10610_v57 = vld [vmem:[#allocation217_spill] sm:$0xff]  ;;  %v2228_v22 = vadd.f32 %v2227_v38, %v10611_v40  ;;  %v10615_v41 = vld [vmem:[#allocation223_spill] sm:$0xff]  ;;  %v10619_v9 = vld [vmem:[#allocation174_spill] sm:$0xff] }
 0x4ea   :  { %v2207_v62 = vadd.f32 %v2206_v49, %v10610_v57  ;;  %v10612_v3 = vld [vmem:[#allocation221_spill] sm:$0xff]  ;;  %v2166_v53 = vadd.f32 %v2165_v25, %v10614_v4  ;;  %v2270_v61 = vadd.f32 %v2269_v37, %v10615_v41  ;;  %v10617_v46 = vld [vmem:[#allocation171_spill] sm:$0xff]  ;;  %v2146_v38 = vadd.f32 %v2145_v28, %v7845_v44  ;;  %v10621_v57 = vld [vmem:[#allocation178_spill] sm:$0xff] }
 0x4eb   :  { %v2249_v24 = vadd.f32 %v2248_v7, %v10612_v3  ;;  %v10616_v33 = vld [vmem:[#allocation225_spill] sm:$0xff]  ;;  %v2187_v51 = vadd.f32 %v2186_v54, %v10617_v46  ;;  %v2229_v19 = vadd.f32 %v2228_v22, %v10619_v9  ;;  %v10622_v40 = vld [vmem:[#allocation179_spill] sm:$0xff]  ;;  %v10623_v3 = vld [vmem:[#allocation36_spill] sm:$0xff] }
 0x4ec   :  { %v2291_v18 = vadd.f32 %v2290_v59, %v10616_v33  ;;  %v10618_v63 = vld [vmem:[#allocation173_spill] sm:$0xff]  ;;  %v2167_v7 = vadd.f32 %v2166_v53, %v7848_v35  ;;  %v2271_v58 = vadd.f32 %v2270_v61, %v10621_v57  ;;  %v2147_v22 = vadd.f32 %v2146_v38, %v7893_v15  ;;  %v10624_v29 = vld [vmem:[#allocation70_spill] sm:$0xff]  ;;  %v10625_v28 = vld [vmem:[#allocation71_spill] sm:$0xff] }
 0x4ed   :  { %v2208_v55 = vadd.f32 %v2207_v62, %v10618_v63  ;;  %v2250_v49 = vadd.f32 %v2249_v24, %v10620_v23  ;;  %v2188_v37 = vadd.f32 %v2187_v51, %v7851_v39  ;;  %v2230_v54 = vadd.f32 %v2229_v19, %v7857_v42  ;;  %v10627_v46 = vld [vmem:[#allocation63_spill] sm:$0xff]  ;;  %v10628_v51 = vld [vmem:[#allocation194_spill] sm:$0xff]  ;;  %v10631_v9 = vld [vmem:[#allocation28_spill] sm:$0xff] }
 0x4ee   :  { %v2292_v25 = vadd.f32 %v2291_v18, %v10622_v40  ;;  %v2168_v24 = vadd.f32 %v2167_v7, %v7896_v17  ;;  %v2272_v44 = vadd.f32 %v2271_v58, %v10624_v29  ;;  %v2148_v42 = vadd.f32 %v2147_v22, %v7941_v27  ;;  %v10626_v18 = vld [vmem:[#allocation62_spill] sm:$0xff]  ;;  %v10629_v63 = vld [vmem:[#allocation27_spill] sm:$0xff]  ;;  %v10632_v19 = vld [vmem:[#allocation109_spill] sm:$0xff] }
 0x4ef   :  { %v2209_v59 = vadd.f32 %v2208_v55, %v7854_v60  ;;  %v2251_v62 = vadd.f32 %v2250_v49, %v10623_v3  ;;  %v2189_v4 = vadd.f32 %v2188_v37, %v7899_v1  ;;  %v2231_v39 = vadd.f32 %v2230_v54, %v7905_v5  ;;  %v10630_v55 = vld [vmem:[#allocation25_spill] sm:$0xff]  ;;  %v10633_v23 = vld [vmem:[#allocation234_spill] sm:$0xff]  ;;  %v10634_v49 = vld [vmem:[#allocation51_spill] sm:$0xff] }
 0x4f0   :  { %v2293_v35 = vadd.f32 %v2292_v25, %v10625_v28  ;;  %v2169_v41 = vadd.f32 %v2168_v24, %v7944_v14  ;;  %v2273_v15 = vadd.f32 %v2272_v44, %v7911_v10  ;;  %v2149_v5 = vadd.f32 %v2148_v42, %v7989_v13  ;;  %v10635_v38 = vld [vmem:[#allocation53_spill] sm:$0xff]  ;;  %v10636_v7 = vld [vmem:[#allocation110_spill] sm:$0xff]  ;;  %v10638_v25 = vld [vmem:[#allocation240_spill] sm:$0xff] }
 0x4f1   :  { %v2210_v53 = vadd.f32 %v2209_v59, %v7902_v16  ;;  %v2252_v60 = vadd.f32 %v2251_v62, %v7908_v47  ;;  %v2190_v61 = vadd.f32 %v2189_v4, %v7947_v11  ;;  %v2232_v1 = vadd.f32 %v2231_v39, %v7953_v2  ;;  %v10637_v58 = vld [vmem:[#allocation114_spill] sm:$0xff]  ;;  %v10640_v3 = vld [vmem:[#allocation120_spill] sm:$0xff]  ;;  %v10641_v22 = vld [vmem:[#allocation123_spill] sm:$0xff] }
 0x4f2   :  { %v2294_v17 = vadd.f32 %v2293_v35, %v7914_v6  ;;  %v2170_v47 = vadd.f32 %v2169_v41, %v7992_v12  ;;  %v2274_v27 = vadd.f32 %v2273_v15, %v7959_v31  ;;  %v2150_v2 = vadd.f32 %v2149_v5, %v8037_v30  ;;  %v10639_v59 = vld [vmem:[#allocation118_spill] sm:$0xff]  ;;  %v10643_v4 = vld [vmem:[#allocation128_spill] sm:$0xff] }
 0x4f3   :  { %v2211_v33 = vadd.f32 %v2210_v53, %v7950_v32  ;;  %v2253_v16 = vadd.f32 %v2252_v60, %v7956_v20  ;;  %v2191_v10 = vadd.f32 %v2190_v61, %v7995_v34  ;;  %v2233_v11 = vadd.f32 %v2232_v1, %v8001_v45  ;;  %v10642_v28 = vld [vmem:[#allocation126_spill] sm:$0xff] }
 0x4f4   :  { %v2295_v14 = vadd.f32 %v2294_v17, %v7962_v36  ;;  %v2171_v20 = vadd.f32 %v2170_v47, %v8040_v8  ;;  %v2275_v13 = vadd.f32 %v2274_v27, %v8007_v0  ;;  %v2151_v45 = vadd.f32 %v2150_v2, %v10626_v18 }
 0x4f5   :  { %v2212_v6 = vadd.f32 %v2211_v33, %v7998_v26  ;;  %v2254_v32 = vadd.f32 %v2253_v16, %v8004_v50  ;;  %v2192_v31 = vadd.f32 %v2191_v10, %v8043_v52  ;;  %v2234_v34 = vadd.f32 %v2233_v11, %v8049_v56 }
 0x4f6   :  { %v2296_v12 = vadd.f32 %v2295_v14, %v8010_v21  ;;  %v2172_v50 = vadd.f32 %v2171_v20, %v10627_v46  ;;  %v2276_v30 = vadd.f32 %v2275_v13, %v10628_v51  ;;  %v2152_v56 = vadd.f32 %v2151_v45, %v10634_v49 }
 0x4f7   :  { %v2213_v36 = vadd.f32 %v2212_v6, %v8046_v48  ;;  %v2255_v26 = vadd.f32 %v2254_v32, %v8052_v43  ;;  %v2193_v0 = vadd.f32 %v2192_v31, %v10630_v55  ;;  %v2235_v52 = vadd.f32 %v2234_v34, %v10632_v19 }
 0x4f8   :  { %v2297_v8 = vadd.f32 %v2296_v12, %v10629_v63  ;;  %v2173_v43 = vadd.f32 %v2172_v50, %v10635_v38  ;;  %v2277_v57 = vadd.f32 %v2276_v30, %v10636_v7  ;;  %v2153_v29 = vrot.slane %v2152_v56, 4  ;;  %v10644_v7 = vld [vmem:[#allocation204_spill] sm:$0xff] }
 0x4f9   :  { %v2214_v21 = vadd.f32 %v2213_v36, %v10631_v9  ;;  %v2256_v48 = vadd.f32 %v2255_v26, %v10633_v23  ;;  %v2194_v37 = vadd.f32 %v2193_v0, %v10638_v25  ;;  %v2236_v62 = vadd.f32 %v2235_v52, %v10640_v3  ;;  %v10647_v25 = vld [vmem:[#allocation108_spill] sm:$0xff] }
 0x4fa   :  { %v2298_v40 = vadd.f32 %v2297_v8, %v10637_v58  ;;  %v2174_v44 = vrot.slane %v2173_v43, 4  ;;  %v2278_v35 = vadd.f32 %v2277_v57, %v10642_v28  ;;  %v2154_v15 = vadd.f32 %v2153_v29, %v2152_v56  ;;  %v10645_v57 = vld [vmem:[#allocation87_spill] sm:$0xff]  ;;  %v10652_v29 = vld [vmem:[#allocation208_spill] sm:$0xff] }
 0x4fb   :  { %v2215_v54 = vadd.f32 %v2214_v21, %v10639_v59  ;;  %v2257_v24 = vadd.f32 %v2256_v48, %v10641_v22  ;;  %v2195_v39 = vrot.slane %v2194_v37, 4  ;;  %v2237_v42 = vrot.slane %v2236_v62, 4  ;;  %v10648_v59 = vld [vmem:[#allocation206_spill] sm:$0xff]  ;;  %v10651_v22 = vld [vmem:[#allocation115_spill] sm:$0xff] }
 0x4fc   :  { %v2299_v53 = vadd.f32 %v2298_v40, %v10643_v4  ;;  %v2175_v17 = vadd.f32 %v2174_v44, %v2173_v43  ;;  %v2279_v61 = vrot.slane %v2278_v35, 4  ;;  %v2155_v27 = vrot.slane %v2154_v15, 2  ;;  %v10646_v40 = vld [vmem:[#allocation205_spill] sm:$0xff]  ;;  %v10653_v44 = vld [vmem:[#allocation43_spill] sm:$0xff]  ;;  %v10655_v4 = vld [vmem:[#allocation52_spill] sm:$0xff] }
 0x4fd   :  { %v2216_v60 = vrot.slane %v2215_v54, 4  ;;  %v2258_v41 = vrot.slane %v2257_v24, 4  ;;  %v2196_v1 = vadd.f32 %v2195_v39, %v2194_v37  ;;  %v2238_v5 = vadd.f32 %v2237_v42, %v2236_v62  ;;  %v10650_v62 = vld [vmem:[#allocation32_spill] sm:$0xff]  ;;  %v10657_v42 = vld [vmem:[#allocation50_spill] sm:$0xff] }
 0x4fe   :  { %v2300_v33 = vrot.slane %v2299_v53, 4  ;;  %v2176_v14 = vrot.slane %v2175_v17, 2  ;;  %v2280_v10 = vadd.f32 %v2279_v61, %v2278_v35  ;;  %v2156_v13 = vadd.f32 %v2155_v27, %v2154_v15  ;;  %v10654_v35 = vld [vmem:[#allocation212_spill] sm:$0xff]  ;;  %v10658_v15 = vld [vmem:[#allocation103_spill] sm:$0xff]  ;;  %v10663_v27 = vld [vmem:[#allocation78_spill] sm:$0xff] }
 0x4ff   :  { %v2217_v16 = vadd.f32 %v2216_v60, %v2215_v54  ;;  %v2259_v47 = vadd.f32 %v2258_v41, %v2257_v24  ;;  %v2197_v11 = vrot.slane %v2196_v1, 2  ;;  %v2239_v2 = vrot.slane %v2238_v5, 2  ;;  %v10649_v54 = vld [vmem:[#allocation101_spill] sm:$0xff]  ;;  %v10656_v39 = vld [vmem:[#allocation48_spill] sm:$0xff] }
 0x500   :  { %v2301_v6 = vadd.f32 %v2300_v33, %v2299_v53  ;;  %v2177_v12 = vadd.f32 %v2176_v14, %v2175_v17  ;;  %v2281_v31 = vrot.slane %v2280_v10, 2  ;;  %v2157_v46 = vrot.slane %v2156_v13, 1  ;;  %v10659_v17 = vld [vmem:[#allocation89_spill] sm:$0xff]  ;;  %v10660_v33 = vld [vmem:[#allocation34_spill] sm:$0xff] }
 0x501   :  { %v2218_v32 = vrot.slane %v2217_v16, 2  ;;  %v2260_v20 = vrot.slane %v2259_v47, 2  ;;  %v2198_v34 = vadd.f32 %v2197_v11, %v2196_v1  ;;  %v2240_v18 = vadd.f32 %v2239_v2, %v2238_v5  ;;  %v10661_v1 = vld [vmem:[#allocation95_spill] sm:$0xff]  ;;  %v10662_v5 = vld [vmem:[#allocation117_spill] sm:$0xff]  ;;  %v10665_v11 = vld [vmem:[#allocation84_spill] sm:$0xff] }
 0x502   :  { %v2302_v36 = vrot.slane %v2301_v6, 2  ;;  %v2178_v50 = vrot.slane %v2177_v12, 1  ;;  %v2282_v51 = vadd.f32 %v2281_v31, %v2280_v10  ;;  %v8308_v9 = vadd.f32 %v2157_v46, %v2156_v13  ;;  %v10664_v10 = vld [vmem:[#allocation119_spill] sm:$0xff]  ;;  %v10667_v13 = vld [vmem:[#allocation133_spill] sm:$0xff]  ;;  %v10668_v31 = vld [vmem:[#allocation228_spill] sm:$0xff] }
 0x503   :  { %v2219_v26 = vadd.f32 %v2218_v32, %v2217_v16  ;;  %v2261_v45 = vadd.f32 %v2260_v20, %v2259_v47  ;;  %v2199_v63 = vrot.slane %v2198_v34, 1  ;;  %v2241_v55 = vrot.slane %v2240_v18, 1  ;;  %v10666_v2 = vld [vmem:[#allocation131_spill] sm:$0xff]  ;;  %v10671_v46 = vld [vmem:[#allocation137_spill] sm:$0xff] }
 0x504   :  { %v2303_v30 = vadd.f32 %v2302_v36, %v2301_v6  ;;  %v8310_v21 = vadd.f32 %v2178_v50, %v2177_v12  ;;  %v2283_v19 = vrot.slane %v2282_v51, 1  ;;  %v2306_v58 = vadd.f32 %v10645_v57, %v10644_v7  ;;  %v10676_v7 = vld [vmem:[#allocation142_spill] sm:$0xff] }
 0x505   :  { %v2220_v8 = vrot.slane %v2219_v26, 1  ;;  %v2262_v0 = vrot.slane %v2261_v45, 1  ;;  %v8312_v23 = vadd.f32 %v2199_v63, %v2198_v34  ;;  %v8316_v49 = vadd.f32 %v2241_v55, %v2240_v18  ;;  %v10669_v34 = vld [vmem:[#allocation121_spill] sm:$0xff]  ;;  %v10670_v18 = vld [vmem:[#allocation135_spill] sm:$0xff]  ;;  %v10673_v63 = vld [vmem:[#allocation140_spill] sm:$0xff] }
 0x506   :  { %v2304_v52 = vrot.slane %v2303_v30, 1  ;;  %v8320_v38 = vadd.f32 %v2283_v19, %v2282_v51  ;;  %v2327_v37 = vadd.f32 %v10647_v25, %v10646_v40  ;;  %v2348_v3 = vadd.f32 %v10649_v54, %v10648_v59  ;;  %v10672_v51 = vld [vmem:[#allocation138_spill] sm:$0xff]  ;;  %v10674_v55 = vld [vmem:[#allocation33_spill] sm:$0xff]  ;;  %v10675_v19 = vld [vmem:[#allocation35_spill] sm:$0xff] }
 0x507   :  { %v8314_v48 = vadd.f32 %v2220_v8, %v2219_v26  ;;  %v8318_v56 = vadd.f32 %v2262_v0, %v2261_v45  ;;  %v2369_v24 = vadd.f32 %v10651_v22, %v10650_v62  ;;  %v2390_v28 = vadd.f32 %v10653_v44, %v10652_v29  ;;  %v10678_v25 = vld [vmem:[#allocation37_spill] sm:$0xff]  ;;  %v10679_v59 = vld [vmem:[#allocation86_spill] sm:$0xff]  ;;  %v10681_v22 = vld [vmem:[#allocation91_spill] sm:$0xff] }
 0x508   :  { %v8322_v43 = vadd.f32 %v2304_v52, %v2303_v30  ;;  %v2411_v53 = vadd.f32 %v10655_v4, %v10654_v35  ;;  %v2307_v60 = vadd.f32 %v2306_v58, %v10656_v39  ;;  %v2328_v41 = vadd.f32 %v2327_v37, %v10657_v42  ;;  %v10677_v58 = vld [vmem:[#allocation64_spill] sm:$0xff]  ;;  %v10682_v29 = vld [vmem:[#allocation154_spill] sm:$0xff]  ;;  %v10686_v42 = vld [vmem:[#allocation157_spill] sm:$0xff] }
 0x509   :  { %v2432_v61 = vadd.f32 %v10659_v17, %v10658_v15  ;;  %v2453_v16 = vadd.f32 %v10661_v1, %v10660_v33  ;;  %v2349_v47 = vadd.f32 %v2348_v3, %v10662_v5  ;;  %v2370_v14 = vadd.f32 %v2369_v24, %v10663_v27  ;;  %v10680_v3 = vld [vmem:[#allocation88_spill] sm:$0xff]  ;;  %v10684_v4 = vld [vmem:[#allocation210_spill] sm:$0xff]  ;;  %v10687_v15 = vld [vmem:[#allocation159_spill] sm:$0xff] }
 0x50a   :  { %v2391_v6 = vadd.f32 %v2390_v28, %v10664_v10  ;;  %v2412_v32 = vadd.f32 %v2411_v53, %v10665_v11  ;;  %v2308_v20 = vadd.f32 %v2307_v60, %v10666_v2  ;;  %v2329_v12 = vadd.f32 %v2328_v41, %v10667_v13  ;;  %v10683_v28 = vld [vmem:[#allocation156_spill] sm:$0xff]  ;;  %v10689_v1 = vld [vmem:[#allocation163_spill] sm:$0xff]  ;;  %v10690_v5 = vld [vmem:[#allocation18_spill] sm:$0xff] }
 0x50b   :  { %v2433_v36 = vadd.f32 %v2432_v61, %v10668_v31  ;;  %v2454_v26 = vadd.f32 %v2453_v16, %v10669_v34  ;;  %v2350_v45 = vadd.f32 %v2349_v47, %v10670_v18  ;;  %v2371_v50 = vadd.f32 %v2370_v14, %v10671_v46  ;;  %v10685_v39 = vld [vmem:[#allocation144_spill] sm:$0xff]  ;;  %v10688_v61 = vld [vmem:[#allocation161_spill] sm:$0xff]  ;;  %v10693_v11 = vld [vmem:[#allocation158_spill] sm:$0xff] }
 0x50c   :  { %v2392_v30 = vadd.f32 %v2391_v6, %v10672_v51  ;;  %v2413_v8 = vadd.f32 %v2412_v32, %v10673_v63  ;;  %v2309_v0 = vadd.f32 %v2308_v20, %v10674_v55  ;;  %v2330_v52 = vadd.f32 %v2329_v12, %v10675_v19  ;;  %v10691_v27 = vld [vmem:[#allocation180_spill] sm:$0xff]  ;;  %v10696_v31 = vld [vmem:[#allocation22_spill] sm:$0xff]  ;;  %v10697_v34 = vld [vmem:[#allocation189_spill] sm:$0xff] }
 0x50d   :  { %v2434_v57 = vadd.f32 %v2433_v36, %v10676_v7  ;;  %v2455_v40 = vadd.f32 %v2454_v26, %v10677_v58  ;;  %v2351_v37 = vadd.f32 %v2350_v45, %v10678_v25  ;;  %v2372_v54 = vadd.f32 %v2371_v50, %v10679_v59  ;;  %v10692_v10 = vld [vmem:[#allocation164_spill] sm:$0xff]  ;;  %v10698_v18 = vld [vmem:[#allocation227_spill] sm:$0xff]  ;;  %v10699_v46 = vld [vmem:[#allocation229_spill] sm:$0xff] }
 0x50e   :  { %v2393_v62 = vadd.f32 %v2392_v30, %v10680_v3  ;;  %v2414_v24 = vadd.f32 %v2413_v8, %v10681_v22  ;;  %v2310_v44 = vadd.f32 %v2309_v0, %v10682_v29  ;;  %v2331_v35 = vadd.f32 %v2330_v52, %v10683_v28  ;;  %v10694_v2 = vld [vmem:[#allocation20_spill] sm:$0xff]  ;;  %v10700_v51 = vld [vmem:[#allocation191_spill] sm:$0xff]  ;;  %v10701_v63 = vld [vmem:[#allocation209_spill] sm:$0xff] }
 0x50f   :  { %v2435_v53 = vadd.f32 %v2434_v57, %v10684_v4  ;;  %v2456_v60 = vadd.f32 %v2455_v40, %v10685_v39  ;;  %v2352_v41 = vadd.f32 %v2351_v37, %v10686_v42  ;;  %v2373_v17 = vadd.f32 %v2372_v54, %v10687_v15  ;;  %v10695_v13 = vld [vmem:[#allocation184_spill] sm:$0xff]  ;;  %v10702_v55 = vld [vmem:[#allocation231_spill] sm:$0xff]  ;;  %v10703_v19 = vld [vmem:[#allocation233_spill] sm:$0xff] }
 0x510   :  { %v2394_v33 = vadd.f32 %v2393_v62, %v10688_v61  ;;  %v2415_v16 = vadd.f32 %v2414_v24, %v10689_v1  ;;  %v2311_v47 = vadd.f32 %v2310_v44, %v10690_v5  ;;  %v2332_v14 = vadd.f32 %v2331_v35, %v10691_v27  ;;  %v10704_v7 = vld [vmem:[#allocation235_spill] sm:$0xff]  ;;  %v10705_v58 = vld [vmem:[#allocation237_spill] sm:$0xff]  ;;  %v10707_v59 = vld [vmem:[#allocation182_spill] sm:$0xff] }
 0x511   :  { %v2436_v6 = vadd.f32 %v2435_v53, %v10692_v10  ;;  %v2457_v32 = vadd.f32 %v2456_v60, %v10693_v11  ;;  %v2353_v20 = vadd.f32 %v2352_v41, %v10694_v2  ;;  %v2374_v12 = vadd.f32 %v2373_v17, %v10695_v13  ;;  %v10706_v25 = vld [vmem:[#allocation181_spill] sm:$0xff]  ;;  %v10708_v3 = vld [vmem:[#allocation218_spill] sm:$0xff]  ;;  %v10710_v29 = vld [vmem:[#allocation183_spill] sm:$0xff] }
 0x512   :  { %v2395_v36 = vadd.f32 %v2394_v33, %v10696_v31  ;;  %v2416_v26 = vadd.f32 %v2415_v16, %v10697_v34  ;;  %v2312_v45 = vadd.f32 %v2311_v47, %v10698_v18  ;;  %v2333_v50 = vadd.f32 %v2332_v14, %v10699_v46  ;;  %v10709_v22 = vld [vmem:[#allocation166_spill] sm:$0xff]  ;;  %v10711_v28 = vld [vmem:[#allocation185_spill] sm:$0xff]  ;;  %v10713_v39 = vld [vmem:[#allocation187_spill] sm:$0xff] }
 0x513   :  { %v2437_v30 = vadd.f32 %v2436_v6, %v10700_v51  ;;  %v2458_v8 = vadd.f32 %v2457_v32, %v10701_v63  ;;  %v2354_v0 = vadd.f32 %v2353_v20, %v10702_v55  ;;  %v2375_v52 = vadd.f32 %v2374_v12, %v10703_v19  ;;  %v10712_v4 = vld [vmem:[#allocation186_spill] sm:$0xff]  ;;  %v10714_v42 = vld [vmem:[#allocation72_spill] sm:$0xff]  ;;  %v10715_v15 = vld [vmem:[#allocation73_spill] sm:$0xff] }
 0x514   :  { %v2396_v57 = vadd.f32 %v2395_v36, %v10704_v7  ;;  %v2417_v40 = vadd.f32 %v2416_v26, %v10705_v58  ;;  %v2313_v37 = vadd.f32 %v2312_v45, %v10706_v25  ;;  %v2334_v54 = vadd.f32 %v2333_v50, %v10707_v59  ;;  %v10716_v61 = vld [vmem:[#allocation188_spill] sm:$0xff]  ;;  %v10717_v1 = vld [vmem:[#allocation239_spill] sm:$0xff]  ;;  %v10718_v5 = vld [vmem:[#allocation74_spill] sm:$0xff] }
 0x515   :  { %v2438_v62 = vadd.f32 %v2437_v30, %v10708_v3  ;;  %v2459_v24 = vadd.f32 %v2458_v8, %v10709_v22  ;;  %v2355_v44 = vadd.f32 %v2354_v0, %v10710_v29  ;;  %v2376_v35 = vadd.f32 %v2375_v52, %v10711_v28  ;;  %v10719_v27 = vld [vmem:[#allocation75_spill] sm:$0xff]  ;;  %v10720_v10 = vld [vmem:[#allocation76_spill] sm:$0xff]  ;;  %v10721_v11 = vld [vmem:[#allocation77_spill] sm:$0xff] }
 0x516   :  { %v2397_v53 = vadd.f32 %v2396_v57, %v10712_v4  ;;  %v2418_v60 = vadd.f32 %v2417_v40, %v10713_v39  ;;  %v2314_v41 = vadd.f32 %v2313_v37, %v10714_v42  ;;  %v2335_v17 = vadd.f32 %v2334_v54, %v10715_v15  ;;  %v10722_v2 = vld [vmem:[#allocation80_spill] sm:$0xff]  ;;  %v10723_v13 = vld [vmem:[#allocation81_spill] sm:$0xff]  ;;  %v10725_v34 = vld [vmem:[#allocation79_spill] sm:$0xff] }
 0x517   :  { %v2439_v33 = vadd.f32 %v2438_v62, %v10716_v61  ;;  %v2460_v16 = vadd.f32 %v2459_v24, %v10717_v1  ;;  %v2356_v47 = vadd.f32 %v2355_v44, %v10718_v5  ;;  %v2377_v14 = vadd.f32 %v2376_v35, %v10719_v27  ;;  %v10724_v31 = vld [vmem:[#allocation224_spill] sm:$0xff]  ;;  %v10726_v18 = vld [vmem:[#allocation82_spill] sm:$0xff]  ;;  %v10727_v46 = vld [vmem:[#allocation83_spill] sm:$0xff] }
 0x518   :  { %v2398_v6 = vadd.f32 %v2397_v53, %v10720_v10  ;;  %v2419_v32 = vadd.f32 %v2418_v60, %v10721_v11  ;;  %v2315_v20 = vadd.f32 %v2314_v41, %v10722_v2  ;;  %v2336_v12 = vadd.f32 %v2335_v17, %v10723_v13  ;;  %v10728_v51 = vld [vmem:[#allocation6_spill] sm:$0xff]  ;;  %v10729_v63 = vld [vmem:[#allocation7_spill] sm:$0xff]  ;;  %v10732_v7 = vld [vmem:[#allocation8_spill] sm:$0xff] }
 0x519   :  { %v2440_v36 = vadd.f32 %v2439_v33, %v10724_v31  ;;  %v2461_v26 = vadd.f32 %v2460_v16, %v10725_v34  ;;  %v2357_v45 = vadd.f32 %v2356_v47, %v10726_v18  ;;  %v2378_v50 = vadd.f32 %v2377_v14, %v10727_v46  ;;  %v10730_v55 = vld [vmem:[#allocation10_spill] sm:$0xff]  ;;  %v10731_v19 = vld [vmem:[#allocation11_spill] sm:$0xff]  ;;  %v10733_v58 = vld [vmem:[#allocation9_spill] sm:$0xff] }
 0x51a   :  { %v2399_v30 = vadd.f32 %v2398_v6, %v10728_v51  ;;  %v2420_v8 = vadd.f32 %v2419_v32, %v10729_v63  ;;  %v2316_v0 = vadd.f32 %v2315_v20, %v10730_v55  ;;  %v2337_v52 = vadd.f32 %v2336_v12, %v10731_v19  ;;  %v10734_v25 = vld [vmem:[#allocation12_spill] sm:$0xff]  ;;  %v10735_v59 = vld [vmem:[#allocation13_spill] sm:$0xff]  ;;  %v10736_v3 = vld [vmem:[#allocation14_spill] sm:$0xff] }
 0x51b   :  { %v2441_v57 = vadd.f32 %v2440_v36, %v10732_v7  ;;  %v2462_v40 = vadd.f32 %v2461_v26, %v10733_v58  ;;  %v2358_v37 = vadd.f32 %v2357_v45, %v10734_v25  ;;  %v2379_v54 = vadd.f32 %v2378_v50, %v10735_v59  ;;  %v10737_v22 = vld [vmem:[#allocation15_spill] sm:$0xff]  ;;  %v10738_v29 = vld [vmem:[#allocation230_spill] sm:$0xff]  ;;  %v10740_v4 = vld [vmem:[#allocation16_spill] sm:$0xff] }
 0x51c   :  { %v2400_v62 = vadd.f32 %v2399_v30, %v10736_v3  ;;  %v2421_v24 = vadd.f32 %v2420_v8, %v10737_v22  ;;  %v2317_v44 = vadd.f32 %v2316_v0, %v10738_v29  ;;  %v10739_v28 = vld [vmem:[#allocation19_spill] sm:$0xff]  ;;  %v10741_v39 = vld [vmem:[#allocation17_spill] sm:$0xff]  ;;  %v10744_v61 = vld [vmem:[#allocation190_spill] sm:$0xff] }
 0x51d   :  { %v2338_v35 = vadd.f32 %v2337_v52, %v10739_v28  ;;  %v2442_v53 = vadd.f32 %v2441_v57, %v10740_v4  ;;  %v2463_v60 = vadd.f32 %v2462_v40, %v10741_v39  ;;  %v10742_v42 = vld [vmem:[#allocation21_spill] sm:$0xff]  ;;  %v10743_v15 = vld [vmem:[#allocation23_spill] sm:$0xff]  ;;  %v10745_v1 = vld [vmem:[#allocation24_spill] sm:$0xff] }
 0x51e   :  { %v2359_v41 = vadd.f32 %v2358_v37, %v10742_v42  ;;  %v2380_v17 = vadd.f32 %v2379_v54, %v10743_v15  ;;  %v2401_v33 = vadd.f32 %v2400_v62, %v10744_v61  ;;  %v2422_v16 = vadd.f32 %v2421_v24, %v10745_v1  ;;  %v10746_v5 = vld [vmem:[#allocation241_spill] sm:$0xff]  ;;  %v10747_v27 = vld [vmem:[#allocation242_spill] sm:$0xff]  ;;  %v10748_v10 = vld [vmem:[#allocation192_spill] sm:$0xff] }
 0x51f   :  { %v2318_v47 = vadd.f32 %v2317_v44, %v10746_v5  ;;  %v2339_v14 = vadd.f32 %v2338_v35, %v10747_v27  ;;  %v2443_v6 = vadd.f32 %v2442_v53, %v10748_v10  ;;  %v10749_v11 = vld [vmem:[#allocation26_spill] sm:$0xff]  ;;  %v10750_v2 = vld [vmem:[#allocation243_spill] sm:$0xff]  ;;  %v10751_v13 = vld [vmem:[#allocation244_spill] sm:$0xff] }
 0x520   :  { %v2464_v32 = vadd.f32 %v2463_v60, %v10749_v11  ;;  %v2360_v20 = vadd.f32 %v2359_v41, %v10750_v2  ;;  %v2381_v12 = vadd.f32 %v2380_v17, %v10751_v13  ;;  %v10752_v31 = vld [vmem:[#allocation58_spill] sm:$0xff]  ;;  %v10753_v34 = vld [vmem:[#allocation59_spill] sm:$0xff]  ;;  %v10754_v18 = vld [vmem:[#allocation236_spill] sm:$0xff] }
 0x521   :  { %v2402_v36 = vadd.f32 %v2401_v33, %v10752_v31  ;;  %v2423_v26 = vadd.f32 %v2422_v16, %v10753_v34  ;;  %v2319_v45 = vadd.f32 %v2318_v47, %v10754_v18  ;;  %v10755_v46 = vld [vmem:[#allocation116_spill] sm:$0xff]  ;;  %v10757_v63 = vld [vmem:[#allocation61_spill] sm:$0xff]  ;;  %v10758_v55 = vld [vmem:[#allocation39_spill] sm:$0xff] }
 0x522   :  { %v2340_v50 = vadd.f32 %v2339_v14, %v10755_v46  ;;  %v10756_v51 = vld [vmem:[#allocation60_spill] sm:$0xff]  ;;  %v2465_v8 = vadd.f32 %v2464_v32, %v10757_v63  ;;  %v2361_v0 = vadd.f32 %v2360_v20, %v10758_v55  ;;  %v10759_v19 = vld [vmem:[#allocation41_spill] sm:$0xff]  ;;  %v10761_v58 = vld [vmem:[#allocation46_spill] sm:$0xff] }
 0x523   :  { %v2444_v30 = vadd.f32 %v2443_v6, %v10756_v51  ;;  %v2382_v52 = vadd.f32 %v2381_v12, %v10759_v19  ;;  %v10760_v7 = vld [vmem:[#allocation44_spill] sm:$0xff]  ;;  %v2424_v40 = vadd.f32 %v2423_v26, %v10761_v58  ;;  %v10762_v25 = vld [vmem:[#allocation90_spill] sm:$0xff]  ;;  %v10764_v3 = vld [vmem:[#allocation47_spill] sm:$0xff] }
 0x524   :  { %v2403_v57 = vadd.f32 %v2402_v36, %v10760_v7  ;;  %v2320_v37 = vadd.f32 %v2319_v45, %v10762_v25  ;;  %v10763_v59 = vld [vmem:[#allocation132_spill] sm:$0xff]  ;;  %v10765_v22 = vld [vmem:[#allocation238_spill] sm:$0xff]  ;;  %v10769_v39 = vld [vmem:[#allocation139_spill] sm:$0xff] }
 0x525   :  { %v2341_v54 = vadd.f32 %v2340_v50, %v10763_v59  ;;  %v2445_v62 = vadd.f32 %v2444_v30, %v10764_v3  ;;  %v2466_v24 = vadd.f32 %v2465_v8, %v10765_v22  ;;  %v10766_v29 = vld [vmem:[#allocation134_spill] sm:$0xff]  ;;  %v10767_v28 = vld [vmem:[#allocation92_spill] sm:$0xff]  ;;  %v2425_v60 = vadd.f32 %v2424_v40, %v10769_v39  ;;  %v10770_v15 = vld [vmem:[#allocation93_spill] sm:$0xff] }
 0x526   :  { %v2362_v44 = vadd.f32 %v2361_v0, %v10766_v29  ;;  %v2383_v35 = vadd.f32 %v2382_v52, %v10767_v28  ;;  %v10768_v4 = vld [vmem:[#allocation136_spill] sm:$0xff]  ;;  %v2321_v42 = vrot.slane %v2320_v37, 4  ;;  %v10771_v61 = vld [vmem:[#allocation94_spill] sm:$0xff] }
 0x527   :  { %v2404_v53 = vadd.f32 %v2403_v57, %v10768_v4  ;;  %v2342_v41 = vrot.slane %v2341_v54, 4  ;;  %v2446_v17 = vadd.f32 %v2445_v62, %v10770_v15  ;;  %v2467_v33 = vadd.f32 %v2466_v24, %v10771_v61 }
 0x528   :  { %v2363_v1 = vrot.slane %v2362_v44, 4  ;;  %v2384_v16 = vrot.slane %v2383_v35, 4  ;;  %v2426_v47 = vrot.slane %v2425_v60, 4  ;;  %v2322_v27 = vadd.f32 %v2321_v42, %v2320_v37 }
 0x529   :  { %v2405_v5 = vrot.slane %v2404_v53, 4  ;;  %v2343_v14 = vadd.f32 %v2342_v41, %v2341_v54  ;;  %v2447_v10 = vrot.slane %v2446_v17, 4  ;;  %v2468_v6 = vrot.slane %v2467_v33, 4 }
 0x52a   :  { %v2364_v11 = vadd.f32 %v2363_v1, %v2362_v44  ;;  %v2385_v32 = vadd.f32 %v2384_v16, %v2383_v35  ;;  %v2427_v20 = vadd.f32 %v2426_v47, %v2425_v60  ;;  %v2323_v13 = vrot.slane %v2322_v27, 2 }
 0x52b   :  { %v2406_v2 = vadd.f32 %v2405_v5, %v2404_v53  ;;  %v2344_v12 = vrot.slane %v2343_v14, 2  ;;  %v2448_v31 = vadd.f32 %v2447_v10, %v2446_v17  ;;  %v2469_v36 = vadd.f32 %v2468_v6, %v2467_v33 }
 0x52c   :  { %v2365_v34 = vrot.slane %v2364_v11, 2  ;;  %v2386_v26 = vrot.slane %v2385_v32, 2  ;;  %v2428_v45 = vrot.slane %v2427_v20, 2  ;;  %v2324_v46 = vadd.f32 %v2323_v13, %v2322_v27 }
 0x52d   :  { %v2407_v18 = vrot.slane %v2406_v2, 2  ;;  %v2345_v50 = vadd.f32 %v2344_v12, %v2343_v14  ;;  %v2449_v51 = vrot.slane %v2448_v31, 2  ;;  %v2470_v30 = vrot.slane %v2469_v36, 2 }
 0x52e   :  { %v2366_v63 = vadd.f32 %v2365_v34, %v2364_v11  ;;  %v2387_v8 = vadd.f32 %v2386_v26, %v2385_v32  ;;  %v2429_v0 = vadd.f32 %v2428_v45, %v2427_v20  ;;  %v2325_v19 = vrot.slane %v2324_v46, 1 }
 0x52f   :  { %v2408_v55 = vadd.f32 %v2407_v18, %v2406_v2  ;;  %v2346_v52 = vrot.slane %v2345_v50, 1  ;;  %v2450_v7 = vadd.f32 %v2449_v51, %v2448_v31  ;;  %v2471_v57 = vadd.f32 %v2470_v30, %v2469_v36 }
 0x530   :  { %v2367_v58 = vrot.slane %v2366_v63, 1  ;;  %v2388_v40 = vrot.slane %v2387_v8, 1  ;;  %v2430_v37 = vrot.slane %v2429_v0, 1  ;;  %v2326_v59 = vadd.f32 %v2325_v19, %v2324_v46 }
 0x531   :  { %v2409_v25 = vrot.slane %v2408_v55, 1  ;;  %v2347_v54 = vadd.f32 %v2346_v52, %v2345_v50  ;;  %v2451_v3 = vrot.slane %v2450_v7, 1  ;;  %v2472_v62 = vrot.slane %v2471_v57, 1 }
 0x532   :  { %v2368_v22 = vadd.f32 %v2367_v58, %v2366_v63  ;;  %v2389_v24 = vadd.f32 %v2388_v40, %v2387_v8  ;;  %v2431_v44 = vadd.f32 %v2430_v37, %v2429_v0  ;;  %v2475_v4 = vstv %s8472_s4  ;;  %s3107_s4 = smov [#allocation3]  }
 0x533   :  { %v2410_v29 = vadd.f32 %v2409_v25, %v2408_v55  ;;  %v2452_v28 = vadd.f32 %v2451_v3, %v2450_v7  ;;  %v2473_v35 = vadd.f32 %v2472_v62, %v2471_v57  ;;  %v2476_v53 = vadd.f32 %v2475_v4, %v8308_v9  ;;  %s2552_s2 = sshll.u32 %s3107_s4, 4  ;;  %s2553_s2 = int_to_ptr.vmem [resolvable:$true] %s2552_s2 }
 0x534   :  { %v2477_v39 = vadd.f32 %v2475_v4, %v8310_v21  ;;  %v2478_v60 = vadd.f32 %v2475_v4, %v8312_v23  ;;  %v2479_v42 = vadd.f32 %v2475_v4, %v8314_v48  ;;  %v2480_v41 = vadd.f32 %v2475_v4, %v8316_v49 }
 0x535   :  { %v2481_v15 = vadd.f32 %v2475_v4, %v8318_v56  ;;  %v2482_v17 = vadd.f32 %v2475_v4, %v8320_v38  ;;  %v2483_v61 = vadd.f32 %v2475_v4, %v8322_v43  ;;  %v2484_v33 = vadd.f32 %v2475_v4, %v2326_v59 }
 0x536   :  { %v2485_v1 = vadd.f32 %v2475_v4, %v2347_v54  ;;  %v2486_v16 = vadd.f32 %v2475_v4, %v2368_v22  ;;  %v2487_v5 = vadd.f32 %v2475_v4, %v2389_v24  ;;  %v2488_v47 = vadd.f32 %v2475_v4, %v2410_v29 }
 0x537   :  { %v2489_v9 = vadd.f32 %v2475_v4, %v2431_v44  ;;  %v2490_v27 = vadd.f32 %v2475_v4, %v2452_v28  ;;  %v2491_v21 = vadd.f32 %v2475_v4, %v2473_v35  ;;  %v2508_v14 = vrot.slane %v2477_v39, 7 }
 0x538   :  { %v2509_v23 = vrot.slane %v2478_v60, 6  ;;  %v2510_v10 = vrot.slane %v2479_v42, 5  ;;  %v2511_v48 = vrot.slane %v2480_v41, 4  ;;  %v2512_v6 = vrot.slane %v2481_v15, 3 }
 0x539   :  { %v2513_v49 = vrot.slane %v2482_v17, 2  ;;  %v2514_v11 = vrot.slane %v2483_v61, 1  ;;  %v2515_v56 = vrot.slane %v2485_v1, 7  ;;  %v2516_v32 = vrot.slane %v2486_v16, 6 }
 0x53a   :  { %v2517_v38 = vrot.slane %v2487_v5, 5  ;;  %v2518_v2 = vrot.slane %v2488_v47, 4  ;;  %v2519_v43 = vrot.slane %v2489_v9, 3  ;;  %v2520_v20 = vrot.slane %v2490_v27, 2 }
 0x53b   :  { %v2521_v13 = vrot.slane %v2491_v21, 1  ;;  %v2523_v12 = vsel %vm2522_vm0, %v2476_v53, %v2508_v14  ;;  %v2525_v31 = vsel %vm2524_vm1, %v2509_v23, %v2510_v10  ;;  %v2529_v34 = vsel %vm2528_vm3, %v2511_v48, %v2512_v6 }
 0x53c   :  { %v2527_v36 = vsel %vm2526_vm2, %v2523_v12, %v2525_v31  ;;  %v2531_v26 = vsel %vm2530_vm4, %v2513_v49, %v2514_v11  ;;  %v2536_v45 = vsel %vm2522_vm0, %v2484_v33, %v2515_v56  ;;  %v2537_v46 = vsel %vm2524_vm1, %v2516_v32, %v2517_v38 }
 0x53d   :  { %v2533_v18 = vsel %vm2532_vm5, %v2529_v34, %v2531_v26  ;;  %v2538_v51 = vsel %vm2526_vm2, %v2536_v45, %v2537_v46  ;;  %v2539_v30 = vsel %vm2528_vm3, %v2518_v2, %v2519_v43  ;;  %v2540_v63 = vsel %vm2530_vm4, %v2520_v20, %v2521_v13 }
 0x53e   :  { %v2535_v50 = vsel %vm2534_vm6, %v2527_v36, %v2533_v18  ;;  %v2541_v8 = vsel %vm2532_vm5, %v2539_v30, %v2540_v63 }
 0x53f   :  { %2545 = vst [vmem:[#allocation3] sm:$0xff] %v2535_v50  ;;  %v2542_v55 = vsel %vm2534_vm6, %v2538_v51, %v2541_v8 }
 0x540   :  { %2546 = vst [vmem:[#allocation3 + $0x8] sm:$0xff] %v2542_v55 }
 0x541   :  { %2557 = dma.vmem_to_hbm [thread:$0]  %s2553_s2, 256, %s2555_s16, [#allocation4]  }
 0x542   :  { %3104 = dma.done.wait [#allocation4], 256  }
 0x543   :  { %3105 = vsyncadd [#allocation4], 4294967040 }
 0x544   :  { %2562 = vsyncpa [#allocation4], 1 }

</bundles_post_ra>
